<compile_context>
chip_gen: v6e
topology: v6e:2x2x1
jax: 0.10.0
libtpu: 0.0.40
codegen_flags: <defaults>
</compile_context>

<pallas_src>
import functools

import jax
import jax.numpy as jnp
from jax import lax
from jax.experimental import pallas as pl
from jax.experimental.pallas import tpu as pltpu

EPS = 1e-5


# ----------------------------- in-kernel helpers -----------------------------

def _bn(h, gamma, beta, *, relu):
    """Training-mode BatchNorm1d over the flattened (N*L) lane axis; one-pass stats."""
    m = h.shape[-1]
    inv_m = 1.0 / m
    s = jnp.sum(h, axis=-1, keepdims=True)
    ss = jnp.sum(h * h, axis=-1, keepdims=True)
    mean = s * inv_m
    var = ss * inv_m - mean * mean              # biased variance, one reduction pass each
    out = (h - mean) * lax.rsqrt(var + EPS) * gamma + beta
    return jnp.maximum(out, 0.0) if relu else out


def _conv3(x, w_flat, mask_prev, mask_next):
    """kernel_size=3, stride=1, padding=1 Conv1d as a single im2col matmul.

    x:         (Cin, M) activations (f32), M = N*L lane-dense.
    w_flat:    (Cout, 3*Cin) weights, tap-major blocks [k=0 | k=1 | k=2].
    mask_prev: (1, M) {0,1} mask zeroing the left tap where it would cross an
               example boundary (position l == 0 within each example).
    mask_next: (1, M) {0,1} mask zeroing the right tap (l == L-1).
    """
    cin, m = x.shape
    zero_col = jnp.zeros((cin, 1), x.dtype)
    # taps built purely in-register: static lane slices, no VMEM scratch round trip
    x_prev = jnp.concatenate([zero_col, x[:, : m - 1]], axis=1) * mask_prev  # x[:, p-1]
    x_next = jnp.concatenate([x[:, 1:], zero_col], axis=1) * mask_next       # x[:, p+1]
    taps = jnp.concatenate([x_prev, x, x_next], axis=0)                      # (3*Cin, M)
    return jnp.dot(w_flat, taps.astype(w_flat.dtype),
                   preferred_element_type=jnp.float32)


def _res_block(x, w1, g1, be1, w2, g2, be2, mask_prev, mask_next, wa=None, ba=None):
    """ResidualBlock: conv-bn-relu-conv-bn (+ optional 1x1 adjust) + relu."""
    h = _bn(_conv3(x, w1, mask_prev, mask_next), g1, be1, relu=True)
    h = _bn(_conv3(h, w2, mask_prev, mask_next), g2, be2, relu=False)
    if wa is None:
        identity = x
    else:
        identity = jnp.dot(wa, x.astype(wa.dtype),
                           preferred_element_type=jnp.float32) + ba
    return jnp.maximum(h + identity, 0.0)


# --------------------------------- the kernel ---------------------------------

def _resnet_cnn_kernel(seq_len, *refs):
    (x_ref,
     wi, gi, bei,
     w11, g11, be11, w12, g12, be12,
     w21, g21, be21, w22, g22, be22, wa2, ba2,
     w31, g31, be31, w32, g32, be32,
     pool_m, fcw, fcb,
     o_ref) = refs

    m = x_ref.shape[-1]
    lane = lax.broadcasted_iota(jnp.int32, (1, m), 1)
    mask_prev = ((lane % seq_len) != 0).astype(jnp.float32)
    mask_next = ((lane % seq_len) != (seq_len - 1)).astype(jnp.float32)

    x = x_ref[...].astype(jnp.float32)

    # initial conv -> bn -> relu (conv bias dropped: cancelled by training-mode BN)
    h = _bn(_conv3(x, wi[...], mask_prev, mask_next), gi[...], bei[...], relu=True)

    # residual blocks
    h = _res_block(h, w11[...], g11[...], be11[...], w12[...], g12[...], be12[...],
                   mask_prev, mask_next)
    h = _res_block(h, w21[...], g21[...], be21[...], w22[...], g22[...], be22[...],
                   mask_prev, mask_next, wa=wa2[...], ba=ba2[...])
    h = _res_block(h, w31[...], g31[...], be31[...], w32[...], g32[...], be32[...],
                   mask_prev, mask_next)

    # AdaptiveAvgPool1d(1) expressed as a matmul with a (M, N) averaging matrix,
    # then fc1: (1, 128) @ (128, N) + b  -> (1, N)
    pool = pool_m[...]
    pooled = jnp.dot(h.astype(pool.dtype), pool, preferred_element_type=jnp.float32)
    out = jnp.dot(fcw[...], pooled.astype(fcw.dtype),
                  preferred_element_type=jnp.float32) + fcb[...]
    o_ref[...] = out.astype(o_ref.dtype)


# --------------------------------- wrapper ------------------------------------

def resnet_cnn_forward(x, params, *, mm_dtype=jnp.float32):
    """x: (N, L, 20) float -- same input the PyTorch forward takes (it permutes to NCL).

    Returns (N, 1) emotion logits.
    """
    n, seq_len, feat = x.shape
    m = n * seq_len
    f32 = jnp.float32

    def col(v):                                   # (C,) -> (C, 1) broadcast column
        return v.reshape(-1, 1).astype(f32)

    def conv_w(w, cin_pad=None):                  # (Cout, Cin, K) -> (Cout, K*Cin) tap-major
        cout, cin, _ = w.shape
        wt = jnp.transpose(w, (0, 2, 1))          # (Cout, K, Cin)
        if cin_pad is not None and cin_pad != cin:
            wt = jnp.pad(wt, ((0, 0), (0, 0), (0, cin_pad - cin)))
        return wt.reshape(cout, -1).astype(mm_dtype)

    # activations in (C, N*L) lane-dense layout; pad input channels to a sublane multiple
    feat_pad = ((feat + 7) // 8) * 8
    xc = jnp.transpose(x, (2, 0, 1)).reshape(feat, m)
    xc = jnp.pad(xc, ((0, feat_pad - feat), (0, 0))).astype(mm_dtype)

    # (M, N) averaging matrix for AdaptiveAvgPool1d(1)
    pool = ((jnp.arange(m) // seq_len)[:, None] == jnp.arange(n)[None, :])
    pool = (pool.astype(f32) / seq_len).astype(mm_dtype)

    pi, p1, p2, p3, fc = (params['init'], params['block1'], params['block2'],
                          params['block3'], params['fc'])

    # NOTE: conv biases of the BN-followed convs (init, w1/w2 of each block) are
    # intentionally NOT passed -- training-mode BN cancels them exactly.
    args = [
        xc,
        conv_w(pi['w'], feat_pad), col(pi['g']), col(pi['be']),
        conv_w(p1['w1']), col(p1['g1']), col(p1['be1']),
        conv_w(p1['w2']), col(p1['g2']), col(p1['be2']),
        conv_w(p2['w1']), col(p2['g1']), col(p2['be1']),
        conv_w(p2['w2']), col(p2['g2']), col(p2['be2']),
        p2['wa'][:, :, 0].astype(mm_dtype), col(p2['ba']),
        conv_w(p3['w1']), col(p3['g1']), col(p3['be1']),
        conv_w(p3['w2']), col(p3['g2']), col(p3['be2']),
        pool,
        fc['w'].astype(mm_dtype), fc['b'].reshape(1, 1).astype(f32),
    ]

    vmem = pl.BlockSpec(memory_space=pltpu.MemorySpace.VMEM)
    out = pl.pallas_call(
        functools.partial(_resnet_cnn_kernel, seq_len),
        out_shape=jax.ShapeDtypeStruct((1, n), f32),
        in_specs=[vmem] * len(args),
        out_specs=vmem,
    )(*args)
    return out.T                                   # (N, 1)


# ----------------------------- pure-JAX reference ------------------------------

def resnet_cnn_ref(x, params):
    def conv1d(h, w, b, pad):
        out = lax.conv_general_dilated(h, w, window_strides=(1,), padding=[(pad, pad)],
                                       dimension_numbers=('NCH', 'OIH', 'NCH'))
        return out + b[None, :, None]

    def bn(h, g, be):
        mu = h.mean(axis=(0, 2), keepdims=True)
        var = ((h - mu) ** 2).mean(axis=(0, 2), keepdims=True)
        return (h - mu) / jnp.sqrt(var + EPS) * g[None, :, None] + be[None, :, None]

    def block(h, p):
        identity = h
        out = jax.nn.relu(bn(conv1d(h, p['w1'], p['b1'], 1), p['g1'], p['be1']))
        out = bn(conv1d(out, p['w2'], p['b2'], 1), p['g2'], p['be2'])
        if 'wa' in p:
            identity = conv1d(h, p['wa'], p['ba'], 0)
        return jax.nn.relu(out + identity)

    h = jnp.transpose(x, (0, 2, 1))                            # (N, 20, L)
    pi = params['init']
    h = jax.nn.relu(bn(conv1d(h, pi['w'], pi['b'], 1), pi['g'], pi['be']))
    h = block(h, params['block1'])
    h = block(h, params['block2'])
    h = block(h, params['block3'])
    pooled = h.mean(axis=-1)                                   # (N, 128)
    return pooled @ params['fc']['w'].T + params['fc']['b'][None, :]


# ------------------------------------ test -------------------------------------

if __name__ == "__main__":
    N, L, F = 2, 16, 20                                        # batch, seq len, features

    keys = iter(jax.random.split(jax.random.PRNGKey(0), 40))
    nrm = lambda shape, s=0.1: s * jax.random.normal(next(keys), shape, jnp.float32)
    conv_p = lambda co, ci, k=3: (nrm((co, ci, k)), nrm((co,)))
    bn_p = lambda c: (1.0 + nrm((c,)), nrm((c,)))

    w_i, b_i = conv_p(64, 20); g_i, be_i = bn_p(64)
    w11, b11 = conv_p(64, 64); g11, be11 = bn_p(64)
    w12, b12 = conv_p(64, 64); g12, be12 = bn_p(64)
    w21, b21 = conv_p(128, 64); g21, be21 = bn_p(128)
    w22, b22 = conv_p(128, 128); g22, be22 = bn_p(128)
    wa2, ba2 = conv_p(128, 64, 1)
    w31, b31 = conv_p(128, 128); g31, be31 = bn_p(128)
    w32, b32 = conv_p(128, 128); g32, be32 = bn_p(128)
    fw, fb = nrm((1, 128)), nrm((1,))

    params = {
        'init':   {'w': w_i, 'b': b_i, 'g': g_i, 'be': be_i},
        'block1': {'w1': w11, 'b1': b11, 'g1': g11, 'be1': be11,
                   'w2': w12, 'b2': b12, 'g2': g12, 'be2': be12},
        'block2': {'w1': w21, 'b1': b21, 'g1': g21, 'be1': be21,
                   'w2': w22, 'b2': b22, 'g2': g22, 'be2': be22,
                   'wa': wa2, 'ba': ba2},
        'block3': {'w1': w31, 'b1': b31, 'g1': g31, 'be1': be31,
                   'w2': w32, 'b2': b32, 'g2': g32, 'be2': be32},
        'fc':     {'w': fw, 'b': fb},
    }

    x = jax.random.normal(next(keys), (N, L, F), jnp.float32)

    out = jax.block_until_ready(resnet_cnn_forward(x, params))
    ref = jax.block_until_ready(resnet_cnn_ref(x, params))

    assert out.shape == (N, 1), out.shape
    max_diff = float(jnp.max(jnp.abs(out - ref)))
    assert max_diff < 2e-4, f"mismatch vs reference: {max_diff}"

    print("KERNEL_OK")
</pallas_src>

<mosaic_0001>
module attributes {stable_mosaic.version = 11 : i64} {
  func.func @_resnet_cnn_kernel(%arg0: memref<24x32xf32, #tpu.memory_space<vmem>>, %arg1: memref<64x72xf32, #tpu.memory_space<vmem>>, %arg2: memref<64x1xf32, #tpu.memory_space<vmem>>, %arg3: memref<64x1xf32, #tpu.memory_space<vmem>>, %arg4: memref<64x192xf32, #tpu.memory_space<vmem>>, %arg5: memref<64x1xf32, #tpu.memory_space<vmem>>, %arg6: memref<64x1xf32, #tpu.memory_space<vmem>>, %arg7: memref<64x192xf32, #tpu.memory_space<vmem>>, %arg8: memref<64x1xf32, #tpu.memory_space<vmem>>, %arg9: memref<64x1xf32, #tpu.memory_space<vmem>>, %arg10: memref<128x192xf32, #tpu.memory_space<vmem>>, %arg11: memref<128x1xf32, #tpu.memory_space<vmem>>, %arg12: memref<128x1xf32, #tpu.memory_space<vmem>>, %arg13: memref<128x384xf32, #tpu.memory_space<vmem>>, %arg14: memref<128x1xf32, #tpu.memory_space<vmem>>, %arg15: memref<128x1xf32, #tpu.memory_space<vmem>>, %arg16: memref<128x64xf32, #tpu.memory_space<vmem>>, %arg17: memref<128x1xf32, #tpu.memory_space<vmem>>, %arg18: memref<128x384xf32, #tpu.memory_space<vmem>>, %arg19: memref<128x1xf32, #tpu.memory_space<vmem>>, %arg20: memref<128x1xf32, #tpu.memory_space<vmem>>, %arg21: memref<128x384xf32, #tpu.memory_space<vmem>>, %arg22: memref<128x1xf32, #tpu.memory_space<vmem>>, %arg23: memref<128x1xf32, #tpu.memory_space<vmem>>, %arg24: memref<32x2xf32, #tpu.memory_space<vmem>>, %arg25: memref<1x128xf32, #tpu.memory_space<vmem>>, %arg26: memref<1x1xf32, #tpu.memory_space<vmem>>, %arg27: memref<1x2xf32, #tpu.memory_space<vmem>>) attributes {dimension_semantics = [], scalar_prefetch = 0 : i64, scratch_operands = 0 : i64, tpu.core_type = #tpu.core_type<tc>} {
    %0 = tpu.iota {dimensions = array<i32: 1>} : vector<1x32xi32>
    %c16_i32 = arith.constant 16 : i32
    %c0_i32 = arith.constant 0 : i32
    %1 = arith.cmpi eq, %c16_i32, %c0_i32 : i32
    %c1_i32 = arith.constant 1 : i32
    %2 = arith.select %1, %c1_i32, %c16_i32 : i32
    %3 = vector.broadcast %2 : i32 to vector<1x32xi32>
    %4 = arith.remsi %0, %3 : vector<1x32xi32>
    %c0_i32_0 = arith.constant 0 : i32
    %5 = vector.broadcast %c0_i32_0 : i32 to vector<1x32xi32>
    %6 = arith.cmpi ne, %4, %5 : vector<1x32xi32>
    %c0_i32_1 = arith.constant 0 : i32
    %7 = vector.broadcast %c0_i32_1 : i32 to vector<1x32xi32>
    %8 = arith.cmpi slt, %4, %7 : vector<1x32xi32>
    %c0_i32_2 = arith.constant 0 : i32
    %9 = arith.cmpi slt, %2, %c0_i32_2 : i32
    %10 = vector.broadcast %9 : i1 to vector<1x32xi1>
    %11 = vector.broadcast %10 : vector<1x32xi1> to vector<1x32xi1>
    %12 = arith.xori %8, %11 : vector<1x32xi1>
    %13 = arith.andi %12, %6 : vector<1x32xi1>
    %14 = vector.broadcast %2 : i32 to vector<1x32xi32>
    %15 = arith.addi %4, %14 : vector<1x32xi32>
    %16 = arith.select %13, %15, %4 : vector<1x32xi1>, vector<1x32xi32>
    %c0_i32_3 = arith.constant 0 : i32
    %17 = vector.broadcast %c0_i32_3 : i32 to vector<1x32xi32>
    %18 = arith.cmpi ne, %16, %17 : vector<1x32xi32>
    %19 = arith.extui %18 : vector<1x32xi1> to vector<1x32xi32>
    %20 = arith.sitofp %19 : vector<1x32xi32> to vector<1x32xf32>
    %c16_i32_4 = arith.constant 16 : i32
    %c0_i32_5 = arith.constant 0 : i32
    %21 = arith.cmpi eq, %c16_i32_4, %c0_i32_5 : i32
    %c1_i32_6 = arith.constant 1 : i32
    %22 = arith.select %21, %c1_i32_6, %c16_i32_4 : i32
    %23 = vector.broadcast %22 : i32 to vector<1x32xi32>
    %24 = arith.remsi %0, %23 : vector<1x32xi32>
    %c0_i32_7 = arith.constant 0 : i32
    %25 = vector.broadcast %c0_i32_7 : i32 to vector<1x32xi32>
    %26 = arith.cmpi ne, %24, %25 : vector<1x32xi32>
    %c0_i32_8 = arith.constant 0 : i32
    %27 = vector.broadcast %c0_i32_8 : i32 to vector<1x32xi32>
    %28 = arith.cmpi slt, %24, %27 : vector<1x32xi32>
    %c0_i32_9 = arith.constant 0 : i32
    %29 = arith.cmpi slt, %22, %c0_i32_9 : i32
    %30 = vector.broadcast %29 : i1 to vector<1x32xi1>
    %31 = vector.broadcast %30 : vector<1x32xi1> to vector<1x32xi1>
    %32 = arith.xori %28, %31 : vector<1x32xi1>
    %33 = arith.andi %32, %26 : vector<1x32xi1>
    %34 = vector.broadcast %22 : i32 to vector<1x32xi32>
    %35 = arith.addi %24, %34 : vector<1x32xi32>
    %36 = arith.select %33, %35, %24 : vector<1x32xi1>, vector<1x32xi32>
    %c15_i32 = arith.constant 15 : i32
    %37 = vector.broadcast %c15_i32 : i32 to vector<1x32xi32>
    %38 = arith.cmpi ne, %36, %37 : vector<1x32xi32>
    %39 = arith.extui %38 : vector<1x32xi1> to vector<1x32xi32>
    %40 = arith.sitofp %39 : vector<1x32xi32> to vector<1x32xf32>
    %c0 = arith.constant 0 : index
    %c0_10 = arith.constant 0 : index
    %41 = vector.load %arg0[%c0, %c0_10] : memref<24x32xf32, #tpu.memory_space<vmem>>, vector<24x32xf32>
    %c0_11 = arith.constant 0 : index
    %c0_12 = arith.constant 0 : index
    %42 = vector.load %arg1[%c0_11, %c0_12] : memref<64x72xf32, #tpu.memory_space<vmem>>, vector<64x72xf32>
    %cst = arith.constant 0.000000e+00 : f32
    %43 = vector.broadcast %cst : f32 to vector<24x1xf32>
    %44 = vector.extract_strided_slice %41 {offsets = [0, 0], sizes = [24, 31], strides = [1, 1]} : vector<24x32xf32> to vector<24x31xf32>
    %45 = tpu.concatenate %43, %44 in 1 : vector<24x1xf32>, vector<24x31xf32> -> vector<24x32xf32>
    %46 = vector.broadcast %20 : vector<1x32xf32> to vector<24x32xf32>
    %47 = arith.mulf %45, %46 : vector<24x32xf32>
    %48 = vector.extract_strided_slice %41 {offsets = [0, 1], sizes = [24, 31], strides = [1, 1]} : vector<24x32xf32> to vector<24x31xf32>
    %49 = tpu.concatenate %48, %43 in 1 : vector<24x31xf32>, vector<24x1xf32> -> vector<24x32xf32>
    %50 = vector.broadcast %40 : vector<1x32xf32> to vector<24x32xf32>
    %51 = arith.mulf %49, %50 : vector<24x32xf32>
    %52 = tpu.concatenate %47, %41, %51 in 0 : vector<24x32xf32>, vector<24x32xf32>, vector<24x32xf32> -> vector<72x32xf32>
    %cst_13 = arith.constant dense<0.000000e+00> : vector<64x32xf32>
    %53 = tpu.matmul %42, %52, %cst_13 {dimension_numbers = #tpu.dot_dimension_numbers<[1], [0], [0], [1], [0, 0, 1, 1], [], []>} : vector<64x72xf32>, vector<72x32xf32>, vector<64x32xf32> -> vector<64x32xf32>
    %c0_14 = arith.constant 0 : index
    %c0_15 = arith.constant 0 : index
    %54 = vector.load %arg2[%c0_14, %c0_15] : memref<64x1xf32, #tpu.memory_space<vmem>>, vector<64x1xf32>
    %c0_16 = arith.constant 0 : index
    %c0_17 = arith.constant 0 : index
    %55 = vector.load %arg3[%c0_16, %c0_17] : memref<64x1xf32, #tpu.memory_space<vmem>>, vector<64x1xf32>
    %cst_18 = arith.constant dense<0.000000e+00> : vector<64xf32>
    %56 = vector.multi_reduction <add>, %53, %cst_18 [1] : vector<64x32xf32> to vector<64xf32>
    %57 = vector.shape_cast %56 : vector<64xf32> to vector<64x1xf32>
    %58 = arith.mulf %53, %53 : vector<64x32xf32>
    %cst_19 = arith.constant dense<0.000000e+00> : vector<64xf32>
    %59 = vector.multi_reduction <add>, %58, %cst_19 [1] : vector<64x32xf32> to vector<64xf32>
    %60 = vector.shape_cast %59 : vector<64xf32> to vector<64x1xf32>
    %cst_20 = arith.constant 3.125000e-02 : f32
    %61 = vector.broadcast %cst_20 : f32 to vector<64x1xf32>
    %62 = arith.mulf %57, %61 : vector<64x1xf32>
    %cst_21 = arith.constant 3.125000e-02 : f32
    %63 = vector.broadcast %cst_21 : f32 to vector<64x1xf32>
    %64 = arith.mulf %60, %63 : vector<64x1xf32>
    %65 = arith.mulf %62, %62 : vector<64x1xf32>
    %66 = arith.subf %64, %65 : vector<64x1xf32>
    %67 = vector.broadcast %62 : vector<64x1xf32> to vector<64x32xf32>
    %68 = arith.subf %53, %67 : vector<64x32xf32>
    %cst_22 = arith.constant 9.99999974E-6 : f32
    %69 = vector.broadcast %cst_22 : f32 to vector<64x1xf32>
    %70 = arith.addf %66, %69 : vector<64x1xf32>
    %71 = math.rsqrt %70 : vector<64x1xf32>
    %72 = vector.broadcast %71 : vector<64x1xf32> to vector<64x32xf32>
    %73 = arith.mulf %68, %72 : vector<64x32xf32>
    %74 = vector.broadcast %54 : vector<64x1xf32> to vector<64x32xf32>
    %75 = arith.mulf %73, %74 : vector<64x32xf32>
    %76 = vector.broadcast %55 : vector<64x1xf32> to vector<64x32xf32>
    %77 = arith.addf %75, %76 : vector<64x32xf32>
    %cst_23 = arith.constant 0.000000e+00 : f32
    %78 = vector.broadcast %cst_23 : f32 to vector<64x32xf32>
    %79 = arith.maximumf %77, %78 : vector<64x32xf32>
    %c0_24 = arith.constant 0 : index
    %c0_25 = arith.constant 0 : index
    %80 = vector.load %arg4[%c0_24, %c0_25] : memref<64x192xf32, #tpu.memory_space<vmem>>, vector<64x192xf32>
    %c0_26 = arith.constant 0 : index
    %c0_27 = arith.constant 0 : index
    %81 = vector.load %arg5[%c0_26, %c0_27] : memref<64x1xf32, #tpu.memory_space<vmem>>, vector<64x1xf32>
    %c0_28 = arith.constant 0 : index
    %c0_29 = arith.constant 0 : index
    %82 = vector.load %arg6[%c0_28, %c0_29] : memref<64x1xf32, #tpu.memory_space<vmem>>, vector<64x1xf32>
    %c0_30 = arith.constant 0 : index
    %c0_31 = arith.constant 0 : index
    %83 = vector.load %arg7[%c0_30, %c0_31] : memref<64x192xf32, #tpu.memory_space<vmem>>, vector<64x192xf32>
    %c0_32 = arith.constant 0 : index
    %c0_33 = arith.constant 0 : index
    %84 = vector.load %arg8[%c0_32, %c0_33] : memref<64x1xf32, #tpu.memory_space<vmem>>, vector<64x1xf32>
    %c0_34 = arith.constant 0 : index
    %c0_35 = arith.constant 0 : index
    %85 = vector.load %arg9[%c0_34, %c0_35] : memref<64x1xf32, #tpu.memory_space<vmem>>, vector<64x1xf32>
    %cst_36 = arith.constant 0.000000e+00 : f32
    %86 = vector.broadcast %cst_36 : f32 to vector<64x1xf32>
    %87 = vector.extract_strided_slice %79 {offsets = [0, 0], sizes = [64, 31], strides = [1, 1]} : vector<64x32xf32> to vector<64x31xf32>
    %88 = tpu.concatenate %86, %87 in 1 : vector<64x1xf32>, vector<64x31xf32> -> vector<64x32xf32>
    %89 = vector.broadcast %20 : vector<1x32xf32> to vector<64x32xf32>
    %90 = arith.mulf %88, %89 : vector<64x32xf32>
    %91 = vector.extract_strided_slice %79 {offsets = [0, 1], sizes = [64, 31], strides = [1, 1]} : vector<64x32xf32> to vector<64x31xf32>
    %92 = tpu.concatenate %91, %86 in 1 : vector<64x31xf32>, vector<64x1xf32> -> vector<64x32xf32>
    %93 = vector.broadcast %40 : vector<1x32xf32> to vector<64x32xf32>
    %94 = arith.mulf %92, %93 : vector<64x32xf32>
    %95 = tpu.concatenate %90, %79, %94 in 0 : vector<64x32xf32>, vector<64x32xf32>, vector<64x32xf32> -> vector<192x32xf32>
    %cst_37 = arith.constant dense<0.000000e+00> : vector<64x32xf32>
    %96 = tpu.matmul %80, %95, %cst_37 {dimension_numbers = #tpu.dot_dimension_numbers<[1], [0], [0], [1], [0, 0, 1, 1], [], []>} : vector<64x192xf32>, vector<192x32xf32>, vector<64x32xf32> -> vector<64x32xf32>
    %cst_38 = arith.constant dense<0.000000e+00> : vector<64xf32>
    %97 = vector.multi_reduction <add>, %96, %cst_38 [1] : vector<64x32xf32> to vector<64xf32>
    %98 = vector.shape_cast %97 : vector<64xf32> to vector<64x1xf32>
    %99 = arith.mulf %96, %96 : vector<64x32xf32>
    %cst_39 = arith.constant dense<0.000000e+00> : vector<64xf32>
    %100 = vector.multi_reduction <add>, %99, %cst_39 [1] : vector<64x32xf32> to vector<64xf32>
    %101 = vector.shape_cast %100 : vector<64xf32> to vector<64x1xf32>
    %cst_40 = arith.constant 3.125000e-02 : f32
    %102 = vector.broadcast %cst_40 : f32 to vector<64x1xf32>
    %103 = arith.mulf %98, %102 : vector<64x1xf32>
    %cst_41 = arith.constant 3.125000e-02 : f32
    %104 = vector.broadcast %cst_41 : f32 to vector<64x1xf32>
    %105 = arith.mulf %101, %104 : vector<64x1xf32>
    %106 = arith.mulf %103, %103 : vector<64x1xf32>
    %107 = arith.subf %105, %106 : vector<64x1xf32>
    %108 = vector.broadcast %103 : vector<64x1xf32> to vector<64x32xf32>
    %109 = arith.subf %96, %108 : vector<64x32xf32>
    %cst_42 = arith.constant 9.99999974E-6 : f32
    %110 = vector.broadcast %cst_42 : f32 to vector<64x1xf32>
    %111 = arith.addf %107, %110 : vector<64x1xf32>
    %112 = math.rsqrt %111 : vector<64x1xf32>
    %113 = vector.broadcast %112 : vector<64x1xf32> to vector<64x32xf32>
    %114 = arith.mulf %109, %113 : vector<64x32xf32>
    %115 = vector.broadcast %81 : vector<64x1xf32> to vector<64x32xf32>
    %116 = arith.mulf %114, %115 : vector<64x32xf32>
    %117 = vector.broadcast %82 : vector<64x1xf32> to vector<64x32xf32>
    %118 = arith.addf %116, %117 : vector<64x32xf32>
    %cst_43 = arith.constant 0.000000e+00 : f32
    %119 = vector.broadcast %cst_43 : f32 to vector<64x32xf32>
    %120 = arith.maximumf %118, %119 : vector<64x32xf32>
    %cst_44 = arith.constant 0.000000e+00 : f32
    %121 = vector.broadcast %cst_44 : f32 to vector<64x1xf32>
    %122 = vector.extract_strided_slice %120 {offsets = [0, 0], sizes = [64, 31], strides = [1, 1]} : vector<64x32xf32> to vector<64x31xf32>
    %123 = tpu.concatenate %121, %122 in 1 : vector<64x1xf32>, vector<64x31xf32> -> vector<64x32xf32>
    %124 = vector.broadcast %20 : vector<1x32xf32> to vector<64x32xf32>
    %125 = arith.mulf %123, %124 : vector<64x32xf32>
    %126 = vector.extract_strided_slice %120 {offsets = [0, 1], sizes = [64, 31], strides = [1, 1]} : vector<64x32xf32> to vector<64x31xf32>
    %127 = tpu.concatenate %126, %121 in 1 : vector<64x31xf32>, vector<64x1xf32> -> vector<64x32xf32>
    %128 = vector.broadcast %40 : vector<1x32xf32> to vector<64x32xf32>
    %129 = arith.mulf %127, %128 : vector<64x32xf32>
    %130 = tpu.concatenate %125, %120, %129 in 0 : vector<64x32xf32>, vector<64x32xf32>, vector<64x32xf32> -> vector<192x32xf32>
    %cst_45 = arith.constant dense<0.000000e+00> : vector<64x32xf32>
    %131 = tpu.matmul %83, %130, %cst_45 {dimension_numbers = #tpu.dot_dimension_numbers<[1], [0], [0], [1], [0, 0, 1, 1], [], []>} : vector<64x192xf32>, vector<192x32xf32>, vector<64x32xf32> -> vector<64x32xf32>
    %cst_46 = arith.constant dense<0.000000e+00> : vector<64xf32>
    %132 = vector.multi_reduction <add>, %131, %cst_46 [1] : vector<64x32xf32> to vector<64xf32>
    %133 = vector.shape_cast %132 : vector<64xf32> to vector<64x1xf32>
    %134 = arith.mulf %131, %131 : vector<64x32xf32>
    %cst_47 = arith.constant dense<0.000000e+00> : vector<64xf32>
    %135 = vector.multi_reduction <add>, %134, %cst_47 [1] : vector<64x32xf32> to vector<64xf32>
    %136 = vector.shape_cast %135 : vector<64xf32> to vector<64x1xf32>
    %cst_48 = arith.constant 3.125000e-02 : f32
    %137 = vector.broadcast %cst_48 : f32 to vector<64x1xf32>
    %138 = arith.mulf %133, %137 : vector<64x1xf32>
    %cst_49 = arith.constant 3.125000e-02 : f32
    %139 = vector.broadcast %cst_49 : f32 to vector<64x1xf32>
    %140 = arith.mulf %136, %139 : vector<64x1xf32>
    %141 = arith.mulf %138, %138 : vector<64x1xf32>
    %142 = arith.subf %140, %141 : vector<64x1xf32>
    %143 = vector.broadcast %138 : vector<64x1xf32> to vector<64x32xf32>
    %144 = arith.subf %131, %143 : vector<64x32xf32>
    %cst_50 = arith.constant 9.99999974E-6 : f32
    %145 = vector.broadcast %cst_50 : f32 to vector<64x1xf32>
    %146 = arith.addf %142, %145 : vector<64x1xf32>
    %147 = math.rsqrt %146 : vector<64x1xf32>
    %148 = vector.broadcast %147 : vector<64x1xf32> to vector<64x32xf32>
    %149 = arith.mulf %144, %148 : vector<64x32xf32>
    %150 = vector.broadcast %84 : vector<64x1xf32> to vector<64x32xf32>
    %151 = arith.mulf %149, %150 : vector<64x32xf32>
    %152 = vector.broadcast %85 : vector<64x1xf32> to vector<64x32xf32>
    %153 = arith.addf %151, %152 : vector<64x32xf32>
    %154 = arith.addf %153, %79 : vector<64x32xf32>
    %cst_51 = arith.constant 0.000000e+00 : f32
    %155 = vector.broadcast %cst_51 : f32 to vector<64x32xf32>
    %156 = arith.maximumf %154, %155 : vector<64x32xf32>
    %c0_52 = arith.constant 0 : index
    %c0_53 = arith.constant 0 : index
    %157 = vector.load %arg10[%c0_52, %c0_53] : memref<128x192xf32, #tpu.memory_space<vmem>>, vector<128x192xf32>
    %c0_54 = arith.constant 0 : index
    %c0_55 = arith.constant 0 : index
    %158 = vector.load %arg11[%c0_54, %c0_55] : memref<128x1xf32, #tpu.memory_space<vmem>>, vector<128x1xf32>
    %c0_56 = arith.constant 0 : index
    %c0_57 = arith.constant 0 : index
    %159 = vector.load %arg12[%c0_56, %c0_57] : memref<128x1xf32, #tpu.memory_space<vmem>>, vector<128x1xf32>
    %c0_58 = arith.constant 0 : index
    %c0_59 = arith.constant 0 : index
    %160 = vector.load %arg13[%c0_58, %c0_59] : memref<128x384xf32, #tpu.memory_space<vmem>>, vector<128x384xf32>
    %c0_60 = arith.constant 0 : index
    %c0_61 = arith.constant 0 : index
    %161 = vector.load %arg14[%c0_60, %c0_61] : memref<128x1xf32, #tpu.memory_space<vmem>>, vector<128x1xf32>
    %c0_62 = arith.constant 0 : index
    %c0_63 = arith.constant 0 : index
    %162 = vector.load %arg15[%c0_62, %c0_63] : memref<128x1xf32, #tpu.memory_space<vmem>>, vector<128x1xf32>
    %c0_64 = arith.constant 0 : index
    %c0_65 = arith.constant 0 : index
    %163 = vector.load %arg16[%c0_64, %c0_65] : memref<128x64xf32, #tpu.memory_space<vmem>>, vector<128x64xf32>
    %c0_66 = arith.constant 0 : index
    %c0_67 = arith.constant 0 : index
    %164 = vector.load %arg17[%c0_66, %c0_67] : memref<128x1xf32, #tpu.memory_space<vmem>>, vector<128x1xf32>
    %cst_68 = arith.constant 0.000000e+00 : f32
    %165 = vector.broadcast %cst_68 : f32 to vector<64x1xf32>
    %166 = vector.extract_strided_slice %156 {offsets = [0, 0], sizes = [64, 31], strides = [1, 1]} : vector<64x32xf32> to vector<64x31xf32>
    %167 = tpu.concatenate %165, %166 in 1 : vector<64x1xf32>, vector<64x31xf32> -> vector<64x32xf32>
    %168 = vector.broadcast %20 : vector<1x32xf32> to vector<64x32xf32>
    %169 = arith.mulf %167, %168 : vector<64x32xf32>
    %170 = vector.extract_strided_slice %156 {offsets = [0, 1], sizes = [64, 31], strides = [1, 1]} : vector<64x32xf32> to vector<64x31xf32>
    %171 = tpu.concatenate %170, %165 in 1 : vector<64x31xf32>, vector<64x1xf32> -> vector<64x32xf32>
    %172 = vector.broadcast %40 : vector<1x32xf32> to vector<64x32xf32>
    %173 = arith.mulf %171, %172 : vector<64x32xf32>
    %174 = tpu.concatenate %169, %156, %173 in 0 : vector<64x32xf32>, vector<64x32xf32>, vector<64x32xf32> -> vector<192x32xf32>
    %cst_69 = arith.constant dense<0.000000e+00> : vector<128x32xf32>
    %175 = tpu.matmul %157, %174, %cst_69 {dimension_numbers = #tpu.dot_dimension_numbers<[1], [0], [0], [1], [0, 0, 1, 1], [], []>} : vector<128x192xf32>, vector<192x32xf32>, vector<128x32xf32> -> vector<128x32xf32>
    %cst_70 = arith.constant dense<0.000000e+00> : vector<128xf32>
    %176 = vector.multi_reduction <add>, %175, %cst_70 [1] : vector<128x32xf32> to vector<128xf32>
    %177 = vector.shape_cast %176 : vector<128xf32> to vector<128x1xf32>
    %178 = arith.mulf %175, %175 : vector<128x32xf32>
    %cst_71 = arith.constant dense<0.000000e+00> : vector<128xf32>
    %179 = vector.multi_reduction <add>, %178, %cst_71 [1] : vector<128x32xf32> to vector<128xf32>
    %180 = vector.shape_cast %179 : vector<128xf32> to vector<128x1xf32>
    %cst_72 = arith.constant 3.125000e-02 : f32
    %181 = vector.broadcast %cst_72 : f32 to vector<128x1xf32>
    %182 = arith.mulf %177, %181 : vector<128x1xf32>
    %cst_73 = arith.constant 3.125000e-02 : f32
    %183 = vector.broadcast %cst_73 : f32 to vector<128x1xf32>
    %184 = arith.mulf %180, %183 : vector<128x1xf32>
    %185 = arith.mulf %182, %182 : vector<128x1xf32>
    %186 = arith.subf %184, %185 : vector<128x1xf32>
    %187 = vector.broadcast %182 : vector<128x1xf32> to vector<128x32xf32>
    %188 = arith.subf %175, %187 : vector<128x32xf32>
    %cst_74 = arith.constant 9.99999974E-6 : f32
    %189 = vector.broadcast %cst_74 : f32 to vector<128x1xf32>
    %190 = arith.addf %186, %189 : vector<128x1xf32>
    %191 = math.rsqrt %190 : vector<128x1xf32>
    %192 = vector.broadcast %191 : vector<128x1xf32> to vector<128x32xf32>
    %193 = arith.mulf %188, %192 : vector<128x32xf32>
    %194 = vector.broadcast %158 : vector<128x1xf32> to vector<128x32xf32>
    %195 = arith.mulf %193, %194 : vector<128x32xf32>
    %196 = vector.broadcast %159 : vector<128x1xf32> to vector<128x32xf32>
    %197 = arith.addf %195, %196 : vector<128x32xf32>
    %cst_75 = arith.constant 0.000000e+00 : f32
    %198 = vector.broadcast %cst_75 : f32 to vector<128x32xf32>
    %199 = arith.maximumf %197, %198 : vector<128x32xf32>
    %cst_76 = arith.constant 0.000000e+00 : f32
    %200 = vector.broadcast %cst_76 : f32 to vector<128x1xf32>
    %201 = vector.extract_strided_slice %199 {offsets = [0, 0], sizes = [128, 31], strides = [1, 1]} : vector<128x32xf32> to vector<128x31xf32>
    %202 = tpu.concatenate %200, %201 in 1 : vector<128x1xf32>, vector<128x31xf32> -> vector<128x32xf32>
    %203 = vector.broadcast %20 : vector<1x32xf32> to vector<128x32xf32>
    %204 = arith.mulf %202, %203 : vector<128x32xf32>
    %205 = vector.extract_strided_slice %199 {offsets = [0, 1], sizes = [128, 31], strides = [1, 1]} : vector<128x32xf32> to vector<128x31xf32>
    %206 = tpu.concatenate %205, %200 in 1 : vector<128x31xf32>, vector<128x1xf32> -> vector<128x32xf32>
    %207 = vector.broadcast %40 : vector<1x32xf32> to vector<128x32xf32>
    %208 = arith.mulf %206, %207 : vector<128x32xf32>
    %209 = tpu.concatenate %204, %199, %208 in 0 : vector<128x32xf32>, vector<128x32xf32>, vector<128x32xf32> -> vector<384x32xf32>
    %cst_77 = arith.constant dense<0.000000e+00> : vector<128x32xf32>
    %210 = tpu.matmul %160, %209, %cst_77 {dimension_numbers = #tpu.dot_dimension_numbers<[1], [0], [0], [1], [0, 0, 1, 1], [], []>} : vector<128x384xf32>, vector<384x32xf32>, vector<128x32xf32> -> vector<128x32xf32>
    %cst_78 = arith.constant dense<0.000000e+00> : vector<128xf32>
    %211 = vector.multi_reduction <add>, %210, %cst_78 [1] : vector<128x32xf32> to vector<128xf32>
    %212 = vector.shape_cast %211 : vector<128xf32> to vector<128x1xf32>
    %213 = arith.mulf %210, %210 : vector<128x32xf32>
    %cst_79 = arith.constant dense<0.000000e+00> : vector<128xf32>
    %214 = vector.multi_reduction <add>, %213, %cst_79 [1] : vector<128x32xf32> to vector<128xf32>
    %215 = vector.shape_cast %214 : vector<128xf32> to vector<128x1xf32>
    %cst_80 = arith.constant 3.125000e-02 : f32
    %216 = vector.broadcast %cst_80 : f32 to vector<128x1xf32>
    %217 = arith.mulf %212, %216 : vector<128x1xf32>
    %cst_81 = arith.constant 3.125000e-02 : f32
    %218 = vector.broadcast %cst_81 : f32 to vector<128x1xf32>
    %219 = arith.mulf %215, %218 : vector<128x1xf32>
    %220 = arith.mulf %217, %217 : vector<128x1xf32>
    %221 = arith.subf %219, %220 : vector<128x1xf32>
    %222 = vector.broadcast %217 : vector<128x1xf32> to vector<128x32xf32>
    %223 = arith.subf %210, %222 : vector<128x32xf32>
    %cst_82 = arith.constant 9.99999974E-6 : f32
    %224 = vector.broadcast %cst_82 : f32 to vector<128x1xf32>
    %225 = arith.addf %221, %224 : vector<128x1xf32>
    %226 = math.rsqrt %225 : vector<128x1xf32>
    %227 = vector.broadcast %226 : vector<128x1xf32> to vector<128x32xf32>
    %228 = arith.mulf %223, %227 : vector<128x32xf32>
    %229 = vector.broadcast %161 : vector<128x1xf32> to vector<128x32xf32>
    %230 = arith.mulf %228, %229 : vector<128x32xf32>
    %231 = vector.broadcast %162 : vector<128x1xf32> to vector<128x32xf32>
    %232 = arith.addf %230, %231 : vector<128x32xf32>
    %cst_83 = arith.constant dense<0.000000e+00> : vector<128x32xf32>
    %233 = tpu.matmul %163, %156, %cst_83 {dimension_numbers = #tpu.dot_dimension_numbers<[1], [0], [0], [1], [0, 0, 1, 1], [], []>} : vector<128x64xf32>, vector<64x32xf32>, vector<128x32xf32> -> vector<128x32xf32>
    %234 = vector.broadcast %164 : vector<128x1xf32> to vector<128x32xf32>
    %235 = arith.addf %233, %234 : vector<128x32xf32>
    %236 = arith.addf %232, %235 : vector<128x32xf32>
    %cst_84 = arith.constant 0.000000e+00 : f32
    %237 = vector.broadcast %cst_84 : f32 to vector<128x32xf32>
    %238 = arith.maximumf %236, %237 : vector<128x32xf32>
    %c0_85 = arith.constant 0 : index
    %c0_86 = arith.constant 0 : index
    %239 = vector.load %arg18[%c0_85, %c0_86] : memref<128x384xf32, #tpu.memory_space<vmem>>, vector<128x384xf32>
    %c0_87 = arith.constant 0 : index
    %c0_88 = arith.constant 0 : index
    %240 = vector.load %arg19[%c0_87, %c0_88] : memref<128x1xf32, #tpu.memory_space<vmem>>, vector<128x1xf32>
    %c0_89 = arith.constant 0 : index
    %c0_90 = arith.constant 0 : index
    %241 = vector.load %arg20[%c0_89, %c0_90] : memref<128x1xf32, #tpu.memory_space<vmem>>, vector<128x1xf32>
    %c0_91 = arith.constant 0 : index
    %c0_92 = arith.constant 0 : index
    %242 = vector.load %arg21[%c0_91, %c0_92] : memref<128x384xf32, #tpu.memory_space<vmem>>, vector<128x384xf32>
    %c0_93 = arith.constant 0 : index
    %c0_94 = arith.constant 0 : index
    %243 = vector.load %arg22[%c0_93, %c0_94] : memref<128x1xf32, #tpu.memory_space<vmem>>, vector<128x1xf32>
    %c0_95 = arith.constant 0 : index
    %c0_96 = arith.constant 0 : index
    %244 = vector.load %arg23[%c0_95, %c0_96] : memref<128x1xf32, #tpu.memory_space<vmem>>, vector<128x1xf32>
    %cst_97 = arith.constant 0.000000e+00 : f32
    %245 = vector.broadcast %cst_97 : f32 to vector<128x1xf32>
    %246 = vector.extract_strided_slice %238 {offsets = [0, 0], sizes = [128, 31], strides = [1, 1]} : vector<128x32xf32> to vector<128x31xf32>
    %247 = tpu.concatenate %245, %246 in 1 : vector<128x1xf32>, vector<128x31xf32> -> vector<128x32xf32>
    %248 = vector.broadcast %20 : vector<1x32xf32> to vector<128x32xf32>
    %249 = arith.mulf %247, %248 : vector<128x32xf32>
    %250 = vector.extract_strided_slice %238 {offsets = [0, 1], sizes = [128, 31], strides = [1, 1]} : vector<128x32xf32> to vector<128x31xf32>
    %251 = tpu.concatenate %250, %245 in 1 : vector<128x31xf32>, vector<128x1xf32> -> vector<128x32xf32>
    %252 = vector.broadcast %40 : vector<1x32xf32> to vector<128x32xf32>
    %253 = arith.mulf %251, %252 : vector<128x32xf32>
    %254 = tpu.concatenate %249, %238, %253 in 0 : vector<128x32xf32>, vector<128x32xf32>, vector<128x32xf32> -> vector<384x32xf32>
    %cst_98 = arith.constant dense<0.000000e+00> : vector<128x32xf32>
    %255 = tpu.matmul %239, %254, %cst_98 {dimension_numbers = #tpu.dot_dimension_numbers<[1], [0], [0], [1], [0, 0, 1, 1], [], []>} : vector<128x384xf32>, vector<384x32xf32>, vector<128x32xf32> -> vector<128x32xf32>
    %cst_99 = arith.constant dense<0.000000e+00> : vector<128xf32>
    %256 = vector.multi_reduction <add>, %255, %cst_99 [1] : vector<128x32xf32> to vector<128xf32>
    %257 = vector.shape_cast %256 : vector<128xf32> to vector<128x1xf32>
    %258 = arith.mulf %255, %255 : vector<128x32xf32>
    %cst_100 = arith.constant dense<0.000000e+00> : vector<128xf32>
    %259 = vector.multi_reduction <add>, %258, %cst_100 [1] : vector<128x32xf32> to vector<128xf32>
    %260 = vector.shape_cast %259 : vector<128xf32> to vector<128x1xf32>
    %cst_101 = arith.constant 3.125000e-02 : f32
    %261 = vector.broadcast %cst_101 : f32 to vector<128x1xf32>
    %262 = arith.mulf %257, %261 : vector<128x1xf32>
    %cst_102 = arith.constant 3.125000e-02 : f32
    %263 = vector.broadcast %cst_102 : f32 to vector<128x1xf32>
    %264 = arith.mulf %260, %263 : vector<128x1xf32>
    %265 = arith.mulf %262, %262 : vector<128x1xf32>
    %266 = arith.subf %264, %265 : vector<128x1xf32>
    %267 = vector.broadcast %262 : vector<128x1xf32> to vector<128x32xf32>
    %268 = arith.subf %255, %267 : vector<128x32xf32>
    %cst_103 = arith.constant 9.99999974E-6 : f32
    %269 = vector.broadcast %cst_103 : f32 to vector<128x1xf32>
    %270 = arith.addf %266, %269 : vector<128x1xf32>
    %271 = math.rsqrt %270 : vector<128x1xf32>
    %272 = vector.broadcast %271 : vector<128x1xf32> to vector<128x32xf32>
    %273 = arith.mulf %268, %272 : vector<128x32xf32>
    %274 = vector.broadcast %240 : vector<128x1xf32> to vector<128x32xf32>
    %275 = arith.mulf %273, %274 : vector<128x32xf32>
    %276 = vector.broadcast %241 : vector<128x1xf32> to vector<128x32xf32>
    %277 = arith.addf %275, %276 : vector<128x32xf32>
    %cst_104 = arith.constant 0.000000e+00 : f32
    %278 = vector.broadcast %cst_104 : f32 to vector<128x32xf32>
    %279 = arith.maximumf %277, %278 : vector<128x32xf32>
    %cst_105 = arith.constant 0.000000e+00 : f32
    %280 = vector.broadcast %cst_105 : f32 to vector<128x1xf32>
    %281 = vector.extract_strided_slice %279 {offsets = [0, 0], sizes = [128, 31], strides = [1, 1]} : vector<128x32xf32> to vector<128x31xf32>
    %282 = tpu.concatenate %280, %281 in 1 : vector<128x1xf32>, vector<128x31xf32> -> vector<128x32xf32>
    %283 = vector.broadcast %20 : vector<1x32xf32> to vector<128x32xf32>
    %284 = arith.mulf %282, %283 : vector<128x32xf32>
    %285 = vector.extract_strided_slice %279 {offsets = [0, 1], sizes = [128, 31], strides = [1, 1]} : vector<128x32xf32> to vector<128x31xf32>
    %286 = tpu.concatenate %285, %280 in 1 : vector<128x31xf32>, vector<128x1xf32> -> vector<128x32xf32>
    %287 = vector.broadcast %40 : vector<1x32xf32> to vector<128x32xf32>
    %288 = arith.mulf %286, %287 : vector<128x32xf32>
    %289 = tpu.concatenate %284, %279, %288 in 0 : vector<128x32xf32>, vector<128x32xf32>, vector<128x32xf32> -> vector<384x32xf32>
    %cst_106 = arith.constant dense<0.000000e+00> : vector<128x32xf32>
    %290 = tpu.matmul %242, %289, %cst_106 {dimension_numbers = #tpu.dot_dimension_numbers<[1], [0], [0], [1], [0, 0, 1, 1], [], []>} : vector<128x384xf32>, vector<384x32xf32>, vector<128x32xf32> -> vector<128x32xf32>
    %cst_107 = arith.constant dense<0.000000e+00> : vector<128xf32>
    %291 = vector.multi_reduction <add>, %290, %cst_107 [1] : vector<128x32xf32> to vector<128xf32>
    %292 = vector.shape_cast %291 : vector<128xf32> to vector<128x1xf32>
    %293 = arith.mulf %290, %290 : vector<128x32xf32>
    %cst_108 = arith.constant dense<0.000000e+00> : vector<128xf32>
    %294 = vector.multi_reduction <add>, %293, %cst_108 [1] : vector<128x32xf32> to vector<128xf32>
    %295 = vector.shape_cast %294 : vector<128xf32> to vector<128x1xf32>
    %cst_109 = arith.constant 3.125000e-02 : f32
    %296 = vector.broadcast %cst_109 : f32 to vector<128x1xf32>
    %297 = arith.mulf %292, %296 : vector<128x1xf32>
    %cst_110 = arith.constant 3.125000e-02 : f32
    %298 = vector.broadcast %cst_110 : f32 to vector<128x1xf32>
    %299 = arith.mulf %295, %298 : vector<128x1xf32>
    %300 = arith.mulf %297, %297 : vector<128x1xf32>
    %301 = arith.subf %299, %300 : vector<128x1xf32>
    %302 = vector.broadcast %297 : vector<128x1xf32> to vector<128x32xf32>
    %303 = arith.subf %290, %302 : vector<128x32xf32>
    %cst_111 = arith.constant 9.99999974E-6 : f32
    %304 = vector.broadcast %cst_111 : f32 to vector<128x1xf32>
    %305 = arith.addf %301, %304 : vector<128x1xf32>
    %306 = math.rsqrt %305 : vector<128x1xf32>
    %307 = vector.broadcast %306 : vector<128x1xf32> to vector<128x32xf32>
    %308 = arith.mulf %303, %307 : vector<128x32xf32>
    %309 = vector.broadcast %243 : vector<128x1xf32> to vector<128x32xf32>
    %310 = arith.mulf %308, %309 : vector<128x32xf32>
    %311 = vector.broadcast %244 : vector<128x1xf32> to vector<128x32xf32>
    %312 = arith.addf %310, %311 : vector<128x32xf32>
    %313 = arith.addf %312, %238 : vector<128x32xf32>
    %cst_112 = arith.constant 0.000000e+00 : f32
    %314 = vector.broadcast %cst_112 : f32 to vector<128x32xf32>
    %315 = arith.maximumf %313, %314 : vector<128x32xf32>
    %c0_113 = arith.constant 0 : index
    %c0_114 = arith.constant 0 : index
    %316 = vector.load %arg24[%c0_113, %c0_114] : memref<32x2xf32, #tpu.memory_space<vmem>>, vector<32x2xf32>
    %cst_115 = arith.constant dense<0.000000e+00> : vector<128x2xf32>
    %317 = tpu.matmul %315, %316, %cst_115 {dimension_numbers = #tpu.dot_dimension_numbers<[1], [0], [0], [1], [0, 0, 1, 1], [], []>} : vector<128x32xf32>, vector<32x2xf32>, vector<128x2xf32> -> vector<128x2xf32>
    %c0_116 = arith.constant 0 : index
    %c0_117 = arith.constant 0 : index
    %318 = vector.load %arg25[%c0_116, %c0_117] : memref<1x128xf32, #tpu.memory_space<vmem>>, vector<1x128xf32>
    %cst_118 = arith.constant dense<0.000000e+00> : vector<1x2xf32>
    %319 = tpu.matmul %318, %317, %cst_118 {dimension_numbers = #tpu.dot_dimension_numbers<[1], [0], [0], [1], [0, 0, 1, 1], [], []>} : vector<1x128xf32>, vector<128x2xf32>, vector<1x2xf32> -> vector<1x2xf32>
    %c0_119 = arith.constant 0 : index
    %c0_120 = arith.constant 0 : index
    %320 = vector.load %arg26[%c0_119, %c0_120] : memref<1x1xf32, #tpu.memory_space<vmem>>, vector<1x1xf32>
    %321 = vector.broadcast %320 : vector<1x1xf32> to vector<1x2xf32>
    %322 = arith.addf %319, %321 : vector<1x2xf32>
    %c0_121 = arith.constant 0 : index
    %c0_122 = arith.constant 0 : index
    %323 = vector.load %arg27[%c0_121, %c0_122] : memref<1x2xf32, #tpu.memory_space<vmem>>, vector<1x2xf32>
    tpu.vector_store %arg27[%c0_121, %c0_122], %322 {strides = array<i32>} : memref<1x2xf32, #tpu.memory_space<vmem>>, vector<1x2xf32>,
    return
  }
}

</mosaic_0001>

<bundles_post_ra>
// kernel: tpu_custom_call.1
= control target key start
LH: loop header
LB: loop body
LE: loop exit
PB: predicated region body
PF: predicated region fallthrough
CT: control target
= control target key end

     0   :  { %s10969_s0 = inlined_call_operand.vmem [shape: f32[24,32], index: 0, kind: input, shape index: {}]   ;;  %s10970_s1 = inlined_call_operand.vmem [shape: f32[64,72], index: 1, kind: input, shape index: {}]   ;;  %s10971_s2 = inlined_call_operand.vmem [shape: f32[64,1], index: 2, kind: input, shape index: {}]   ;;  %s10972_s3 = inlined_call_operand.vmem [shape: f32[64,1], index: 3, kind: input, shape index: {}]   ;;  %s10973_s4 = inlined_call_operand.vmem [shape: f32[64,192], index: 4, kind: input, shape index: {}]   ;;  %s10974_s5 = inlined_call_operand.vmem [shape: f32[64,1], index: 5, kind: input, shape index: {}]   ;;  %s10975_s6 = inlined_call_operand.vmem [shape: f32[64,1], index: 6, kind: input, shape index: {}]   ;;  %s10976_s7 = inlined_call_operand.vmem [shape: f32[64,192], index: 7, kind: input, shape index: {}]   ;;  %s10977_s8 = inlined_call_operand.vmem [shape: f32[64,1], index: 8, kind: input, shape index: {}]   ;;  %s10978_s9 = inlined_call_operand.vmem [shape: f32[64,1], index: 9, kind: input, shape index: {}]   ;;  %s10979_s10 = inlined_call_operand.vmem [shape: f32[128,192], index: 10, kind: input, shape index: {}]   ;;  %s10980_s11 = inlined_call_operand.vmem [shape: f32[128,1], index: 11, kind: input, shape index: {}]   ;;  %s10981_s12 = inlined_call_operand.vmem [shape: f32[128,1], index: 12, kind: input, shape index: {}]   ;;  %s10982_s13 = inlined_call_operand.vmem [shape: f32[128,384], index: 13, kind: input, shape index: {}]   ;;  %s10983_s14 = inlined_call_operand.vmem [shape: f32[128,1], index: 14, kind: input, shape index: {}]   ;;  %s10984_s15 = inlined_call_operand.vmem [shape: f32[128,1], index: 15, kind: input, shape index: {}]   ;;  %s10985_s16 = inlined_call_operand.vmem [shape: f32[128,64], index: 16, kind: input, shape index: {}]   ;;  %s10986_s17 = inlined_call_operand.vmem [shape: f32[128,1], index: 17, kind: input, shape index: {}]   ;;  %s10987_s18 = inlined_call_operand.vmem [shape: f32[128,384], index: 18, kind: input, shape index: {}]   ;;  %s10988_s19 = inlined_call_operand.vmem [shape: f32[128,1], index: 19, kind: input, shape index: {}]   ;;  %s10989_s20 = inlined_call_operand.vmem [shape: f32[128,1], index: 20, kind: input, shape index: {}]   ;;  %s10990_s21 = inlined_call_operand.vmem [shape: f32[128,384], index: 21, kind: input, shape index: {}]   ;;  %s10991_s22 = inlined_call_operand.vmem [shape: f32[128,1], index: 22, kind: input, shape index: {}]   ;;  %s10992_s23 = inlined_call_operand.vmem [shape: f32[128,1], index: 23, kind: input, shape index: {}]   ;;  %s10993_s24 = inlined_call_operand.vmem [shape: f32[32,2], index: 24, kind: input, shape index: {}]   ;;  %s10994_s25 = inlined_call_operand.vmem [shape: f32[1,128], index: 25, kind: input, shape index: {}]   ;;  %s10995_s26 = inlined_call_operand.<no memory space> [shape: f32[1,1], index: 26, kind: input, shape index: {}]   ;;  %s10996_s27 = inlined_call_operand.hbm [shape: f32[1,2], index: 27, kind: output, shape index: {}]  }
   0x1   :  { %11080 = sst [smem:[#allocation49_spill]] %s10969_s0  ;;  %v32_v0 = vstv %s10995_s26 }
   0x2   :  { %11081 = sst [smem:[#allocation50_spill]] %s10970_s1  ;;  %33 = vst [vmem:[#allocation2] sm:$0x1] %v32_v0 }
   0x3   :  { %11082 = sst [smem:[#allocation51_spill]] %s10971_s2 }
   0x4   :  { %11083 = sst [smem:[#allocation52_spill]] %s10972_s3 }
   0x5   :  { %11084 = sst [smem:[#allocation53_spill]] %s10973_s4 }
   0x6   :  { %11085 = sst [smem:[#allocation54_spill]] %s10974_s5 }
   0x7   :  { %11086 = sst [smem:[#allocation55_spill]] %s10975_s6 }
   0x8   :  { %11087 = sst [smem:[#allocation56_spill]] %s10976_s7 }
   0x9   :  { %11088 = sst [smem:[#allocation57_spill]] %s10977_s8 }
   0xa   :  { %11089 = sst [smem:[#allocation58_spill]] %s10978_s9 }
   0xb   :  { %11090 = sst [smem:[#allocation59_spill]] %s10979_s10 }
   0xc   :  { %11091 = sst [smem:[#allocation60_spill]] %s10980_s11 }
   0xd   :  { %s11092_s9 = sld [smem:[#allocation49_spill]]  ;;  %s6886_s0 = smov 127  }
  0x13   :  { %v111_v1 = vld [vmem:[%s11092_s9 + $0x10] sm:$0xff]  ;;  %v109_v2 = vld [vmem:[%s11092_s9] sm:$0xff] }
  0x14   :  { %143 = vrot.lane.b32.xlu0 %v111_v1, %s6886_s0  ;;  %139 = vrot.lane.b32.xlu1 %v109_v2, %s6886_s0 }
  0x15   :  { %34 = vsyncpa [#allocation4], 0  ;;  %v110_v3 = vld [vmem:[%s11092_s9 + $0x8] sm:$0xff]  ;;  %v11010_v4 = vmov 0.0   ;;  %s6888_s26 = smov 1   ;;  %s11093_s11 = sld [smem:[#allocation50_spill]]  ;;  %v11009_v8 = vlaneseq }
  0x16   :  { %703 = vmatprep.subr.mxu1 %v11010_v4  ;;  %vm155_vm0 = vcmask 588800   ;;  %s11094_s7 = sld [smem:[#allocation51_spill]]  ;;  %v6889_v7 = vmov 0   ;;  %vm148_vm2 = vcmask 252928   ;;  %vm132_vm3 = vcmask 7168  }
  0x17   :  { %6686 = vset.pattern.permute.xlu1 %v6889_v7  ;;  %6687 = vset.pattern.permute.xlu0 %v6889_v7  ;;  %v90_v9 = vand.u32 127, %v11009_v8  ;;  %vm301_vm5 = vcmask 261120   ;;  %s11097_s9 = sld [smem:[#allocation52_spill]]  ;;  %vm678_vm6 = vcmask 523264   ;;  %vm6890_vm7 = vmmov 0  }
  0x18   :  { %141 = vrot.lane.b32.xlu0 %v110_v3, %s6886_s0  ;;  %127 = vrot.lane.b32.xlu1 %v111_v1, %s6888_s26  ;;  %s11098_s1 = sld [smem:[#allocation54_spill]]  ;;  %vm5871_vm8 = vcmask 8192  }
  0x19   :  { %v95_v10 = vand.u32 15, %v90_v9  ;;  %s11099_s3 = sld [smem:[#allocation55_spill]] }
  0x1a   :  { %s11100_s5 = sld [smem:[#allocation53_spill]] }
  0x1b   :  { %v112_v5 = vld [vmem:[%s11093_s11] sm:$0xff]  ;;  %vm106_vm1 = vcmp.ne.s32.totalorder %v95_v10, 15  ;;  %vm103_vm4 = vcmp.ne.s32.totalorder %v95_v10, 0  ;;  %v113_v31 = vld [vmem:[%s11093_s11 + $0x8] sm:$0xff]  ;;  %v114_v32 = vld [vmem:[%s11093_s11 + $0x10] sm:$0xff]  ;;  %s11101_s30 = sld [smem:[#allocation56_spill]] }
  0x1c   :  { %125 = vrot.lane.b32.xlu0 %v110_v3, %s6888_s26  ;;  %123 = vrot.lane.b32.xlu1 %v109_v2, %s6888_s26  ;;  %v292_v6 = vld [vmem:[%s11094_s7 + $0x38] sm:$0xff]  ;;  %v7060_v11 = vsel %vm106_vm1, 1.0, %v11010_v4  ;;  %v7069_v23 = vsel %vm103_vm4, 1.0, %v11010_v4  ;;  %v116_v34 = vld [vmem:[%s11093_s11 + $0x20] sm:$0xff]  ;;  %s11102_s29 = sld [smem:[#allocation57_spill]] }
  0x1d   :  { %6393 = vmatprep.mubr.msk.f32.mxu0 %vm155_vm0, %v112_v5  ;;  %11095 = vst [vmem:[#allocation6_spill] sm:$0xff] %v7060_v11  ;;  %11096 = vst [vmem:[#allocation7_spill] sm:$0xff] %v7069_v23  ;;  %v115_v33 = vld [vmem:[%s11093_s11 + $0x18] sm:$0xff]  ;;  %v117_v35 = vld [vmem:[%s11093_s11 + $0x28] sm:$0xff]  ;;  %s11112_s2 = sld [smem:[#allocation59_spill]] }
  0x1e   :  { %v118_v36 = vld [vmem:[%s11093_s11 + $0x30] sm:$0xff]  ;;  %v119_v37 = vld [vmem:[%s11093_s11 + $0x38] sm:$0xff]  ;;  %v289_v9 = vld [vmem:[%s11094_s7 + $0x20] sm:$0xff]  ;;  %s11113_s11 = sld [smem:[#allocation60_spill]] }
  0x1f   :  { %v300_v5 = vld [vmem:[%s11097_s9 + $0x38] sm:$0xff]  ;;  %v299_v7 = vld [vmem:[%s11097_s9 + $0x30] sm:$0xff] }
  0x20   :  { %459 = vperm.xlu1 %6686, %v292_v6   ;;  %v290_v6 = vld [vmem:[%s11094_s7 + $0x28] sm:$0xff]  ;;  %v291_v10 = vld [vmem:[%s11094_s7 + $0x30] sm:$0xff] }
  0x86   :  { %v144_v12 = vpop.permute.xlu0 %143  ;;  %v140_v13 = vpop.permute.xlu1 %139 }
  0x87   :  { %v151_v14 = vsel %vm148_vm2, %v144_v12, 0.0  ;;  %v149_v16 = vsel %vm148_vm2, %v140_v13, 0.0  ;;  %v298_v12 = vld [vmem:[%s11097_s9 + $0x28] sm:$0xff]  ;;  %v296_v13 = vld [vmem:[%s11097_s9 + $0x18] sm:$0xff] }
  0x88   :  { %v154_v15 = vmul.f32 %v7060_v11, %v151_v14  ;;  %v152_v20 = vmul.f32 %v7060_v11, %v149_v16  ;;  %v288_v14 = vld [vmem:[%s11094_s7 + $0x18] sm:$0xff]  ;;  %v297_v16 = vld [vmem:[%s11097_s9 + $0x20] sm:$0xff] }
  0x8a   :  { %v142_v17 = vpop.permute.xlu0 %141  ;;  %6375 = vmatprep.subr.mxu0 %v154_v15  ;;  %v128_v21 = vpop.permute.xlu1 %127 }
  0x8b   :  { %v150_v18 = vsel %vm148_vm2, %v142_v17, 0.0  ;;  %6376 = vmatpush3.msra.mxu0 %v154_v15  ;;  %v135_v24 = vsel %vm132_vm3, 0.0, %v128_v21  ;;  %v295_v15 = vld [vmem:[%s11097_s9 + $0x10] sm:$0xff]  ;;  %v294_v17 = vld [vmem:[%s11097_s9 + $0x8] sm:$0xff] }
  0x8c   :  { %v153_v19 = vmul.f32 %v7060_v11, %v150_v18  ;;  %v138_v27 = vmul.f32 %v7069_v23, %v135_v24  ;;  %v287_v18 = vld [vmem:[%s11094_s7 + $0x10] sm:$0xff]  ;;  %v286_v21 = vld [vmem:[%s11094_s7 + $0x8] sm:$0xff]  ;;  %v293_v24 = vld [vmem:[%s11097_s9] sm:$0xff] }
  0x8e   :  { %6377 = vmatprep.subr.mxu0 %v153_v19  ;;  %v126_v22 = vpop.permute.xlu0 %125  ;;  %v124_v25 = vpop.permute.xlu1 %123 }
  0x8f   :  { %6378 = vmatpush3.msra.mxu0 %v153_v19  ;;  %v134_v26 = vsel %vm132_vm3, 0.0, %v126_v22  ;;  %v133_v28 = vsel %vm132_vm3, 0.0, %v124_v25  ;;  %v285_v22 = vld [vmem:[%s11094_s7] sm:$0xff] }
  0x90   :  { %6379 = vmatprep.subr.mxu0 %v152_v20  ;;  %v137_v29 = vmul.f32 %v7069_v23, %v134_v26  ;;  %v136_v30 = vmul.f32 %v7069_v23, %v133_v28 }
  0x91   :  { %6380 = vmatpush3.msra.mxu0 %v152_v20 }
  0x92   :  { %6381 = vmatprep.subr.mxu0 %v111_v1 }
  0x93   :  { %6382 = vmatpush3.msra.mxu0 %v111_v1 }
  0x94   :  { %6383 = vmatprep.subr.mxu0 %v110_v3 }
  0x95   :  { %6384 = vmatpush3.msra.mxu0 %v110_v3 }
  0x96   :  { %6385 = vmatprep.subr.mxu0 %v109_v2 }
  0x97   :  { %6386 = vmatpush3.msra.mxu0 %v109_v2 }
  0x98   :  { %6387 = vmatprep.subr.mxu0 %v138_v27 }
  0x99   :  { %6388 = vmatpush3.msra.mxu0 %v138_v27 }
  0x9a   :  { %6389 = vmatprep.subr.mxu0 %v137_v29 }
  0x9b   :  { %6390 = vmatpush3.msra.mxu0 %v137_v29  ;;  %v460_v25 = vpop.permute.xlu1 %459 }
  0x9c   :  { %6391 = vmatprep.subr.mxu0 %v136_v30 }
  0x9d   :  { %6392 = vmatpush3.msra.mxu0 %v136_v30 }
  0x9e   :  { %6394 = vmatmul.mubr.msk.f32.vlgmr.msra.gmra.mxu0 %vm155_vm0, %v113_v31  ;;  %1144 = vmatprep.subr.mxu0 %v11010_v4 }
  0x9f   :  { %6396 = vmatprep.mubr.msk.f32.mxu0 %vm155_vm0, %v114_v32 }
  0xa2   :  { %6397 = vmatmul.mubr.msk.f32.gmra.mxu0 %vm155_vm0, %v115_v33 }
  0xa3   :  { %6399 = vmatprep.mubr.msk.f32.mxu0 %vm155_vm0, %v116_v34 }
  0xa6   :  { %6400 = vmatmul.mubr.msk.f32.gmra.mxu0 %vm155_vm0, %v117_v35 }
  0xa7   :  { %6402 = vmatprep.mubr.msk.f32.mxu0 %vm155_vm0, %v118_v36 }
  0xaa   :  { %6403 = vmatmul.mubr.msk.f32.gmra.mxu0 %vm155_vm0, %v119_v37 }
 0x15e   :  { %v7106_v38 = vpop.f32.mrf.mxu0 }
 0x15f   :  { %v305_v39 = vsel %vm301_vm5, %v7106_v38, 0.0  ;;  %v327_v40 = vmul.f32 %v7106_v38, %v7106_v38 }
 0x160   :  { %306 = vadd.xlane.f32.xlu0 %v305_v39  ;;  %v7112_v41 = vpop.f32.mrf.mxu0 }
 0x161   :  { %v337_v42 = vsel %vm301_vm5, %v327_v40, 0.0  ;;  %v302_v44 = vsel %vm301_vm5, %v7112_v41, 0.0  ;;  %v326_v51 = vmul.f32 %v7112_v41, %v7112_v41 }
 0x162   :  { %338 = vadd.xlane.f32.xlu1 %v337_v42  ;;  %v7115_v43 = vpop.f32.mrf.mxu0 }
 0x163   :  { %v329_v45 = vmul.f32 %v7115_v43, %v7115_v43  ;;  %v311_v50 = vsel %vm301_vm5, %v7115_v43, 0.0  ;;  %v334_v55 = vsel %vm301_vm5, %v326_v51, 0.0 }
 0x164   :  { %303 = vadd.xlane.f32.xlu0 %v302_v44  ;;  %v7121_v46 = vpop.f32.mrf.mxu0 }
 0x165   :  { %v343_v47 = vsel %vm301_vm5, %v329_v45, 0.0  ;;  %v328_v48 = vmul.f32 %v7121_v46, %v7121_v46  ;;  %v308_v59 = vsel %vm301_vm5, %v7121_v46, 0.0 }
 0x166   :  { %344 = vadd.xlane.f32.xlu1 %v343_v47  ;;  %v7126_v49 = vpop.f32.mrf.mxu0 }
 0x167   :  { %v331_v52 = vmul.f32 %v7126_v49, %v7126_v49  ;;  %v340_v53 = vsel %vm301_vm5, %v328_v48, 0.0  ;;  %v317_v62 = vsel %vm301_vm5, %v7126_v49, 0.0 }
 0x168   :  { %312 = vadd.xlane.f32.xlu0 %v311_v50  ;;  %v7135_v54 = vpop.f32.mrf.mxu0 }
 0x169   :  { %v349_v56 = vsel %vm301_vm5, %v331_v52, 0.0  ;;  %v330_v57 = vmul.f32 %v7135_v54, %v7135_v54  ;;  %v314_v0 = vsel %vm301_vm5, %v7135_v54, 0.0 }
 0x16a   :  { %341 = vadd.xlane.f32.xlu1 %v340_v53  ;;  %v7141_v58 = vpop.f32.mrf.mxu0 }
 0x16b   :  { %v346_v60 = vsel %vm301_vm5, %v330_v57, 0.0  ;;  %v323_v1 = vsel %vm301_vm5, %v7141_v58, 0.0  ;;  %v333_v2 = vmul.f32 %v7141_v58, %v7141_v58 }
 0x16c   :  { %335 = vadd.xlane.f32.xlu0 %v334_v55  ;;  %v7146_v61 = vpop.f32.mrf.mxu0 }
 0x16d   :  { %v320_v63 = vsel %vm301_vm5, %v7146_v61, 0.0  ;;  %v355_v3 = vsel %vm301_vm5, %v333_v2, 0.0  ;;  %v332_v19 = vmul.f32 %v7146_v61, %v7146_v61 }
 0x16e   :  { %350 = vadd.xlane.f32.xlu1 %v349_v56 }
 0x16f   :  { %v352_v20 = vsel %vm301_vm5, %v332_v19, 0.0 }
 0x170   :  { %309 = vadd.xlane.f32.xlu0 %v308_v59 }
 0x172   :  { %347 = vadd.xlane.f32.xlu1 %v346_v60 }
 0x174   :  { %318 = vadd.xlane.f32.xlu0 %v317_v62 }
 0x176   :  { %321 = vadd.xlane.f32.xlu1 %v320_v63 }
 0x178   :  { %315 = vadd.xlane.f32.xlu0 %v314_v0 }
 0x17c   :  { %324 = vadd.xlane.f32.xlu0 %v323_v1 }
 0x180   :  { %356 = vadd.xlane.f32.xlu0 %v355_v3 }
 0x187   :  { %507 = vperm.xlu1 %6686, %v300_v5  }
 0x18b   :  { %449 = vperm.xlu1 %6686, %v290_v6  }
 0x18f   :  { %502 = vperm.xlu1 %6686, %v299_v7  }
 0x193   :  { %444 = vperm.xlu1 %6686, %v289_v9  }
 0x196   :  { %454 = vperm.xlu0 %6687, %v291_v10  }
 0x197   :  { %497 = vperm.xlu1 %6686, %v298_v12  }
 0x19a   :  { %487 = vperm.xlu0 %6687, %v296_v13  }
 0x19b   :  { %439 = vperm.xlu1 %6686, %v288_v14  }
 0x19e   :  { %482 = vperm.xlu0 %6687, %v295_v15  }
 0x19f   :  { %492 = vperm.xlu1 %6686, %v297_v16  }
 0x1a2   :  { %477 = vperm.xlu0 %6687, %v294_v17  }
 0x1a3   :  { %434 = vperm.xlu1 %6686, %v287_v18  }
 0x1c7   :  { %353 = vadd.xlane.f32.xlu1 %v352_v20 }
 0x1d8   :  { %429 = vperm.xlu1 %6686, %v286_v21  }
 0x1dc   :  { %424 = vperm.xlu1 %6686, %v285_v22  }
 0x1e0   :  { %472 = vperm.xlu1 %6686, %v293_v24  }
 0x1e9   :  { %v7207_v26 = vpop.xlane.xlu0 %306 }
 0x1eb   :  { %v7209_v27 = vpop.xlane.xlu1 %338 }
 0x1ed   :  { %v7211_v28 = vpop.xlane.xlu0 %303 }
 0x1ef   :  { %v345_v29 = vpop.xlane.xlu1 %344 }
 0x1f0   :  { %v369_v53 = vmul.f32 0.03125, %v345_v29 }
 0x1f1   :  { %v313_v30 = vpop.xlane.xlu0 %312 }
 0x1f2   :  { %v361_v44 = vmul.f32 0.03125, %v313_v30  ;;  %v359_v30 = vmul.f32 0.03125, %v7207_v26 }
 0x1f3   :  { %v7213_v31 = vpop.xlane.xlu1 %341 }
 0x1f4   :  { %v377_v51 = vmul.f32 %v361_v44, %v361_v44  ;;  %v393_v16 = vsub.f32 %v7115_v43, %v361_v44  ;;  %v368_v26 = vmul.f32 0.03125, %v7213_v31 }
 0x1f5   :  { %v7215_v32 = vpop.xlane.xlu0 %335 }
 0x1f6   :  { %v385_v59 = vsub.f32 %v369_v53, %v377_v51 }
 0x1f7   :  { %v351_v33 = vpop.xlane.xlu1 %350 }
 0x1f8   :  { %v371_v45 = vmul.f32 0.03125, %v351_v33  ;;  %v401_v0 = vadd.f32 1e-05, %v385_v59  ;;  %v375_v33 = vmul.f32 %v359_v30, %v359_v30 }
 0x1f9   :  { %v7217_v34 = vpop.xlane.xlu0 %309 }
 0x1fb   :  { %v7219_v35 = vpop.xlane.xlu1 %347 }
 0x1fd   :  { %v319_v36 = vpop.xlane.xlu0 %318 }
 0x1fe   :  { %v363_v37 = vmul.f32 0.03125, %v319_v36  ;;  %v367_v36 = vmul.f32 0.03125, %v7209_v27  ;;  %v391_v27 = vsub.f32 %v7106_v38, %v359_v30 }
 0x1ff   :  { %v7221_v39 = vpop.xlane.xlu1 %321 }
 0x200   :  { %v379_v40 = vmul.f32 %v363_v37, %v363_v37  ;;  %v395_v6 = vsub.f32 %v7126_v49, %v363_v37  ;;  %v383_v37 = vsub.f32 %v367_v36, %v375_v33 }
 0x201   :  { %v316_v42 = vpop.xlane.xlu0 %315 }
 0x202   :  { %v387_v48 = vsub.f32 %v371_v45, %v379_v40  ;;  %v399_v40 = vadd.f32 1e-05, %v383_v37  ;;  %v362_v44 = vmul.f32 0.03125, %v316_v42  ;;  %v358_v42 = vmul.f32 0.03125, %v7211_v28 }
 0x203   :  { %v508_v47 = vpop.permute.xlu1 %507 }
 0x204   :  { %v403_v55 = vadd.f32 1e-05, %v387_v48  ;;  %v360_v48 = vmul.f32 0.03125, %v7217_v34 }
 0x205   :  { %v325_v50 = vpop.xlane.xlu0 %324 }
 0x206   :  { %v365_v52 = vmul.f32 0.03125, %v325_v50  ;;  %6688 = vrsqrt.f32 %v403_v55  ;;  %v370_v50 = vmul.f32 0.03125, %v7219_v35  ;;  %v376_v53 = vmul.f32 %v360_v48, %v360_v48 }
 0x207   :  { %v450_v56 = vpop.permute.xlu1 %449  ;;  %v364_v55 = vmul.f32 0.03125, %v7221_v39  ;;  %v366_v35 = vmul.f32 0.03125, %v7215_v32 }
 0x208   :  { %v381_v60 = vmul.f32 %v365_v52, %v365_v52  ;;  %v397_v9 = vsub.f32 %v7141_v58, %v365_v52 }
 0x209   :  { %v357_v57 = vpop.xlane.xlu0 %356 }
 0x20a   :  { %v373_v62 = vmul.f32 0.03125, %v357_v57 }
 0x20b   :  { %v7223_v2 = vpop.permute.xlu1 %502 }
 0x20c   :  { %v389_v63 = vsub.f32 %v373_v62, %v381_v60  ;;  %v384_v62 = vsub.f32 %v368_v26, %v376_v53  ;;  %v547_v53 = vld [vmem:[%s11098_s1 + $0x28] sm:$0xff] }
 0x20e   :  { %v405_v1 = vadd.f32 1e-05, %v389_v63  ;;  %v380_v63 = vmul.f32 %v364_v55, %v364_v55  ;;  %v400_v31 = vadd.f32 1e-05, %v384_v62 }
 0x20f   :  { %v7225_v3 = vpop.permute.xlu1 %444 }
 0x210   :  { %6690 = vrsqrt.f32 %v405_v1 }
 0x211   :  { %6692 = vrsqrt.f32 %v401_v0  ;;  %v7229_v15 = vpop.permute.xlu0 %454 }
 0x212   :  { %6694 = vrsqrt.f32 %v399_v40 }
 0x213   :  { %v6689_v5 = vpop.eup %6688  ;;  %v498_v7 = vpop.permute.xlu1 %497 }
 0x214   :  { %v419_v10 = vmul.f32 %v6689_v5, %v395_v6  ;;  %v374_v6 = vmul.f32 %v358_v42, %v358_v42 }
 0x215   :  { %v488_v49 = vpop.permute.xlu0 %487 }
 0x216   :  { %v467_v17 = vmul.f32 %v450_v56, %v419_v10  ;;  %v382_v10 = vsub.f32 %v366_v35, %v374_v6 }
 0x217   :  { %v440_v19 = vpop.permute.xlu1 %439 }
 0x218   :  { %v515_v22 = vadd.f32 %v498_v7, %v467_v17  ;;  %v398_v28 = vadd.f32 1e-05, %v382_v10 }
 0x219   :  { %v483_v59 = vpop.permute.xlu0 %482 }
 0x21a   :  { %v7238_v58 = vmax.f32 %v515_v22, 0.0 }
 0x21b   :  { %v493_v45 = vpop.permute.xlu1 %492 }
 0x21d   :  { %v6691_v12 = vpop.eup %6690  ;;  %v478_v39 = vpop.permute.xlu0 %477 }
 0x21e   :  { %v421_v13 = vmul.f32 %v6691_v12, %v397_v9  ;;  %v6693_v14 = vpop.eup %6692 }
 0x21f   :  { %v417_v20 = vmul.f32 %v6693_v14, %v393_v16  ;;  %v435_v52 = vpop.permute.xlu1 %434  ;;  %v6695_v57 = vpop.eup %6694  ;;  %v396_v14 = vsub.f32 %v7146_v61, %v364_v55  ;;  %v546_v55 = vld [vmem:[%s11098_s1 + $0x20] sm:$0xff] }
 0x220   :  { %v469_v18 = vmul.f32 %v460_v25, %v421_v13  ;;  %v415_v1 = vmul.f32 %v6695_v57, %v391_v27  ;;  %v394_v13 = vsub.f32 %v7135_v54, %v362_v44  ;;  %v545_v27 = vld [vmem:[%s11098_s1 + $0x18] sm:$0xff] }
 0x221   :  { %v465_v24 = vmul.f32 %v440_v19, %v417_v20  ;;  %v392_v20 = vsub.f32 %v7121_v46, %v360_v48  ;;  %v548_v46 = vld [vmem:[%s11098_s1 + $0x30] sm:$0xff] }
 0x222   :  { %v517_v21 = vadd.f32 %v508_v47, %v469_v18  ;;  %v378_v47 = vmul.f32 %v362_v44, %v362_v44 }
 0x223   :  { %v513_v43 = vadd.f32 %v488_v49, %v465_v24 }
 0x224   :  { %v7232_v29 = vmax.f32 %v517_v21, 0.0  ;;  %v386_v51 = vsub.f32 %v370_v50, %v378_v47  ;;  %v555_v47 = vld [vmem:[%s11099_s3 + $0x28] sm:$0xff] }
 0x225   :  { %v7242_v25 = vmax.f32 %v513_v43, 0.0  ;;  %v527_v50 = vld [vmem:[%s11100_s5 + $0x8] sm:$0xff] }
 0x226   :  { %612 = vrot.lane.b32.xlu0 %v7232_v29, %s6888_s26  ;;  %704 = vmatpush1.msra.mxu1 %v7232_v29  ;;  %v402_v56 = vadd.f32 1e-05, %v386_v51  ;;  %v549_v51 = vld [vmem:[%s11098_s1 + $0x38] sm:$0xff] }
 0x227   :  { %705 = vmatprep.subr.mxu1 %v11010_v4  ;;  %5897 = vmatprep.mubr.msk.f32.mxu1 %vm678_vm6, %v527_v50 }
 0x228   :  { %6696 = vrsqrt.f32 %v402_v56 }
 0x22a   :  { %608 = vrot.lane.b32.xlu0 %v7238_v58, %s6888_s26 }
 0x22e   :  { %604 = vrot.lane.b32.xlu0 %v7242_v25, %s6888_s26 }
 0x235   :  { %v6697_v32 = vpop.eup %6696 }
 0x236   :  { %v418_v16 = vmul.f32 %v6697_v32, %v394_v13 }
 0x238   :  { %v466_v21 = vmul.f32 %v7225_v3, %v418_v16  ;;  %v390_v3 = vsub.f32 %v7112_v41, %v358_v42  ;;  %v556_v41 = vld [vmem:[%s11099_s3 + $0x30] sm:$0xff] }
 0x23a   :  { %v514_v49 = vadd.f32 %v493_v45, %v466_v21 }
 0x250   :  { %v354_v60 = vpop.xlane.xlu1 %353 }
 0x251   :  { %v372_v34 = vmul.f32 0.03125, %v354_v60 }
 0x253   :  { %v388_v0 = vsub.f32 %v372_v34, %v380_v63 }
 0x254   :  { %v430_v5 = vpop.permute.xlu1 %429 }
 0x255   :  { %v404_v7 = vadd.f32 1e-05, %v388_v0  ;;  %v463_v9 = vmul.f32 %v430_v5, %v415_v1 }
 0x257   :  { %6698 = vrsqrt.f32 %v404_v7  ;;  %v511_v38 = vadd.f32 %v478_v39, %v463_v9 }
 0x258   :  { %6700 = vrsqrt.f32 %v400_v31  ;;  %v425_v61 = vpop.permute.xlu1 %424 }
 0x259   :  { %v7255_v12 = vmax.f32 %v511_v38, 0.0  ;;  %6702 = vrsqrt.f32 %v398_v28 }
 0x25b   :  { %600 = vrot.lane.b32.xlu0 %v7255_v12, %s6888_s26 }
 0x25c   :  { %v473_v37 = vpop.permute.xlu1 %472 }
 0x25f   :  { %652 = vrot.lane.b32.xlu0 %v7232_v29, %s6886_s0 }
 0x263   :  { %648 = vrot.lane.b32.xlu0 %v7238_v58, %s6886_s0 }
 0x264   :  { %v6699_v17 = vpop.eup %6698 }
 0x265   :  { %v420_v18 = vmul.f32 %v6699_v17, %v396_v14  ;;  %v6701_v19 = vpop.eup %6700 }
 0x266   :  { %v416_v24 = vmul.f32 %v6701_v19, %v392_v20  ;;  %v6703_v33 = vpop.eup %6702 }
 0x267   :  { %644 = vrot.lane.b32.xlu0 %v7242_v25, %s6886_s0  ;;  %v468_v22 = vmul.f32 %v7229_v15, %v420_v18  ;;  %v414_v36 = vmul.f32 %v6703_v33, %v390_v3 }
 0x268   :  { %v464_v43 = vmul.f32 %v435_v52, %v416_v24  ;;  %v557_v52 = vld [vmem:[%s11099_s3 + $0x38] sm:$0xff] }
 0x269   :  { %v516_v54 = vadd.f32 %v7223_v2, %v468_v22  ;;  %v7283_v2 = vmax.f32 %v514_v49, 0.0  ;;  %v462_v40 = vmul.f32 %v425_v61, %v414_v36 }
 0x26a   :  { %v512_v15 = vadd.f32 %v483_v59, %v464_v43 }
 0x26b   :  { %640 = vrot.lane.b32.xlu0 %v7255_v12, %s6886_s0  ;;  %v7273_v30 = vmax.f32 %v516_v54, 0.0  ;;  %v510_v45 = vadd.f32 %v473_v37, %v462_v40 }
 0x26c   :  { %v7294_v44 = vmax.f32 %v512_v15, 0.0 }
 0x26d   :  { %610 = vrot.lane.b32.xlu1 %v7273_v30, %s6888_s26  ;;  %706 = vmatpush1.msra.mxu1 %v7273_v30  ;;  %v7305_v48 = vmax.f32 %v510_v45, 0.0 }
 0x26e   :  { %707 = vmatprep.subr.mxu1 %v11010_v4 }
 0x26f   :  { %708 = vmatpush1.msra.mxu1 %v7238_v58  ;;  %960 = vperm.xlu0 %6687, %v548_v46  }
 0x270   :  { %709 = vmatprep.subr.mxu1 %v11010_v4 }
 0x271   :  { %606 = vrot.lane.b32.xlu1 %v7283_v2, %s6888_s26  ;;  %710 = vmatpush1.msra.mxu1 %v7283_v2 }
 0x272   :  { %711 = vmatprep.subr.mxu1 %v11010_v4 }
 0x273   :  { %712 = vmatpush1.msra.mxu1 %v7242_v25  ;;  %1008 = vperm.xlu0 %6687, %v556_v41  }
 0x274   :  { %713 = vmatprep.subr.mxu1 %v11010_v4 }
 0x275   :  { %602 = vrot.lane.b32.xlu1 %v7294_v44, %s6888_s26  ;;  %714 = vmatpush1.msra.mxu1 %v7294_v44 }
 0x276   :  { %715 = vmatprep.subr.mxu1 %v11010_v4 }
 0x277   :  { %1003 = vperm.xlu0 %6687, %v555_v47   ;;  %716 = vmatpush1.msra.mxu1 %v7255_v12 }
 0x278   :  { %717 = vmatprep.subr.mxu1 %v11010_v4 }
 0x279   :  { %598 = vrot.lane.b32.xlu1 %v7305_v48, %s6888_s26  ;;  %718 = vmatpush1.msra.mxu1 %v7305_v48 }
 0x27a   :  { %719 = vmatprep.subr.mxu1 %v11010_v4 }
 0x27d   :  { %650 = vrot.lane.b32.xlu1 %v7273_v30, %s6886_s0 }
 0x281   :  { %646 = vrot.lane.b32.xlu1 %v7283_v2, %s6886_s0 }
 0x285   :  { %642 = vrot.lane.b32.xlu1 %v7294_v44, %s6886_s0 }
 0x289   :  { %638 = vrot.lane.b32.xlu1 %v7305_v48, %s6886_s0 }
 0x28d   :  { %965 = vperm.xlu1 %6686, %v549_v51  }
 0x291   :  { %1013 = vperm.xlu1 %6686, %v557_v52   ;;  %v526_v52 = vld [vmem:[%s11100_s5] sm:$0xff] }
 0x295   :  { %955 = vperm.xlu1 %6686, %v547_v53   ;;  %v529_v53 = vld [vmem:[%s11100_s5 + $0x18] sm:$0xff] }
 0x298   :  { %v613_v26 = vpop.permute.xlu0 %612 }
 0x299   :  { %v629_v56 = vsel %vm132_vm3, 0.0, %v613_v26  ;;  %950 = vperm.xlu1 %6686, %v546_v55   ;;  %v528_v55 = vld [vmem:[%s11100_s5 + $0x10] sm:$0xff]  ;;  %v531_v26 = vld [vmem:[%s11100_s5 + $0x28] sm:$0xff] }
 0x29a   :  { %v637_v57 = vmul.f32 %v7069_v23, %v629_v56  ;;  %v530_v56 = vld [vmem:[%s11100_s5 + $0x20] sm:$0xff] }
 0x29c   :  { %720 = vmatpush1.msra.mxu1 %v637_v57  ;;  %v609_v59 = vpop.permute.xlu0 %608  ;;  %v533_v57 = vld [vmem:[%s11100_s5 + $0x38] sm:$0xff] }
 0x29d   :  { %945 = vperm.xlu1 %6686, %v545_v27   ;;  %721 = vmatprep.subr.mxu1 %v11010_v4  ;;  %v627_v63 = vsel %vm132_vm3, 0.0, %v609_v59  ;;  %v532_v27 = vld [vmem:[%s11100_s5 + $0x30] sm:$0xff]  ;;  %v535_v59 = vld [vmem:[%s11100_s5 + $0x48] sm:$0xff] }
 0x29e   :  { %v635_v0 = vmul.f32 %v7069_v23, %v627_v63  ;;  %v539_v63 = vld [vmem:[%s11100_s5 + $0x68] sm:$0xff] }
 0x2a0   :  { %v605_v60 = vpop.permute.xlu0 %604 }
 0x2a1   :  { %v625_v39 = vsel %vm132_vm3, 0.0, %v605_v60  ;;  %v534_v60 = vld [vmem:[%s11100_s5 + $0x40] sm:$0xff] }
 0x2a2   :  { %v633_v7 = vmul.f32 %v7069_v23, %v625_v39 }
 0x2cd   :  { %v601_v42 = vpop.permute.xlu0 %600 }
 0x2ce   :  { %v623_v10 = vsel %vm132_vm3, 0.0, %v601_v42  ;;  %v537_v42 = vld [vmem:[%s11100_s5 + $0x58] sm:$0xff] }
 0x2cf   :  { %v631_v13 = vmul.f32 %v7069_v23, %v623_v10 }
 0x2d1   :  { %v653_v1 = vpop.permute.xlu0 %652 }
 0x2d2   :  { %v669_v16 = vsel %vm148_vm2, %v653_v1, 0.0 }
 0x2d3   :  { %v677_v19 = vmul.f32 %v7060_v11, %v669_v16 }
 0x2d5   :  { %v649_v28 = vpop.permute.xlu0 %648 }
 0x2d6   :  { %v667_v22 = vsel %vm148_vm2, %v649_v28, 0.0 }
 0x2d7   :  { %v675_v61 = vmul.f32 %v7060_v11, %v667_v22 }
 0x2d9   :  { %v645_v20 = vpop.permute.xlu0 %644 }
 0x2da   :  { %v665_v43 = vsel %vm148_vm2, %v645_v20, 0.0 }
 0x2db   :  { %v673_v15 = vmul.f32 %v7060_v11, %v665_v43 }
 0x2dd   :  { %v641_v46 = vpop.permute.xlu0 %640 }
 0x2de   :  { %v663_v37 = vsel %vm148_vm2, %v641_v46, 0.0 }
 0x2df   :  { %v611_v62 = vpop.permute.xlu1 %610  ;;  %v671_v45 = vmul.f32 %v7060_v11, %v663_v37 }
 0x2e0   :  { %v628_v34 = vsel %vm132_vm3, 0.0, %v611_v62  ;;  %v536_v62 = vld [vmem:[%s11100_s5 + $0x50] sm:$0xff] }
 0x2e1   :  { %v636_v35 = vmul.f32 %v7069_v23, %v628_v34  ;;  %v538_v34 = vld [vmem:[%s11100_s5 + $0x60] sm:$0xff] }
 0x2e3   :  { %722 = vmatpush1.msra.mxu1 %v636_v35  ;;  %v607_v5 = vpop.permute.xlu1 %606  ;;  %v541_v35 = vld [vmem:[%s11100_s5 + $0x78] sm:$0xff] }
 0x2e4   :  { %v626_v6 = vsel %vm132_vm3, 0.0, %v607_v5  ;;  %723 = vmatprep.subr.mxu1 %v11010_v4 }
 0x2e5   :  { %v634_v31 = vmul.f32 %v7069_v23, %v626_v6  ;;  %724 = vmatpush1.msra.mxu1 %v635_v0  ;;  %v540_v0 = vld [vmem:[%s11100_s5 + $0x70] sm:$0xff]  ;;  %s11103_s5 = sld [smem:[#allocation58_spill]] }
 0x2e6   :  { %725 = vmatprep.subr.mxu1 %v11010_v4 }
 0x2e7   :  { %726 = vmatpush1.msra.mxu1 %v634_v31  ;;  %v603_v9 = vpop.permute.xlu1 %602 }
 0x2e8   :  { %v624_v38 = vsel %vm132_vm3, 0.0, %v603_v9  ;;  %727 = vmatprep.subr.mxu1 %v11010_v4 }
 0x2e9   :  { %v632_v32 = vmul.f32 %v7069_v23, %v624_v38  ;;  %728 = vmatpush1.msra.mxu1 %v633_v7 }
 0x2ea   :  { %729 = vmatprep.subr.mxu1 %v11010_v4 }
 0x2eb   :  { %730 = vmatpush1.msra.mxu1 %v632_v32  ;;  %v599_v14 = vpop.permute.xlu1 %598 }
 0x2ec   :  { %v622_v17 = vsel %vm132_vm3, 0.0, %v599_v14  ;;  %731 = vmatprep.subr.mxu1 %v11010_v4 }
 0x2ed   :  { %v630_v18 = vmul.f32 %v7069_v23, %v622_v17  ;;  %732 = vmatpush1.msra.mxu1 %v631_v13 }
 0x2ee   :  { %733 = vmatprep.subr.mxu1 %v11010_v4 }
 0x2ef   :  { %734 = vmatpush1.msra.mxu1 %v630_v18  ;;  %v651_v21 = vpop.permute.xlu1 %650 }
 0x2f0   :  { %v668_v24 = vsel %vm148_vm2, %v651_v21, 0.0  ;;  %751 = vmatprep.subr.mxu1 %v11010_v4 }
 0x2f1   :  { %v676_v54 = vmul.f32 %v7060_v11, %v668_v24  ;;  %752 = vmatpush2.msra.mxu1 %v677_v19 }
 0x2f2   :  { %753 = vmatprep.subr.mxu1 %v11010_v4 }
 0x2f3   :  { %754 = vmatpush2.msra.mxu1 %v676_v54  ;;  %v647_v49 = vpop.permute.xlu1 %646 }
 0x2f4   :  { %v666_v33 = vsel %vm148_vm2, %v647_v49, 0.0  ;;  %755 = vmatprep.subr.mxu1 %v11010_v4 }
 0x2f5   :  { %v674_v3 = vmul.f32 %v7060_v11, %v666_v33  ;;  %756 = vmatpush2.msra.mxu1 %v675_v61 }
 0x2f6   :  { %757 = vmatprep.subr.mxu1 %v11010_v4 }
 0x2f7   :  { %758 = vmatpush2.msra.mxu1 %v674_v3  ;;  %v643_v36 = vpop.permute.xlu1 %642 }
 0x2f8   :  { %v664_v41 = vsel %vm148_vm2, %v643_v36, 0.0  ;;  %759 = vmatprep.subr.mxu1 %v11010_v4 }
 0x2f9   :  { %v672_v40 = vmul.f32 %v7060_v11, %v664_v41  ;;  %760 = vmatpush2.msra.mxu1 %v673_v15 }
 0x2fa   :  { %761 = vmatprep.subr.mxu1 %v11010_v4 }
 0x2fb   :  { %762 = vmatpush2.msra.mxu1 %v672_v40  ;;  %v639_v47 = vpop.permute.xlu1 %638 }
 0x2fc   :  { %v662_v50 = vsel %vm148_vm2, %v639_v47, 0.0  ;;  %763 = vmatprep.subr.mxu1 %v11010_v4 }
 0x2fd   :  { %v670_v51 = vmul.f32 %v7060_v11, %v662_v50  ;;  %764 = vmatpush2.msra.mxu1 %v671_v45 }
 0x2fe   :  { %765 = vmatprep.subr.mxu1 %v11010_v4 }
 0x2ff   :  { %766 = vmatpush2.msra.mxu1 %v670_v51 }
 0x300   :  { %768 = vmatmul.mubr.f32.vlgmr.msra.gmra.mxu1 %v526_v52  ;;  %1793 = vmatprep.subr.mxu1 %v11010_v4 }
 0x301   :  { %5898 = vmatprep.mubr.msk.f32.mxu1 %vm678_vm6, %v529_v53 }
 0x304   :  { %773 = vmatmul.mubr.f32.gmra.mxu1 %v528_v55 }
 0x305   :  { %5899 = vmatprep.mubr.msk.f32.mxu1 %vm678_vm6, %v531_v26  ;;  %v544_v26 = vld [vmem:[%s11098_s1 + $0x10] sm:$0xff] }
 0x308   :  { %778 = vmatmul.mubr.f32.gmra.mxu1 %v530_v56  ;;  %v543_v56 = vld [vmem:[%s11098_s1 + $0x8] sm:$0xff] }
 0x309   :  { %5900 = vmatprep.mubr.msk.f32.mxu1 %vm678_vm6, %v533_v57  ;;  %v554_v57 = vld [vmem:[%s11099_s3 + $0x20] sm:$0xff] }
 0x30c   :  { %783 = vmatmul.mubr.f32.gmra.mxu1 %v532_v27  ;;  %v542_v27 = vld [vmem:[%s11098_s1] sm:$0xff] }
 0x30d   :  { %5901 = vmatprep.mubr.msk.f32.mxu1 %vm678_vm6, %v535_v59  ;;  %v553_v59 = vld [vmem:[%s11099_s3 + $0x18] sm:$0xff] }
 0x310   :  { %788 = vmatmul.mubr.f32.gmra.mxu1 %v534_v60  ;;  %v550_v60 = vld [vmem:[%s11099_s3] sm:$0xff] }
 0x311   :  { %5902 = vmatprep.mubr.msk.f32.mxu1 %vm678_vm6, %v537_v42  ;;  %v552_v42 = vld [vmem:[%s11099_s3 + $0x10] sm:$0xff] }
 0x314   :  { %793 = vmatmul.mubr.f32.gmra.mxu1 %v536_v62  ;;  %v551_v62 = vld [vmem:[%s11099_s3 + $0x8] sm:$0xff] }
 0x315   :  { %5903 = vmatprep.mubr.msk.f32.mxu1 %vm678_vm6, %v539_v63  ;;  %v7520_v63 = vpop.permute.xlu1 %965 }
 0x318   :  { %798 = vmatmul.mubr.f32.gmra.mxu1 %v538_v34  ;;  %v7522_v34 = vpop.permute.xlu0 %960 }
 0x319   :  { %5904 = vmatprep.mubr.msk.f32.mxu1 %vm678_vm6, %v541_v35  ;;  %v7524_v35 = vpop.permute.xlu1 %1013 }
 0x31c   :  { %803 = vmatmul.mubr.f32.gmra.mxu1 %v540_v0  ;;  %v7526_v0 = vpop.permute.xlu0 %1008 }
 0x3c0   :  { %v7440_v1 = vpop.f32.mrf.mxu1 }
 0x3c1   :  { %v808_v5 = vsel %vm301_vm5, %v7440_v1, 0.0  ;;  %v832_v39 = vmul.f32 %v7440_v1, %v7440_v1 }
 0x3c2   :  { %809 = vadd.xlane.f32.xlu0 %v808_v5  ;;  %v771_v6 = vpop.f32.mrf.mxu1  ;;  %v7528_v5 = vpop.permute.xlu1 %955 }
 0x3c3   :  { %v840_v7 = vsel %vm301_vm5, %v832_v39, 0.0  ;;  %v7530_v39 = vpop.permute.xlu0 %1003 }
 0x3c4   :  { %v7446_v31 = vpop.f32.mrf.mxu1 }
 0x3c5   :  { %v833_v9 = vmul.f32 %v7446_v31, %v7446_v31  ;;  %v811_v32 = vsel %vm301_vm5, %v7446_v31, 0.0 }
 0x3c6   :  { %841 = vadd.xlane.f32.xlu0 %v840_v7  ;;  %v776_v10 = vpop.f32.mrf.mxu1  ;;  %v7532_v6 = vpop.permute.xlu1 %950 }
 0x3c7   :  { %v843_v38 = vsel %vm301_vm5, %v833_v9, 0.0 }
 0x3c8   :  { %844 = vadd.xlane.f32.xlu1 %v843_v38  ;;  %v7452_v28 = vpop.f32.mrf.mxu1 }
 0x3c9   :  { %v834_v13 = vmul.f32 %v7452_v28, %v7452_v28  ;;  %v814_v18 = vsel %vm301_vm5, %v7452_v28, 0.0 }
 0x3ca   :  { %812 = vadd.xlane.f32.xlu0 %v811_v32  ;;  %v781_v14 = vpop.f32.mrf.mxu1  ;;  %v7534_v9 = vpop.permute.xlu1 %945 }
 0x3cb   :  { %v846_v16 = vsel %vm301_vm5, %v834_v13, 0.0 }
 0x3cc   :  { %847 = vadd.xlane.f32.xlu1 %v846_v16  ;;  %v7459_v17 = vpop.f32.mrf.mxu1 }
 0x3cd   :  { %v835_v19 = vmul.f32 %v7459_v17, %v7459_v17  ;;  %v817_v24 = vsel %vm301_vm5, %v7459_v17, 0.0 }
 0x3ce   :  { %815 = vadd.xlane.f32.xlu0 %v814_v18  ;;  %v786_v20 = vpop.f32.mrf.mxu1 }
 0x3cf   :  { %v849_v21 = vsel %vm301_vm5, %v835_v19, 0.0 }
 0x3d0   :  { %850 = vadd.xlane.f32.xlu1 %v849_v21  ;;  %v7466_v22 = vpop.f32.mrf.mxu1 }
 0x3d1   :  { %v836_v54 = vmul.f32 %v7466_v22, %v7466_v22  ;;  %v820_v33 = vsel %vm301_vm5, %v7466_v22, 0.0 }
 0x3d2   :  { %818 = vadd.xlane.f32.xlu0 %v817_v24  ;;  %v791_v61 = vpop.f32.mrf.mxu1 }
 0x3d3   :  { %v852_v49 = vsel %vm301_vm5, %v836_v54, 0.0 }
 0x3d4   :  { %853 = vadd.xlane.f32.xlu1 %v852_v49  ;;  %v7473_v43 = vpop.f32.mrf.mxu1 }
 0x3d5   :  { %v837_v46 = vmul.f32 %v7473_v43, %v7473_v43  ;;  %v823_v37 = vsel %vm301_vm5, %v7473_v43, 0.0 }
 0x3d6   :  { %821 = vadd.xlane.f32.xlu0 %v820_v33  ;;  %v796_v3 = vpop.f32.mrf.mxu1 }
 0x3d7   :  { %v855_v15 = vsel %vm301_vm5, %v837_v46, 0.0 }
 0x3d8   :  { %856 = vadd.xlane.f32.xlu1 %v855_v15  ;;  %v7480_v36 = vpop.f32.mrf.mxu1 }
 0x3d9   :  { %v826_v40 = vsel %vm301_vm5, %v7480_v36, 0.0  ;;  %v838_v45 = vmul.f32 %v7480_v36, %v7480_v36 }
 0x3da   :  { %824 = vadd.xlane.f32.xlu0 %v823_v37  ;;  %v801_v41 = vpop.f32.mrf.mxu1 }
 0x3db   :  { %v858_v53 = vsel %vm301_vm5, %v838_v45, 0.0 }
 0x3dc   :  { %827 = vadd.xlane.f32.xlu1 %v826_v40  ;;  %v7488_v47 = vpop.f32.mrf.mxu1 }
 0x3dd   :  { %v829_v50 = vsel %vm301_vm5, %v7488_v47, 0.0  ;;  %v839_v51 = vmul.f32 %v7488_v47, %v7488_v47 }
 0x3de   :  { %830 = vadd.xlane.f32.xlu0 %v829_v50  ;;  %v806_v52 = vpop.f32.mrf.mxu1 }
 0x3df   :  { %v861_v55 = vsel %vm301_vm5, %v839_v51, 0.0 }
 0x3e0   :  { %859 = vadd.xlane.f32.xlu1 %v858_v53 }
 0x3e2   :  { %862 = vadd.xlane.f32.xlu0 %v861_v55 }
 0x3f1   :  { %940 = vperm.xlu1 %6686, %v544_v26  }
 0x3f5   :  { %935 = vperm.xlu1 %6686, %v543_v56  }
 0x3f8   :  { %998 = vperm.xlu0 %6687, %v554_v57  }
 0x3f9   :  { %930 = vperm.xlu1 %6686, %v542_v27  }
 0x3fc   :  { %993 = vperm.xlu0 %6687, %v553_v59  }
 0x3fd   :  { %978 = vperm.xlu1 %6686, %v550_v60  }
 0x400   :  { %988 = vperm.xlu0 %6687, %v552_v42  }
 0x404   :  { %983 = vperm.xlu0 %6687, %v551_v62  }
 0x44b   :  { %v810_v7 = vpop.xlane.xlu0 %809 }
 0x44c   :  { %v7544_v56 = vmul.f32 0.03125, %v810_v7 }
 0x44e   :  { %v880_v7 = vmul.f32 %v7544_v56, %v7544_v56 }
 0x44f   :  { %v842_v10 = vpop.xlane.xlu0 %841 }
 0x451   :  { %v845_v38 = vpop.xlane.xlu1 %844 }
 0x453   :  { %v813_v32 = vpop.xlane.xlu0 %812 }
 0x454   :  { %v7546_v42 = vmul.f32 0.03125, %v813_v32 }
 0x455   :  { %v848_v13 = vpop.xlane.xlu1 %847 }
 0x456   :  { %v874_v51 = vmul.f32 0.03125, %v848_v13 }
 0x457   :  { %v816_v14 = vpop.xlane.xlu0 %815 }
 0x458   :  { %v7536_v24 = vmul.f32 0.03125, %v816_v14 }
 0x459   :  { %v851_v16 = vpop.xlane.xlu1 %850 }
 0x45a   :  { %v882_v37 = vmul.f32 %v7536_v24, %v7536_v24  ;;  %v875_v27 = vmul.f32 0.03125, %v851_v16  ;;  %v881_v16 = vmul.f32 %v7546_v42, %v7546_v42 }
 0x45b   :  { %v819_v18 = vpop.xlane.xlu0 %818 }
 0x45c   :  { %v7538_v33 = vmul.f32 0.03125, %v819_v18  ;;  %v890_v57 = vsub.f32 %v874_v51, %v882_v37 }
 0x45d   :  { %v854_v19 = vpop.xlane.xlu1 %853 }
 0x45e   :  { %v876_v61 = vmul.f32 0.03125, %v854_v19  ;;  %v883_v52 = vmul.f32 %v7538_v33, %v7538_v33  ;;  %v872_v19 = vmul.f32 0.03125, %v842_v10 }
 0x45f   :  { %v822_v20 = vpop.xlane.xlu0 %821 }
 0x460   :  { %v868_v21 = vmul.f32 0.03125, %v822_v20  ;;  %v891_v20 = vsub.f32 %v875_v27, %v883_v52  ;;  %v888_v37 = vsub.f32 %v872_v19, %v880_v7  ;;  %v898_v7 = vsub.f32 %v7452_v28, %v7536_v24 }
 0x461   :  { %v857_v54 = vpop.xlane.xlu1 %856 }
 0x462   :  { %v884_v49 = vmul.f32 %v868_v21, %v868_v21  ;;  %v877_v40 = vmul.f32 0.03125, %v857_v54  ;;  %v904_v51 = vadd.f32 1e-05, %v888_v37  ;;  %v896_v37 = vsub.f32 %v7440_v1, %v7544_v56 }
 0x463   :  { %v825_v46 = vpop.xlane.xlu0 %824 }
 0x464   :  { %v892_v3 = vsub.f32 %v876_v61, %v884_v49  ;;  %v869_v15 = vmul.f32 0.03125, %v825_v46  ;;  %v906_v46 = vadd.f32 1e-05, %v890_v57  ;;  %v900_v57 = vsub.f32 %v7466_v22, %v868_v21 }
 0x465   :  { %v828_v41 = vpop.xlane.xlu1 %827 }
 0x466   :  { %v885_v45 = vmul.f32 %v869_v15, %v869_v15  ;;  %v870_v50 = vmul.f32 0.03125, %v828_v41  ;;  %v908_v55 = vadd.f32 1e-05, %v892_v3  ;;  %v873_v41 = vmul.f32 0.03125, %v845_v38 }
 0x467   :  { %v831_v53 = vpop.xlane.xlu0 %830 }
 0x468   :  { %v893_v26 = vsub.f32 %v877_v40, %v885_v45  ;;  %v871_v59 = vmul.f32 0.03125, %v831_v53  ;;  %v886_v14 = vmul.f32 %v870_v50, %v870_v50  ;;  %6704 = vrsqrt.f32 %v908_v55 }
 0x469   :  { %v860_v60 = vpop.xlane.xlu1 %859  ;;  %v907_v40 = vadd.f32 1e-05, %v891_v20  ;;  %v889_v45 = vsub.f32 %v873_v41, %v881_v16  ;;  %v902_v38 = vsub.f32 %v7480_v36, %v870_v50  ;;  %v899_v36 = vsub.f32 %v7459_v17, %v7538_v33 }
 0x46a   :  { %v909_v62 = vadd.f32 1e-05, %v893_v26  ;;  %v878_v18 = vmul.f32 0.03125, %v860_v60  ;;  %v887_v54 = vmul.f32 %v871_v59, %v871_v59  ;;  %v901_v60 = vsub.f32 %v7473_v43, %v869_v15 }
 0x46b   :  { %v863_v13 = vpop.xlane.xlu0 %862  ;;  %v905_v52 = vadd.f32 1e-05, %v889_v45 }
 0x46c   :  { %v894_v61 = vsub.f32 %v878_v18, %v886_v14  ;;  %v879_v49 = vmul.f32 0.03125, %v863_v13  ;;  %6706 = vrsqrt.f32 %v909_v62  ;;  %v903_v13 = vsub.f32 %v7488_v47, %v871_v59 }
 0x46d   :  { %v941_v53 = vpop.permute.xlu1 %940 }
 0x46e   :  { %v910_v32 = vadd.f32 1e-05, %v894_v61  ;;  %v895_v3 = vsub.f32 %v879_v49, %v887_v54 }
 0x470   :  { %6708 = vrsqrt.f32 %v910_v32  ;;  %v911_v10 = vadd.f32 1e-05, %v895_v3 }
 0x471   :  { %6710 = vrsqrt.f32 %v906_v46  ;;  %v936_v18 = vpop.permute.xlu1 %935 }
 0x472   :  { %6712 = vrsqrt.f32 %v911_v10 }
 0x473   :  { %6714 = vrsqrt.f32 %v907_v40  ;;  %v999_v26 = vpop.permute.xlu0 %998 }
 0x474   :  { %6716 = vrsqrt.f32 %v904_v51 }
 0x475   :  { %v6705_v55 = vpop.eup %6704  ;;  %6718 = vrsqrt.f32 %v905_v52  ;;  %v931_v16 = vpop.permute.xlu1 %930 }
 0x476   :  { %v924_v62 = vmul.f32 %v6705_v55, %v900_v57 }
 0x477   :  { %v994_v49 = vpop.permute.xlu0 %993 }
 0x478   :  { %v972_v22 = vmul.f32 %v7532_v6, %v924_v62  ;;  %v589_v62 = vld [vmem:[%s11103_s5 + $0x38] sm:$0xff] }
 0x479   :  { %v6707_v27 = vpop.eup %6706  ;;  %v979_v45 = vpop.permute.xlu1 %978 }
 0x47a   :  { %v925_v20 = vmul.f32 %v6707_v27, %v901_v60  ;;  %v1020_v32 = vadd.f32 %v999_v26, %v972_v22  ;;  %v559_v27 = vld [vmem:[%s11101_s30 + $0x8] sm:$0xff]  ;;  %v581_v60 = vld [vmem:[%s11102_s29 + $0x38] sm:$0xff] }
 0x47b   :  { %5905 = vmatprep.mubr.msk.f32.mxu0 %vm678_vm6, %v559_v27 }
 0x47c   :  { %v973_v59 = vmul.f32 %v7528_v5, %v925_v20  ;;  %v897_v5 = vsub.f32 %v7446_v31, %v7546_v42  ;;  %v1028_v33 = vmax.f32 %v1020_v32, 0.0  ;;  %v578_v20 = vld [vmem:[%s11102_s29 + $0x20] sm:$0xff] }
 0x47d   :  { %v6709_v14 = vpop.eup %6708 }
 0x47e   :  { %v6711_v19 = vpop.eup %6710  ;;  %v926_v54 = vmul.f32 %v6709_v14, %v902_v38  ;;  %v580_v38 = vld [vmem:[%s11102_s29 + $0x30] sm:$0xff] }
 0x47f   :  { %v6713_v61 = vpop.eup %6712  ;;  %v922_v50 = vmul.f32 %v6711_v19, %v898_v7  ;;  %v588_v14 = vld [vmem:[%s11103_s5 + $0x30] sm:$0xff]  ;;  %v587_v19 = vld [vmem:[%s11103_s5 + $0x28] sm:$0xff] }
 0x480   :  { %v974_v21 = vmul.f32 %v7522_v34, %v926_v54  ;;  %v927_v43 = vmul.f32 %v6713_v61, %v903_v13  ;;  %v6715_v15 = vpop.eup %6714  ;;  %v989_v34 = vpop.permute.xlu0 %988  ;;  %v577_v13 = vld [vmem:[%s11102_s29 + $0x18] sm:$0xff] }
 0x481   :  { %v923_v3 = vmul.f32 %v6715_v15, %v899_v36  ;;  %v6717_v24 = vpop.eup %6716  ;;  %v970_v41 = vmul.f32 %v941_v53, %v922_v50 }
 0x482   :  { %v1022_v46 = vadd.f32 %v7526_v0, %v974_v21  ;;  %v975_v47 = vmul.f32 %v7520_v63, %v927_v43  ;;  %v1021_v0 = vadd.f32 %v7530_v39, %v973_v59  ;;  %v6719_v63 = vpop.eup %6718  ;;  %v920_v40 = vmul.f32 %v6717_v24, %v896_v37 }
 0x483   :  { %v971_v10 = vmul.f32 %v7534_v9, %v923_v3  ;;  %v921_v1 = vmul.f32 %v6719_v63, %v897_v5 }
 0x484   :  { %v1030_v28 = vmax.f32 %v1022_v46, 0.0  ;;  %v1023_v6 = vadd.f32 %v7524_v35, %v975_v47  ;;  %v1018_v35 = vadd.f32 %v989_v34, %v970_v41  ;;  %v968_v56 = vmul.f32 %v931_v16, %v920_v40  ;;  %v984_v52 = vpop.permute.xlu0 %983 }
 0x485   :  { %v1019_v51 = vadd.f32 %v994_v49, %v971_v10  ;;  %v1029_v39 = vmax.f32 %v1021_v0, 0.0  ;;  %v969_v31 = vmul.f32 %v936_v18, %v921_v1  ;;  %v579_v18 = vld [vmem:[%s11102_s29 + $0x28] sm:$0xff] }
 0x486   :  { %1052 = vrot.lane.b32.xlu1 %v1030_v28, %s6888_s26  ;;  %v1031_v17 = vmax.f32 %v1023_v6, 0.0  ;;  %v1016_v42 = vadd.f32 %v979_v45, %v968_v56  ;;  %v1026_v9 = vmax.f32 %v1018_v35, 0.0 }
 0x487   :  { %v1027_v53 = vmax.f32 %v1019_v51, 0.0  ;;  %v1017_v55 = vadd.f32 %v984_v52, %v969_v31 }
 0x488   :  { %1054 = vrot.lane.b32.xlu0 %v1031_v17, %s6888_s26  ;;  %1145 = vmatpush1.msra.mxu0 %v1031_v17  ;;  %v1024_v26 = vmax.f32 %v1016_v42, 0.0 }
 0x489   :  { %1146 = vmatprep.subr.mxu0 %v11010_v4  ;;  %v1025_v57 = vmax.f32 %v1017_v55, 0.0 }
 0x48a   :  { %1048 = vrot.lane.b32.xlu1 %v1028_v33, %s6888_s26  ;;  %1147 = vmatpush1.msra.mxu0 %v1030_v28 }
 0x48b   :  { %1148 = vmatprep.subr.mxu0 %v11010_v4 }
 0x48c   :  { %1050 = vrot.lane.b32.xlu0 %v1029_v39, %s6888_s26  ;;  %1149 = vmatpush1.msra.mxu0 %v1029_v39 }
 0x48d   :  { %1150 = vmatprep.subr.mxu0 %v11010_v4 }
 0x48e   :  { %1151 = vmatpush1.msra.mxu0 %v1028_v33  ;;  %1044 = vrot.lane.b32.xlu1 %v1026_v9, %s6888_s26 }
 0x48f   :  { %1152 = vmatprep.subr.mxu0 %v11010_v4 }
 0x490   :  { %1046 = vrot.lane.b32.xlu0 %v1027_v53, %s6888_s26  ;;  %1153 = vmatpush1.msra.mxu0 %v1027_v53 }
 0x491   :  { %1154 = vmatprep.subr.mxu0 %v11010_v4 }
 0x492   :  { %1155 = vmatpush1.msra.mxu0 %v1026_v9  ;;  %1040 = vrot.lane.b32.xlu1 %v1024_v26, %s6888_s26 }
 0x493   :  { %1156 = vmatprep.subr.mxu0 %v11010_v4 }
 0x494   :  { %1042 = vrot.lane.b32.xlu0 %v1025_v57, %s6888_s26  ;;  %1157 = vmatpush1.msra.mxu0 %v1025_v57 }
 0x495   :  { %1158 = vmatprep.subr.mxu0 %v11010_v4 }
 0x496   :  { %1092 = vrot.lane.b32.xlu1 %v1030_v28, %s6886_s0  ;;  %1159 = vmatpush1.msra.mxu0 %v1024_v26 }
 0x497   :  { %1160 = vmatprep.subr.mxu0 %v11010_v4 }
 0x498   :  { %1094 = vrot.lane.b32.xlu0 %v1031_v17, %s6886_s0 }
 0x49a   :  { %1088 = vrot.lane.b32.xlu1 %v1028_v33, %s6886_s0 }
 0x49c   :  { %1090 = vrot.lane.b32.xlu0 %v1029_v39, %s6886_s0 }
 0x49e   :  { %1084 = vrot.lane.b32.xlu1 %v1026_v9, %s6886_s0 }
 0x4a0   :  { %1086 = vrot.lane.b32.xlu0 %v1027_v53, %s6886_s0 }
 0x4a2   :  { %1080 = vrot.lane.b32.xlu1 %v1024_v26, %s6886_s0 }
 0x4a4   :  { %1082 = vrot.lane.b32.xlu0 %v1025_v57, %s6886_s0 }
 0x4a6   :  { %1406 = vperm.xlu1 %6686, %v581_v60  }
 0x4a8   :  { %1401 = vperm.xlu0 %6687, %v580_v38  }
 0x4aa   :  { %1454 = vperm.xlu1 %6686, %v589_v62  }
 0x4ac   :  { %1449 = vperm.xlu0 %6687, %v588_v14  }
 0x4ae   :  { %1396 = vperm.xlu1 %6686, %v579_v18   ;;  %v558_v18 = vld [vmem:[%s11101_s30] sm:$0xff] }
 0x4b0   :  { %1444 = vperm.xlu0 %6687, %v587_v19   ;;  %v561_v19 = vld [vmem:[%s11101_s30 + $0x18] sm:$0xff] }
 0x4b2   :  { %1391 = vperm.xlu1 %6686, %v578_v20   ;;  %v560_v20 = vld [vmem:[%s11101_s30 + $0x10] sm:$0xff] }
 0x4b6   :  { %1386 = vperm.xlu1 %6686, %v577_v13   ;;  %v563_v13 = vld [vmem:[%s11101_s30 + $0x28] sm:$0xff] }
 0x4f8   :  { %v1053_v54 = vpop.permute.xlu1 %1052 }
 0x4f9   :  { %v1070_v49 = vsel %vm132_vm3, 0.0, %v1053_v54  ;;  %v562_v54 = vld [vmem:[%s11101_s30 + $0x20] sm:$0xff] }
 0x4fa   :  { %v1055_v61 = vpop.permute.xlu0 %1054  ;;  %v1078_v43 = vmul.f32 %v7069_v23, %v1070_v49  ;;  %v564_v49 = vld [vmem:[%s11101_s30 + $0x30] sm:$0xff] }
 0x4fb   :  { %v1071_v7 = vsel %vm132_vm3, 0.0, %v1055_v61  ;;  %v565_v61 = vld [vmem:[%s11101_s30 + $0x38] sm:$0xff] }
 0x4fc   :  { %v1079_v22 = vmul.f32 %v7069_v23, %v1071_v7  ;;  %v1049_v21 = vpop.permute.xlu1 %1048  ;;  %v567_v7 = vld [vmem:[%s11101_s30 + $0x48] sm:$0xff] }
 0x4fd   :  { %v1068_v36 = vsel %vm132_vm3, 0.0, %v1049_v21  ;;  %v569_v21 = vld [vmem:[%s11101_s30 + $0x58] sm:$0xff] }
 0x4fe   :  { %v1051_v15 = vpop.permute.xlu0 %1050  ;;  %1161 = vmatpush1.msra.mxu0 %v1079_v22  ;;  %v1076_v59 = vmul.f32 %v7069_v23, %v1068_v36  ;;  %v566_v22 = vld [vmem:[%s11101_s30 + $0x40] sm:$0xff] }
 0x4ff   :  { %v1069_v50 = vsel %vm132_vm3, 0.0, %v1051_v15  ;;  %1162 = vmatprep.subr.mxu0 %v11010_v4  ;;  %v571_v15 = vld [vmem:[%s11101_s30 + $0x68] sm:$0xff]  ;;  %v570_v36 = vld [vmem:[%s11101_s30 + $0x60] sm:$0xff] }
 0x500   :  { %v1077_v46 = vmul.f32 %v7069_v23, %v1069_v50  ;;  %1163 = vmatpush1.msra.mxu0 %v1078_v43  ;;  %v1045_v47 = vpop.permute.xlu1 %1044  ;;  %v568_v43 = vld [vmem:[%s11101_s30 + $0x50] sm:$0xff]  ;;  %v573_v50 = vld [vmem:[%s11101_s30 + $0x78] sm:$0xff] }
 0x501   :  { %1164 = vmatprep.subr.mxu0 %v11010_v4  ;;  %v1066_v32 = vsel %vm132_vm3, 0.0, %v1045_v47 }
 0x502   :  { %v1047_v16 = vpop.permute.xlu0 %1046  ;;  %1165 = vmatpush1.msra.mxu0 %v1077_v46  ;;  %v1074_v24 = vmul.f32 %v7069_v23, %v1066_v32  ;;  %v572_v46 = vld [vmem:[%s11101_s30 + $0x70] sm:$0xff] }
 0x503   :  { %v1067_v3 = vsel %vm132_vm3, 0.0, %v1047_v16  ;;  %1166 = vmatprep.subr.mxu0 %v11010_v4 }
 0x504   :  { %v1075_v28 = vmul.f32 %v7069_v23, %v1067_v3  ;;  %1167 = vmatpush1.msra.mxu0 %v1076_v59  ;;  %v1041_v6 = vpop.permute.xlu1 %1040 }
 0x505   :  { %1168 = vmatprep.subr.mxu0 %v11010_v4  ;;  %v1064_v37 = vsel %vm132_vm3, 0.0, %v1041_v6 }
 0x506   :  { %v1043_v34 = vpop.permute.xlu0 %1042  ;;  %1169 = vmatpush1.msra.mxu0 %v1075_v28  ;;  %v1072_v63 = vmul.f32 %v7069_v23, %v1064_v37 }
 0x507   :  { %v1065_v41 = vsel %vm132_vm3, 0.0, %v1043_v34  ;;  %1170 = vmatprep.subr.mxu0 %v11010_v4 }
 0x508   :  { %v1073_v17 = vmul.f32 %v7069_v23, %v1065_v41  ;;  %1171 = vmatpush1.msra.mxu0 %v1074_v24  ;;  %v1093_v0 = vpop.permute.xlu1 %1092 }
 0x509   :  { %1172 = vmatprep.subr.mxu0 %v11010_v4  ;;  %v1110_v33 = vsel %vm148_vm2, %v1093_v0, 0.0 }
 0x50a   :  { %v1095_v5 = vpop.permute.xlu0 %1094  ;;  %1173 = vmatpush1.msra.mxu0 %v1073_v17  ;;  %v1118_v45 = vmul.f32 %v7060_v11, %v1110_v33 }
 0x50b   :  { %v1111_v40 = vsel %vm148_vm2, %v1095_v5, 0.0  ;;  %1174 = vmatprep.subr.mxu0 %v11010_v4 }
 0x50c   :  { %v1119_v10 = vmul.f32 %v7060_v11, %v1111_v40  ;;  %1175 = vmatpush1.msra.mxu0 %v1072_v63  ;;  %v1089_v35 = vpop.permute.xlu1 %1088 }
 0x50d   :  { %1192 = vmatprep.subr.mxu0 %v11010_v4  ;;  %v1108_v56 = vsel %vm148_vm2, %v1089_v35, 0.0 }
 0x50e   :  { %v1091_v1 = vpop.permute.xlu0 %1090  ;;  %1193 = vmatpush2.msra.mxu0 %v1119_v10  ;;  %v1116_v31 = vmul.f32 %v7060_v11, %v1108_v56 }
 0x50f   :  { %v1109_v51 = vsel %vm148_vm2, %v1091_v1, 0.0  ;;  %1194 = vmatprep.subr.mxu0 %v11010_v4 }
 0x510   :  { %v1117_v39 = vmul.f32 %v7060_v11, %v1109_v51  ;;  %1195 = vmatpush2.msra.mxu0 %v1118_v45  ;;  %v1085_v52 = vpop.permute.xlu1 %1084 }
 0x511   :  { %1196 = vmatprep.subr.mxu0 %v11010_v4  ;;  %v1106_v9 = vsel %vm148_vm2, %v1085_v52, 0.0 }
 0x512   :  { %v1087_v42 = vpop.permute.xlu0 %1086  ;;  %1197 = vmatpush2.msra.mxu0 %v1117_v39  ;;  %v1114_v57 = vmul.f32 %v7060_v11, %v1106_v9 }
 0x513   :  { %v1107_v53 = vsel %vm148_vm2, %v1087_v42, 0.0  ;;  %1198 = vmatprep.subr.mxu0 %v11010_v4 }
 0x514   :  { %v1115_v55 = vmul.f32 %v7060_v11, %v1107_v53  ;;  %1199 = vmatpush2.msra.mxu0 %v1116_v31  ;;  %v1081_v26 = vpop.permute.xlu1 %1080 }
 0x515   :  { %1200 = vmatprep.subr.mxu0 %v11010_v4  ;;  %v1104_v60 = vsel %vm148_vm2, %v1081_v26, 0.0 }
 0x516   :  { %v1083_v27 = vpop.permute.xlu0 %1082  ;;  %1201 = vmatpush2.msra.mxu0 %v1115_v55  ;;  %v1112_v14 = vmul.f32 %v7060_v11, %v1104_v60 }
 0x517   :  { %v1105_v38 = vsel %vm148_vm2, %v1083_v27, 0.0  ;;  %1202 = vmatprep.subr.mxu0 %v11010_v4 }
 0x518   :  { %v1113_v62 = vmul.f32 %v7060_v11, %v1105_v38  ;;  %1203 = vmatpush2.msra.mxu0 %v1114_v57 }
 0x519   :  { %1204 = vmatprep.subr.mxu0 %v11010_v4 }
 0x51a   :  { %1205 = vmatpush2.msra.mxu0 %v1113_v62 }
 0x51b   :  { %1206 = vmatprep.subr.mxu0 %v11010_v4 }
 0x51c   :  { %1207 = vmatpush2.msra.mxu0 %v1112_v14 }
 0x51d   :  { %1209 = vmatmul.mubr.f32.vlgmr.msra.gmra.mxu0 %v558_v18 }
 0x51e   :  { %5906 = vmatprep.mubr.msk.f32.mxu0 %vm678_vm6, %v561_v19 }
 0x521   :  { %1214 = vmatmul.mubr.f32.gmra.mxu0 %v560_v20 }
 0x522   :  { %5907 = vmatprep.mubr.msk.f32.mxu0 %vm678_vm6, %v563_v13  ;;  %v576_v13 = vld [vmem:[%s11102_s29 + $0x10] sm:$0xff] }
 0x525   :  { %1219 = vmatmul.mubr.f32.gmra.mxu0 %v562_v54  ;;  %v575_v54 = vld [vmem:[%s11102_s29 + $0x8] sm:$0xff] }
 0x526   :  { %5908 = vmatprep.mubr.msk.f32.mxu0 %vm678_vm6, %v565_v61  ;;  %v586_v61 = vld [vmem:[%s11103_s5 + $0x20] sm:$0xff] }
 0x529   :  { %1224 = vmatmul.mubr.f32.gmra.mxu0 %v564_v49  ;;  %v574_v49 = vld [vmem:[%s11102_s29] sm:$0xff] }
 0x52a   :  { %5909 = vmatprep.mubr.msk.f32.mxu0 %vm678_vm6, %v567_v7  ;;  %v585_v7 = vld [vmem:[%s11103_s5 + $0x18] sm:$0xff] }
 0x52d   :  { %1229 = vmatmul.mubr.f32.gmra.mxu0 %v566_v22  ;;  %v582_v22 = vld [vmem:[%s11103_s5] sm:$0xff] }
 0x52e   :  { %5910 = vmatprep.mubr.msk.f32.mxu0 %vm678_vm6, %v569_v21  ;;  %v584_v21 = vld [vmem:[%s11103_s5 + $0x10] sm:$0xff] }
 0x531   :  { %1234 = vmatmul.mubr.f32.gmra.mxu0 %v568_v43  ;;  %v583_v43 = vld [vmem:[%s11103_s5 + $0x8] sm:$0xff] }
 0x532   :  { %5911 = vmatprep.mubr.msk.f32.mxu0 %vm678_vm6, %v571_v15  ;;  %v7803_v15 = vpop.permute.xlu1 %1406 }
 0x535   :  { %1239 = vmatmul.mubr.f32.gmra.mxu0 %v570_v36  ;;  %v7805_v36 = vpop.permute.xlu0 %1401 }
 0x536   :  { %5912 = vmatprep.mubr.msk.f32.mxu0 %vm678_vm6, %v573_v50  ;;  %v7807_v50 = vpop.permute.xlu1 %1454 }
 0x539   :  { %1244 = vmatmul.mubr.f32.gmra.mxu0 %v572_v46  ;;  %v7809_v46 = vpop.permute.xlu0 %1449 }
 0x5dd   :  { %v7723_v47 = vpop.f32.mrf.mxu0 }
 0x5de   :  { %v1273_v59 = vmul.f32 %v7723_v47, %v7723_v47  ;;  %v1249_v16 = vsel %vm301_vm5, %v7723_v47, 0.0 }
 0x5df   :  { %1250 = vadd.xlane.f32.xlu0 %v1249_v16  ;;  %v1212_v32 = vpop.f32.mrf.mxu0  ;;  %v7813_v16 = vpop.permute.xlu0 %1444 }
 0x5e0   :  { %v1281_v6 = vsel %vm301_vm5, %v1273_v59, 0.0  ;;  %v7811_v59 = vpop.permute.xlu1 %1396 }
 0x5e1   :  { %v7729_v3 = vpop.f32.mrf.mxu0 }
 0x5e2   :  { %v1274_v28 = vmul.f32 %v7729_v3, %v7729_v3  ;;  %v1252_v17 = vsel %vm301_vm5, %v7729_v3, 0.0 }
 0x5e3   :  { %1282 = vadd.xlane.f32.xlu0 %v1281_v6  ;;  %v1217_v24 = vpop.f32.mrf.mxu0 }
 0x5e4   :  { %v1284_v34 = vsel %vm301_vm5, %v1274_v28, 0.0  ;;  %v7815_v32 = vpop.permute.xlu1 %1391 }
 0x5e5   :  { %1285 = vadd.xlane.f32.xlu1 %v1284_v34  ;;  %v7735_v37 = vpop.f32.mrf.mxu0 }
 0x5e6   :  { %v1275_v41 = vmul.f32 %v7735_v37, %v7735_v37  ;;  %v1255_v40 = vsel %vm301_vm5, %v7735_v37, 0.0 }
 0x5e7   :  { %1253 = vadd.xlane.f32.xlu0 %v1252_v17  ;;  %v1222_v0 = vpop.f32.mrf.mxu0 }
 0x5e8   :  { %v1287_v63 = vsel %vm301_vm5, %v1275_v41, 0.0  ;;  %v7817_v6 = vpop.permute.xlu1 %1386 }
 0x5e9   :  { %1288 = vadd.xlane.f32.xlu1 %v1287_v63  ;;  %v7742_v5 = vpop.f32.mrf.mxu0 }
 0x5ea   :  { %v1276_v33 = vmul.f32 %v7742_v5, %v7742_v5  ;;  %v1258_v56 = vsel %vm301_vm5, %v7742_v5, 0.0 }
 0x5eb   :  { %1256 = vadd.xlane.f32.xlu0 %v1255_v40  ;;  %v1227_v10 = vpop.f32.mrf.mxu0 }
 0x5ec   :  { %v1290_v35 = vsel %vm301_vm5, %v1276_v33, 0.0 }
 0x5ed   :  { %1291 = vadd.xlane.f32.xlu1 %v1290_v35  ;;  %v7749_v45 = vpop.f32.mrf.mxu0 }
 0x5ee   :  { %v1277_v1 = vmul.f32 %v7749_v45, %v7749_v45  ;;  %v1261_v42 = vsel %vm301_vm5, %v7749_v45, 0.0 }
 0x5ef   :  { %1259 = vadd.xlane.f32.xlu0 %v1258_v56  ;;  %v1232_v51 = vpop.f32.mrf.mxu0 }
 0x5f0   :  { %v1293_v39 = vsel %vm301_vm5, %v1277_v1, 0.0 }
 0x5f1   :  { %1294 = vadd.xlane.f32.xlu1 %v1293_v39  ;;  %v7756_v52 = vpop.f32.mrf.mxu0 }
 0x5f2   :  { %v1278_v31 = vmul.f32 %v7756_v52, %v7756_v52  ;;  %v1264_v26 = vsel %vm301_vm5, %v7756_v52, 0.0 }
 0x5f3   :  { %1262 = vadd.xlane.f32.xlu0 %v1261_v42  ;;  %v1237_v9 = vpop.f32.mrf.mxu0 }
 0x5f4   :  { %v1296_v53 = vsel %vm301_vm5, %v1278_v31, 0.0 }
 0x5f5   :  { %1297 = vadd.xlane.f32.xlu1 %v1296_v53  ;;  %v7763_v55 = vpop.f32.mrf.mxu0 }
 0x5f6   :  { %v1279_v27 = vmul.f32 %v7763_v55, %v7763_v55  ;;  %v1267_v60 = vsel %vm301_vm5, %v7763_v55, 0.0 }
 0x5f7   :  { %1265 = vadd.xlane.f32.xlu0 %v1264_v26  ;;  %v1242_v57 = vpop.f32.mrf.mxu0 }
 0x5f8   :  { %v1299_v19 = vsel %vm301_vm5, %v1279_v27, 0.0 }
 0x5f9   :  { %1268 = vadd.xlane.f32.xlu1 %v1267_v60  ;;  %v7771_v38 = vpop.f32.mrf.mxu0 }
 0x5fa   :  { %v1280_v62 = vmul.f32 %v7771_v38, %v7771_v38  ;;  %v1270_v14 = vsel %vm301_vm5, %v7771_v38, 0.0 }
 0x5fb   :  { %1271 = vadd.xlane.f32.xlu0 %v1270_v14  ;;  %v1247_v18 = vpop.f32.mrf.mxu0 }
 0x5fc   :  { %v1302_v20 = vsel %vm301_vm5, %v1280_v62, 0.0 }
 0x5fd   :  { %1300 = vadd.xlane.f32.xlu1 %v1299_v19 }
 0x5ff   :  { %1303 = vadd.xlane.f32.xlu0 %v1302_v20 }
 0x60e   :  { %1381 = vperm.xlu1 %6686, %v576_v13  }
 0x612   :  { %1376 = vperm.xlu1 %6686, %v575_v54  }
 0x615   :  { %1439 = vperm.xlu0 %6687, %v586_v61  }
 0x616   :  { %1371 = vperm.xlu1 %6686, %v574_v49  }
 0x619   :  { %1434 = vperm.xlu0 %6687, %v585_v7  }
 0x61a   :  { %1419 = vperm.xlu1 %6686, %v582_v22  }
 0x61d   :  { %1429 = vperm.xlu0 %6687, %v584_v21  }
 0x621   :  { %1424 = vperm.xlu0 %6687, %v583_v43  }
 0x668   :  { %v1251_v28 = vpop.xlane.xlu0 %1250 }
 0x669   :  { %v7827_v20 = vmul.f32 0.03125, %v1251_v28 }
 0x66c   :  { %v1283_v24 = vpop.xlane.xlu0 %1282 }
 0x66d   :  { %v1313_v22 = vmul.f32 0.03125, %v1283_v24 }
 0x66e   :  { %v1286_v34 = vpop.xlane.xlu1 %1285 }
 0x670   :  { %v1254_v41 = vpop.xlane.xlu0 %1253 }
 0x671   :  { %v7829_v13 = vmul.f32 0.03125, %v1254_v41 }
 0x672   :  { %v1289_v17 = vpop.xlane.xlu1 %1288 }
 0x673   :  { %v1315_v57 = vmul.f32 0.03125, %v1289_v17  ;;  %v1322_v28 = vmul.f32 %v7829_v13, %v7829_v13 }
 0x674   :  { %v1257_v0 = vpop.xlane.xlu0 %1256 }
 0x675   :  { %v7819_v10 = vmul.f32 0.03125, %v1257_v0 }
 0x676   :  { %v1292_v63 = vpop.xlane.xlu1 %1291 }
 0x677   :  { %v1323_v42 = vmul.f32 %v7819_v10, %v7819_v10  ;;  %v1316_v61 = vmul.f32 0.03125, %v1292_v63 }
 0x678   :  { %v1260_v33 = vpop.xlane.xlu0 %1259 }
 0x679   :  { %v7821_v56 = vmul.f32 0.03125, %v1260_v33  ;;  %v1331_v54 = vsub.f32 %v1315_v57, %v1323_v42  ;;  %v1314_v42 = vmul.f32 0.03125, %v1286_v34 }
 0x67a   :  { %v1295_v40 = vpop.xlane.xlu1 %1294 }
 0x67b   :  { %v1317_v39 = vmul.f32 0.03125, %v1295_v40  ;;  %v1324_v27 = vmul.f32 %v7821_v56, %v7821_v56  ;;  %v1347_v41 = vadd.f32 1e-05, %v1331_v54 }
 0x67c   :  { %v1263_v35 = vpop.xlane.xlu0 %1262 }
 0x67d   :  { %v1309_v1 = vmul.f32 0.03125, %v1263_v35  ;;  %v1332_v21 = vsub.f32 %v1316_v61, %v1324_v27  ;;  %v1321_v35 = vmul.f32 %v7827_v20, %v7827_v20  ;;  %v1330_v27 = vsub.f32 %v1314_v42, %v1322_v28 }
 0x67e   :  { %v1298_v51 = vpop.xlane.xlu1 %1297 }
 0x67f   :  { %v1325_v31 = vmul.f32 %v1309_v1, %v1309_v1  ;;  %v1318_v14 = vmul.f32 0.03125, %v1298_v51  ;;  %v1329_v24 = vsub.f32 %v1313_v22, %v1321_v35 }
 0x680   :  { %v1266_v9 = vpop.xlane.xlu0 %1265 }
 0x681   :  { %v1333_v53 = vsub.f32 %v1317_v39, %v1325_v31  ;;  %v1310_v26 = vmul.f32 0.03125, %v1266_v9  ;;  %v1348_v9 = vadd.f32 1e-05, %v1332_v21 }
 0x682   :  { %v1269_v60 = vpop.xlane.xlu1 %1268 }
 0x683   :  { %v1349_v62 = vadd.f32 1e-05, %v1333_v53  ;;  %v1326_v18 = vmul.f32 %v1310_v26, %v1310_v26  ;;  %v1311_v19 = vmul.f32 0.03125, %v1269_v60  ;;  %v1342_v34 = vsub.f32 %v7756_v52, %v1310_v26 }
 0x684   :  { %v1272_v49 = vpop.xlane.xlu0 %1271  ;;  %v1340_v52 = vsub.f32 %v7742_v5, %v7821_v56 }
 0x685   :  { %v1334_v7 = vsub.f32 %v1318_v14, %v1326_v18  ;;  %v1312_v43 = vmul.f32 0.03125, %v1272_v49  ;;  %6720 = vrsqrt.f32 %v1349_v62  ;;  %v1327_v33 = vmul.f32 %v1311_v19, %v1311_v19 }
 0x686   :  { %v1301_v17 = vpop.xlane.xlu1 %1300  ;;  %v1345_v62 = vadd.f32 1e-05, %v1329_v24  ;;  %v1346_v14 = vadd.f32 1e-05, %v1330_v27  ;;  %v1341_v49 = vsub.f32 %v7749_v45, %v1309_v1 }
 0x687   :  { %v1350_v0 = vadd.f32 1e-05, %v1334_v7  ;;  %v1319_v40 = vmul.f32 0.03125, %v1301_v17  ;;  %v1328_v63 = vmul.f32 %v1312_v43, %v1312_v43 }
 0x688   :  { %v1304_v51 = vpop.xlane.xlu0 %1303 }
 0x689   :  { %6722 = vrsqrt.f32 %v1350_v0  ;;  %v1335_v39 = vsub.f32 %v1319_v40, %v1327_v33  ;;  %v1320_v31 = vmul.f32 0.03125, %v1304_v51  ;;  %v1343_v33 = vsub.f32 %v7763_v55, %v1311_v19 }
 0x68a   :  { %6724 = vrsqrt.f32 %v1347_v41  ;;  %v1382_v18 = vpop.permute.xlu1 %1381  ;;  %v1339_v41 = vsub.f32 %v7735_v37, %v7819_v10  ;;  %v1344_v51 = vsub.f32 %v7771_v38, %v1312_v43 }
 0x68b   :  { %v1351_v53 = vadd.f32 1e-05, %v1335_v39  ;;  %v1336_v57 = vsub.f32 %v1320_v31, %v1328_v63 }
 0x68d   :  { %6726 = vrsqrt.f32 %v1351_v53  ;;  %v1352_v60 = vadd.f32 1e-05, %v1336_v57  ;;  %v1338_v53 = vsub.f32 %v7729_v3, %v7829_v13 }
 0x68e   :  { %6728 = vrsqrt.f32 %v1348_v9  ;;  %v1377_v21 = vpop.permute.xlu1 %1376 }
 0x68f   :  { %6730 = vrsqrt.f32 %v1352_v60 }
 0x690   :  { %6732 = vrsqrt.f32 %v1345_v62  ;;  %v1440_v61 = vpop.permute.xlu0 %1439 }
 0x691   :  { %6734 = vrsqrt.f32 %v1346_v14 }
 0x692   :  { %v6721_v54 = vpop.eup %6720  ;;  %v1372_v31 = vpop.permute.xlu1 %1371 }
 0x693   :  { %v1365_v22 = vmul.f32 %v6721_v54, %v1341_v49 }
 0x694   :  { %v1435_v35 = vpop.permute.xlu0 %1434 }
 0x695   :  { %v1413_v63 = vmul.f32 %v7815_v32, %v1365_v22  ;;  %v1337_v32 = vsub.f32 %v7723_v47, %v7827_v20  ;;  %v1528_v22 = vld [vmem:[%s11113_s11 + $0x78] sm:$0xff] }
 0x696   :  { %v6723_v7 = vpop.eup %6722 }
 0x697   :  { %v6725_v17 = vpop.eup %6724  ;;  %v1366_v0 = vmul.f32 %v6723_v7, %v1342_v34  ;;  %v1461_v9 = vadd.f32 %v1440_v61, %v1413_v63  ;;  %v1527_v34 = vld [vmem:[%s11113_s11 + $0x70] sm:$0xff]  ;;  %v1540_v63 = vld [vmem:[%s10981_s12 + $0x58] sm:$0xff] }
 0x698   :  { %v1363_v39 = vmul.f32 %v6725_v17, %v1339_v41  ;;  %v1430_v10 = vpop.permute.xlu0 %1429  ;;  %v1544_v17 = vld [vmem:[%s10981_s12 + $0x78] sm:$0xff]  ;;  %v1541_v41 = vld [vmem:[%s10981_s12 + $0x60] sm:$0xff] }
 0x699   :  { %v1414_v26 = vmul.f32 %v7811_v59, %v1366_v0  ;;  %v1525_v0 = vld [vmem:[%s11113_s11 + $0x60] sm:$0xff] }
 0x69a   :  { %v6727_v40 = vpop.eup %6726  ;;  %v1411_v59 = vmul.f32 %v1382_v18, %v1363_v39 }
 0x69b   :  { %v6729_v28 = vpop.eup %6728  ;;  %v1367_v45 = vmul.f32 %v6727_v40, %v1343_v33  ;;  %v1462_v5 = vadd.f32 %v7813_v16, %v1414_v26  ;;  %v1420_v16 = vpop.permute.xlu1 %1419  ;;  %v1543_v33 = vld [vmem:[%s10981_s12 + $0x70] sm:$0xff]  ;;  %v1524_v40 = vld [vmem:[%s11113_s11 + $0x58] sm:$0xff]  ;;  %v1538_v26 = vld [vmem:[%s10981_s12 + $0x48] sm:$0xff] }
 0x69c   :  { %v6731_v1 = vpop.eup %6730  ;;  %v1364_v24 = vmul.f32 %v6729_v28, %v1340_v52  ;;  %v1459_v27 = vadd.f32 %v1430_v10, %v1411_v59  ;;  %v1523_v28 = vld [vmem:[%s11113_s11 + $0x50] sm:$0xff]  ;;  %v1520_v52 = vld [vmem:[%s11113_s11 + $0x38] sm:$0xff] }
 0x69d   :  { %v1415_v55 = vmul.f32 %v7805_v36, %v1367_v45  ;;  %v1368_v19 = vmul.f32 %v6731_v1, %v1344_v51  ;;  %v6733_v42 = vpop.eup %6732  ;;  %v1470_v62 = vadd.f32 %v1462_v5, %v7238_v58  ;;  %v1522_v51 = vld [vmem:[%s11113_s11 + $0x48] sm:$0xff]  ;;  %v1521_v45 = vld [vmem:[%s11113_s11 + $0x40] sm:$0xff]  ;;  %v1539_v1 = vld [vmem:[%s10981_s12 + $0x50] sm:$0xff] }
 0x69e   :  { %v6735_v43 = vpop.eup %6734  ;;  %v1361_v57 = vmul.f32 %v6733_v42, %v1337_v32  ;;  %v1467_v18 = vadd.f32 %v1459_v27, %v7294_v44 }
 0x69f   :  { %v1463_v37 = vadd.f32 %v7809_v46, %v1415_v55  ;;  %v1416_v38 = vmul.f32 %v7803_v15, %v1368_v19  ;;  %v1412_v46 = vmul.f32 %v7817_v6, %v1364_v24  ;;  %v1469_v15 = vadd.f32 %v1461_v9, %v7283_v2 }
 0x6a0   :  { %v1362_v20 = vmul.f32 %v6735_v43, %v1338_v53  ;;  %v7876_v54 = vmax.f32 %v1470_v62, 0.0  ;;  %v7880_v61 = vmax.f32 %v1467_v18, 0.0 }
 0x6a1   :  { %v1471_v56 = vadd.f32 %v1463_v37, %v7273_v30  ;;  %v1464_v36 = vadd.f32 %v7807_v50, %v1416_v38  ;;  %v1409_v30 = vmul.f32 %v1372_v31, %v1361_v57  ;;  %v1460_v14 = vadd.f32 %v1435_v35, %v1412_v46  ;;  %v1425_v50 = vpop.permute.xlu0 %1424  ;;  %v1542_v35 = vld [vmem:[%s10981_s12 + $0x68] sm:$0xff] }
 0x6a2   :  { %v1410_v6 = vmul.f32 %v1377_v21, %v1362_v20  ;;  %v7865_v13 = vmax.f32 %v1469_v15, 0.0  ;;  %11107 = vst [vmem:[#allocation11_spill] sm:$0xff] %v7876_v54  ;;  %11108 = vst [vmem:[#allocation12_spill] sm:$0xff] %v7880_v61  ;;  %v1526_v21 = vld [vmem:[%s11113_s11 + $0x68] sm:$0xff] }
 0x6a3   :  { %v7857_v60 = vmax.f32 %v1471_v56, 0.0  ;;  %v1472_v47 = vadd.f32 %v1464_v36, %v7232_v29  ;;  %v1457_v2 = vadd.f32 %v1420_v16, %v1409_v30  ;;  %v1468_v29 = vadd.f32 %v1460_v14, %v7242_v25 }
 0x6a4   :  { %11106 = vst [vmem:[#allocation10_spill] sm:$0xff] %v7865_v13  ;;  %v1458_v58 = vadd.f32 %v1425_v50, %v1410_v6 }
 0x6a5   :  { %11104 = vst [vmem:[#allocation8_spill] sm:$0xff] %v7857_v60  ;;  %1677 = vrot.lane.b32.xlu1 %v7857_v60, %s6888_s26  ;;  %v7863_v3 = vmax.f32 %v1472_v47, 0.0  ;;  %v1465_v44 = vadd.f32 %v1457_v2, %v7305_v48  ;;  %v7886_v25 = vmax.f32 %v1468_v29, 0.0 }
 0x6a6   :  { %v1466_v49 = vadd.f32 %v1458_v58, %v7255_v12  ;;  %v1482_v12 = vld [vmem:[%s11112_s2 + $0x8] sm:$0xff] }
 0x6a7   :  { %11105 = vst [vmem:[#allocation9_spill] sm:$0xff] %v7863_v3  ;;  %1679 = vrot.lane.b32.xlu0 %v7863_v3, %s6888_s26  ;;  %1794 = vmatpush1.msra.mxu1 %v7863_v3  ;;  %11109 = vst [vmem:[#allocation13_spill] sm:$0xff] %v7886_v25  ;;  %v7893_v48 = vmax.f32 %v1465_v44, 0.0 }
 0x6a8   :  { %1795 = vmatprep.subr.mxu1 %v11010_v4  ;;  %v7899_v7 = vmax.f32 %v1466_v49, 0.0  ;;  %5913 = vmatprep.mubr.msk.f32.mxu1 %vm678_vm6, %v1482_v12 }
 0x6a9   :  { %1673 = vrot.lane.b32.xlu1 %v7865_v13, %s6888_s26  ;;  %1796 = vmatpush1.msra.mxu1 %v7857_v60  ;;  %11110 = vst [vmem:[#allocation14_spill] sm:$0xff] %v7893_v48 }
 0x6aa   :  { %1797 = vmatprep.subr.mxu1 %v11010_v4  ;;  %11111 = vst [vmem:[#allocation15_spill] sm:$0xff] %v7899_v7 }
 0x6ab   :  { %1675 = vrot.lane.b32.xlu0 %v7876_v54, %s6888_s26  ;;  %1798 = vmatpush1.msra.mxu1 %v7876_v54 }
 0x6ac   :  { %1799 = vmatprep.subr.mxu1 %v11010_v4 }
 0x6ad   :  { %1800 = vmatpush1.msra.mxu1 %v7865_v13  ;;  %1669 = vrot.lane.b32.xlu1 %v7880_v61, %s6888_s26 }
 0x6ae   :  { %1801 = vmatprep.subr.mxu1 %v11010_v4 }
 0x6af   :  { %1671 = vrot.lane.b32.xlu0 %v7886_v25, %s6888_s26  ;;  %1802 = vmatpush1.msra.mxu1 %v7886_v25 }
 0x6b0   :  { %1803 = vmatprep.subr.mxu1 %v11010_v4 }
 0x6b1   :  { %1804 = vmatpush1.msra.mxu1 %v7880_v61  ;;  %1665 = vrot.lane.b32.xlu1 %v7893_v48, %s6888_s26 }
 0x6b2   :  { %1805 = vmatprep.subr.mxu1 %v11010_v4 }
 0x6b3   :  { %1667 = vrot.lane.b32.xlu0 %v7899_v7, %s6888_s26  ;;  %1806 = vmatpush1.msra.mxu1 %v7899_v7 }
 0x6b4   :  { %1807 = vmatprep.subr.mxu1 %v11010_v4 }
 0x6b5   :  { %1717 = vrot.lane.b32.xlu1 %v7857_v60, %s6886_s0  ;;  %1808 = vmatpush1.msra.mxu1 %v7893_v48 }
 0x6b6   :  { %1809 = vmatprep.subr.mxu1 %v11010_v4 }
 0x6b7   :  { %1719 = vrot.lane.b32.xlu0 %v7863_v3, %s6886_s0 }
 0x6b9   :  { %1713 = vrot.lane.b32.xlu1 %v7865_v13, %s6886_s0 }
 0x6bb   :  { %1715 = vrot.lane.b32.xlu0 %v7876_v54, %s6886_s0 }
 0x6bd   :  { %1709 = vrot.lane.b32.xlu1 %v7880_v61, %s6886_s0 }
 0x6bf   :  { %1711 = vrot.lane.b32.xlu0 %v7886_v25, %s6886_s0 }
 0x6c1   :  { %1705 = vrot.lane.b32.xlu1 %v7893_v48, %s6886_s0 }
 0x6c3   :  { %1707 = vrot.lane.b32.xlu0 %v7899_v7, %s6886_s0 }
 0x6c5   :  { %2250 = vperm.xlu1 %6686, %v1527_v34  }
 0x6c7   :  { %2255 = vperm.xlu0 %6687, %v1528_v22  }
 0x6c9   :  { %2245 = vperm.xlu1 %6686, %v1526_v21  }
 0x6cb   :  { %2351 = vperm.xlu0 %6687, %v1544_v17  }
 0x6cd   :  { %2240 = vperm.xlu1 %6686, %v1525_v0  }
 0x6cf   :  { %2346 = vperm.xlu0 %6687, %v1543_v33  }
 0x6d1   :  { %2235 = vperm.xlu1 %6686, %v1524_v40  }
 0x6d3   :  { %2341 = vperm.xlu0 %6687, %v1542_v35  }
 0x6d5   :  { %2230 = vperm.xlu1 %6686, %v1523_v28  }
 0x6d7   :  { %2336 = vperm.xlu0 %6687, %v1541_v41  }
 0x6d9   :  { %2225 = vperm.xlu1 %6686, %v1522_v51  }
 0x6db   :  { %2331 = vperm.xlu0 %6687, %v1540_v63  }
 0x6dd   :  { %2220 = vperm.xlu1 %6686, %v1521_v45   ;;  %v1481_v45 = vld [vmem:[%s11112_s2] sm:$0xff] }
 0x6df   :  { %2326 = vperm.xlu0 %6687, %v1539_v1   ;;  %v1484_v1 = vld [vmem:[%s11112_s2 + $0x18] sm:$0xff] }
 0x6e1   :  { %2215 = vperm.xlu1 %6686, %v1520_v52   ;;  %v1483_v52 = vld [vmem:[%s11112_s2 + $0x10] sm:$0xff] }
 0x6e3   :  { %2321 = vperm.xlu0 %6687, %v1538_v26   ;;  %v1486_v26 = vld [vmem:[%s11112_s2 + $0x28] sm:$0xff] }
 0x717   :  { %v1678_v39 = vpop.permute.xlu1 %1677 }
 0x718   :  { %v1695_v19 = vsel %vm132_vm3, 0.0, %v1678_v39  ;;  %v1485_v39 = vld [vmem:[%s11112_s2 + $0x20] sm:$0xff] }
 0x719   :  { %v1680_v55 = vpop.permute.xlu0 %1679  ;;  %v1703_v9 = vmul.f32 %v7069_v23, %v1695_v19  ;;  %v1487_v19 = vld [vmem:[%s11112_s2 + $0x30] sm:$0xff] }
 0x71a   :  { %v1696_v31 = vsel %vm132_vm3, 0.0, %v1680_v55  ;;  %v1488_v55 = vld [vmem:[%s11112_s2 + $0x38] sm:$0xff] }
 0x71b   :  { %v1704_v24 = vmul.f32 %v7069_v23, %v1696_v31  ;;  %v1674_v42 = vpop.permute.xlu1 %1673  ;;  %v1490_v31 = vld [vmem:[%s11112_s2 + $0x48] sm:$0xff] }
 0x71c   :  { %v1693_v38 = vsel %vm132_vm3, 0.0, %v1674_v42  ;;  %v1492_v42 = vld [vmem:[%s11112_s2 + $0x58] sm:$0xff] }
 0x71d   :  { %v1676_v37 = vpop.permute.xlu0 %1675  ;;  %1810 = vmatpush1.msra.mxu1 %v1704_v24  ;;  %v1701_v5 = vmul.f32 %v7069_v23, %v1693_v38  ;;  %v1489_v24 = vld [vmem:[%s11112_s2 + $0x40] sm:$0xff] }
 0x71e   :  { %v1694_v32 = vsel %vm132_vm3, 0.0, %v1676_v37  ;;  %1811 = vmatprep.subr.mxu1 %v11010_v4  ;;  %v1494_v37 = vld [vmem:[%s11112_s2 + $0x68] sm:$0xff]  ;;  %v1493_v38 = vld [vmem:[%s11112_s2 + $0x60] sm:$0xff] }
 0x71f   :  { %v1702_v10 = vmul.f32 %v7069_v23, %v1694_v32  ;;  %1812 = vmatpush1.msra.mxu1 %v1703_v9  ;;  %v1670_v43 = vpop.permute.xlu1 %1669  ;;  %v1491_v9 = vld [vmem:[%s11112_s2 + $0x50] sm:$0xff]  ;;  %v1496_v32 = vld [vmem:[%s11112_s2 + $0x78] sm:$0xff] }
 0x720   :  { %1813 = vmatprep.subr.mxu1 %v11010_v4  ;;  %v1691_v56 = vsel %vm132_vm3, 0.0, %v1670_v43  ;;  %v1498_v43 = vld [vmem:[%s11112_s2 + $0x88] sm:$0xff] }
 0x721   :  { %v1672_v59 = vpop.permute.xlu0 %1671  ;;  %1814 = vmatpush1.msra.mxu1 %v1702_v10  ;;  %v1699_v46 = vmul.f32 %v7069_v23, %v1691_v56  ;;  %v1495_v10 = vld [vmem:[%s11112_s2 + $0x70] sm:$0xff] }
 0x722   :  { %v1692_v36 = vsel %vm132_vm3, 0.0, %v1672_v59  ;;  %1815 = vmatprep.subr.mxu1 %v11010_v4  ;;  %v1500_v59 = vld [vmem:[%s11112_s2 + $0x98] sm:$0xff]  ;;  %v1499_v56 = vld [vmem:[%s11112_s2 + $0x90] sm:$0xff] }
 0x723   :  { %v1700_v53 = vmul.f32 %v7069_v23, %v1692_v36  ;;  %1816 = vmatpush1.msra.mxu1 %v1701_v5  ;;  %v1666_v57 = vpop.permute.xlu1 %1665  ;;  %v1497_v5 = vld [vmem:[%s11112_s2 + $0x80] sm:$0xff]  ;;  %v1502_v36 = vld [vmem:[%s11112_s2 + $0xa8] sm:$0xff] }
 0x724   :  { %1817 = vmatprep.subr.mxu1 %v11010_v4  ;;  %v1689_v27 = vsel %vm132_vm3, 0.0, %v1666_v57  ;;  %v1504_v57 = vld [vmem:[%s11112_s2 + $0xb8] sm:$0xff] }
 0x725   :  { %v1668_v15 = vpop.permute.xlu0 %1667  ;;  %1818 = vmatpush1.msra.mxu1 %v1700_v53  ;;  %v1697_v62 = vmul.f32 %v7069_v23, %v1689_v27  ;;  %v1501_v53 = vld [vmem:[%s11112_s2 + $0xa0] sm:$0xff] }
 0x726   :  { %v1690_v47 = vsel %vm132_vm3, 0.0, %v1668_v15  ;;  %1819 = vmatprep.subr.mxu1 %v11010_v4  ;;  %v1506_v15 = vld [vmem:[%s11112_s2 + $0xc8] sm:$0xff]  ;;  %v1505_v27 = vld [vmem:[%s11112_s2 + $0xc0] sm:$0xff] }
 0x727   :  { %v1698_v20 = vmul.f32 %v7069_v23, %v1690_v47  ;;  %1820 = vmatpush1.msra.mxu1 %v1699_v46  ;;  %v1718_v16 = vpop.permute.xlu1 %1717  ;;  %v1503_v46 = vld [vmem:[%s11112_s2 + $0xb0] sm:$0xff]  ;;  %v1508_v47 = vld [vmem:[%s11112_s2 + $0xd8] sm:$0xff] }
 0x728   :  { %1821 = vmatprep.subr.mxu1 %v11010_v4  ;;  %v1735_v14 = vsel %vm148_vm2, %v1718_v16, 0.0  ;;  %v1510_v16 = vld [vmem:[%s11112_s2 + $0xe8] sm:$0xff] }
 0x729   :  { %v1720_v30 = vpop.permute.xlu0 %1719  ;;  %1822 = vmatpush1.msra.mxu1 %v1698_v20  ;;  %v1743_v18 = vmul.f32 %v7060_v11, %v1735_v14  ;;  %v1507_v20 = vld [vmem:[%s11112_s2 + $0xd0] sm:$0xff] }
 0x72a   :  { %v1736_v50 = vsel %vm148_vm2, %v1720_v30, 0.0  ;;  %1823 = vmatprep.subr.mxu1 %v11010_v4  ;;  %v1512_v30 = vld [vmem:[%s11112_s2 + $0xf8] sm:$0xff]  ;;  %v1511_v14 = vld [vmem:[%s11112_s2 + $0xf0] sm:$0xff] }
 0x72b   :  { %v1744_v6 = vmul.f32 %v7060_v11, %v1736_v50  ;;  %1824 = vmatpush1.msra.mxu1 %v1697_v62  ;;  %v1714_v2 = vpop.permute.xlu1 %1713  ;;  %v1509_v62 = vld [vmem:[%s11112_s2 + $0xe0] sm:$0xff] }
 0x72c   :  { %1841 = vmatprep.subr.mxu1 %v11010_v4  ;;  %v1733_v58 = vsel %vm148_vm2, %v1714_v2, 0.0 }
 0x72d   :  { %v1716_v29 = vpop.permute.xlu0 %1715  ;;  %1842 = vmatpush2.msra.mxu1 %v1744_v6  ;;  %v1741_v34 = vmul.f32 %v7060_v11, %v1733_v58 }
 0x72e   :  { %v1734_v44 = vsel %vm148_vm2, %v1716_v29, 0.0  ;;  %1843 = vmatprep.subr.mxu1 %v11010_v4 }
 0x72f   :  { %v1742_v49 = vmul.f32 %v7060_v11, %v1734_v44  ;;  %1844 = vmatpush2.msra.mxu1 %v1743_v18  ;;  %v1710_v12 = vpop.permute.xlu1 %1709 }
 0x730   :  { %1845 = vmatprep.subr.mxu1 %v11010_v4  ;;  %v1731_v21 = vsel %vm148_vm2, %v1710_v12, 0.0 }
 0x731   :  { %v1712_v22 = vpop.permute.xlu0 %1711  ;;  %1846 = vmatpush2.msra.mxu1 %v1742_v49  ;;  %v1739_v40 = vmul.f32 %v7060_v11, %v1731_v21 }
 0x732   :  { %v1732_v17 = vsel %vm148_vm2, %v1712_v22, 0.0  ;;  %1847 = vmatprep.subr.mxu1 %v11010_v4 }
 0x733   :  { %v1740_v0 = vmul.f32 %v7060_v11, %v1732_v17  ;;  %1848 = vmatpush2.msra.mxu1 %v1741_v34  ;;  %v1706_v33 = vpop.permute.xlu1 %1705 }
 0x734   :  { %1849 = vmatprep.subr.mxu1 %v11010_v4  ;;  %v1729_v28 = vsel %vm148_vm2, %v1706_v33, 0.0 }
 0x735   :  { %v1708_v35 = vpop.permute.xlu0 %1707  ;;  %1850 = vmatpush2.msra.mxu1 %v1740_v0  ;;  %v1737_v63 = vmul.f32 %v7060_v11, %v1729_v28 }
 0x736   :  { %v1730_v41 = vsel %vm148_vm2, %v1708_v35, 0.0  ;;  %1851 = vmatprep.subr.mxu1 %v11010_v4 }
 0x737   :  { %v1738_v51 = vmul.f32 %v7060_v11, %v1730_v41  ;;  %1852 = vmatpush2.msra.mxu1 %v1739_v40 }
 0x738   :  { %1853 = vmatprep.subr.mxu1 %v11010_v4 }
 0x739   :  { %1854 = vmatpush2.msra.mxu1 %v1738_v51 }
 0x73a   :  { %1855 = vmatprep.subr.mxu1 %v11010_v4 }
 0x73b   :  { %1856 = vmatpush2.msra.mxu1 %v1737_v63 }
 0x73c   :  { %1858 = vmatmul.mubr.f32.vlgmr.msra.gmra.mxu1 %v1481_v45 }
 0x73d   :  { %5914 = vmatprep.mubr.msk.f32.mxu1 %vm678_vm6, %v1484_v1 }
 0x740   :  { %1863 = vmatmul.mubr.f32.gmra.mxu1 %v1483_v52 }
 0x741   :  { %5915 = vmatprep.mubr.msk.f32.mxu1 %vm678_vm6, %v1486_v26 }
 0x744   :  { %1868 = vmatmul.mubr.f32.gmra.mxu1 %v1485_v39 }
 0x745   :  { %5916 = vmatprep.mubr.msk.f32.mxu1 %vm678_vm6, %v1488_v55 }
 0x748   :  { %1873 = vmatmul.mubr.f32.gmra.mxu1 %v1487_v19 }
 0x749   :  { %5917 = vmatprep.mubr.msk.f32.mxu1 %vm678_vm6, %v1490_v31 }
 0x74c   :  { %1878 = vmatmul.mubr.f32.gmra.mxu1 %v1489_v24 }
 0x74d   :  { %5918 = vmatprep.mubr.msk.f32.mxu1 %vm678_vm6, %v1492_v42 }
 0x750   :  { %1883 = vmatmul.mubr.f32.gmra.mxu1 %v1491_v9 }
 0x751   :  { %5919 = vmatprep.mubr.msk.f32.mxu1 %vm678_vm6, %v1494_v37 }
 0x754   :  { %1888 = vmatmul.mubr.f32.gmra.mxu1 %v1493_v38 }
 0x755   :  { %5920 = vmatprep.mubr.msk.f32.mxu1 %vm678_vm6, %v1496_v32 }
 0x758   :  { %1893 = vmatmul.mubr.f32.gmra.mxu1 %v1495_v10 }
 0x759   :  { %5921 = vmatprep.mubr.msk.f32.mxu1 %vm678_vm6, %v1498_v43 }
 0x75c   :  { %1898 = vmatmul.mubr.f32.gmra.mxu1 %v1497_v5 }
 0x75d   :  { %5922 = vmatprep.mubr.msk.f32.mxu1 %vm678_vm6, %v1500_v59 }
 0x760   :  { %1903 = vmatmul.mubr.f32.gmra.mxu1 %v1499_v56 }
 0x761   :  { %5923 = vmatprep.mubr.msk.f32.mxu1 %vm678_vm6, %v1502_v36 }
 0x764   :  { %1908 = vmatmul.mubr.f32.gmra.mxu1 %v1501_v53 }
 0x765   :  { %5924 = vmatprep.mubr.msk.f32.mxu1 %vm678_vm6, %v1504_v57 }
 0x768   :  { %1913 = vmatmul.mubr.f32.gmra.mxu1 %v1503_v46 }
 0x769   :  { %5925 = vmatprep.mubr.msk.f32.mxu1 %vm678_vm6, %v1506_v15 }
 0x76c   :  { %1918 = vmatmul.mubr.f32.gmra.mxu1 %v1505_v27 }
 0x76d   :  { %5926 = vmatprep.mubr.msk.f32.mxu1 %vm678_vm6, %v1508_v47 }
 0x770   :  { %1923 = vmatmul.mubr.f32.gmra.mxu1 %v1507_v20 }
 0x771   :  { %5927 = vmatprep.mubr.msk.f32.mxu1 %vm678_vm6, %v1510_v16 }
 0x774   :  { %1928 = vmatmul.mubr.f32.gmra.mxu1 %v1509_v62 }
 0x775   :  { %5928 = vmatprep.mubr.msk.f32.mxu1 %vm678_vm6, %v1512_v30 }
 0x778   :  { %1933 = vmatmul.mubr.f32.gmra.mxu1 %v1511_v14 }
 0x7fc   :  { %v8134_v50 = vpop.f32.mrf.mxu1 }
 0x7fd   :  { %11114 = vst [vmem:[#allocation16_spill] sm:$0xff] %v8134_v50  ;;  %v1986_v6 = vmul.f32 %v8134_v50, %v8134_v50  ;;  %v1938_v2 = vsel %vm301_vm5, %v8134_v50, 0.0 }
 0x7fe   :  { %1939 = vadd.xlane.f32.xlu0 %v1938_v2  ;;  %v1861_v18 = vpop.f32.mrf.mxu1 }
 0x7ff   :  { %v2002_v29 = vsel %vm301_vm5, %v1986_v6, 0.0 }
 0x800   :  { %2003 = vadd.xlane.f32.xlu1 %v2002_v29  ;;  %v8141_v58 = vpop.f32.mrf.mxu1 }
 0x801   :  { %11115 = vst [vmem:[#allocation17_spill] sm:$0xff] %v8141_v58  ;;  %v1987_v44 = vmul.f32 %v8141_v58, %v8141_v58  ;;  %v1941_v49 = vsel %vm301_vm5, %v8141_v58, 0.0 }
 0x802   :  { %1942 = vadd.xlane.f32.xlu0 %v1941_v49  ;;  %v1866_v12 = vpop.f32.mrf.mxu1 }
 0x803   :  { %v2005_v34 = vsel %vm301_vm5, %v1987_v44, 0.0 }
 0x804   :  { %2006 = vadd.xlane.f32.xlu1 %v2005_v34  ;;  %v8148_v22 = vpop.f32.mrf.mxu1 }
 0x805   :  { %11116 = vst [vmem:[#allocation18_spill] sm:$0xff] %v8148_v22  ;;  %v1988_v21 = vmul.f32 %v8148_v22, %v8148_v22  ;;  %v1944_v17 = vsel %vm301_vm5, %v8148_v22, 0.0 }
 0x806   :  { %1945 = vadd.xlane.f32.xlu0 %v1944_v17  ;;  %v1871_v0 = vpop.f32.mrf.mxu1 }
 0x807   :  { %v2008_v33 = vsel %vm301_vm5, %v1988_v21, 0.0 }
 0x808   :  { %2009 = vadd.xlane.f32.xlu1 %v2008_v33  ;;  %v8155_v40 = vpop.f32.mrf.mxu1 }
 0x809   :  { %11117 = vst [vmem:[#allocation19_spill] sm:$0xff] %v8155_v40  ;;  %v1989_v35 = vmul.f32 %v8155_v40, %v8155_v40  ;;  %v1947_v28 = vsel %vm301_vm5, %v8155_v40, 0.0 }
 0x80a   :  { %1948 = vadd.xlane.f32.xlu0 %v1947_v28  ;;  %v1876_v41 = vpop.f32.mrf.mxu1 }
 0x80b   :  { %v2011_v51 = vsel %vm301_vm5, %v1989_v35, 0.0 }
 0x80c   :  { %2012 = vadd.xlane.f32.xlu1 %v2011_v51  ;;  %v8162_v63 = vpop.f32.mrf.mxu1 }
 0x80d   :  { %11118 = vst [vmem:[#allocation20_spill] sm:$0xff] %v8162_v63  ;;  %v1990_v45 = vmul.f32 %v8162_v63, %v8162_v63  ;;  %v1950_v1 = vsel %vm301_vm5, %v8162_v63, 0.0 }
 0x80e   :  { %1951 = vadd.xlane.f32.xlu0 %v1950_v1  ;;  %v1881_v52 = vpop.f32.mrf.mxu1 }
 0x80f   :  { %v2014_v26 = vsel %vm301_vm5, %v1990_v45, 0.0 }
 0x810   :  { %2015 = vadd.xlane.f32.xlu1 %v2014_v26  ;;  %v8169_v39 = vpop.f32.mrf.mxu1 }
 0x811   :  { %11119 = vst [vmem:[#allocation21_spill] sm:$0xff] %v8169_v39  ;;  %v1991_v55 = vmul.f32 %v8169_v39, %v8169_v39  ;;  %v1953_v19 = vsel %vm301_vm5, %v8169_v39, 0.0 }
 0x812   :  { %1954 = vadd.xlane.f32.xlu0 %v1953_v19  ;;  %v1886_v31 = vpop.f32.mrf.mxu1 }
 0x813   :  { %v2017_v24 = vsel %vm301_vm5, %v1991_v55, 0.0 }
 0x814   :  { %2018 = vadd.xlane.f32.xlu1 %v2017_v24  ;;  %v8176_v42 = vpop.f32.mrf.mxu1 }
 0x815   :  { %11120 = vst [vmem:[#allocation22_spill] sm:$0xff] %v8176_v42  ;;  %v1992_v9 = vmul.f32 %v8176_v42, %v8176_v42  ;;  %v1956_v37 = vsel %vm301_vm5, %v8176_v42, 0.0 }
 0x816   :  { %1957 = vadd.xlane.f32.xlu0 %v1956_v37  ;;  %v1891_v38 = vpop.f32.mrf.mxu1 }
 0x817   :  { %v2020_v32 = vsel %vm301_vm5, %v1992_v9, 0.0 }
 0x818   :  { %2021 = vadd.xlane.f32.xlu1 %v2020_v32  ;;  %v8183_v10 = vpop.f32.mrf.mxu1 }
 0x819   :  { %11121 = vst [vmem:[#allocation23_spill] sm:$0xff] %v8183_v10  ;;  %v1993_v43 = vmul.f32 %v8183_v10, %v8183_v10  ;;  %v1959_v5 = vsel %vm301_vm5, %v8183_v10, 0.0 }
 0x81a   :  { %1960 = vadd.xlane.f32.xlu0 %v1959_v5  ;;  %v1896_v59 = vpop.f32.mrf.mxu1  ;;  %v1518_v5 = vld [vmem:[%s11113_s11 + $0x28] sm:$0xff] }
 0x81b   :  { %v2023_v56 = vsel %vm301_vm5, %v1993_v43, 0.0  ;;  %v1519_v43 = vld [vmem:[%s11113_s11 + $0x30] sm:$0xff]  ;;  %v1537_v59 = vld [vmem:[%s10981_s12 + $0x40] sm:$0xff] }
 0x81c   :  { %2024 = vadd.xlane.f32.xlu1 %v2023_v56  ;;  %v8190_v36 = vpop.f32.mrf.mxu1  ;;  %v1517_v56 = vld [vmem:[%s11113_s11 + $0x20] sm:$0xff] }
 0x81d   :  { %v1994_v53 = vmul.f32 %v8190_v36, %v8190_v36  ;;  %v1962_v57 = vsel %vm301_vm5, %v8190_v36, 0.0 }
 0x81e   :  { %1963 = vadd.xlane.f32.xlu0 %v1962_v57  ;;  %v1901_v46 = vpop.f32.mrf.mxu1  ;;  %v1516_v57 = vld [vmem:[%s11113_s11 + $0x18] sm:$0xff] }
 0x81f   :  { %v2026_v15 = vsel %vm301_vm5, %v1994_v53, 0.0  ;;  %v1536_v53 = vld [vmem:[%s10981_s12 + $0x38] sm:$0xff]  ;;  %v8264_v46 = vpop.permute.xlu0 %2255 }
 0x820   :  { %2027 = vadd.xlane.f32.xlu1 %v2026_v15  ;;  %v8197_v27 = vpop.f32.mrf.mxu1  ;;  %v1535_v15 = vld [vmem:[%s10981_s12 + $0x30] sm:$0xff] }
 0x821   :  { %v1995_v47 = vmul.f32 %v8197_v27, %v8197_v27  ;;  %v1965_v20 = vsel %vm301_vm5, %v8197_v27, 0.0 }
 0x822   :  { %1966 = vadd.xlane.f32.xlu0 %v1965_v20  ;;  %v1906_v16 = vpop.f32.mrf.mxu1  ;;  %v8272_v20 = vpop.permute.xlu1 %2250 }
 0x823   :  { %v2029_v62 = vsel %vm301_vm5, %v1995_v47, 0.0  ;;  %v1515_v47 = vld [vmem:[%s11113_s11 + $0x10] sm:$0xff]  ;;  %v1534_v16 = vld [vmem:[%s10981_s12 + $0x28] sm:$0xff] }
 0x824   :  { %2030 = vadd.xlane.f32.xlu1 %v2029_v62  ;;  %v8204_v30 = vpop.f32.mrf.mxu1  ;;  %v1514_v62 = vld [vmem:[%s11113_s11 + $0x8] sm:$0xff] }
 0x825   :  { %v1996_v14 = vmul.f32 %v8204_v30, %v8204_v30  ;;  %v1968_v6 = vsel %vm301_vm5, %v8204_v30, 0.0 }
 0x826   :  { %1969 = vadd.xlane.f32.xlu0 %v1968_v6  ;;  %v1911_v2 = vpop.f32.mrf.mxu1  ;;  %v8282_v6 = vpop.permute.xlu1 %2245 }
 0x827   :  { %v2032_v18 = vsel %vm301_vm5, %v1996_v14, 0.0  ;;  %v8280_v14 = vpop.permute.xlu0 %2351  ;;  %v1533_v2 = vld [vmem:[%s10981_s12 + $0x20] sm:$0xff] }
 0x828   :  { %2033 = vadd.xlane.f32.xlu1 %v2032_v18  ;;  %v8211_v29 = vpop.f32.mrf.mxu1  ;;  %v1513_v18 = vld [vmem:[%s11113_s11] sm:$0xff] }
 0x829   :  { %v1997_v44 = vmul.f32 %v8211_v29, %v8211_v29  ;;  %v1971_v49 = vsel %vm301_vm5, %v8211_v29, 0.0 }
 0x82a   :  { %1972 = vadd.xlane.f32.xlu0 %v1971_v49  ;;  %v1916_v12 = vpop.f32.mrf.mxu1  ;;  %v1532_v49 = vld [vmem:[%s10981_s12 + $0x18] sm:$0xff] }
 0x82b   :  { %v2035_v34 = vsel %vm301_vm5, %v1997_v44, 0.0  ;;  %v8290_v44 = vpop.permute.xlu0 %2346  ;;  %v1529_v12 = vld [vmem:[%s10981_s12] sm:$0xff] }
 0x82c   :  { %2036 = vadd.xlane.f32.xlu1 %v2035_v34  ;;  %v8218_v21 = vpop.f32.mrf.mxu1  ;;  %v8298_v34 = vpop.permute.xlu1 %2240 }
 0x82d   :  { %v1998_v17 = vmul.f32 %v8218_v21, %v8218_v21  ;;  %v1974_v0 = vsel %vm301_vm5, %v8218_v21, 0.0 }
 0x82e   :  { %1975 = vadd.xlane.f32.xlu0 %v1974_v0  ;;  %v1921_v33 = vpop.f32.mrf.mxu1 }
 0x82f   :  { %v2038_v35 = vsel %vm301_vm5, %v1998_v17, 0.0  ;;  %v1531_v17 = vld [vmem:[%s10981_s12 + $0x10] sm:$0xff]  ;;  %v8303_v0 = vpop.permute.xlu0 %2341 }
 0x830   :  { %2039 = vadd.xlane.f32.xlu1 %v2038_v35  ;;  %v8225_v28 = vpop.f32.mrf.mxu1  ;;  %v8305_v33 = vpop.permute.xlu1 %2235  ;;  %v1530_v35 = vld [vmem:[%s10981_s12 + $0x8] sm:$0xff] }
 0x831   :  { %v1999_v41 = vmul.f32 %v8225_v28, %v8225_v28  ;;  %v1977_v51 = vsel %vm301_vm5, %v8225_v28, 0.0  ;;  %11122 = vst [vmem:[#allocation24_spill] sm:$0xff] %v8305_v33 }
 0x832   :  { %1978 = vadd.xlane.f32.xlu0 %v1977_v51  ;;  %v1926_v45 = vpop.f32.mrf.mxu1 }
 0x833   :  { %v2041_v1 = vsel %vm301_vm5, %v1999_v41, 0.0  ;;  %v8310_v41 = vpop.permute.xlu0 %2336 }
 0x834   :  { %2042 = vadd.xlane.f32.xlu1 %v2041_v1  ;;  %v8232_v52 = vpop.f32.mrf.mxu1  ;;  %v8312_v51 = vpop.permute.xlu1 %2230 }
 0x835   :  { %v2000_v55 = vmul.f32 %v8232_v52, %v8232_v52  ;;  %v1980_v19 = vsel %vm301_vm5, %v8232_v52, 0.0 }
 0x836   :  { %v1931_v26 = vpop.f32.mrf.mxu1 }
 0x837   :  { %v2044_v38 = vsel %vm301_vm5, %v2000_v55, 0.0  ;;  %v8314_v45 = vpop.permute.xlu0 %2331 }
 0x838   :  { %1981 = vadd.xlane.f32.xlu1 %v1980_v19  ;;  %v8238_v31 = vpop.f32.mrf.mxu1  ;;  %11123 = vst [vmem:[#allocation25_spill] sm:$0xff] %v8314_v45  ;;  %v8316_v1 = vpop.permute.xlu1 %2225 }
 0x839   :  { %v2001_v24 = vmul.f32 %v8238_v31, %v8238_v31  ;;  %v1983_v9 = vsel %vm301_vm5, %v8238_v31, 0.0  ;;  %11124 = vst [vmem:[#allocation26_spill] sm:$0xff] %v8316_v1 }
 0x83a   :  { %1984 = vadd.xlane.f32.xlu0 %v1983_v9  ;;  %v1936_v37 = vpop.f32.mrf.mxu1 }
 0x83b   :  { %v2047_v32 = vsel %vm301_vm5, %v2001_v24, 0.0  ;;  %v8318_v26 = vpop.permute.xlu0 %2326 }
 0x83c   :  { %2045 = vadd.xlane.f32.xlu1 %v2044_v38  ;;  %11125 = vst [vmem:[#allocation27_spill] sm:$0xff] %v8318_v26  ;;  %v8320_v55 = vpop.permute.xlu1 %2220 }
 0x83d   :  { %11126 = vst [vmem:[#allocation28_spill] sm:$0xff] %v8320_v55 }
 0x83e   :  { %2048 = vadd.xlane.f32.xlu0 %v2047_v32 }
 0x83f   :  { %v8322_v19 = vpop.permute.xlu0 %2321 }
 0x840   :  { %11127 = vst [vmem:[#allocation29_spill] sm:$0xff] %v8322_v19  ;;  %v8324_v24 = vpop.permute.xlu1 %2215 }
 0x841   :  { %11128 = vst [vmem:[#allocation30_spill] sm:$0xff] %v8324_v24 }
 0x84d   :  { %2210 = vperm.xlu1 %6686, %v1519_v43  }
 0x851   :  { %2205 = vperm.xlu1 %6686, %v1518_v5  }
 0x854   :  { %2316 = vperm.xlu0 %6687, %v1537_v59  }
 0x855   :  { %2200 = vperm.xlu1 %6686, %v1517_v56  }
 0x858   :  { %2311 = vperm.xlu0 %6687, %v1536_v53  }
 0x859   :  { %2195 = vperm.xlu1 %6686, %v1516_v57  }
 0x85c   :  { %2306 = vperm.xlu0 %6687, %v1535_v15  }
 0x85d   :  { %2190 = vperm.xlu1 %6686, %v1515_v47  }
 0x860   :  { %2301 = vperm.xlu0 %6687, %v1534_v16  }
 0x861   :  { %2185 = vperm.xlu1 %6686, %v1514_v62  }
 0x864   :  { %2296 = vperm.xlu0 %6687, %v1533_v2  }
 0x865   :  { %2180 = vperm.xlu1 %6686, %v1513_v18  }
 0x868   :  { %2291 = vperm.xlu0 %6687, %v1532_v49  }
 0x869   :  { %2276 = vperm.xlu1 %6686, %v1529_v12  }
 0x86c   :  { %2286 = vperm.xlu0 %6687, %v1531_v17  }
 0x870   :  { %2281 = vperm.xlu0 %6687, %v1530_v35  }
 0x887   :  { %v8326_v9 = vpop.xlane.xlu0 %1939 }
 0x889   :  { %v8328_v37 = vpop.xlane.xlu1 %2003 }
 0x88b   :  { %v8330_v38 = vpop.xlane.xlu0 %1942 }
 0x88d   :  { %v8332_v32 = vpop.xlane.xlu1 %2006 }
 0x88f   :  { %v8334_v43 = vpop.xlane.xlu0 %1945 }
 0x891   :  { %v8336_v5 = vpop.xlane.xlu1 %2009 }
 0x893   :  { %v8338_v59 = vpop.xlane.xlu0 %1948 }
 0x895   :  { %v8340_v56 = vpop.xlane.xlu1 %2012 }
 0x897   :  { %v8342_v53 = vpop.xlane.xlu0 %1951 }
 0x899   :  { %v8344_v57 = vpop.xlane.xlu1 %2015 }
 0x89b   :  { %v8346_v15 = vpop.xlane.xlu0 %1954 }
 0x89d   :  { %v8348_v47 = vpop.xlane.xlu1 %2018 }
 0x89f   :  { %v1958_v16 = vpop.xlane.xlu0 %1957 }
 0x8a1   :  { %v2022_v62 = vpop.xlane.xlu1 %2021 }
 0x8a3   :  { %v1961_v2 = vpop.xlane.xlu0 %1960 }
 0x8a5   :  { %v8350_v18 = vpop.xlane.xlu1 %2024 }
 0x8a7   :  { %v1964_v49 = vpop.xlane.xlu0 %1963 }
 0x8a8   :  { %v8366_v39 = vmul.f32 0.03125, %v1964_v49 }
 0x8a9   :  { %v2028_v12 = vpop.xlane.xlu1 %2027 }
 0x8ab   :  { %v1967_v17 = vpop.xlane.xlu0 %1966 }
 0x8ac   :  { %v8368_v19 = vmul.f32 0.03125, %v1967_v17 }
 0x8ad   :  { %v2031_v35 = vpop.xlane.xlu1 %2030 }
 0x8ae   :  { %v2075_v42 = vmul.f32 0.03125, %v2031_v35 }
 0x8af   :  { %v1970_v8 = vpop.xlane.xlu0 %1969 }
 0x8b0   :  { %v8354_v54 = vmul.f32 0.03125, %v1970_v8 }
 0x8b1   :  { %v2034_v4 = vpop.xlane.xlu1 %2033 }
 0x8b2   :  { %v2076_v24 = vmul.f32 0.03125, %v2034_v4  ;;  %v2090_v4 = vmul.f32 %v8366_v39, %v8366_v39 }
 0x8b3   :  { %v1973_v48 = vpop.xlane.xlu0 %1972 }
 0x8b4   :  { %v8360_v58 = vmul.f32 0.03125, %v1973_v48 }
 0x8b5   :  { %v2037_v7 = vpop.xlane.xlu1 %2036 }
 0x8b7   :  { %v1976_v61 = vpop.xlane.xlu0 %1975 }
 0x8b8   :  { %v8352_v25 = vmul.f32 0.03125, %v1976_v61  ;;  %v2092_v61 = vmul.f32 %v8354_v54, %v8354_v54 }
 0x8b9   :  { %v2040_v13 = vpop.xlane.xlu1 %2039 }
 0x8ba   :  { %v2094_v3 = vmul.f32 %v8352_v25, %v8352_v25  ;;  %v2078_v11 = vmul.f32 0.03125, %v2040_v13  ;;  %v2077_v13 = vmul.f32 0.03125, %v2037_v7  ;;  %v2108_v45 = vsub.f32 %v2076_v24, %v2092_v61 }
 0x8bb   :  { %v1979_v60 = vpop.xlane.xlu0 %1978  ;;  %v8382_v24 = vmul.f32 0.03125, %v1958_v16  ;;  %v8384_v61 = vmul.f32 0.03125, %v1961_v2 }
 0x8bc   :  { %v8358_v23 = vmul.f32 0.03125, %v1979_v60  ;;  %v2110_v8 = vsub.f32 %v2078_v11, %v2094_v3  ;;  %v2093_v60 = vmul.f32 %v8360_v58, %v8360_v58  ;;  %v2074_v11 = vmul.f32 0.03125, %v2028_v12 }
 0x8bd   :  { %v2043_v50 = vpop.xlane.xlu1 %2042  ;;  %v2091_v3 = vmul.f32 %v8368_v19, %v8368_v19  ;;  %v2088_v16 = vmul.f32 %v8382_v24, %v8382_v24 }
 0x8be   :  { %v2095_v40 = vmul.f32 %v8358_v23, %v8358_v23  ;;  %v2079_v22 = vmul.f32 0.03125, %v2043_v50  ;;  %v2142_v50 = vadd.f32 1e-05, %v2110_v8  ;;  %v2109_v49 = vsub.f32 %v2077_v13, %v2093_v60 }
 0x8bf   :  { %v2106_v60 = vsub.f32 %v2074_v11, %v2090_v4  ;;  %v2107_v35 = vsub.f32 %v2075_v42, %v2091_v3  ;;  %v2073_v4 = vmul.f32 0.03125, %v8350_v18  ;;  %v8399_v11 = vmul.f32 0.03125, %v8346_v15 }
 0x8c0   :  { %v2111_v63 = vsub.f32 %v2079_v22, %v2095_v40  ;;  %6736 = vrsqrt.f32 %v2142_v50  ;;  %v2141_v13 = vadd.f32 1e-05, %v2109_v49  ;;  %v2089_v50 = vmul.f32 %v8384_v61, %v8384_v61 }
 0x8c1   :  { %v1982_v48 = vpop.xlane.xlu1 %1981  ;;  %v8402_v3 = vmul.f32 0.03125, %v8334_v43  ;;  %v2070_v49 = vmul.f32 0.03125, %v8344_v57  ;;  %v2087_v15 = vmul.f32 %v8399_v11, %v8399_v11 }
 0x8c2   :  { %v8372_v1 = vmul.f32 0.03125, %v1982_v48  ;;  %v2143_v7 = vadd.f32 1e-05, %v2111_v63  ;;  %v2105_v18 = vsub.f32 %v2073_v4, %v2089_v50  ;;  %v2066_v50 = vmul.f32 0.03125, %v8328_v37 }
 0x8c3   :  { %v1985_v55 = vpop.xlane.xlu0 %1984  ;;  %v2084_v57 = vmul.f32 %v8402_v3, %v8402_v3 }
 0x8c4   :  { %v8374_v10 = vmul.f32 0.03125, %v1985_v55  ;;  %v2096_v22 = vmul.f32 %v8372_v1, %v8372_v1  ;;  %v2140_v55 = vadd.f32 1e-05, %v2108_v45  ;;  %6738 = vrsqrt.f32 %v2143_v7 }
 0x8c5   :  { %v2046_v17 = vpop.xlane.xlu1 %2045  ;;  %v2072_v45 = vmul.f32 0.03125, %v2022_v62 }
 0x8c6   :  { %v2080_v40 = vmul.f32 0.03125, %v2046_v17  ;;  %v2097_v12 = vmul.f32 %v8374_v10, %v8374_v10  ;;  %v8389_v17 = vmul.f32 0.03125, %v8342_v53  ;;  %6740 = vrsqrt.f32 %v2140_v55 }
 0x8c7   :  { %v2049_v8 = vpop.xlane.xlu0 %2048  ;;  %v2139_v53 = vadd.f32 1e-05, %v2107_v35  ;;  %v2104_v7 = vsub.f32 %v2072_v45, %v2088_v16  ;;  %v8418_v55 = vmul.f32 0.03125, %v8326_v9  ;;  %v2069_v9 = vmul.f32 0.03125, %v8340_v56 }
 0x8c8   :  { %v2112_v48 = vsub.f32 %v2080_v40, %v2096_v22  ;;  %v2081_v26 = vmul.f32 0.03125, %v2049_v8  ;;  %v2086_v62 = vmul.f32 %v8389_v17, %v8389_v17  ;;  %v2071_v40 = vmul.f32 0.03125, %v8348_v47 }
 0x8c9   :  { %v8393_v2 = vpop.permute.xlu1 %2210  ;;  %v2068_v8 = vmul.f32 0.03125, %v8336_v5  ;;  %v8426_v47 = vmul.f32 0.03125, %v8330_v38  ;;  %v2082_v16 = vmul.f32 %v8418_v55, %v8418_v55  ;;  %v2126_v5 = vsub.f32 %v8218_v21, %v8352_v25 }
 0x8ca   :  { %v2144_v63 = vadd.f32 1e-05, %v2112_v48  ;;  %v2113_v33 = vsub.f32 %v2081_v26, %v2097_v12  ;;  %v2138_v26 = vadd.f32 1e-05, %v2106_v60  ;;  %v2102_v12 = vsub.f32 %v2070_v49, %v2086_v62 }
 0x8cb   :  { %v2137_v60 = vadd.f32 1e-05, %v2105_v18  ;;  %v2100_v4 = vsub.f32 %v2068_v8, %v2084_v57  ;;  %v2127_v56 = vsub.f32 %v8225_v28, %v8358_v23  ;;  %v2083_v25 = vmul.f32 %v8426_v47, %v8426_v47 }
 0x8cc   :  { %6742 = vrsqrt.f32 %v2144_v63  ;;  %v2145_v42 = vadd.f32 1e-05, %v2113_v33  ;;  %v8410_v33 = vmul.f32 0.03125, %v8338_v59  ;;  %v2136_v59 = vadd.f32 1e-05, %v2104_v7 }
 0x8cd   :  { %6744 = vrsqrt.f32 %v2141_v13  ;;  %v8415_v43 = vpop.permute.xlu1 %2205  ;;  %v6737_v13 = vpop.eup %6736  ;;  %v2103_v63 = vsub.f32 %v2071_v40, %v2087_v15  ;;  %v2067_v21 = vmul.f32 0.03125, %v8332_v32  ;;  %v2124_v40 = vsub.f32 %v8204_v30, %v8354_v54 }
 0x8ce   :  { %6746 = vrsqrt.f32 %v2145_v42  ;;  %v2085_v35 = vmul.f32 %v8410_v33, %v8410_v33  ;;  %v2134_v42 = vadd.f32 1e-05, %v2102_v12  ;;  %v2174_v62 = vmul.f32 %v6737_v13, %v2126_v5 }
 0x8cf   :  { %v8407_v22 = vpop.permute.xlu0 %2316  ;;  %6748 = vrsqrt.f32 %v2138_v26  ;;  %v2135_v7 = vadd.f32 1e-05, %v2103_v63  ;;  %v2129_v23 = vsub.f32 %v8238_v31, %v8374_v10  ;;  %v2098_v57 = vsub.f32 %v2066_v50, %v2082_v16 }
 0x8d0   :  { %6750 = vrsqrt.f32 %v2139_v53  ;;  %v2128_v53 = vsub.f32 %v8232_v52, %v8372_v1  ;;  %v2101_v37 = vsub.f32 %v2069_v9, %v2085_v35  ;;  %v2132_v8 = vadd.f32 1e-05, %v2100_v4 }
 0x8d1   :  { %v6739_v45 = vpop.eup %6738  ;;  %6752 = vrsqrt.f32 %v2136_v59  ;;  %v8436_v38 = vpop.permute.xlu1 %2200  ;;  %v2125_v32 = vsub.f32 %v8211_v29, %v8360_v58  ;;  %v2099_v35 = vsub.f32 %v2067_v21, %v2083_v25  ;;  %v2130_v29 = vadd.f32 1e-05, %v2098_v57 }
 0x8d2   :  { %6754 = vrsqrt.f32 %v2137_v60  ;;  %v2175_v52 = vmul.f32 %v6739_v45, %v2127_v56  ;;  %v2270_v60 = vmul.f32 %v8298_v34, %v2174_v62  ;;  %v2133_v54 = vadd.f32 1e-05, %v2101_v37  ;;  %v11131_v62 = vld [vmem:[#allocation22_spill] sm:$0xff]  ;;  %v11133_v37 = vld [vmem:[#allocation28_spill] sm:$0xff] }
 0x8d3   :  { %v8423_v48 = vpop.permute.xlu0 %2311  ;;  %v6741_v26 = vpop.eup %6740  ;;  %6756 = vrsqrt.f32 %v2134_v42  ;;  %v2123_v34 = vsub.f32 %v8197_v27, %v8368_v19  ;;  %v2131_v50 = vadd.f32 1e-05, %v2099_v35  ;;  %v11129_v27 = vld [vmem:[#allocation24_spill] sm:$0xff] }
 0x8d4   :  { %v2172_v13 = vmul.f32 %v6741_v26, %v2124_v40  ;;  %6758 = vrsqrt.f32 %v2135_v7  ;;  %v2271_v63 = vmul.f32 %v8282_v6, %v2175_v52  ;;  %v11134_v40 = vld [vmem:[#allocation25_spill] sm:$0xff] }
 0x8d5   :  { %v8455_v30 = vpop.permute.xlu1 %2195  ;;  %6760 = vrsqrt.f32 %v2132_v8 }
 0x8d6   :  { %v2268_v6 = vmul.f32 %v8312_v51, %v2172_v13  ;;  %6762 = vrsqrt.f32 %v2133_v54  ;;  %v11137_v54 = vld [vmem:[#allocation29_spill] sm:$0xff] }
 0x8d7   :  { %v8445_v18 = vpop.permute.xlu0 %2306  ;;  %6764 = vrsqrt.f32 %v2130_v29  ;;  %v11139_v29 = vld [vmem:[#allocation30_spill] sm:$0xff] }
 0x8d8   :  { %6766 = vrsqrt.f32 %v2131_v50 }
 0x8d9   :  { %v6743_v49 = vpop.eup %6742  ;;  %v2191_v26 = vpop.permute.xlu1 %2190 }
 0x8da   :  { %v6745_v15 = vpop.eup %6744  ;;  %v2176_v28 = vmul.f32 %v6743_v49, %v2128_v53  ;;  %v11132_v49 = vld [vmem:[#allocation23_spill] sm:$0xff] }
 0x8db   :  { %v6747_v1 = vpop.eup %6746  ;;  %v2173_v16 = vmul.f32 %v6745_v15, %v2125_v32  ;;  %v8464_v5 = vpop.permute.xlu0 %2301  ;;  %v2121_v25 = vsub.f32 %v11132_v49, %v8384_v61 }
 0x8dc   :  { %v2272_v12 = vmul.f32 %v8272_v20, %v2176_v28  ;;  %v2177_v59 = vmul.f32 %v6747_v1, %v2129_v23  ;;  %v6749_v10 = vpop.eup %6748  ;;  %v2122_v20 = vsub.f32 %v8190_v36, %v8366_v39  ;;  %v2367_v36 = vadd.f32 %v8303_v0, %v2271_v63  ;;  %v11135_v28 = vld [vmem:[#allocation26_spill] sm:$0xff] }
 0x8dd   :  { %v6751_v58 = vpop.eup %6750  ;;  %v2269_v19 = vmul.f32 %v11129_v27, %v2173_v16  ;;  %v2120_v0 = vsub.f32 %v11131_v62, %v8382_v24  ;;  %v2186_v32 = vpop.permute.xlu1 %2185 }
 0x8de   :  { %v2368_v31 = vadd.f32 %v8290_v44, %v2272_v12  ;;  %v2273_v9 = vmul.f32 %v8264_v46, %v2177_v59  ;;  %v2366_v46 = vadd.f32 %v8310_v41, %v2270_v60  ;;  %v2170_v4 = vmul.f32 %v6749_v10, %v2122_v20  ;;  %v6753_v56 = vpop.eup %6752  ;;  %v11130_v41 = vld [vmem:[#allocation27_spill] sm:$0xff]  ;;  %v11136_v59 = vld [vmem:[#allocation20_spill] sm:$0xff]  ;;  %v11138_v10 = vld [vmem:[#allocation21_spill] sm:$0xff] }
 0x8df   :  { %v2171_v42 = vmul.f32 %v6751_v58, %v2123_v34  ;;  %v2364_v51 = vadd.f32 %v11130_v41, %v2268_v6  ;;  %v6755_v53 = vpop.eup %6754  ;;  %v2297_v21 = vpop.permute.xlu0 %2296  ;;  %v8490_v15 = vmax.f32 %v2367_v36, 0.0  ;;  %v2365_v23 = vadd.f32 %v11134_v40, %v2269_v19 }
 0x8e0   :  { %v8466_v45 = vmax.f32 %v2368_v31, 0.0  ;;  %v2369_v44 = vadd.f32 %v8280_v14, %v2273_v9  ;;  %v8480_v14 = vmax.f32 %v2366_v46, 0.0  ;;  %v2266_v7 = vmul.f32 %v11133_v37, %v2170_v4  ;;  %v6757_v1 = vpop.eup %6756  ;;  %v11141_v4 = vld [vmem:[#allocation19_spill] sm:$0xff] }
 0x8e1   :  { %v2267_v52 = vmul.f32 %v11135_v28, %v2171_v42  ;;  %v2168_v57 = vmul.f32 %v6753_v56, %v2120_v0  ;;  %v2169_v24 = vmul.f32 %v6755_v53, %v2121_v25  ;;  %v8497_v61 = vmax.f32 %v2364_v51, 0.0  ;;  %v6759_v12 = vpop.eup %6758  ;;  %v2181_v36 = vpop.permute.xlu1 %2180 }
 0x8e2   :  { %2430 = vrot.lane.b32.xlu1 %v8466_v45, %s6888_s26  ;;  %v8473_v39 = vmax.f32 %v2369_v44, 0.0  ;;  %v2362_v8 = vadd.f32 %v8407_v22, %v2266_v7  ;;  %v2118_v60 = vsub.f32 %v11136_v59, %v8389_v17  ;;  %v8504_v35 = vmax.f32 %v2365_v23, 0.0  ;;  %v6761_v63 = vpop.eup %6760  ;;  %v1608_v59 = vld [vmem:[%s10983_s14 + $0x78] sm:$0xff] }
 0x8e3   :  { %v2264_v13 = vmul.f32 %v8393_v2, %v2168_v57  ;;  %v2363_v22 = vadd.f32 %v11137_v54, %v2267_v52  ;;  %v2119_v31 = vsub.f32 %v11138_v10, %v8399_v11  ;;  %v2292_v9 = vpop.permute.xlu0 %2291  ;;  %v2265_v20 = vmul.f32 %v11139_v29, %v2169_v24  ;;  %v11140_v2 = vld [vmem:[#allocation18_spill] sm:$0xff]  ;;  %v6763_v44 = vpop.eup %6762  ;;  %v1623_v54 = vld [vmem:[%s10984_s15 + $0x70] sm:$0xff]  ;;  %v1604_v29 = vld [vmem:[%s10983_s14 + $0x58] sm:$0xff] }
 0x8e4   :  { %2432 = vrot.lane.b32.xlu0 %v8473_v39, %s6888_s26  ;;  %5978 = vmatprep.subr.mxu0 %v8473_v39  ;;  %v8509_v16 = vmax.f32 %v2362_v8, 0.0  ;;  %v2166_v58 = vmul.f32 %v6757_v1, %v2118_v60  ;;  %v2116_v34 = vsub.f32 %v11140_v2, %v8402_v3  ;;  %v1546_v1 = vld [vmem:[%s10982_s13 + $0x8] sm:$0xff]  ;;  %v1656_v60 = vld [vmem:[%s10986_s17 + $0x78] sm:$0xff]  ;;  %v1605_v10 = vld [vmem:[%s10983_s14 + $0x60] sm:$0xff] }
 0x8e5   :  { %v2360_v17 = vadd.f32 %v8445_v18, %v2264_v13  ;;  %v2167_v46 = vmul.f32 %v6759_v12, %v2119_v31  ;;  %v2361_v11 = vadd.f32 %v8423_v48, %v2265_v20  ;;  %v8521_v50 = vmax.f32 %v2363_v22, 0.0  ;;  %v11142_v48 = vld [vmem:[#allocation16_spill] sm:$0xff]  ;;  %v2277_v7 = vpop.permute.xlu1 %2276  ;;  %2626 = vmatprep.mubr.f32.mxu0 %v1546_v1  ;;  %v1606_v22 = vld [vmem:[%s10983_s14 + $0x68] sm:$0xff] }
 0x8e6   :  { %2426 = vrot.lane.b32.xlu1 %v8480_v14, %s6888_s26  ;;  %v2262_v6 = vmul.f32 %v8436_v38, %v2166_v58  ;;  %v2117_v18 = vsub.f32 %v11141_v4, %v8410_v33  ;;  %v2164_v3 = vmul.f32 %v6761_v63, %v2116_v34  ;;  %v6765_v38 = vpop.eup %6764  ;;  %v2114_v56 = vsub.f32 %v11142_v48, %v8418_v55  ;;  %v1607_v12 = vld [vmem:[%s10983_s14 + $0x70] sm:$0xff]  ;;  %v1624_v13 = vld [vmem:[%s10984_s15 + $0x78] sm:$0xff]  ;;  %v1622_v63 = vld [vmem:[%s10984_s15 + $0x68] sm:$0xff] }
 0x8e7   :  { %v2263_v27 = vmul.f32 %v8415_v43, %v2167_v46  ;;  %v8526_v19 = vmax.f32 %v2360_v17, 0.0  ;;  %v2287_v41 = vpop.permute.xlu0 %2286  ;;  %v6767_v51 = vpop.eup %6766  ;;  %v8532_v53 = vmax.f32 %v2361_v11, 0.0  ;;  %v11143_v43 = vld [vmem:[#allocation17_spill] sm:$0xff]  ;;  %v1655_v31 = vld [vmem:[%s10986_s17 + $0x70] sm:$0xff]  ;;  %v1602_v46 = vld [vmem:[%s10983_s14 + $0x48] sm:$0xff] }
 0x8e8   :  { %2428 = vrot.lane.b32.xlu0 %v8490_v15, %s6888_s26  ;;  %v2358_v42 = vadd.f32 %v2297_v21, %v2262_v6  ;;  %v2165_v62 = vmul.f32 %v6763_v44, %v2117_v18  ;;  %v2260_v33 = vmul.f32 %v2191_v26, %v2164_v3  ;;  %v2115_v49 = vsub.f32 %v11143_v43, %v8426_v47  ;;  %v1621_v58 = vld [vmem:[%s10984_s15 + $0x60] sm:$0xff]  ;;  %v1603_v20 = vld [vmem:[%s10983_s14 + $0x50] sm:$0xff]  ;;  %v1652_v2 = vld [vmem:[%s10986_s17 + $0x58] sm:$0xff] }
 0x8e9   :  { %v2359_v0 = vadd.f32 %v8464_v5, %v2263_v27  ;;  %v2162_v37 = vmul.f32 %v6765_v38, %v2114_v56  ;;  %v1653_v17 = vld [vmem:[%s10986_s17 + $0x60] sm:$0xff]  ;;  %v1620_v34 = vld [vmem:[%s10984_s15 + $0x58] sm:$0xff]  ;;  %v1619_v44 = vld [vmem:[%s10984_s15 + $0x50] sm:$0xff] }
 0x8ea   :  { %2422 = vrot.lane.b32.xlu1 %v8497_v61, %s6888_s26  ;;  %v2261_v25 = vmul.f32 %v8455_v30, %v2165_v62  ;;  %v8540_v21 = vmax.f32 %v2358_v42, 0.0  ;;  %v2356_v55 = vadd.f32 %v2287_v41, %v2260_v33  ;;  %v2163_v26 = vmul.f32 %v6767_v51, %v2115_v49  ;;  %v1601_v6 = vld [vmem:[%s10983_s14 + $0x40] sm:$0xff]  ;;  %v1651_v11 = vld [vmem:[%s10986_s17 + $0x50] sm:$0xff]  ;;  %v1650_v4 = vld [vmem:[%s10986_s17 + $0x48] sm:$0xff] }
 0x8eb   :  { %v8544_v40 = vmax.f32 %v2359_v0, 0.0  ;;  %v2258_v5 = vmul.f32 %v2181_v36, %v2162_v37  ;;  %v2282_v28 = vpop.permute.xlu0 %2281  ;;  %v1618_v18 = vld [vmem:[%s10984_s15 + $0x48] sm:$0xff]  ;;  %v1617_v36 = vld [vmem:[%s10984_s15 + $0x40] sm:$0xff]  ;;  %v1600_v27 = vld [vmem:[%s10983_s14 + $0x38] sm:$0xff] }
 0x8ec   :  { %2424 = vrot.lane.b32.xlu0 %v8504_v35, %s6888_s26  ;;  %v2357_v23 = vadd.f32 %v2292_v9, %v2261_v25  ;;  %v2259_v47 = vmul.f32 %v2186_v32, %v2163_v26  ;;  %v8548_v30 = vmax.f32 %v2356_v55, 0.0  ;;  %v1654_v9 = vld [vmem:[%s10986_s17 + $0x68] sm:$0xff]  ;;  %v1599_v3 = vld [vmem:[%s10983_s14 + $0x30] sm:$0xff]  ;;  %v1649_v42 = vld [vmem:[%s10986_s17 + $0x40] sm:$0xff] }
 0x8ed   :  { %v2354_v52 = vadd.f32 %v2277_v7, %v2258_v5  ;;  %v1648_v38 = vld [vmem:[%s10986_s17 + $0x38] sm:$0xff]  ;;  %v1615_v33 = vld [vmem:[%s10984_s15 + $0x30] sm:$0xff]  ;;  %v1598_v25 = vld [vmem:[%s10983_s14 + $0x28] sm:$0xff] }
 0x8ee   :  { %2418 = vrot.lane.b32.xlu1 %v8509_v16, %s6888_s26  ;;  %v8555_v57 = vmax.f32 %v2357_v23, 0.0  ;;  %v2355_v8 = vadd.f32 %v2282_v28, %v2259_v47  ;;  %v1616_v56 = vld [vmem:[%s10984_s15 + $0x38] sm:$0xff]  ;;  %v11144_v0 = vld [vmem:[#allocation7_spill] sm:$0xff] }
 0x8ef   :  { %v8559_v24 = vmax.f32 %v2354_v52, 0.0 }
 0x8f0   :  { %2420 = vrot.lane.b32.xlu0 %v8521_v50, %s6888_s26  ;;  %v8563_v32 = vmax.f32 %v2355_v8, 0.0 }
 0x8f2   :  { %2414 = vrot.lane.b32.xlu1 %v8526_v19, %s6888_s26 }
 0x8f4   :  { %2416 = vrot.lane.b32.xlu0 %v8532_v53, %s6888_s26 }
 0x8f6   :  { %2410 = vrot.lane.b32.xlu1 %v8540_v21, %s6888_s26 }
 0x8f8   :  { %2412 = vrot.lane.b32.xlu0 %v8544_v40, %s6888_s26 }
 0x8fa   :  { %2406 = vrot.lane.b32.xlu1 %v8548_v30, %s6888_s26 }
 0x8fc   :  { %2408 = vrot.lane.b32.xlu0 %v8555_v57, %s6888_s26 }
 0x8fe   :  { %2402 = vrot.lane.b32.xlu1 %v8559_v24, %s6888_s26 }
 0x900   :  { %2404 = vrot.lane.b32.xlu0 %v8563_v32, %s6888_s26 }
 0x902   :  { %2510 = vrot.lane.b32.xlu1 %v8466_v45, %s6886_s0 }
 0x904   :  { %2512 = vrot.lane.b32.xlu0 %v8473_v39, %s6886_s0  ;;  %v1547_v39 = vld [vmem:[%s10982_s13 + $0x10] sm:$0xff] }
 0x905   :  { %6437 = vmatprep.mubr.f32.mxu1 %v1547_v39 }
 0x906   :  { %2506 = vrot.lane.b32.xlu1 %v8480_v14, %s6886_s0 }
 0x908   :  { %2508 = vrot.lane.b32.xlu0 %v8490_v15, %s6886_s0 }
 0x90a   :  { %2502 = vrot.lane.b32.xlu1 %v8497_v61, %s6886_s0 }
 0x90c   :  { %2504 = vrot.lane.b32.xlu0 %v8504_v35, %s6886_s0 }
 0x90e   :  { %2498 = vrot.lane.b32.xlu1 %v8509_v16, %s6886_s0 }
 0x910   :  { %2500 = vrot.lane.b32.xlu0 %v8521_v50, %s6886_s0 }
 0x912   :  { %2494 = vrot.lane.b32.xlu1 %v8526_v19, %s6886_s0 }
 0x914   :  { %2496 = vrot.lane.b32.xlu0 %v8532_v53, %s6886_s0 }
 0x916   :  { %2490 = vrot.lane.b32.xlu1 %v8540_v21, %s6886_s0 }
 0x918   :  { %2492 = vrot.lane.b32.xlu0 %v8544_v40, %s6886_s0 }
 0x91a   :  { %2486 = vrot.lane.b32.xlu1 %v8548_v30, %s6886_s0 }
 0x91c   :  { %2488 = vrot.lane.b32.xlu0 %v8555_v57, %s6886_s0 }
 0x91e   :  { %2482 = vrot.lane.b32.xlu1 %v8559_v24, %s6886_s0 }
 0x920   :  { %2484 = vrot.lane.b32.xlu0 %v8563_v32, %s6886_s0 }
 0x922   :  { %3164 = vperm.xlu1 %6686, %v1607_v12  }
 0x924   :  { %3169 = vperm.xlu0 %6687, %v1608_v59  }
 0x926   :  { %3361 = vperm.xlu1 %6686, %v1656_v60  }
 0x928   :  { %3265 = vperm.xlu0 %6687, %v1624_v13  }
 0x92a   :  { %3260 = vperm.xlu1 %6686, %v1623_v54  }
 0x92c   :  { %3159 = vperm.xlu0 %6687, %v1606_v22  }
 0x92e   :  { %3154 = vperm.xlu1 %6686, %v1605_v10  }
 0x930   :  { %3356 = vperm.xlu0 %6687, %v1655_v31  }
 0x932   :  { %3351 = vperm.xlu1 %6686, %v1654_v9  }
 0x934   :  { %3255 = vperm.xlu0 %6687, %v1622_v63  }
 0x936   :  { %3250 = vperm.xlu1 %6686, %v1621_v58  }
 0x938   :  { %3149 = vperm.xlu0 %6687, %v1604_v29  }
 0x93a   :  { %3144 = vperm.xlu1 %6686, %v1603_v20  }
 0x93c   :  { %3346 = vperm.xlu0 %6687, %v1653_v17  }
 0x93e   :  { %3341 = vperm.xlu1 %6686, %v1652_v2  }
 0x940   :  { %3245 = vperm.xlu0 %6687, %v1620_v34  }
 0x942   :  { %3240 = vperm.xlu1 %6686, %v1619_v44  }
 0x944   :  { %3139 = vperm.xlu0 %6687, %v1602_v46  }
 0x946   :  { %3134 = vperm.xlu1 %6686, %v1601_v6  }
 0x948   :  { %3336 = vperm.xlu0 %6687, %v1651_v11  }
 0x94a   :  { %3331 = vperm.xlu1 %6686, %v1650_v4  }
 0x94c   :  { %3235 = vperm.xlu0 %6687, %v1618_v18  }
 0x94e   :  { %3230 = vperm.xlu1 %6686, %v1617_v36  }
 0x950   :  { %3129 = vperm.xlu0 %6687, %v1600_v27  }
 0x952   :  { %3124 = vperm.xlu1 %6686, %v1599_v3  }
 0x954   :  { %3326 = vperm.xlu0 %6687, %v1649_v42   ;;  %v2431_v48 = vpop.permute.xlu1 %2430  ;;  %v1549_v42 = vld [vmem:[%s10982_s13 + $0x20] sm:$0xff] }
 0x955   :  { %v2464_v51 = vsel %vm132_vm3, 0.0, %v2431_v48 }
 0x956   :  { %v2433_v41 = vpop.permute.xlu0 %2432  ;;  %3321 = vperm.xlu1 %6686, %v1648_v38   ;;  %v2480_v37 = vmul.f32 %v11144_v0, %v2464_v51 }
 0x957   :  { %v2465_v62 = vsel %vm132_vm3, 0.0, %v2433_v41  ;;  %v1548_v41 = vld [vmem:[%s10982_s13 + $0x18] sm:$0xff] }
 0x958   :  { %v2481_v43 = vmul.f32 %v11144_v0, %v2465_v62  ;;  %3225 = vperm.xlu0 %6687, %v1616_v56   ;;  %v2427_v49 = vpop.permute.xlu1 %2426 }
 0x959   :  { %v2462_v7 = vsel %vm132_vm3, 0.0, %v2427_v49 }
 0x95a   :  { %5979 = vmatpush3.msra.mxu0 %v2481_v43  ;;  %v2429_v55 = vpop.permute.xlu0 %2428  ;;  %3220 = vperm.xlu1 %6686, %v1615_v33   ;;  %v2478_v28 = vmul.f32 %v11144_v0, %v2462_v7  ;;  %v11148_v43 = vld [vmem:[#allocation11_spill] sm:$0xff] }
 0x95b   :  { %v2463_v26 = vsel %vm132_vm3, 0.0, %v2429_v55  ;;  %5980 = vmatprep.subr.mxu0 %v8466_v45 }
 0x95c   :  { %v2479_v5 = vmul.f32 %v11144_v0, %v2463_v26  ;;  %3119 = vperm.xlu0 %6687, %v1598_v25   ;;  %5981 = vmatpush3.msra.mxu0 %v2480_v37  ;;  %v2423_v23 = vpop.permute.xlu1 %2422  ;;  %v1552_v25 = vld [vmem:[%s10982_s13 + $0x38] sm:$0xff]  ;;  %v11149_v26 = vld [vmem:[#allocation10_spill] sm:$0xff] }
 0x95d   :  { %5982 = vmatprep.subr.mxu0 %v8490_v15  ;;  %v2460_v52 = vsel %vm132_vm3, 0.0, %v2423_v23  ;;  %v1551_v23 = vld [vmem:[%s10982_s13 + $0x30] sm:$0xff] }
 0x95e   :  { %v2425_v47 = vpop.permute.xlu0 %2424  ;;  %5983 = vmatpush3.msra.mxu0 %v2479_v5  ;;  %v2476_v39 = vmul.f32 %v11144_v0, %v2460_v52  ;;  %v11150_v52 = vld [vmem:[#allocation13_spill] sm:$0xff] }
 0x95f   :  { %v2461_v1 = vsel %vm132_vm3, 0.0, %v2425_v47  ;;  %5984 = vmatprep.subr.mxu0 %v8480_v14 }
 0x960   :  { %v2477_v8 = vmul.f32 %v11144_v0, %v2461_v1  ;;  %5985 = vmatpush3.msra.mxu0 %v2478_v28  ;;  %v2419_v45 = vpop.permute.xlu1 %2418 }
 0x961   :  { %5986 = vmatprep.subr.mxu0 %v8504_v35  ;;  %v2458_v15 = vsel %vm132_vm3, 0.0, %v2419_v45 }
 0x962   :  { %v2421_v12 = vpop.permute.xlu0 %2420  ;;  %5987 = vmatpush3.msra.mxu0 %v2477_v8  ;;  %v2474_v13 = vmul.f32 %v11144_v0, %v2458_v15  ;;  %v1555_v8 = vld [vmem:[%s10982_s13 + $0x50] sm:$0xff] }
 0x963   :  { %v2459_v59 = vsel %vm132_vm3, 0.0, %v2421_v12  ;;  %5988 = vmatprep.subr.mxu0 %v8497_v61  ;;  %v11151_v15 = vld [vmem:[#allocation12_spill] sm:$0xff] }
 0x964   :  { %v2475_v60 = vmul.f32 %v11144_v0, %v2459_v59  ;;  %5989 = vmatpush3.msra.mxu0 %v2476_v39  ;;  %v2415_v14 = vpop.permute.xlu1 %2414  ;;  %v1554_v59 = vld [vmem:[%s10982_s13 + $0x48] sm:$0xff] }
 0x965   :  { %5990 = vmatprep.subr.mxu0 %v8521_v50  ;;  %v2456_v35 = vsel %vm132_vm3, 0.0, %v2415_v14 }
 0x966   :  { %v2417_v54 = vpop.permute.xlu0 %2416  ;;  %5991 = vmatpush3.msra.mxu0 %v2475_v60  ;;  %v2472_v31 = vmul.f32 %v11144_v0, %v2456_v35  ;;  %v1558_v35 = vld [vmem:[%s10982_s13 + $0x68] sm:$0xff] }
 0x967   :  { %v2457_v22 = vsel %vm132_vm3, 0.0, %v2417_v54  ;;  %5992 = vmatprep.subr.mxu0 %v8509_v16  ;;  %v11152_v54 = vld [vmem:[#allocation15_spill] sm:$0xff] }
 0x968   :  { %v2473_v10 = vmul.f32 %v11144_v0, %v2457_v22  ;;  %5993 = vmatpush3.msra.mxu0 %v2474_v13  ;;  %v2411_v61 = vpop.permute.xlu1 %2410 }
 0x969   :  { %5994 = vmatprep.subr.mxu0 %v8532_v53  ;;  %v2454_v50 = vsel %vm132_vm3, 0.0, %v2411_v61 }
 0x96a   :  { %v2413_v9 = vpop.permute.xlu0 %2412  ;;  %5995 = vmatpush3.msra.mxu0 %v2473_v10  ;;  %v2470_v29 = vmul.f32 %v11144_v0, %v2454_v50  ;;  %v1557_v50 = vld [vmem:[%s10982_s13 + $0x60] sm:$0xff] }
 0x96b   :  { %v2455_v63 = vsel %vm132_vm3, 0.0, %v2413_v9  ;;  %5996 = vmatprep.subr.mxu0 %v8526_v19  ;;  %v11153_v9 = vld [vmem:[#allocation14_spill] sm:$0xff] }
 0x96c   :  { %v2471_v58 = vmul.f32 %v11144_v0, %v2455_v63  ;;  %5997 = vmatpush3.msra.mxu0 %v2472_v31  ;;  %v2407_v16 = vpop.permute.xlu1 %2406 }
 0x96d   :  { %5998 = vmatprep.subr.mxu0 %v8544_v40  ;;  %v2452_v53 = vsel %vm132_vm3, 0.0, %v2407_v16  ;;  %v1561_v16 = vld [vmem:[%s10982_s13 + $0x80] sm:$0xff] }
 0x96e   :  { %v2409_v20 = vpop.permute.xlu0 %2408  ;;  %5999 = vmatpush3.msra.mxu0 %v2471_v58  ;;  %v2468_v34 = vmul.f32 %v11144_v0, %v2452_v53 }
 0x96f   :  { %v2453_v17 = vsel %vm132_vm3, 0.0, %v2409_v20  ;;  %6000 = vmatprep.subr.mxu0 %v8540_v21 }
 0x970   :  { %v2469_v2 = vmul.f32 %v11144_v0, %v2453_v17  ;;  %6001 = vmatpush3.msra.mxu0 %v2470_v29  ;;  %v2403_v19 = vpop.permute.xlu1 %2402 }
 0x971   :  { %6002 = vmatprep.subr.mxu0 %v8555_v57  ;;  %v2450_v40 = vsel %vm132_vm3, 0.0, %v2403_v19  ;;  %v1545_v57 = vld [vmem:[%s10982_s13] sm:$0xff] }
 0x972   :  { %v2405_v44 = vpop.permute.xlu0 %2404  ;;  %6003 = vmatpush3.msra.mxu0 %v2469_v2  ;;  %v2466_v11 = vmul.f32 %v11144_v0, %v2450_v40  ;;  %v1560_v2 = vld [vmem:[%s10982_s13 + $0x78] sm:$0xff] }
 0x973   :  { %v2451_v46 = vsel %vm132_vm3, 0.0, %v2405_v44  ;;  %6004 = vmatprep.subr.mxu0 %v8548_v30  ;;  %v11145_v30 = vld [vmem:[#allocation6_spill] sm:$0xff]  ;;  %v1564_v44 = vld [vmem:[%s10982_s13 + $0x98] sm:$0xff] }
 0x974   :  { %v2467_v6 = vmul.f32 %v11144_v0, %v2451_v46  ;;  %6005 = vmatpush3.msra.mxu0 %v2468_v34  ;;  %v2511_v21 = vpop.permute.xlu1 %2510 }
 0x975   :  { %6006 = vmatprep.subr.mxu0 %v8563_v32  ;;  %v2544_v18 = vsel %vm148_vm2, %v2511_v21, 0.0  ;;  %v11146_v32 = vld [vmem:[#allocation9_spill] sm:$0xff]  ;;  %v1563_v21 = vld [vmem:[%s10982_s13 + $0x90] sm:$0xff] }
 0x976   :  { %v2513_v4 = vpop.permute.xlu0 %2512  ;;  %6007 = vmatpush3.msra.mxu0 %v2467_v6  ;;  %v2560_v38 = vmul.f32 %v11145_v30, %v2544_v18  ;;  %v1567_v18 = vld [vmem:[%s10982_s13 + $0xb0] sm:$0xff] }
 0x977   :  { %v2545_v36 = vsel %vm148_vm2, %v2513_v4, 0.0  ;;  %6008 = vmatprep.subr.mxu0 %v8559_v24  ;;  %v11147_v24 = vld [vmem:[#allocation8_spill] sm:$0xff] }
 0x978   :  { %v2561_v27 = vmul.f32 %v11145_v30, %v2545_v36  ;;  %6009 = vmatpush3.msra.mxu0 %v2466_v11  ;;  %v2507_v3 = vpop.permute.xlu1 %2506 }
 0x979   :  { %2627 = vmatmul.mubr.f32.vlgmr.msra.gmra.mxu0 %v1545_v57  ;;  %6461 = vmatprep.subr.mxu0 %v11146_v32  ;;  %v2542_v51 = vsel %vm148_vm2, %v2507_v3, 0.0 }
 0x97a   :  { %6405 = vmatprep.subr.mxu1 %v2561_v27  ;;  %v2509_v48 = vpop.permute.xlu0 %2508  ;;  %6462 = vmatpush3.msra.mxu0 %v11146_v32  ;;  %v2558_v37 = vmul.f32 %v11145_v30, %v2542_v51  ;;  %v1566_v32 = vld [vmem:[%s10982_s13 + $0xa8] sm:$0xff]  ;;  %v1572_v51 = vld [vmem:[%s10982_s13 + $0xd8] sm:$0xff] }
 0x97b   :  { %v2543_v56 = vsel %vm148_vm2, %v2509_v48, 0.0  ;;  %6406 = vmatpush3.msra.mxu1 %v2561_v27  ;;  %6463 = vmatprep.subr.mxu0 %v11147_v24  ;;  %v1569_v48 = vld [vmem:[%s10982_s13 + $0xc0] sm:$0xff] }
 0x97c   :  { %v2559_v62 = vmul.f32 %v11145_v30, %v2543_v56  ;;  %2631 = vmatprep.mubr.f32.mxu0 %v1549_v42  ;;  %6407 = vmatprep.subr.mxu1 %v2560_v38  ;;  %v2503_v33 = vpop.permute.xlu1 %2502  ;;  %v1570_v42 = vld [vmem:[%s10982_s13 + $0xc8] sm:$0xff] }
 0x97d   :  { %6464 = vmatpush3.msra.mxu0 %v11147_v24  ;;  %6408 = vmatpush3.msra.mxu1 %v2560_v38  ;;  %v2540_v28 = vsel %vm148_vm2, %v2503_v33, 0.0  ;;  %v1550_v56 = vld [vmem:[%s10982_s13 + $0x28] sm:$0xff]  ;;  %v1573_v24 = vld [vmem:[%s10982_s13 + $0xe0] sm:$0xff]  ;;  %v1576_v33 = vld [vmem:[%s10982_s13 + $0xf8] sm:$0xff] }
 0x97e   :  { %2632 = vmatmul.mubr.f32.gmra.mxu0 %v1548_v41  ;;  %6465 = vmatprep.subr.mxu0 %v11148_v43  ;;  %v2505_v49 = vpop.permute.xlu0 %2504  ;;  %v2556_v45 = vmul.f32 %v11145_v30, %v2540_v28  ;;  %v1553_v41 = vld [vmem:[%s10982_s13 + $0x40] sm:$0xff] }
 0x97f   :  { %v2541_v55 = vsel %vm148_vm2, %v2505_v49, 0.0  ;;  %6409 = vmatprep.subr.mxu1 %v2559_v62  ;;  %6466 = vmatpush3.msra.mxu0 %v11148_v43  ;;  %v1559_v43 = vld [vmem:[%s10982_s13 + $0x70] sm:$0xff]  ;;  %v1581_v28 = vld [vmem:[%s10982_s13 + $0x120] sm:$0xff] }
 0x980   :  { %v2557_v7 = vmul.f32 %v11145_v30, %v2541_v55  ;;  %6410 = vmatpush3.msra.mxu1 %v2559_v62  ;;  %6467 = vmatprep.subr.mxu0 %v11149_v26  ;;  %v2499_v5 = vpop.permute.xlu1 %2498  ;;  %v1556_v62 = vld [vmem:[%s10982_s13 + $0x58] sm:$0xff]  ;;  %v1575_v49 = vld [vmem:[%s10982_s13 + $0xf0] sm:$0xff]  ;;  %v1565_v55 = vld [vmem:[%s10982_s13 + $0xa0] sm:$0xff] }
 0x981   :  { %2636 = vmatprep.mubr.f32.mxu0 %v1552_v25  ;;  %6411 = vmatprep.subr.mxu1 %v2558_v37  ;;  %v2538_v60 = vsel %vm148_vm2, %v2499_v5, 0.0  ;;  %v1562_v25 = vld [vmem:[%s10982_s13 + $0x88] sm:$0xff] }
 0x982   :  { %6468 = vmatpush3.msra.mxu0 %v11149_v26  ;;  %6412 = vmatpush3.msra.mxu1 %v2558_v37  ;;  %v2501_v47 = vpop.permute.xlu0 %2500  ;;  %v2554_v10 = vmul.f32 %v11145_v30, %v2538_v60  ;;  %v1579_v37 = vld [vmem:[%s10982_s13 + $0x110] sm:$0xff]  ;;  %v1568_v26 = vld [vmem:[%s10982_s13 + $0xb8] sm:$0xff]  ;;  %v1582_v5 = vld [vmem:[%s10982_s13 + $0x128] sm:$0xff] }
 0x983   :  { %2637 = vmatmul.mubr.f32.gmra.mxu0 %v1551_v23  ;;  %6469 = vmatprep.subr.mxu0 %v11150_v52  ;;  %v2539_v1 = vsel %vm148_vm2, %v2501_v47, 0.0  ;;  %v1571_v23 = vld [vmem:[%s10982_s13 + $0xd0] sm:$0xff]  ;;  %v1574_v47 = vld [vmem:[%s10982_s13 + $0xe8] sm:$0xff] }
 0x984   :  { %6413 = vmatprep.subr.mxu1 %v2557_v7  ;;  %6470 = vmatpush3.msra.mxu0 %v11150_v52  ;;  %v2495_v39 = vpop.permute.xlu1 %2494  ;;  %v2555_v12 = vmul.f32 %v11145_v30, %v2539_v1  ;;  %v1585_v52 = vld [vmem:[%s10982_s13 + $0x140] sm:$0xff]  ;;  %v1591_v60 = vld [vmem:[%s10982_s13 + $0x170] sm:$0xff] }
 0x985   :  { %6414 = vmatpush3.msra.mxu1 %v2557_v7  ;;  %6471 = vmatprep.subr.mxu0 %v11151_v15  ;;  %v2536_v31 = vsel %vm148_vm2, %v2495_v39, 0.0  ;;  %v1578_v7 = vld [vmem:[%s10982_s13 + $0x108] sm:$0xff]  ;;  %v1577_v1 = vld [vmem:[%s10982_s13 + $0x100] sm:$0xff]  ;;  %v1588_v39 = vld [vmem:[%s10982_s13 + $0x158] sm:$0xff] }
 0x986   :  { %2641 = vmatprep.mubr.f32.mxu0 %v1555_v8  ;;  %6415 = vmatprep.subr.mxu1 %v2556_v45  ;;  %v2497_v14 = vpop.permute.xlu0 %2496  ;;  %v2552_v29 = vmul.f32 %v11145_v30, %v2536_v31  ;;  %v1584_v8 = vld [vmem:[%s10982_s13 + $0x138] sm:$0xff]  ;;  %v1629_v31 = vld [vmem:[%s10985_s16 + $0x20] sm:$0xff] }
 0x987   :  { %6472 = vmatpush3.msra.mxu0 %v11151_v15  ;;  %6416 = vmatpush3.msra.mxu1 %v2556_v45  ;;  %v2537_v13 = vsel %vm148_vm2, %v2497_v14, 0.0  ;;  %v1580_v45 = vld [vmem:[%s10982_s13 + $0x118] sm:$0xff]  ;;  %v1587_v15 = vld [vmem:[%s10982_s13 + $0x150] sm:$0xff]  ;;  %v1589_v14 = vld [vmem:[%s10982_s13 + $0x160] sm:$0xff] }
 0x988   :  { %2642 = vmatmul.mubr.f32.gmra.mxu0 %v1554_v59  ;;  %6473 = vmatprep.subr.mxu0 %v11152_v54  ;;  %v2491_v22 = vpop.permute.xlu1 %2490  ;;  %v2553_v61 = vmul.f32 %v11145_v30, %v2537_v13  ;;  %v1586_v59 = vld [vmem:[%s10982_s13 + $0x148] sm:$0xff] }
 0x989   :  { %6417 = vmatprep.subr.mxu1 %v2555_v12  ;;  %6474 = vmatpush3.msra.mxu0 %v11152_v54  ;;  %v2534_v17 = vsel %vm148_vm2, %v2491_v22, 0.0  ;;  %v1590_v13 = vld [vmem:[%s10982_s13 + $0x168] sm:$0xff]  ;;  %v1592_v54 = vld [vmem:[%s10982_s13 + $0x178] sm:$0xff] }
 0x98a   :  { %6418 = vmatpush3.msra.mxu1 %v2555_v12  ;;  %6475 = vmatprep.subr.mxu0 %v11153_v9  ;;  %v2493_v63 = vpop.permute.xlu0 %2492  ;;  %v2550_v40 = vmul.f32 %v11145_v30, %v2534_v17  ;;  %v1583_v12 = vld [vmem:[%s10982_s13 + $0x130] sm:$0xff]  ;;  %v1626_v22 = vld [vmem:[%s10985_s16 + $0x8] sm:$0xff] }
 0x98b   :  { %2646 = vmatprep.mubr.f32.mxu0 %v1558_v35  ;;  %6419 = vmatprep.subr.mxu1 %v2554_v10  ;;  %v2535_v58 = vsel %vm148_vm2, %v2493_v63, 0.0  ;;  %v1625_v35 = vld [vmem:[%s10985_s16] sm:$0xff]  ;;  %v1632_v63 = vld [vmem:[%s10985_s16 + $0x38] sm:$0xff]  ;;  %v1638_v17 = vld [vmem:[%s10985_s16 + $0x68] sm:$0xff] }
 0x98c   :  { %6476 = vmatpush3.msra.mxu0 %v11153_v9  ;;  %6420 = vmatpush3.msra.mxu1 %v2554_v10  ;;  %v2551_v20 = vmul.f32 %v11145_v30, %v2535_v58  ;;  %v2487_v53 = vpop.permute.xlu1 %2486  ;;  %v1627_v10 = vld [vmem:[%s10985_s16 + $0x10] sm:$0xff]  ;;  %v1630_v9 = vld [vmem:[%s10985_s16 + $0x28] sm:$0xff]  ;;  %v1633_v58 = vld [vmem:[%s10985_s16 + $0x40] sm:$0xff] }
 0x98d   :  { %2647 = vmatmul.mubr.f32.gmra.mxu0 %v1557_v50  ;;  %6421 = vmatprep.subr.mxu1 %v2553_v61  ;;  %v2532_v6 = vsel %vm148_vm2, %v2487_v53, 0.0  ;;  %v1631_v50 = vld [vmem:[%s10985_s16 + $0x30] sm:$0xff]  ;;  %v1637_v53 = vld [vmem:[%s10985_s16 + $0x60] sm:$0xff] }
 0x98e   :  { %6422 = vmatpush3.msra.mxu1 %v2553_v61  ;;  %2651 = vmatprep.mubr.f32.mxu0 %v1561_v16  ;;  %v2489_v19 = vpop.permute.xlu0 %2488  ;;  %v2548_v36 = vmul.f32 %v11145_v30, %v2532_v6  ;;  %v1628_v61 = vld [vmem:[%s10985_s16 + $0x18] sm:$0xff]  ;;  %v1634_v16 = vld [vmem:[%s10985_s16 + $0x48] sm:$0xff] }
 0x98f   :  { %6423 = vmatprep.subr.mxu1 %v2552_v29  ;;  %v2533_v34 = vsel %vm148_vm2, %v2489_v19, 0.0  ;;  %v1640_v19 = vld [vmem:[%s10985_s16 + $0x78] sm:$0xff] }
 0x990   :  { %6424 = vmatpush3.msra.mxu1 %v2552_v29  ;;  %v2549_v46 = vmul.f32 %v11145_v30, %v2533_v34  ;;  %v2483_v4 = vpop.permute.xlu1 %2482  ;;  %v1635_v29 = vld [vmem:[%s10985_s16 + $0x50] sm:$0xff] }
 0x991   :  { %2652 = vmatmul.mubr.f32.gmra.mxu0 %v1560_v2  ;;  %6425 = vmatprep.subr.mxu1 %v2551_v20  ;;  %v2530_v3 = vsel %vm148_vm2, %v2483_v4, 0.0  ;;  %v1639_v2 = vld [vmem:[%s10985_s16 + $0x70] sm:$0xff] }
 0x992   :  { %6426 = vmatpush3.msra.mxu1 %v2551_v20  ;;  %2656 = vmatprep.mubr.f32.mxu0 %v1564_v44  ;;  %v2485_v11 = vpop.permute.xlu0 %2484  ;;  %v2546_v38 = vmul.f32 %v11145_v30, %v2530_v3  ;;  %v1636_v20 = vld [vmem:[%s10985_s16 + $0x58] sm:$0xff] }
 0x993   :  { %6427 = vmatprep.subr.mxu1 %v2550_v40  ;;  %v2531_v57 = vsel %vm148_vm2, %v2485_v11, 0.0 }
 0x994   :  { %6428 = vmatpush3.msra.mxu1 %v2550_v40  ;;  %v2547_v27 = vmul.f32 %v11145_v30, %v2531_v57 }
 0x995   :  { %2657 = vmatmul.mubr.f32.gmra.mxu0 %v1563_v21  ;;  %6429 = vmatprep.subr.mxu1 %v2549_v46 }
 0x996   :  { %6430 = vmatpush3.msra.mxu1 %v2549_v46  ;;  %2661 = vmatprep.mubr.f32.mxu0 %v1567_v18 }
 0x997   :  { %6431 = vmatprep.subr.mxu1 %v2548_v36 }
 0x998   :  { %6432 = vmatpush3.msra.mxu1 %v2548_v36 }
 0x999   :  { %2662 = vmatmul.mubr.f32.gmra.mxu0 %v1566_v32  ;;  %6433 = vmatprep.subr.mxu1 %v2547_v27 }
 0x99a   :  { %6434 = vmatpush3.msra.mxu1 %v2547_v27  ;;  %2666 = vmatprep.mubr.f32.mxu0 %v1570_v42 }
 0x99b   :  { %6435 = vmatprep.subr.mxu1 %v2546_v38 }
 0x99c   :  { %6436 = vmatpush3.msra.mxu1 %v2546_v38 }
 0x99d   :  { %2667 = vmatmul.mubr.f32.gmra.mxu0 %v1569_v48  ;;  %6438 = vmatmul.mubr.f32.vlgmr.msra.gmra.mxu1 %v1550_v56 }
 0x99e   :  { %2671 = vmatprep.mubr.f32.mxu0 %v1573_v24  ;;  %6440 = vmatprep.mubr.f32.mxu1 %v1553_v41 }
 0x9a1   :  { %2672 = vmatmul.mubr.f32.gmra.mxu0 %v1572_v51  ;;  %6441 = vmatmul.mubr.f32.gmra.mxu1 %v1556_v62 }
 0x9a2   :  { %2676 = vmatprep.mubr.f32.mxu0 %v1576_v33  ;;  %6443 = vmatprep.mubr.f32.mxu1 %v1559_v43 }
 0x9a5   :  { %2677 = vmatmul.mubr.f32.gmra.mxu0 %v1575_v49  ;;  %6444 = vmatmul.mubr.f32.gmra.mxu1 %v1562_v25 }
 0x9a6   :  { %2681 = vmatprep.mubr.f32.mxu0 %v1579_v37  ;;  %6446 = vmatprep.mubr.f32.mxu1 %v1565_v55 }
 0x9a9   :  { %2682 = vmatmul.mubr.f32.gmra.mxu0 %v1578_v7  ;;  %6447 = vmatmul.mubr.f32.gmra.mxu1 %v1568_v26 }
 0x9aa   :  { %2686 = vmatprep.mubr.f32.mxu0 %v1582_v5  ;;  %6449 = vmatprep.mubr.f32.mxu1 %v1571_v23 }
 0x9ad   :  { %2687 = vmatmul.mubr.f32.gmra.mxu0 %v1581_v28  ;;  %6450 = vmatmul.mubr.f32.gmra.mxu1 %v1574_v47 }
 0x9ae   :  { %2691 = vmatprep.mubr.f32.mxu0 %v1585_v52  ;;  %6452 = vmatprep.mubr.f32.mxu1 %v1577_v1 }
 0x9b1   :  { %2692 = vmatmul.mubr.f32.gmra.mxu0 %v1584_v8  ;;  %6453 = vmatmul.mubr.f32.gmra.mxu1 %v1580_v45 }
 0x9b2   :  { %2696 = vmatprep.mubr.f32.mxu0 %v1588_v39  ;;  %6455 = vmatprep.mubr.f32.mxu1 %v1583_v12 }
 0x9b5   :  { %2697 = vmatmul.mubr.f32.gmra.mxu0 %v1587_v15  ;;  %6456 = vmatmul.mubr.f32.gmra.mxu1 %v1586_v59 }
 0x9b6   :  { %2701 = vmatprep.mubr.f32.mxu0 %v1591_v60  ;;  %6458 = vmatprep.mubr.f32.mxu1 %v1589_v14 }
 0x9b9   :  { %2702 = vmatmul.mubr.f32.gmra.mxu0 %v1590_v13  ;;  %6459 = vmatmul.mubr.f32.gmra.mxu1 %v1592_v54 }
 0x9ba   :  { %6477 = vmatprep.mubr.msk.f32.mxu0 %vm678_vm6, %v1625_v35 }
 0x9bd   :  { %6478 = vmatmul.mubr.msk.f32.vlgmr.msra.gmra.mxu0 %vm678_vm6, %v1626_v22 }
 0x9be   :  { %6480 = vmatprep.mubr.msk.f32.mxu0 %vm678_vm6, %v1627_v10 }
 0x9c1   :  { %6481 = vmatmul.mubr.msk.f32.gmra.mxu0 %vm678_vm6, %v1628_v61 }
 0x9c2   :  { %6483 = vmatprep.mubr.msk.f32.mxu0 %vm678_vm6, %v1629_v31 }
 0x9c5   :  { %6484 = vmatmul.mubr.msk.f32.gmra.mxu0 %vm678_vm6, %v1630_v9 }
 0x9c6   :  { %6486 = vmatprep.mubr.msk.f32.mxu0 %vm678_vm6, %v1631_v50 }
 0x9c9   :  { %6487 = vmatmul.mubr.msk.f32.gmra.mxu0 %vm678_vm6, %v1632_v63 }
 0x9ca   :  { %6489 = vmatprep.mubr.msk.f32.mxu0 %vm678_vm6, %v1633_v58 }
 0x9cd   :  { %6490 = vmatmul.mubr.msk.f32.gmra.mxu0 %vm678_vm6, %v1634_v16 }
 0x9ce   :  { %6492 = vmatprep.mubr.msk.f32.mxu0 %vm678_vm6, %v1635_v29 }
 0x9d1   :  { %6493 = vmatmul.mubr.msk.f32.gmra.mxu0 %vm678_vm6, %v1636_v20 }
 0x9d2   :  { %6495 = vmatprep.mubr.msk.f32.mxu0 %vm678_vm6, %v1637_v53 }
 0x9d5   :  { %6496 = vmatmul.mubr.msk.f32.gmra.mxu0 %vm678_vm6, %v1638_v17 }
 0x9d6   :  { %6498 = vmatprep.mubr.msk.f32.mxu0 %vm678_vm6, %v1639_v2 }
 0x9d9   :  { %6499 = vmatmul.mubr.msk.f32.gmra.mxu0 %vm678_vm6, %v1640_v19 }
 0xa39   :  { %v6010_v34 = vpop.f32.mrf.mxu0 }
 0xa3b   :  { %v6011_v44 = vpop.f32.mrf.mxu0 }
 0xa3c   :  { %v6012_v41 = vadd.f32 %v6011_v44, %v6010_v34 }
 0xa3e   :  { %v6013_v40 = vpop.f32.mrf.mxu0 }
 0xa40   :  { %v6014_v46 = vpop.f32.mrf.mxu0 }
 0xa41   :  { %v6015_v48 = vadd.f32 %v6014_v46, %v6013_v40 }
 0xa43   :  { %v6016_v6 = vpop.f32.mrf.mxu0 }
 0xa45   :  { %v6017_v21 = vpop.f32.mrf.mxu0 }
 0xa46   :  { %v6018_v37 = vadd.f32 %v6017_v21, %v6016_v6 }
 0xa48   :  { %v6019_v11 = vpop.f32.mrf.mxu0 }
 0xa4a   :  { %v6020_v4 = vpop.f32.mrf.mxu0 }
 0xa4b   :  { %v6021_v23 = vadd.f32 %v6020_v4, %v6019_v11 }
 0xa4d   :  { %v6022_v57 = vpop.f32.mrf.mxu0 }
 0xa4f   :  { %v6023_v18 = vpop.f32.mrf.mxu0 }
 0xa50   :  { %v6024_v39 = vadd.f32 %v6023_v18, %v6022_v57 }
 0xa51   :  { %v6025_v36 = vpop.f32.mrf.mxu0 }
 0xa53   :  { %v6026_v27 = vpop.f32.mrf.mxu0 }
 0xa54   :  { %v6027_v54 = vadd.f32 %v6026_v27, %v6025_v36 }
 0xa55   :  { %v6028_v3 = vpop.f32.mrf.mxu0 }
 0xa57   :  { %v6029_v32 = vpop.f32.mrf.mxu0 }
 0xa58   :  { %v6030_v50 = vadd.f32 %v6029_v32, %v6028_v3 }
 0xa59   :  { %v6031_v42 = vpop.f32.mrf.mxu0 }
 0xa5b   :  { %v6032_v38 = vpop.f32.mrf.mxu0 }
 0xa5c   :  { %v6033_v17 = vadd.f32 %v6032_v38, %v6031_v42 }
 0xa5d   :  { %v6034_v56 = vpop.f32.mrf.mxu0  ;;  %v6439_v24 = vpop.f32.mrf.mxu1 }
 0xa5e   :  { %v8991_v33 = vadd.f32 %v6439_v24, %v6015_v48 }
 0xa5f   :  { %v6035_v51 = vpop.f32.mrf.mxu0  ;;  %v2773_v62 = vpop.f32.mrf.mxu1 }
 0xa60   :  { %11154 = vst [vmem:[#allocation24_spill] sm:$0xff] %v8991_v33  ;;  %v8993_v43 = vadd.f32 %v6012_v41, %v2773_v62  ;;  %v2901_v52 = vmul.f32 %v8991_v33, %v8991_v33  ;;  %v2855_v45 = vsel %vm301_vm5, %v8991_v33, 0.0  ;;  %v6036_v6 = vadd.f32 %v6035_v51, %v6034_v56 }
 0xa61   :  { %v6037_v49 = vpop.f32.mrf.mxu0  ;;  %v6442_v25 = vpop.f32.mrf.mxu1 }
 0xa62   :  { %11155 = vst [vmem:[#allocation27_spill] sm:$0xff] %v8993_v43  ;;  %v2852_v55 = vsel %vm301_vm5, %v8993_v43, 0.0  ;;  %v2900_v7 = vmul.f32 %v8993_v43, %v8993_v43  ;;  %v9006_v12 = vadd.f32 %v6442_v25, %v6021_v23  ;;  %v2919_v15 = vsel %vm301_vm5, %v2901_v52, 0.0 }
 0xa63   :  { %v6038_v26 = vpop.f32.mrf.mxu0  ;;  %v2783_v5 = vpop.f32.mrf.mxu1  ;;  %2853 = vadd.xlane.f32.xlu0 %v2852_v55 }
 0xa64   :  { %v8999_v28 = vadd.f32 %v6018_v37, %v2783_v5  ;;  %v2916_v47 = vsel %vm301_vm5, %v2900_v7, 0.0  ;;  %11157 = vst [vmem:[#allocation23_spill] sm:$0xff] %v9006_v12  ;;  %v2903_v10 = vmul.f32 %v9006_v12, %v9006_v12  ;;  %v2861_v9 = vsel %vm301_vm5, %v9006_v12, 0.0 }
 0xa65   :  { %v6040_v1 = vpop.f32.mrf.mxu0  ;;  %2917 = vadd.xlane.f32.xlu1 %v2916_v47  ;;  %v6445_v8 = vpop.f32.mrf.mxu1  ;;  %v6039_v27 = vadd.f32 %v6038_v26, %v6037_v49 }
 0xa66   :  { %11156 = vst [vmem:[#allocation22_spill] sm:$0xff] %v8999_v28  ;;  %v2902_v59 = vmul.f32 %v8999_v28, %v8999_v28  ;;  %v2858_v13 = vsel %vm301_vm5, %v8999_v28, 0.0  ;;  %v9020_v63 = vadd.f32 %v6445_v8, %v6027_v54  ;;  %v2925_v58 = vsel %vm301_vm5, %v2903_v10, 0.0 }
 0xa67   :  { %2856 = vadd.xlane.f32.xlu0 %v2855_v45  ;;  %v6041_v60 = vpop.f32.mrf.mxu0  ;;  %v2793_v14 = vpop.f32.mrf.mxu1 }
 0xa68   :  { %v9013_v35 = vadd.f32 %v6024_v39, %v2793_v14  ;;  %v2922_v22 = vsel %vm301_vm5, %v2902_v59, 0.0  ;;  %11159 = vst [vmem:[#allocation25_spill] sm:$0xff] %v9020_v63  ;;  %v2905_v34 = vmul.f32 %v9020_v63, %v9020_v63  ;;  %v2867_v46 = vsel %vm301_vm5, %v9020_v63, 0.0 }
 0xa69   :  { %2920 = vadd.xlane.f32.xlu1 %v2919_v15  ;;  %v6043_v61 = vpop.f32.mrf.mxu0  ;;  %v6448_v31 = vpop.f32.mrf.mxu1  ;;  %v6042_v24 = vadd.f32 %v6041_v60, %v6040_v1 }
 0xa6a   :  { %11158 = vst [vmem:[#allocation28_spill] sm:$0xff] %v9013_v35  ;;  %v2904_v16 = vmul.f32 %v9013_v35, %v9013_v35  ;;  %v2864_v53 = vsel %vm301_vm5, %v9013_v35, 0.0  ;;  %v9034_v21 = vadd.f32 %v6448_v31, %v6033_v17  ;;  %v2931_v11 = vsel %vm301_vm5, %v2905_v34, 0.0 }
 0xa6b   :  { %2859 = vadd.xlane.f32.xlu0 %v2858_v13  ;;  %v6044_v29 = vpop.f32.mrf.mxu0  ;;  %v2803_v20 = vpop.f32.mrf.mxu1 }
 0xa6c   :  { %v9027_v2 = vadd.f32 %v6030_v50, %v2803_v20  ;;  %v2928_v19 = vsel %vm301_vm5, %v2904_v16, 0.0  ;;  %11161 = vst [vmem:[#allocation20_spill] sm:$0xff] %v9034_v21  ;;  %v2907_v42 = vmul.f32 %v9034_v21, %v9034_v21  ;;  %v2873_v56 = vsel %vm301_vm5, %v9034_v21, 0.0 }
 0xa6d   :  { %2923 = vadd.xlane.f32.xlu1 %v2922_v22  ;;  %v6046_v44 = vpop.f32.mrf.mxu0  ;;  %v6451_v40 = vpop.f32.mrf.mxu1  ;;  %v6045_v55 = vadd.f32 %v6044_v29, %v6043_v61 }
 0xa6e   :  { %11160 = vst [vmem:[#allocation26_spill] sm:$0xff] %v9027_v2  ;;  %v2906_v4 = vmul.f32 %v9027_v2, %v9027_v2  ;;  %v2870_v36 = vsel %vm301_vm5, %v9027_v2, 0.0  ;;  %v9048_v41 = vadd.f32 %v6451_v40, %v6039_v27  ;;  %v2937_v51 = vsel %vm301_vm5, %v2907_v42, 0.0  ;;  %v9088_v40 = vpop.permute.xlu1 %3164 }
 0xa6f   :  { %2862 = vadd.xlane.f32.xlu0 %v2861_v9  ;;  %v6047_v57 = vpop.f32.mrf.mxu0  ;;  %v2813_v18 = vpop.f32.mrf.mxu1 }
 0xa70   :  { %v9041_v3 = vadd.f32 %v6036_v6, %v2813_v18  ;;  %v2934_v32 = vsel %vm301_vm5, %v2906_v4, 0.0  ;;  %v2909_v5 = vmul.f32 %v9048_v41, %v9048_v41  ;;  %v2879_v52 = vsel %vm301_vm5, %v9048_v41, 0.0 }
 0xa71   :  { %2926 = vadd.xlane.f32.xlu1 %v2925_v58  ;;  %v6049_v38 = vpop.f32.mrf.mxu0  ;;  %v6454_v48 = vpop.f32.mrf.mxu1  ;;  %v6048_v1 = vadd.f32 %v6047_v57, %v6046_v44 }
 0xa72   :  { %v2908_v62 = vmul.f32 %v9041_v3, %v9041_v3  ;;  %v2876_v37 = vsel %vm301_vm5, %v9041_v3, 0.0  ;;  %v9062_v8 = vadd.f32 %v6454_v48, %v6045_v55  ;;  %v2943_v45 = vsel %vm301_vm5, %v2909_v5, 0.0  ;;  %v9103_v27 = vpop.permute.xlu1 %3361  ;;  %v1646_v5 = vld [vmem:[%s10986_s17 + $0x28] sm:$0xff] }
 0xa73   :  { %2865 = vadd.xlane.f32.xlu0 %v2864_v53  ;;  %v6050_v49 = vpop.f32.mrf.mxu0  ;;  %v2823_v25 = vpop.f32.mrf.mxu1 }
 0xa74   :  { %v9055_v7 = vadd.f32 %v6042_v24, %v2823_v25  ;;  %v2940_v26 = vsel %vm301_vm5, %v2908_v62, 0.0  ;;  %v6051_v14 = vadd.f32 %v6050_v49, %v6049_v38  ;;  %v2911_v22 = vmul.f32 %v9062_v8, %v9062_v8  ;;  %v9083_v53 = vpop.permute.xlu0 %3169 }
 0xa75   :  { %2929 = vadd.xlane.f32.xlu1 %v2928_v19  ;;  %v6052_v23 = vpop.f32.mrf.mxu0  ;;  %v6457_v47 = vpop.f32.mrf.mxu1  ;;  %v2885_v61 = vsel %vm301_vm5, %v9062_v8, 0.0 }
 0xa76   :  { %v2910_v39 = vmul.f32 %v9055_v7, %v9055_v7  ;;  %v2882_v60 = vsel %vm301_vm5, %v9055_v7, 0.0  ;;  %v9076_v31 = vadd.f32 %v6457_v47, %v6051_v14  ;;  %v2949_v9 = vsel %vm301_vm5, %v2911_v22, 0.0  ;;  %v9113_v24 = vpop.permute.xlu1 %3260  ;;  %v1614_v47 = vld [vmem:[%s10984_s15 + $0x28] sm:$0xff]  ;;  %v1644_v14 = vld [vmem:[%s10986_s17 + $0x18] sm:$0xff] }
 0xa77   :  { %2868 = vadd.xlane.f32.xlu0 %v2867_v46  ;;  %v6053_v15 = vpop.f32.mrf.mxu0  ;;  %v2833_v59 = vpop.f32.mrf.mxu1  ;;  %11162 = vst [vmem:[#allocation29_spill] sm:$0xff] %v9113_v24  ;;  %v1612_v22 = vld [vmem:[%s10984_s15 + $0x18] sm:$0xff] }
 0xa78   :  { %v9069_v13 = vadd.f32 %v6048_v1, %v2833_v59  ;;  %v2946_v54 = vsel %vm301_vm5, %v2910_v39, 0.0  ;;  %v6054_v17 = vadd.f32 %v6053_v15, %v6052_v23  ;;  %v2913_v34 = vmul.f32 %v9076_v31, %v9076_v31  ;;  %v9097_v57 = vpop.permute.xlu0 %3265  ;;  %v1596_v39 = vld [vmem:[%s10983_s14 + $0x18] sm:$0xff]  ;;  %v1595_v15 = vld [vmem:[%s10983_s14 + $0x10] sm:$0xff] }
 0xa79   :  { %2932 = vadd.xlane.f32.xlu1 %v2931_v11  ;;  %v6055_v10 = vpop.f32.mrf.mxu0  ;;  %v6460_v16 = vpop.f32.mrf.mxu1  ;;  %v2891_v6 = vsel %vm301_vm5, %v9076_v31, 0.0 }
 0xa7a   :  { %v2912_v50 = vmul.f32 %v9069_v13, %v9069_v13  ;;  %v2888_v20 = vsel %vm301_vm5, %v9069_v13, 0.0  ;;  %v2955_v4 = vsel %vm301_vm5, %v2913_v34, 0.0  ;;  %v9117_v62 = vpop.permute.xlu1 %3154  ;;  %v1641_v34 = vld [vmem:[%s10986_s17] sm:$0xff] }
 0xa7b   :  { %2871 = vadd.xlane.f32.xlu0 %v2870_v36  ;;  %v6056_v58 = vpop.f32.mrf.mxu0  ;;  %v2843_v44 = vpop.f32.mrf.mxu1 }
 0xa7c   :  { %v6057_v29 = vadd.f32 %v6056_v58, %v6055_v10  ;;  %v2952_v19 = vsel %vm301_vm5, %v2912_v50, 0.0  ;;  %v9094_v11 = vadd.f32 %v6054_v17, %v2843_v44  ;;  %v9110_v48 = vpop.permute.xlu0 %3159  ;;  %v1611_v10 = vld [vmem:[%s10984_s15 + $0x10] sm:$0xff]  ;;  %v1594_v50 = vld [vmem:[%s10983_s14 + $0x8] sm:$0xff]  ;;  %v1593_v58 = vld [vmem:[%s10983_s14] sm:$0xff] }
 0xa7d   :  { %2935 = vadd.xlane.f32.xlu1 %v2934_v32 }
 0xa7e   :  { %v9090_v46 = vadd.f32 %v6460_v16, %v6057_v29  ;;  %v2894_v32 = vsel %vm301_vm5, %v9094_v11, 0.0  ;;  %v2914_v42 = vmul.f32 %v9094_v11, %v9094_v11  ;;  %v9121_v25 = vpop.permute.xlu1 %3351  ;;  %v1643_v29 = vld [vmem:[%s10986_s17 + $0x10] sm:$0xff] }
 0xa7f   :  { %2874 = vadd.xlane.f32.xlu0 %v2873_v56 }
 0xa80   :  { %v2897_v18 = vsel %vm301_vm5, %v9090_v46, 0.0  ;;  %v2915_v36 = vmul.f32 %v9090_v46, %v9090_v46  ;;  %v2958_v56 = vsel %vm301_vm5, %v2914_v42, 0.0 }
 0xa81   :  { %2938 = vadd.xlane.f32.xlu1 %v2937_v51  ;;  %v9115_v51 = vpop.permute.xlu0 %3356 }
 0xa82   :  { %v2961_v38 = vsel %vm301_vm5, %v2915_v36, 0.0  ;;  %v9134_v23 = vpop.permute.xlu1 %3250 }
 0xa83   :  { %2877 = vadd.xlane.f32.xlu0 %v2876_v37  ;;  %v1597_v37 = vld [vmem:[%s10983_s14 + $0x20] sm:$0xff]  ;;  %11163 = vst [vmem:[#allocation21_spill] sm:$0xff] %v9134_v23 }
 0xa85   :  { %2941 = vadd.xlane.f32.xlu1 %v2940_v26  ;;  %v9119_v49 = vpop.permute.xlu0 %3255  ;;  %v1647_v26 = vld [vmem:[%s10986_s17 + $0x30] sm:$0xff] }
 0xa87   :  { %2880 = vadd.xlane.f32.xlu0 %v2879_v52  ;;  %v1613_v52 = vld [vmem:[%s10984_s15 + $0x20] sm:$0xff] }
 0xa89   :  { %2944 = vadd.xlane.f32.xlu1 %v2943_v45  ;;  %v9126_v55 = vpop.permute.xlu0 %3149  ;;  %v9144_v45 = vpop.permute.xlu1 %3144 }
 0xa8a   :  { %11165 = vst [vmem:[#allocation18_spill] sm:$0xff] %v9144_v45 }
 0xa8b   :  { %2883 = vadd.xlane.f32.xlu0 %v2882_v60  ;;  %v1645_v60 = vld [vmem:[%s10986_s17 + $0x20] sm:$0xff] }
 0xa8d   :  { %2947 = vadd.xlane.f32.xlu1 %v2946_v54  ;;  %v9142_v1 = vpop.permute.xlu0 %3346  ;;  %v9160_v54 = vpop.permute.xlu1 %3341 }
 0xa8e   :  { %11164 = vst [vmem:[#allocation30_spill] sm:$0xff] %v9142_v1  ;;  %11167 = vst [vmem:[#allocation16_spill] sm:$0xff] %v9160_v54 }
 0xa8f   :  { %2886 = vadd.xlane.f32.xlu0 %v2885_v61 }
 0xa91   :  { %2950 = vadd.xlane.f32.xlu1 %v2949_v9  ;;  %v9152_v59 = vpop.permute.xlu0 %3245  ;;  %v9170_v9 = vpop.permute.xlu1 %3240 }
 0xa92   :  { %11166 = vst [vmem:[#allocation19_spill] sm:$0xff] %v9152_v59  ;;  %11169 = vst [vmem:[#allocation9_spill] sm:$0xff] %v9170_v9 }
 0xa93   :  { %2889 = vadd.xlane.f32.xlu0 %v2888_v20  ;;  %v1642_v20 = vld [vmem:[%s10986_s17 + $0x8] sm:$0xff] }
 0xa95   :  { %2953 = vadd.xlane.f32.xlu1 %v2952_v19  ;;  %v9168_v61 = vpop.permute.xlu0 %3139  ;;  %v9186_v17 = vpop.permute.xlu1 %3134  ;;  %v1610_v19 = vld [vmem:[%s10984_s15 + $0x8] sm:$0xff] }
 0xa96   :  { %11168 = vst [vmem:[#allocation17_spill] sm:$0xff] %v9168_v61  ;;  %11171 = vst [vmem:[#allocation11_spill] sm:$0xff] %v9186_v17 }
 0xa97   :  { %2892 = vadd.xlane.f32.xlu0 %v2891_v6 }
 0xa99   :  { %2956 = vadd.xlane.f32.xlu1 %v2955_v4  ;;  %v9178_v16 = vpop.permute.xlu0 %3336  ;;  %v9196_v6 = vpop.permute.xlu1 %3331  ;;  %v1609_v4 = vld [vmem:[%s10984_s15] sm:$0xff] }
 0xa9a   :  { %11170 = vst [vmem:[#allocation8_spill] sm:$0xff] %v9178_v16  ;;  %11173 = vst [vmem:[#allocation13_spill] sm:$0xff] %v9196_v6 }
 0xa9b   :  { %2898 = vadd.xlane.f32.xlu0 %v2897_v18 }
 0xa9d   :  { %2895 = vadd.xlane.f32.xlu1 %v2894_v32  ;;  %v9194_v44 = vpop.permute.xlu0 %3235  ;;  %v9203_v36 = vpop.permute.xlu1 %3230 }
 0xa9e   :  { %11172 = vst [vmem:[#allocation10_spill] sm:$0xff] %v9194_v44  ;;  %11175 = vst [vmem:[#allocation15_spill] sm:$0xff] %v9203_v36 }
 0xa9f   :  { %2962 = vadd.xlane.f32.xlu0 %v2961_v38 }
 0xaa1   :  { %2959 = vadd.xlane.f32.xlu1 %v2958_v56  ;;  %v9201_v18 = vpop.permute.xlu0 %3129  ;;  %v9207_v42 = vpop.permute.xlu1 %3124 }
 0xaa2   :  { %11174 = vst [vmem:[#allocation12_spill] sm:$0xff] %v9201_v18  ;;  %11177 = vst [vmem:[#allocation31_spill] sm:$0xff] %v9207_v42 }
 0xaa5   :  { %v9205_v32 = vpop.permute.xlu0 %3326  ;;  %v9211_v56 = vpop.permute.xlu1 %3321 }
 0xaa6   :  { %11176 = vst [vmem:[#allocation14_spill] sm:$0xff] %v9205_v32  ;;  %11179 = vst [vmem:[#allocation33_spill] sm:$0xff] %v9211_v56 }
 0xaa9   :  { %v9209_v38 = vpop.permute.xlu0 %3225 }
 0xaaa   :  { %11178 = vst [vmem:[#allocation32_spill] sm:$0xff] %v9209_v38 }
 0xab2   :  { %3114 = vperm.xlu1 %6686, %v1597_v37   ;;  %v9213_v37 = vpop.permute.xlu0 %3119 }
 0xab3   :  { %11180 = vst [vmem:[#allocation34_spill] sm:$0xff] %v9213_v37 }
 0xab5   :  { %3316 = vperm.xlu0 %6687, %v1647_v26   ;;  %v9215_v26 = vpop.permute.xlu1 %3220 }
 0xab6   :  { %3311 = vperm.xlu1 %6686, %v1646_v5   ;;  %11181 = vst [vmem:[#allocation35_spill] sm:$0xff] %v9215_v26 }
 0xab9   :  { %3215 = vperm.xlu0 %6687, %v1614_v47  }
 0xaba   :  { %3210 = vperm.xlu1 %6686, %v1613_v52  }
 0xabd   :  { %3109 = vperm.xlu0 %6687, %v1596_v39  }
 0xabe   :  { %3104 = vperm.xlu1 %6686, %v1595_v15  }
 0xac1   :  { %3306 = vperm.xlu0 %6687, %v1645_v60  }
 0xac2   :  { %3301 = vperm.xlu1 %6686, %v1644_v14  }
 0xac5   :  { %3205 = vperm.xlu0 %6687, %v1612_v22  }
 0xac6   :  { %3200 = vperm.xlu1 %6686, %v1611_v10  }
 0xac9   :  { %3099 = vperm.xlu0 %6687, %v1594_v50   ;;  %v9235_v50 = vpop.f32.mrf.mxu0 }
 0xaca   :  { %3094 = vperm.xlu1 %6686, %v1593_v58   ;;  %11182 = vst [vmem:[#allocation36_spill] sm:$0xff] %v9235_v50 }
 0xacd   :  { %3296 = vperm.xlu0 %6687, %v1643_v29  }
 0xace   :  { %3291 = vperm.xlu1 %6686, %v1642_v20   ;;  %v9241_v20 = vpop.f32.mrf.mxu0 }
 0xacf   :  { %11183 = vst [vmem:[#allocation37_spill] sm:$0xff] %v9241_v20 }
 0xad1   :  { %3195 = vperm.xlu0 %6687, %v1610_v19  }
 0xad2   :  { %3286 = vperm.xlu1 %6686, %v1641_v34  }
 0xad5   :  { %3190 = vperm.xlu0 %6687, %v1609_v4   ;;  %v9245_v4 = vpop.f32.mrf.mxu0 }
 0xad6   :  { %11184 = vst [vmem:[#allocation38_spill] sm:$0xff] %v9245_v4 }
 0xad7   :  { %v9249_v43 = vpop.f32.mrf.mxu0 }
 0xad8   :  { %11185 = vst [vmem:[#allocation39_spill] sm:$0xff] %v9249_v43 }
 0xad9   :  { %v9251_v26 = vpop.f32.mrf.mxu0 }
 0xada   :  { %11186 = vst [vmem:[#allocation40_spill] sm:$0xff] %v9251_v26 }
 0xadb   :  { %v9253_v12 = vpop.f32.mrf.mxu0 }
 0xadc   :  { %11187 = vst [vmem:[#allocation41_spill] sm:$0xff] %v9253_v12 }
 0xadd   :  { %v9255_v56 = vpop.f32.mrf.mxu0 }
 0xade   :  { %11188 = vst [vmem:[#allocation42_spill] sm:$0xff] %v9255_v56 }
 0xadf   :  { %v9257_v4 = vpop.f32.mrf.mxu0 }
 0xae0   :  { %11189 = vst [vmem:[#allocation43_spill] sm:$0xff] %v9257_v4 }
 0xae1   :  { %v9259_v6 = vpop.f32.mrf.mxu0 }
 0xae2   :  { %11190 = vst [vmem:[#allocation44_spill] sm:$0xff] %v9259_v6 }
 0xae3   :  { %v9271_v17 = vpop.f32.mrf.mxu0 }
 0xae4   :  { %11191 = vst [vmem:[#allocation45_spill] sm:$0xff] %v9271_v17 }
 0xae5   :  { %v9287_v61 = vpop.f32.mrf.mxu0 }
 0xae6   :  { %11192 = vst [vmem:[#allocation46_spill] sm:$0xff] %v9287_v61 }
 0xaec   :  { %v9217_v5 = vpop.xlane.xlu0 %2853 }
 0xaee   :  { %v9219_v47 = vpop.xlane.xlu1 %2917 }
 0xaf0   :  { %v9221_v52 = vpop.xlane.xlu0 %2856 }
 0xaf2   :  { %v9223_v39 = vpop.xlane.xlu1 %2920 }
 0xaf4   :  { %v9225_v15 = vpop.xlane.xlu0 %2859 }
 0xaf6   :  { %v9227_v60 = vpop.xlane.xlu1 %2923 }
 0xaf8   :  { %v9229_v14 = vpop.xlane.xlu0 %2862 }
 0xafa   :  { %v9231_v22 = vpop.xlane.xlu1 %2926 }
 0xafc   :  { %v9233_v10 = vpop.xlane.xlu0 %2865 }
 0xafe   :  { %v9237_v58 = vpop.xlane.xlu1 %2929 }
 0xb00   :  { %v9239_v29 = vpop.xlane.xlu0 %2868 }
 0xb02   :  { %v9243_v19 = vpop.xlane.xlu1 %2932 }
 0xb04   :  { %v2872_v34 = vpop.xlane.xlu0 %2871 }
 0xb05   :  { %v9295_v21 = vmul.f32 0.03125, %v2872_v34 }
 0xb06   :  { %v9247_v30 = vpop.xlane.xlu1 %2935 }
 0xb08   :  { %v2875_v0 = vpop.xlane.xlu0 %2874 }
 0xb09   :  { %v9283_v59 = vmul.f32 0.03125, %v2875_v0 }
 0xb0a   :  { %v2939_v28 = vpop.xlane.xlu1 %2938 }
 0xb0b   :  { %v2987_v61 = vmul.f32 0.03125, %v2939_v28 }
 0xb0c   :  { %v2878_v33 = vpop.xlane.xlu0 %2877 }
 0xb0e   :  { %v2942_v50 = vpop.xlane.xlu1 %2941 }
 0xb10   :  { %v2881_v35 = vpop.xlane.xlu0 %2880 }
 0xb11   :  { %v9269_v56 = vmul.f32 0.03125, %v2881_v35 }
 0xb12   :  { %v2945_v37 = vpop.xlane.xlu1 %2944 }
 0xb13   :  { %v3005_v17 = vmul.f32 %v9269_v56, %v9269_v56 }
 0xb14   :  { %v2884_v20 = vpop.xlane.xlu0 %2883 }
 0xb15   :  { %v9265_v26 = vmul.f32 0.03125, %v2884_v20 }
 0xb16   :  { %v2948_v38 = vpop.xlane.xlu1 %2947 }
 0xb17   :  { %v3006_v20 = vmul.f32 %v9265_v26, %v9265_v26  ;;  %v2990_v9 = vmul.f32 0.03125, %v2948_v38 }
 0xb18   :  { %v2887_v32 = vpop.xlane.xlu0 %2886 }
 0xb19   :  { %v9261_v43 = vmul.f32 0.03125, %v2887_v32  ;;  %v3022_v38 = vsub.f32 %v2990_v9, %v3006_v20 }
 0xb1a   :  { %v2951_v42 = vpop.xlane.xlu1 %2950 }
 0xb1b   :  { %v3007_v4 = vmul.f32 %v9261_v43, %v9261_v43  ;;  %v2991_v6 = vmul.f32 0.03125, %v2951_v42  ;;  %v2989_v42 = vmul.f32 0.03125, %v2945_v37  ;;  %v3003_v37 = vmul.f32 %v9283_v59, %v9283_v59 }
 0xb1c   :  { %v2890_v36 = vpop.xlane.xlu0 %2889 }
 0xb1d   :  { %v9263_v18 = vmul.f32 0.03125, %v2890_v36  ;;  %v9277_v36 = vmul.f32 0.03125, %v2878_v33  ;;  %v3023_v33 = vsub.f32 %v2991_v6, %v3007_v4  ;;  %v3021_v6 = vsub.f32 %v2989_v42, %v3005_v17 }
 0xb1e   :  { %v2954_v44 = vpop.xlane.xlu1 %2953  ;;  %v3002_v42 = vmul.f32 %v9295_v21, %v9295_v21 }
 0xb1f   :  { %v3008_v12 = vmul.f32 %v9263_v18, %v9263_v18  ;;  %v2992_v63 = vmul.f32 0.03125, %v2954_v44 }
 0xb20   :  { %v2893_v16 = vpop.xlane.xlu0 %2892 }
 0xb21   :  { %v9275_v32 = vmul.f32 0.03125, %v2893_v16  ;;  %v3024_v54 = vsub.f32 %v2992_v63, %v3008_v12  ;;  %v3004_v12 = vmul.f32 %v9277_v36, %v9277_v36  ;;  %v2988_v63 = vmul.f32 0.03125, %v2942_v50 }
 0xb22   :  { %v2957_v2 = vpop.xlane.xlu1 %2956 }
 0xb23   :  { %v3009_v35 = vmul.f32 %v9275_v32, %v9275_v32  ;;  %v2993_v44 = vmul.f32 0.03125, %v2957_v2  ;;  %v3056_v2 = vadd.f32 1e-05, %v3024_v54  ;;  %v3054_v54 = vadd.f32 1e-05, %v3022_v38 }
 0xb24   :  { %v2899_v16 = vpop.xlane.xlu0 %2898 }
 0xb25   :  { %v3025_v1 = vsub.f32 %v2993_v44, %v3009_v35  ;;  %v9289_v45 = vmul.f32 0.03125, %v2899_v16  ;;  %v9299_v35 = vpop.f32.mrf.mxu0  ;;  %v3055_v44 = vadd.f32 1e-05, %v3023_v33  ;;  %v2986_v16 = vmul.f32 0.03125, %v9247_v30 }
 0xb26   :  { %v2896_v23 = vpop.xlane.xlu1 %2895  ;;  %v3019_v33 = vsub.f32 %v2987_v61, %v3003_v37  ;;  %v9320_v61 = vmul.f32 0.03125, %v9233_v10 }
 0xb27   :  { %v3057_v0 = vadd.f32 1e-05, %v3025_v1  ;;  %v9293_v24 = vmul.f32 0.03125, %v2896_v23  ;;  %v3011_v9 = vmul.f32 %v9289_v45, %v9289_v45  ;;  %v9304_v1 = vmul.f32 0.03125, %v9239_v29 }
 0xb28   :  { %v2963_v4 = vpop.xlane.xlu0 %2962  ;;  %v3020_v23 = vsub.f32 %v2988_v63, %v3004_v12  ;;  %v9312_v29 = vmul.f32 0.03125, %v9229_v14  ;;  %v3018_v37 = vsub.f32 %v2986_v16, %v3002_v42  ;;  %v3051_v14 = vadd.f32 1e-05, %v3019_v33 }
 0xb29   :  { %6768 = vrsqrt.f32 %v3057_v0  ;;  %v2995_v50 = vmul.f32 0.03125, %v2963_v4  ;;  %v3010_v28 = vmul.f32 %v9293_v24, %v9293_v24  ;;  %v3053_v0 = vadd.f32 1e-05, %v3021_v6  ;;  %v6497_v4 = vpop.f32.mrf.mxu0 }
 0xb2a   :  { %v2960_v34 = vpop.xlane.xlu1 %2959  ;;  %6770 = vrsqrt.f32 %v3056_v2  ;;  %v3001_v38 = vmul.f32 %v9304_v1, %v9304_v1  ;;  %v2985_v2 = vmul.f32 0.03125, %v9243_v19  ;;  %v2999_v19 = vmul.f32 %v9312_v29, %v9312_v29 }
 0xb2b   :  { %v3027_v17 = vsub.f32 %v2995_v50, %v3011_v9  ;;  %v2994_v20 = vmul.f32 0.03125, %v2960_v34  ;;  %6772 = vrsqrt.f32 %v3055_v44  ;;  %v3052_v9 = vadd.f32 1e-05, %v3020_v23  ;;  %v9324_v44 = vpop.f32.mrf.mxu0 }
 0xb2c   :  { %6774 = vrsqrt.f32 %v3054_v54  ;;  %v9327_v34 = vmul.f32 0.03125, %v9221_v52  ;;  %v2983_v23 = vmul.f32 0.03125, %v9231_v22  ;;  %v3017_v54 = vsub.f32 %v2985_v2, %v3001_v38 }
 0xb2d   :  { %v3059_v12 = vadd.f32 1e-05, %v3027_v17  ;;  %v3026_v63 = vsub.f32 %v2994_v20, %v3010_v28  ;;  %v9335_v28 = vmul.f32 0.03125, %v9225_v15  ;;  %v3000_v17 = vmul.f32 %v9320_v61, %v9320_v61  ;;  %v6500_v16 = vpop.f32.mrf.mxu0 }
 0xb2e   :  { %v9317_v50 = vpop.permute.xlu1 %3114  ;;  %v2984_v20 = vmul.f32 0.03125, %v9237_v58  ;;  %v3050_v52 = vadd.f32 1e-05, %v3018_v37  ;;  %v9343_v33 = vmul.f32 0.03125, %v9217_v5  ;;  %v2981_v15 = vmul.f32 0.03125, %v9223_v39 }
 0xb2f   :  { %6776 = vrsqrt.f32 %v3059_v12  ;;  %v3058_v30 = vadd.f32 1e-05, %v3026_v63  ;;  %v3015_v12 = vsub.f32 %v2983_v23, %v2999_v19  ;;  %v3049_v63 = vadd.f32 1e-05, %v3017_v54  ;;  %v3548_v39 = vpop.f32.mrf.mxu0 }
 0xb30   :  { %6778 = vrsqrt.f32 %v3053_v0  ;;  %v9322_v6 = vpop.permute.xlu0 %3316  ;;  %11193 = vst [vmem:[#allocation47_spill] sm:$0xff] %v9343_v33  ;;  %v2997_v0 = vmul.f32 %v9327_v34, %v9327_v34  ;;  %v3041_v58 = vsub.f32 %v9076_v31, %v9275_v32  ;;  %v2982_v5 = vmul.f32 0.03125, %v9227_v60 }
 0xb31   :  { %6780 = vrsqrt.f32 %v3058_v30  ;;  %v3016_v30 = vsub.f32 %v2984_v20, %v3000_v17  ;;  %v2996_v19 = vmul.f32 %v9343_v33, %v9343_v33  ;;  %v3040_v31 = vsub.f32 %v9069_v13, %v9263_v18 }
 0xb32   :  { %6782 = vrsqrt.f32 %v3052_v9  ;;  %v9332_v10 = vpop.permute.xlu1 %3311  ;;  %v2998_v9 = vmul.f32 %v9335_v28, %v9335_v28  ;;  %v2980_v54 = vmul.f32 0.03125, %v9219_v47  ;;  %v3047_v60 = vadd.f32 1e-05, %v3015_v12 }
 0xb33   :  { %6784 = vrsqrt.f32 %v3051_v14  ;;  %v9358_v14 = vadd.f32 %v6497_v4, %v9121_v25  ;;  %v3554_v20 = vadd.f32 %v6500_v16, %v9103_v27  ;;  %v3039_v25 = vsub.f32 %v9062_v8, %v9261_v43 }
 0xb34   :  { %v9340_v42 = vpop.permute.xlu0 %3215  ;;  %6786 = vrsqrt.f32 %v3050_v52  ;;  %v3043_v4 = vsub.f32 %v9090_v46, %v9289_v45  ;;  %v3549_v13 = vadd.f32 %v3548_v39, %v9115_v51  ;;  %v3014_v18 = vsub.f32 %v2982_v5, %v2998_v9 }
 0xb35   :  { %6788 = vrsqrt.f32 %v3049_v63  ;;  %v3038_v47 = vsub.f32 %v9055_v7, %v9265_v26  ;;  %v3042_v43 = vsub.f32 %v9094_v11, %v9293_v24  ;;  %v3012_v12 = vsub.f32 %v2980_v54, %v2996_v19 }
 0xb36   :  { %v6769_v22 = vpop.eup %6768  ;;  %v9348_v38 = vpop.permute.xlu1 %3210  ;;  %6790 = vrsqrt.f32 %v3047_v60  ;;  %v3037_v63 = vsub.f32 %v9048_v41, %v9269_v56  ;;  %v3046_v5 = vadd.f32 1e-05, %v3014_v18  ;;  %v3036_v11 = vsub.f32 %v9041_v3, %v9277_v36 }
 0xb37   :  { %11194 = vst [vmem:[#allocation48_spill] sm:$0xff] %v9348_v38  ;;  %v6771_v2 = vpop.eup %6770  ;;  %v3089_v32 = vmul.f32 %v6769_v22, %v3041_v58  ;;  %v3013_v38 = vsub.f32 %v2981_v15, %v2997_v0  ;;  %v3048_v22 = vadd.f32 1e-05, %v3016_v30  ;;  %v3044_v30 = vadd.f32 1e-05, %v3012_v12 }
 0xb38   :  { %v9355_v37 = vpop.permute.xlu0 %3109  ;;  %v6773_v23 = vpop.eup %6772  ;;  %v3088_v52 = vmul.f32 %v6771_v2, %v3040_v31  ;;  %v11196_v31 = vld [vmem:[#allocation29_spill] sm:$0xff] }
 0xb39   :  { %v6775_v17 = vpop.eup %6774  ;;  %v3185_v46 = vmul.f32 %v9110_v48, %v3089_v32  ;;  %v3087_v45 = vmul.f32 %v6773_v23, %v3039_v25  ;;  %v3045_v51 = vadd.f32 1e-05, %v3013_v38  ;;  %6792 = vrsqrt.f32 %v3048_v22  ;;  %v11197_v23 = vld [vmem:[#allocation21_spill] sm:$0xff] }
 0xb3a   :  { %v9373_v0 = vpop.permute.xlu1 %3104  ;;  %v3184_v2 = vmul.f32 %v9117_v62, %v3088_v52  ;;  %v3086_v9 = vmul.f32 %v6775_v17, %v3038_v47  ;;  %v11195_v62 = vld [vmem:[#allocation20_spill] sm:$0xff] }
 0xb3b   :  { %v3281_v56 = vadd.f32 %v9119_v49, %v3185_v46  ;;  %6794 = vrsqrt.f32 %v3045_v51  ;;  %v3035_v39 = vsub.f32 %v11195_v62, %v9283_v59  ;;  %v11203_v47 = vld [vmem:[#allocation16_spill] sm:$0xff]  ;;  %v11208_v51 = vld [vmem:[#allocation11_spill] sm:$0xff] }
 0xb3c   :  { %v6777_v33 = vpop.eup %6776  ;;  %v9375_v15 = vpop.permute.xlu0 %3306  ;;  %v3280_v54 = vadd.f32 %v11197_v23, %v3184_v2  ;;  %6796 = vrsqrt.f32 %v3046_v5 }
 0xb3d   :  { %v6779_v27 = vpop.eup %6778  ;;  %v3091_v8 = vmul.f32 %v6777_v33, %v3043_v4  ;;  %v3570_v18 = vadd.f32 %v9358_v14, %v3281_v56  ;;  %6798 = vrsqrt.f32 %v3044_v30  ;;  %v11214_v30 = vld [vmem:[#allocation13_spill] sm:$0xff] }
 0xb3e   :  { %v6781_v16 = vpop.eup %6780  ;;  %v3085_v24 = vmul.f32 %v6779_v27, %v3037_v63  ;;  %v9394_v19 = vpop.permute.xlu1 %3301  ;;  %v11204_v27 = vld [vmem:[#allocation46_spill] sm:$0xff] }
 0xb3f   :  { %v6783_v7 = vpop.eup %6782  ;;  %v3187_v26 = vmul.f32 %v9083_v53, %v3091_v8  ;;  %v3090_v58 = vmul.f32 %v6781_v16, %v3042_v43  ;;  %v3183_v53 = vmul.f32 %v9126_v55, %v3087_v45  ;;  %v11200_v55 = vld [vmem:[#allocation17_spill] sm:$0xff]  ;;  %v3534_v43 = vadd.f32 %v11204_v27, %v11203_v47  ;;  %v11205_v8 = vld [vmem:[#allocation26_spill] sm:$0xff] }
 0xb40   :  { %v9386_v48 = vpop.permute.xlu0 %3205  ;;  %v6785_v33 = vpop.eup %6784  ;;  %v3084_v3 = vmul.f32 %v6783_v7, %v3036_v11  ;;  %v3181_v17 = vmul.f32 %v11200_v55, %v3085_v24  ;;  %v3034_v46 = vsub.f32 %v11205_v8, %v9295_v21  ;;  %v11207_v16 = vld [vmem:[#allocation9_spill] sm:$0xff]  ;;  %v11209_v7 = vld [vmem:[#allocation8_spill] sm:$0xff]  ;;  %v9427_v5 = vmax.f32 %v3570_v18, 0.0  ;;  %v11212_v24 = vld [vmem:[#allocation10_spill] sm:$0xff] }
 0xb41   :  { %v3283_v38 = vadd.f32 %v9097_v57, %v3187_v26  ;;  %v3186_v41 = vmul.f32 %v9088_v40, %v3090_v58  ;;  %v11198_v57 = vld [vmem:[#allocation18_spill] sm:$0xff]  ;;  %v3083_v25 = vmul.f32 %v6785_v33, %v3035_v39  ;;  %v6787_v4 = vpop.eup %6786  ;;  %v3529_v26 = vadd.f32 %v9299_v35, %v11209_v7  ;;  %v11210_v21 = vld [vmem:[#allocation25_spill] sm:$0xff]  ;;  %v11215_v35 = vld [vmem:[#allocation44_spill] sm:$0xff] }
 0xb42   :  { %v3182_v60 = vmul.f32 %v11198_v57, %v3086_v9  ;;  %v11199_v40 = vld [vmem:[#allocation30_spill] sm:$0xff]  ;;  %v6789_v45 = vpop.eup %6788  ;;  %v3180_v63 = vmul.f32 %v11208_v51, %v3084_v3  ;;  %v3033_v58 = vsub.f32 %v11210_v21, %v9304_v1  ;;  %v3082_v2 = vmul.f32 %v6787_v4, %v3034_v46  ;;  %v9423_v9 = vpop.permute.xlu1 %3200  ;;  %11211 = vst [vmem:[#allocation21_spill] sm:$0xff] %v9427_v5  ;;  %v11217_v3 = vld [vmem:[#allocation15_spill] sm:$0xff]  ;;  %v11223_v4 = vld [vmem:[#allocation33_spill] sm:$0xff] }
 0xb43   :  { %v3572_v36 = vadd.f32 %v3554_v20, %v3283_v38  ;;  %v3282_v32 = vadd.f32 %v11196_v31, %v3186_v41  ;;  %v3539_v49 = vadd.f32 %v9324_v44, %v11199_v40  ;;  %v11202_v20 = vld [vmem:[#allocation19_spill] sm:$0xff]  ;;  %v3277_v33 = vadd.f32 %v11212_v24, %v3181_v17  ;;  %v11213_v38 = vld [vmem:[#allocation12_spill] sm:$0xff]  ;;  %v11219_v57 = vld [vmem:[#allocation14_spill] sm:$0xff] }
 0xb44   :  { %v3279_v22 = vadd.f32 %v11202_v20, %v3183_v53  ;;  %v9410_v44 = vpop.permute.xlu0 %3099  ;;  %v3278_v12 = vadd.f32 %v11207_v16, %v3182_v60  ;;  %v3179_v41 = vmul.f32 %v11213_v38, %v3083_v25  ;;  %v3081_v56 = vmul.f32 %v6789_v45, %v3033_v58  ;;  %v6791_v53 = vpop.eup %6790  ;;  %v11218_v31 = vld [vmem:[#allocation31_spill] sm:$0xff]  ;;  %v11220_v60 = vld [vmem:[#allocation45_spill] sm:$0xff]  ;;  %v11222_v17 = vld [vmem:[#allocation32_spill] sm:$0xff] }
 0xb45   :  { %v9402_v52 = vmax.f32 %v3572_v36, 0.0  ;;  %v3571_v59 = vadd.f32 %v3549_v13, %v3282_v32  ;;  %v3569_v14 = vadd.f32 %v3539_v49, %v3280_v54  ;;  %v3524_v62 = vadd.f32 %v11215_v35, %v11214_v30  ;;  %v11225_v20 = vld [vmem:[#allocation43_spill] sm:$0xff]  ;;  %v11226_v47 = vld [vmem:[#allocation34_spill] sm:$0xff] }
 0xb46   :  { %v3568_v11 = vadd.f32 %v3534_v43, %v3279_v22  ;;  %v3567_v39 = vadd.f32 %v3529_v26, %v3278_v12  ;;  %v3276_v36 = vadd.f32 %v11217_v3, %v3180_v63  ;;  %v3178_v32 = vmul.f32 %v11218_v31, %v3082_v2  ;;  %v6793_v54 = vpop.eup %6792  ;;  %v3095_v43 = vpop.permute.xlu1 %3094  ;;  %v11227_v46 = vld [vmem:[#allocation23_spill] sm:$0xff]  ;;  %v11233_v24 = vld [vmem:[#allocation22_spill] sm:$0xff] }
 0xb47   :  { %11201 = vst [vmem:[#allocation20_spill] sm:$0xff] %v9402_v52  ;;  %3795 = vrot.lane.b32.xlu0 %v9402_v52, %s6888_s26  ;;  %6114 = vmatprep.subr.mxu1 %v9402_v52  ;;  %v9415_v13 = vmax.f32 %v3571_v59, 0.0  ;;  %v9435_v1 = vmax.f32 %v3569_v14, 0.0  ;;  %v3519_v40 = vadd.f32 %v11220_v60, %v11219_v57  ;;  %v3566_v55 = vadd.f32 %v3524_v62, %v3277_v33  ;;  %v11224_v59 = vld [vmem:[#allocation42_spill] sm:$0xff]  ;;  %v11228_v14 = vld [vmem:[#allocation28_spill] sm:$0xff]  ;;  %v11230_v63 = vld [vmem:[#allocation35_spill] sm:$0xff] }
 0xb48   :  { %v3297_v23 = vpop.permute.xlu0 %3296  ;;  %v9443_v49 = vmax.f32 %v3568_v11, 0.0  ;;  %v3275_v25 = vadd.f32 %v11222_v17, %v3179_v41  ;;  %v3514_v18 = vadd.f32 %v11224_v59, %v11223_v4  ;;  %v3509_v22 = vadd.f32 %v11225_v20, %v9322_v6  ;;  %v6795_v8 = vpop.eup %6794  ;;  %v11234_v41 = vld [vmem:[#allocation40_spill] sm:$0xff]  ;;  %v11235_v62 = vld [vmem:[#allocation41_spill] sm:$0xff]  ;;  %v11237_v3 = vld [vmem:[#allocation47_spill] sm:$0xff] }
 0xb49   :  { %11206 = vst [vmem:[#allocation29_spill] sm:$0xff] %v9415_v13  ;;  %3793 = vrot.lane.b32.xlu1 %v9415_v13, %s6888_s26  ;;  %11216 = vst [vmem:[#allocation18_spill] sm:$0xff] %v9435_v1  ;;  %v3177_v27 = vmul.f32 %v11226_v47, %v3081_v56  ;;  %v3031_v45 = vsub.f32 %v11227_v46, %v9312_v29  ;;  %v3032_v16 = vsub.f32 %v11228_v14, %v9320_v61  ;;  %v6797_v26 = vpop.eup %6796  ;;  %v11232_v61 = vld [vmem:[#allocation24_spill] sm:$0xff] }
 0xb4a   :  { %11221 = vst [vmem:[#allocation30_spill] sm:$0xff] %v9443_v49  ;;  %v9457_v12 = vmax.f32 %v3567_v39, 0.0  ;;  %v3565_v51 = vadd.f32 %v3519_v40, %v3276_v36  ;;  %v3274_v7 = vadd.f32 %v11230_v63, %v3178_v32  ;;  %v9463_v29 = vmax.f32 %v3566_v55, 0.0  ;;  %v6799_v30 = vpop.eup %6798  ;;  %v11248_v63 = vld [vmem:[#allocation37_spill] sm:$0xff] }
 0xb4b   :  { %3791 = vrot.lane.b32.xlu0 %v9427_v5, %s6888_s26  ;;  %v3273_v6 = vadd.f32 %v9340_v42, %v3177_v27  ;;  %v3080_v21 = vmul.f32 %v6793_v54, %v3032_v16  ;;  %v3079_v58 = vmul.f32 %v6791_v53, %v3031_v45  ;;  %v3564_v2 = vadd.f32 %v3514_v18, %v3275_v25  ;;  %v11239_v54 = vld [vmem:[#allocation48_spill] sm:$0xff]  ;;  %v11242_v25 = vld [vmem:[#allocation38_spill] sm:$0xff]  ;;  %v11243_v18 = vld [vmem:[#allocation39_spill] sm:$0xff] }
 0xb4c   :  { %11229 = vst [vmem:[#allocation17_spill] sm:$0xff] %v9457_v12  ;;  %11231 = vst [vmem:[#allocation19_spill] sm:$0xff] %v9463_v29  ;;  %v3029_v11 = vsub.f32 %v11232_v61, %v9327_v34  ;;  %v3030_v33 = vsub.f32 %v11233_v24, %v9335_v28  ;;  %v3563_v38 = vadd.f32 %v3509_v22, %v3274_v7  ;;  %v3196_v42 = vpop.permute.xlu0 %3195  ;;  %v9477_v34 = vmax.f32 %v3565_v51, 0.0  ;;  %v11238_v28 = vld [vmem:[#allocation27_spill] sm:$0xff]  ;;  %v11246_v45 = vld [vmem:[#allocation36_spill] sm:$0xff] }
 0xb4d   :  { %3789 = vrot.lane.b32.xlu1 %v9435_v1, %s6888_s26  ;;  %v3504_v56 = vadd.f32 %v11234_v41, %v9332_v10  ;;  %v3176_v53 = vmul.f32 %v9317_v50, %v3080_v21  ;;  %v3175_v35 = vmul.f32 %v9355_v37, %v3079_v58  ;;  %v3499_v39 = vadd.f32 %v11235_v62, %v9375_v15  ;;  %v3292_v10 = vpop.permute.xlu1 %3291  ;;  %v3590_v21 = vld [vmem:[%s10987_s18 + $0x8] sm:$0xff]  ;;  %v3591_v58 = vld [vmem:[%s10987_s18 + $0x10] sm:$0xff] }
 0xb4e   :  { %11236 = vst [vmem:[#allocation16_spill] sm:$0xff] %v9477_v34  ;;  %v3028_v36 = vsub.f32 %v11238_v28, %v11237_v3  ;;  %v3078_v32 = vmul.f32 %v6797_v26, %v3030_v33  ;;  %v3077_v60 = vmul.f32 %v6795_v8, %v3029_v11  ;;  %v9485_v37 = vmax.f32 %v3564_v2, 0.0  ;;  %3989 = vmatprep.mubr.f32.mxu1 %v3590_v21  ;;  %v3652_v2 = vld [vmem:[%s10988_s19 + $0x78] sm:$0xff]  ;;  %v3651_v61 = vld [vmem:[%s10988_s19 + $0x70] sm:$0xff]  ;;  %v3650_v24 = vld [vmem:[%s10988_s19 + $0x68] sm:$0xff] }
 0xb4f   :  { %3787 = vrot.lane.b32.xlu0 %v9443_v49, %s6888_s26  ;;  %v3562_v31 = vadd.f32 %v3504_v56, %v3273_v6  ;;  %v3272_v57 = vadd.f32 %v11239_v54, %v3176_v53  ;;  %v3271_v50 = vadd.f32 %v9386_v48, %v3175_v35  ;;  %v9487_v15 = vmax.f32 %v3563_v38, 0.0  ;;  %6533 = vmatprep.mubr.f32.mxu0 %v3591_v58  ;;  %v3668_v11 = vld [vmem:[%s10989_s20 + $0x78] sm:$0xff]  ;;  %v3667_v33 = vld [vmem:[%s10989_s20 + $0x70] sm:$0xff]  ;;  %v3649_v38 = vld [vmem:[%s10988_s19 + $0x60] sm:$0xff] }
 0xb50   :  { %11240 = vst [vmem:[#allocation46_spill] sm:$0xff] %v9485_v37  ;;  %v3174_v40 = vmul.f32 %v9373_v0, %v3078_v32  ;;  %v3076_v55 = vmul.f32 %v6799_v30, %v3028_v36  ;;  %v3494_v4 = vadd.f32 %v11242_v25, %v9394_v19  ;;  %v3173_v59 = vmul.f32 %v9410_v44, %v3077_v60  ;;  %v3191_v22 = vpop.permute.xlu0 %3190  ;;  %v3666_v41 = vld [vmem:[%s10989_s20 + $0x68] sm:$0xff]  ;;  %v3648_v56 = vld [vmem:[%s10988_s19 + $0x58] sm:$0xff]  ;;  %v3647_v30 = vld [vmem:[%s10988_s19 + $0x50] sm:$0xff] }
 0xb51   :  { %3785 = vrot.lane.b32.xlu1 %v9457_v12, %s6888_s26  ;;  %11241 = vst [vmem:[#allocation26_spill] sm:$0xff] %v9487_v15  ;;  %v3561_v17 = vadd.f32 %v3499_v39, %v3272_v57  ;;  %v3489_v20 = vadd.f32 %v11243_v18, %v3297_v23  ;;  %v9496_v48 = vmax.f32 %v3562_v31, 0.0  ;;  %v3287_v46 = vpop.permute.xlu1 %3286  ;;  %v3484_v23 = vadd.f32 %v11246_v45, %v3292_v10  ;;  %v3664_v53 = vld [vmem:[%s10989_s20 + $0x58] sm:$0xff]  ;;  %v3646_v35 = vld [vmem:[%s10988_s19 + $0x48] sm:$0xff]  ;;  %v3663_v62 = vld [vmem:[%s10989_s20 + $0x50] sm:$0xff] }
 0xb52   :  { %v3560_v47 = vadd.f32 %v3494_v4, %v3271_v50  ;;  %v3270_v27 = vadd.f32 %v9423_v9, %v3174_v40  ;;  %v3172_v8 = vmul.f32 %v3095_v43, %v3076_v55  ;;  %v3269_v0 = vadd.f32 %v3196_v42, %v3173_v59  ;;  %v3665_v42 = vld [vmem:[%s10989_s20 + $0x60] sm:$0xff]  ;;  %v3662_v3 = vld [vmem:[%s10989_s20 + $0x48] sm:$0xff]  ;;  %v3644_v28 = vld [vmem:[%s10988_s19 + $0x38] sm:$0xff] }
 0xb53   :  { %3783 = vrot.lane.b32.xlu0 %v9463_v29, %s6888_s26  ;;  %11244 = vst [vmem:[#allocation9_spill] sm:$0xff] %v9496_v48  ;;  %v9501_v19 = vmax.f32 %v3561_v17, 0.0  ;;  %v3479_v9 = vadd.f32 %v11248_v63, %v3287_v46  ;;  %v3645_v39 = vld [vmem:[%s10988_s19 + $0x40] sm:$0xff]  ;;  %v11252_v32 = vld [vmem:[#allocation7_spill] sm:$0xff] }
 0xb54   :  { %v3559_v44 = vadd.f32 %v3489_v20, %v3270_v27  ;;  %v3268_v14 = vadd.f32 %v3191_v22, %v3172_v8  ;;  %v9506_v16 = vmax.f32 %v3560_v47, 0.0  ;;  %v3558_v51 = vadd.f32 %v3484_v23, %v3269_v0 }
 0xb55   :  { %3781 = vrot.lane.b32.xlu1 %v9477_v34, %s6888_s26  ;;  %11245 = vst [vmem:[#allocation11_spill] sm:$0xff] %v9501_v19 }
 0xb56   :  { %11247 = vst [vmem:[#allocation8_spill] sm:$0xff] %v9506_v16  ;;  %v9511_v43 = vmax.f32 %v3559_v44, 0.0  ;;  %v3557_v7 = vadd.f32 %v3479_v9, %v3268_v14  ;;  %v9515_v6 = vmax.f32 %v3558_v51, 0.0 }
 0xb57   :  { %3779 = vrot.lane.b32.xlu0 %v9485_v37, %s6888_s26 }
 0xb58   :  { %11249 = vst [vmem:[#allocation25_spill] sm:$0xff] %v9511_v43  ;;  %11250 = vst [vmem:[#allocation10_spill] sm:$0xff] %v9515_v6  ;;  %v9519_v26 = vmax.f32 %v3557_v7, 0.0 }
 0xb59   :  { %3777 = vrot.lane.b32.xlu1 %v9487_v15, %s6888_s26 }
 0xb5a   :  { %11251 = vst [vmem:[#allocation12_spill] sm:$0xff] %v9519_v26 }
 0xb5b   :  { %3775 = vrot.lane.b32.xlu0 %v9496_v48, %s6888_s26 }
 0xb5d   :  { %3773 = vrot.lane.b32.xlu1 %v9501_v19, %s6888_s26 }
 0xb5f   :  { %3771 = vrot.lane.b32.xlu0 %v9506_v16, %s6888_s26 }
 0xb61   :  { %3769 = vrot.lane.b32.xlu1 %v9511_v43, %s6888_s26 }
 0xb63   :  { %3767 = vrot.lane.b32.xlu0 %v9515_v6, %s6888_s26 }
 0xb65   :  { %3765 = vrot.lane.b32.xlu1 %v9519_v26, %s6888_s26 }
 0xb67   :  { %3875 = vrot.lane.b32.xlu0 %v9402_v52, %s6886_s0 }
 0xb69   :  { %3873 = vrot.lane.b32.xlu1 %v9415_v13, %s6886_s0 }
 0xb6b   :  { %3871 = vrot.lane.b32.xlu0 %v9427_v5, %s6886_s0 }
 0xb6d   :  { %3869 = vrot.lane.b32.xlu1 %v9435_v1, %s6886_s0 }
 0xb6f   :  { %3867 = vrot.lane.b32.xlu0 %v9443_v49, %s6886_s0 }
 0xb71   :  { %3865 = vrot.lane.b32.xlu1 %v9457_v12, %s6886_s0 }
 0xb73   :  { %3863 = vrot.lane.b32.xlu0 %v9463_v29, %s6886_s0 }
 0xb75   :  { %3861 = vrot.lane.b32.xlu1 %v9477_v34, %s6886_s0 }
 0xb77   :  { %3859 = vrot.lane.b32.xlu0 %v9485_v37, %s6886_s0 }
 0xb79   :  { %3857 = vrot.lane.b32.xlu1 %v9487_v15, %s6886_s0 }
 0xb7b   :  { %3855 = vrot.lane.b32.xlu0 %v9496_v48, %s6886_s0 }
 0xb7d   :  { %3853 = vrot.lane.b32.xlu1 %v9501_v19, %s6886_s0 }
 0xb7f   :  { %3851 = vrot.lane.b32.xlu0 %v9506_v16, %s6886_s0 }
 0xb81   :  { %3849 = vrot.lane.b32.xlu1 %v9511_v43, %s6886_s0 }
 0xb83   :  { %3847 = vrot.lane.b32.xlu0 %v9515_v6, %s6886_s0 }
 0xb85   :  { %3845 = vrot.lane.b32.xlu1 %v9519_v26, %s6886_s0 }
 0xb87   :  { %4532 = vperm.xlu0 %6687, %v3652_v2  }
 0xb89   :  { %4527 = vperm.xlu1 %6686, %v3651_v61  }
 0xb8b   :  { %4628 = vperm.xlu0 %6687, %v3668_v11  }
 0xb8d   :  { %4522 = vperm.xlu1 %6686, %v3650_v24  }
 0xb8f   :  { %4623 = vperm.xlu0 %6687, %v3667_v33  }
 0xb91   :  { %4517 = vperm.xlu1 %6686, %v3649_v38  }
 0xb93   :  { %4618 = vperm.xlu0 %6687, %v3666_v41  }
 0xb95   :  { %4512 = vperm.xlu1 %6686, %v3648_v56  }
 0xb97   :  { %4613 = vperm.xlu0 %6687, %v3665_v42  }
 0xb99   :  { %4507 = vperm.xlu1 %6686, %v3647_v30  }
 0xb9b   :  { %4608 = vperm.xlu0 %6687, %v3664_v53  }
 0xb9d   :  { %4502 = vperm.xlu1 %6686, %v3646_v35  }
 0xb9f   :  { %4603 = vperm.xlu0 %6687, %v3663_v62  }
 0xba1   :  { %4497 = vperm.xlu1 %6686, %v3645_v39  }
 0xba3   :  { %4598 = vperm.xlu0 %6687, %v3662_v3  }
 0xba5   :  { %4492 = vperm.xlu1 %6686, %v3644_v28  }
 0xbb9   :  { %v3796_v36 = vpop.permute.xlu0 %3795 }
 0xbba   :  { %v3828_v31 = vsel %vm132_vm3, 0.0, %v3796_v36 }
 0xbbb   :  { %v3844_v10 = vmul.f32 %v11252_v32, %v3828_v31  ;;  %v3794_v54 = vpop.permute.xlu1 %3793 }
 0xbbc   :  { %v3827_v57 = vsel %vm132_vm3, 0.0, %v3794_v54 }
 0xbbd   :  { %v3843_v50 = vmul.f32 %v11252_v32, %v3827_v57  ;;  %6115 = vmatpush3.msra.mxu1 %v3844_v10  ;;  %v3792_v60 = vpop.permute.xlu0 %3791  ;;  %v3589_v10 = vld [vmem:[%s10987_s18] sm:$0xff] }
 0xbbe   :  { %v3826_v40 = vsel %vm132_vm3, 0.0, %v3792_v60  ;;  %6116 = vmatprep.subr.mxu1 %v9415_v13  ;;  %v3593_v57 = vld [vmem:[%s10987_s18 + $0x20] sm:$0xff] }
 0xbbf   :  { %v3842_v55 = vmul.f32 %v11252_v32, %v3826_v40  ;;  %6117 = vmatpush3.msra.mxu1 %v3843_v50  ;;  %v3790_v17 = vpop.permute.xlu1 %3789  ;;  %v11253_v50 = vld [vmem:[#allocation6_spill] sm:$0xff] }
 0xbc0   :  { %v3825_v25 = vsel %vm132_vm3, 0.0, %v3790_v17  ;;  %6118 = vmatprep.subr.mxu1 %v9427_v5 }
 0xbc1   :  { %v3841_v4 = vmul.f32 %v11252_v32, %v3825_v25  ;;  %v3788_v59 = vpop.permute.xlu0 %3787  ;;  %6119 = vmatpush3.msra.mxu1 %v3842_v55 }
 0xbc2   :  { %v3824_v18 = vsel %vm132_vm3, 0.0, %v3788_v59  ;;  %6120 = vmatprep.subr.mxu1 %v9435_v1 }
 0xbc3   :  { %v3840_v20 = vmul.f32 %v11252_v32, %v3824_v18  ;;  %6121 = vmatpush3.msra.mxu1 %v3841_v4  ;;  %v3786_v22 = vpop.permute.xlu1 %3785  ;;  %v3592_v4 = vld [vmem:[%s10987_s18 + $0x18] sm:$0xff] }
 0xbc4   :  { %v3823_v47 = vsel %vm132_vm3, 0.0, %v3786_v22  ;;  %6122 = vmatprep.subr.mxu1 %v9443_v49  ;;  %v3596_v18 = vld [vmem:[%s10987_s18 + $0x38] sm:$0xff] }
 0xbc5   :  { %v3839_v27 = vmul.f32 %v11252_v32, %v3823_v47  ;;  %v3784_v8 = vpop.permute.xlu0 %3783  ;;  %6123 = vmatpush3.msra.mxu1 %v3840_v20 }
 0xbc6   :  { %v3822_v0 = vsel %vm132_vm3, 0.0, %v3784_v8  ;;  %6124 = vmatprep.subr.mxu1 %v9457_v12 }
 0xbc7   :  { %v3838_v46 = vmul.f32 %v11252_v32, %v3822_v0  ;;  %6125 = vmatpush3.msra.mxu1 %v3839_v27  ;;  %v3782_v44 = vpop.permute.xlu1 %3781  ;;  %v3595_v0 = vld [vmem:[%s10987_s18 + $0x30] sm:$0xff] }
 0xbc8   :  { %v3821_v45 = vsel %vm132_vm3, 0.0, %v3782_v44  ;;  %6126 = vmatprep.subr.mxu1 %v9463_v29  ;;  %v3599_v44 = vld [vmem:[%s10987_s18 + $0x50] sm:$0xff] }
 0xbc9   :  { %v3837_v23 = vmul.f32 %v11252_v32, %v3821_v45  ;;  %v3780_v14 = vpop.permute.xlu0 %3779  ;;  %6127 = vmatpush3.msra.mxu1 %v3838_v46 }
 0xbca   :  { %v3820_v51 = vsel %vm132_vm3, 0.0, %v3780_v14  ;;  %6128 = vmatprep.subr.mxu1 %v9477_v34 }
 0xbcb   :  { %v3836_v63 = vmul.f32 %v11252_v32, %v3820_v51  ;;  %6129 = vmatpush3.msra.mxu1 %v3837_v23  ;;  %v3778_v9 = vpop.permute.xlu1 %3777 }
 0xbcc   :  { %v3819_v7 = vsel %vm132_vm3, 0.0, %v3778_v9  ;;  %6130 = vmatprep.subr.mxu1 %v9485_v37  ;;  %v3598_v9 = vld [vmem:[%s10987_s18 + $0x48] sm:$0xff] }
 0xbcd   :  { %v3835_v21 = vmul.f32 %v11252_v32, %v3819_v7  ;;  %v3776_v58 = vpop.permute.xlu0 %3775  ;;  %6131 = vmatpush3.msra.mxu1 %v3836_v63 }
 0xbce   :  { %v3818_v2 = vsel %vm132_vm3, 0.0, %v3776_v58  ;;  %6132 = vmatprep.subr.mxu1 %v9487_v15 }
 0xbcf   :  { %v3834_v61 = vmul.f32 %v11252_v32, %v3818_v2  ;;  %6133 = vmatpush3.msra.mxu1 %v3835_v21  ;;  %v3774_v11 = vpop.permute.xlu1 %3773  ;;  %v3602_v21 = vld [vmem:[%s10987_s18 + $0x68] sm:$0xff] }
 0xbd0   :  { %v3817_v24 = vsel %vm132_vm3, 0.0, %v3774_v11  ;;  %6134 = vmatprep.subr.mxu1 %v9496_v48 }
 0xbd1   :  { %v3833_v33 = vmul.f32 %v11252_v32, %v3817_v24  ;;  %v3772_v38 = vpop.permute.xlu0 %3771  ;;  %6135 = vmatpush3.msra.mxu1 %v3834_v61 }
 0xbd2   :  { %v3816_v41 = vsel %vm132_vm3, 0.0, %v3772_v38  ;;  %6136 = vmatprep.subr.mxu1 %v9501_v19 }
 0xbd3   :  { %v3832_v56 = vmul.f32 %v11252_v32, %v3816_v41  ;;  %6137 = vmatpush3.msra.mxu1 %v3833_v33  ;;  %v3770_v42 = vpop.permute.xlu1 %3769  ;;  %v3601_v33 = vld [vmem:[%s10987_s18 + $0x60] sm:$0xff] }
 0xbd4   :  { %v3815_v30 = vsel %vm132_vm3, 0.0, %v3770_v42  ;;  %6138 = vmatprep.subr.mxu1 %v9506_v16  ;;  %v3605_v41 = vld [vmem:[%s10987_s18 + $0x80] sm:$0xff] }
 0xbd5   :  { %v3831_v53 = vmul.f32 %v11252_v32, %v3815_v30  ;;  %v3768_v35 = vpop.permute.xlu0 %3767  ;;  %6139 = vmatpush3.msra.mxu1 %v3832_v56 }
 0xbd6   :  { %v3814_v62 = vsel %vm132_vm3, 0.0, %v3768_v35  ;;  %6140 = vmatprep.subr.mxu1 %v9511_v43 }
 0xbd7   :  { %v3830_v39 = vmul.f32 %v11252_v32, %v3814_v62  ;;  %6141 = vmatpush3.msra.mxu1 %v3831_v53  ;;  %v3766_v3 = vpop.permute.xlu1 %3765  ;;  %v3604_v62 = vld [vmem:[%s10987_s18 + $0x78] sm:$0xff] }
 0xbd8   :  { %v3813_v28 = vsel %vm132_vm3, 0.0, %v3766_v3  ;;  %6142 = vmatprep.subr.mxu1 %v9515_v6  ;;  %v3608_v3 = vld [vmem:[%s10987_s18 + $0x98] sm:$0xff] }
 0xbd9   :  { %v3829_v36 = vmul.f32 %v11252_v32, %v3813_v28  ;;  %v3876_v31 = vpop.permute.xlu0 %3875  ;;  %6143 = vmatpush3.msra.mxu1 %v3830_v39 }
 0xbda   :  { %v3908_v54 = vsel %vm148_vm2, %v3876_v31, 0.0  ;;  %6144 = vmatprep.subr.mxu1 %v9519_v26 }
 0xbdb   :  { %v3924_v60 = vmul.f32 %v11253_v50, %v3908_v54  ;;  %6145 = vmatpush3.msra.mxu1 %v3829_v36  ;;  %v3874_v40 = vpop.permute.xlu1 %3873 }
 0xbdc   :  { %v3907_v55 = vsel %vm148_vm2, %v3874_v40, 0.0  ;;  %3990 = vmatmul.mubr.f32.vlgmr.msra.gmra.mxu1 %v3589_v10  ;;  %v3611_v40 = vld [vmem:[%s10987_s18 + $0xb0] sm:$0xff] }
 0xbdd   :  { %v3923_v17 = vmul.f32 %v11253_v50, %v3907_v55  ;;  %6501 = vmatprep.subr.mxu0 %v3924_v60  ;;  %v3872_v25 = vpop.permute.xlu0 %3871  ;;  %3994 = vmatprep.mubr.f32.mxu1 %v3593_v57  ;;  %v3607_v57 = vld [vmem:[%s10987_s18 + $0x90] sm:$0xff] }
 0xbde   :  { %v3906_v59 = vsel %vm148_vm2, %v3872_v25, 0.0  ;;  %6502 = vmatpush3.msra.mxu0 %v3924_v60 }
 0xbdf   :  { %v3922_v20 = vmul.f32 %v11253_v50, %v3906_v59  ;;  %6503 = vmatprep.subr.mxu0 %v3923_v17  ;;  %v3870_v22 = vpop.permute.xlu1 %3869 }
 0xbe0   :  { %v3905_v47 = vsel %vm148_vm2, %v3870_v22, 0.0  ;;  %6504 = vmatpush3.msra.mxu0 %v3923_v17  ;;  %3995 = vmatmul.mubr.f32.gmra.mxu1 %v3592_v4  ;;  %v3614_v22 = vld [vmem:[%s10987_s18 + $0xc8] sm:$0xff] }
 0xbe1   :  { %v3921_v27 = vmul.f32 %v11253_v50, %v3905_v47  ;;  %v3868_v8 = vpop.permute.xlu0 %3867  ;;  %6505 = vmatprep.subr.mxu0 %v3922_v20  ;;  %3999 = vmatprep.mubr.f32.mxu1 %v3596_v18  ;;  %v3610_v18 = vld [vmem:[%s10987_s18 + $0xa8] sm:$0xff] }
 0xbe2   :  { %v3904_v46 = vsel %vm148_vm2, %v3868_v8, 0.0  ;;  %6506 = vmatpush3.msra.mxu0 %v3922_v20 }
 0xbe3   :  { %v3920_v45 = vmul.f32 %v11253_v50, %v3904_v46  ;;  %6507 = vmatprep.subr.mxu0 %v3921_v27  ;;  %v3866_v23 = vpop.permute.xlu1 %3865  ;;  %v3613_v46 = vld [vmem:[%s10987_s18 + $0xc0] sm:$0xff] }
 0xbe4   :  { %v3903_v14 = vsel %vm148_vm2, %v3866_v23, 0.0  ;;  %6508 = vmatpush3.msra.mxu0 %v3921_v27  ;;  %4000 = vmatmul.mubr.f32.gmra.mxu1 %v3595_v0  ;;  %v3597_v23 = vld [vmem:[%s10987_s18 + $0x40] sm:$0xff] }
 0xbe5   :  { %v3919_v51 = vmul.f32 %v11253_v50, %v3903_v14  ;;  %v3864_v63 = vpop.permute.xlu0 %3863  ;;  %6509 = vmatprep.subr.mxu0 %v3920_v45  ;;  %4004 = vmatprep.mubr.f32.mxu1 %v3599_v44  ;;  %v3594_v44 = vld [vmem:[%s10987_s18 + $0x28] sm:$0xff]  ;;  %v3616_v14 = vld [vmem:[%s10987_s18 + $0xd8] sm:$0xff] }
 0xbe6   :  { %v3902_v7 = vsel %vm148_vm2, %v3864_v63, 0.0  ;;  %6510 = vmatpush3.msra.mxu0 %v3920_v45  ;;  %v3617_v45 = vld [vmem:[%s10987_s18 + $0xe0] sm:$0xff]  ;;  %v3620_v63 = vld [vmem:[%s10987_s18 + $0xf8] sm:$0xff] }
 0xbe7   :  { %v3918_v58 = vmul.f32 %v11253_v50, %v3902_v7  ;;  %6511 = vmatprep.subr.mxu0 %v3919_v51  ;;  %v3862_v2 = vpop.permute.xlu1 %3861  ;;  %v3619_v7 = vld [vmem:[%s10987_s18 + $0xf0] sm:$0xff] }
 0xbe8   :  { %v3901_v61 = vsel %vm148_vm2, %v3862_v2, 0.0  ;;  %6512 = vmatpush3.msra.mxu0 %v3919_v51  ;;  %4005 = vmatmul.mubr.f32.gmra.mxu1 %v3598_v9  ;;  %v3600_v51 = vld [vmem:[%s10987_s18 + $0x58] sm:$0xff]  ;;  %v3603_v9 = vld [vmem:[%s10987_s18 + $0x70] sm:$0xff]  ;;  %v3609_v2 = vld [vmem:[%s10987_s18 + $0xa0] sm:$0xff] }
 0xbe9   :  { %v3917_v11 = vmul.f32 %v11253_v50, %v3901_v61  ;;  %v3860_v24 = vpop.permute.xlu0 %3859  ;;  %6513 = vmatprep.subr.mxu0 %v3918_v58  ;;  %4009 = vmatprep.mubr.f32.mxu1 %v3602_v21  ;;  %v3606_v21 = vld [vmem:[%s10987_s18 + $0x88] sm:$0xff] }
 0xbea   :  { %v3900_v38 = vsel %vm148_vm2, %v3860_v24, 0.0  ;;  %6514 = vmatpush3.msra.mxu0 %v3918_v58  ;;  %v3623_v58 = vld [vmem:[%s10987_s18 + $0x110] sm:$0xff]  ;;  %v3622_v61 = vld [vmem:[%s10987_s18 + $0x108] sm:$0xff] }
 0xbeb   :  { %v3916_v56 = vmul.f32 %v11253_v50, %v3900_v38  ;;  %6515 = vmatprep.subr.mxu0 %v3917_v11  ;;  %v3858_v42 = vpop.permute.xlu1 %3857  ;;  %v3626_v24 = vld [vmem:[%s10987_s18 + $0x128] sm:$0xff]  ;;  %v3625_v38 = vld [vmem:[%s10987_s18 + $0x120] sm:$0xff] }
 0xbec   :  { %v3899_v30 = vsel %vm148_vm2, %v3858_v42, 0.0  ;;  %6516 = vmatpush3.msra.mxu0 %v3917_v11  ;;  %4010 = vmatmul.mubr.f32.gmra.mxu1 %v3601_v33  ;;  %v3612_v11 = vld [vmem:[%s10987_s18 + $0xb8] sm:$0xff]  ;;  %v3615_v33 = vld [vmem:[%s10987_s18 + $0xd0] sm:$0xff]  ;;  %v3621_v42 = vld [vmem:[%s10987_s18 + $0x100] sm:$0xff] }
 0xbed   :  { %v3915_v53 = vmul.f32 %v11253_v50, %v3899_v30  ;;  %v3856_v35 = vpop.permute.xlu0 %3855  ;;  %6517 = vmatprep.subr.mxu0 %v3916_v56  ;;  %4014 = vmatprep.mubr.f32.mxu1 %v3605_v41  ;;  %v3618_v41 = vld [vmem:[%s10987_s18 + $0xe8] sm:$0xff]  ;;  %v3628_v30 = vld [vmem:[%s10987_s18 + $0x138] sm:$0xff] }
 0xbee   :  { %v3898_v39 = vsel %vm148_vm2, %v3856_v35, 0.0  ;;  %6518 = vmatpush3.msra.mxu0 %v3916_v56  ;;  %v3629_v56 = vld [vmem:[%s10987_s18 + $0x140] sm:$0xff]  ;;  %v3632_v35 = vld [vmem:[%s10987_s18 + $0x158] sm:$0xff] }
 0xbef   :  { %v3914_v28 = vmul.f32 %v11253_v50, %v3898_v39  ;;  %6519 = vmatprep.subr.mxu0 %v3915_v53  ;;  %v3854_v36 = vpop.permute.xlu1 %3853  ;;  %v3631_v39 = vld [vmem:[%s10987_s18 + $0x150] sm:$0xff] }
 0xbf0   :  { %v3897_v31 = vsel %vm148_vm2, %v3854_v36, 0.0  ;;  %6520 = vmatpush3.msra.mxu0 %v3915_v53  ;;  %4015 = vmatmul.mubr.f32.gmra.mxu1 %v3604_v62  ;;  %v3624_v53 = vld [vmem:[%s10987_s18 + $0x118] sm:$0xff]  ;;  %v3627_v62 = vld [vmem:[%s10987_s18 + $0x130] sm:$0xff]  ;;  %v3633_v36 = vld [vmem:[%s10987_s18 + $0x160] sm:$0xff] }
 0xbf1   :  { %v3913_v10 = vmul.f32 %v11253_v50, %v3897_v31  ;;  %v3852_v54 = vpop.permute.xlu0 %3851  ;;  %6521 = vmatprep.subr.mxu0 %v3914_v28  ;;  %4019 = vmatprep.mubr.f32.mxu1 %v3608_v3  ;;  %v3630_v3 = vld [vmem:[%s10987_s18 + $0x148] sm:$0xff] }
 0xbf2   :  { %v3896_v60 = vsel %vm148_vm2, %v3852_v54, 0.0  ;;  %6522 = vmatpush3.msra.mxu0 %v3914_v28  ;;  %v3635_v28 = vld [vmem:[%s10987_s18 + $0x170] sm:$0xff]  ;;  %v3634_v31 = vld [vmem:[%s10987_s18 + $0x168] sm:$0xff] }
 0xbf3   :  { %v3912_v55 = vmul.f32 %v11253_v50, %v3896_v60  ;;  %6523 = vmatprep.subr.mxu0 %v3913_v10  ;;  %v3850_v17 = vpop.permute.xlu1 %3849 }
 0xbf4   :  { %v3895_v25 = vsel %vm148_vm2, %v3850_v17, 0.0  ;;  %6524 = vmatpush3.msra.mxu0 %v3913_v10  ;;  %4020 = vmatmul.mubr.f32.gmra.mxu1 %v3607_v57  ;;  %v3636_v10 = vld [vmem:[%s10987_s18 + $0x178] sm:$0xff]  ;;  %s6891_s18 = smov [#allocation3]  }
 0xbf5   :  { %v3911_v4 = vmul.f32 %v11253_v50, %v3895_v25  ;;  %v3848_v59 = vpop.permute.xlu0 %3847  ;;  %6525 = vmatprep.subr.mxu0 %v3912_v55  ;;  %4024 = vmatprep.mubr.f32.mxu1 %v3611_v40 }
 0xbf6   :  { %v3894_v20 = vsel %vm148_vm2, %v3848_v59, 0.0  ;;  %6526 = vmatpush3.msra.mxu0 %v3912_v55 }
 0xbf7   :  { %v3910_v47 = vmul.f32 %v11253_v50, %v3894_v20  ;;  %6527 = vmatprep.subr.mxu0 %v3911_v4  ;;  %v3846_v27 = vpop.permute.xlu1 %3845 }
 0xbf8   :  { %v3893_v8 = vsel %vm148_vm2, %v3846_v27, 0.0  ;;  %6528 = vmatpush3.msra.mxu0 %v3911_v4  ;;  %4025 = vmatmul.mubr.f32.gmra.mxu1 %v3610_v18 }
 0xbf9   :  { %v3909_v0 = vmul.f32 %v11253_v50, %v3893_v8  ;;  %6529 = vmatprep.subr.mxu0 %v3910_v47  ;;  %4029 = vmatprep.mubr.f32.mxu1 %v3614_v22 }
 0xbfa   :  { %6530 = vmatpush3.msra.mxu0 %v3910_v47 }
 0xbfb   :  { %6531 = vmatprep.subr.mxu0 %v3909_v0 }
 0xbfc   :  { %6532 = vmatpush3.msra.mxu0 %v3909_v0  ;;  %4030 = vmatmul.mubr.f32.gmra.mxu1 %v3613_v46 }
 0xbfd   :  { %6534 = vmatmul.mubr.f32.vlgmr.msra.gmra.mxu0 %v3594_v44  ;;  %4034 = vmatprep.mubr.f32.mxu1 %v3617_v45 }
 0xbfe   :  { %6536 = vmatprep.mubr.f32.mxu0 %v3597_v23 }
 0xc00   :  { %4035 = vmatmul.mubr.f32.gmra.mxu1 %v3616_v14 }
 0xc01   :  { %6537 = vmatmul.mubr.f32.gmra.mxu0 %v3600_v51  ;;  %4039 = vmatprep.mubr.f32.mxu1 %v3620_v63 }
 0xc02   :  { %6539 = vmatprep.mubr.f32.mxu0 %v3603_v9 }
 0xc04   :  { %4040 = vmatmul.mubr.f32.gmra.mxu1 %v3619_v7 }
 0xc05   :  { %6540 = vmatmul.mubr.f32.gmra.mxu0 %v3606_v21  ;;  %4044 = vmatprep.mubr.f32.mxu1 %v3623_v58 }
 0xc06   :  { %6542 = vmatprep.mubr.f32.mxu0 %v3609_v2 }
 0xc08   :  { %4045 = vmatmul.mubr.f32.gmra.mxu1 %v3622_v61 }
 0xc09   :  { %6543 = vmatmul.mubr.f32.gmra.mxu0 %v3612_v11  ;;  %4049 = vmatprep.mubr.f32.mxu1 %v3626_v24 }
 0xc0a   :  { %6545 = vmatprep.mubr.f32.mxu0 %v3615_v33 }
 0xc0c   :  { %4050 = vmatmul.mubr.f32.gmra.mxu1 %v3625_v38 }
 0xc0d   :  { %6546 = vmatmul.mubr.f32.gmra.mxu0 %v3618_v41  ;;  %4054 = vmatprep.mubr.f32.mxu1 %v3629_v56 }
 0xc0e   :  { %6548 = vmatprep.mubr.f32.mxu0 %v3621_v42 }
 0xc10   :  { %4055 = vmatmul.mubr.f32.gmra.mxu1 %v3628_v30 }
 0xc11   :  { %6549 = vmatmul.mubr.f32.gmra.mxu0 %v3624_v53  ;;  %4059 = vmatprep.mubr.f32.mxu1 %v3632_v35 }
 0xc12   :  { %6551 = vmatprep.mubr.f32.mxu0 %v3627_v62 }
 0xc14   :  { %4060 = vmatmul.mubr.f32.gmra.mxu1 %v3631_v39 }
 0xc15   :  { %6552 = vmatmul.mubr.f32.gmra.mxu0 %v3630_v3  ;;  %4064 = vmatprep.mubr.f32.mxu1 %v3635_v28 }
 0xc16   :  { %6554 = vmatprep.mubr.f32.mxu0 %v3633_v36 }
 0xc18   :  { %4065 = vmatmul.mubr.f32.gmra.mxu1 %v3634_v31 }
 0xc19   :  { %6555 = vmatmul.mubr.f32.gmra.mxu0 %v3636_v10 }
 0xc9c   :  { %v6146_v54 = vpop.f32.mrf.mxu1 }
 0xc9e   :  { %v6147_v57 = vpop.f32.mrf.mxu1 }
 0xc9f   :  { %v6148_v23 = vadd.f32 %v6147_v57, %v6146_v54 }
 0xca0   :  { %v6149_v60 = vpop.f32.mrf.mxu1 }
 0xca2   :  { %v6150_v40 = vpop.f32.mrf.mxu1 }
 0xca3   :  { %v6151_v46 = vadd.f32 %v6150_v40, %v6149_v60 }
 0xca4   :  { %v6152_v55 = vpop.f32.mrf.mxu1 }
 0xca6   :  { %v6153_v17 = vpop.f32.mrf.mxu1 }
 0xca7   :  { %v6154_v58 = vadd.f32 %v6153_v17, %v6152_v55 }
 0xca8   :  { %v6155_v25 = vpop.f32.mrf.mxu1 }
 0xcaa   :  { %v6156_v4 = vpop.f32.mrf.mxu1 }
 0xcab   :  { %v6157_v33 = vadd.f32 %v6156_v4, %v6155_v25 }
 0xcac   :  { %v6158_v59 = vpop.f32.mrf.mxu1 }
 0xcae   :  { %v6159_v18 = vpop.f32.mrf.mxu1 }
 0xcaf   :  { %v6160_v39 = vadd.f32 %v6159_v18, %v6158_v59 }
 0xcb0   :  { %v6161_v20 = vpop.f32.mrf.mxu1 }
 0xcb2   :  { %v6162_v22 = vpop.f32.mrf.mxu1 }
 0xcb3   :  { %v6163_v57 = vadd.f32 %v6162_v22, %v6161_v20 }
 0xcb4   :  { %v6164_v47 = vpop.f32.mrf.mxu1 }
 0xcb6   :  { %v6165_v27 = vpop.f32.mrf.mxu1 }
 0xcb7   :  { %v6166_v59 = vadd.f32 %v6165_v27, %v6164_v47 }
 0xcb8   :  { %v6167_v8 = vpop.f32.mrf.mxu1 }
 0xcba   :  { %v6168_v0 = vpop.f32.mrf.mxu1 }
 0xcbc   :  { %v6170_v44 = vpop.f32.mrf.mxu1 }
 0xcbd   :  { %v6535_v45 = vpop.f32.mrf.mxu0 }
 0xcbe   :  { %v6171_v14 = vpop.f32.mrf.mxu1  ;;  %v9828_v63 = vadd.f32 %v6535_v45, %v6151_v46 }
 0xcbf   :  { %v4136_v51 = vpop.f32.mrf.mxu0 }
 0xcc0   :  { %11254 = vst [vmem:[#allocation13_spill] sm:$0xff] %v9828_v63  ;;  %v9830_v9 = vadd.f32 %v6148_v23, %v4136_v51  ;;  %v9832_v7 = vpop.f32.mrf.mxu1  ;;  %v4264_v56 = vmul.f32 %v9828_v63, %v9828_v63  ;;  %v4218_v53 = vsel %vm301_vm5, %v9828_v63, 0.0  ;;  %v6169_v51 = vadd.f32 %v6168_v0, %v6167_v8 }
 0xcc1   :  { %v6538_v21 = vpop.f32.mrf.mxu0 }
 0xcc2   :  { %11255 = vst [vmem:[#allocation44_spill] sm:$0xff] %v9830_v9  ;;  %v4215_v2 = vsel %vm301_vm5, %v9830_v9, 0.0  ;;  %v4263_v61 = vmul.f32 %v9830_v9, %v9830_v9  ;;  %v6174_v11 = vpop.f32.mrf.mxu1  ;;  %v9845_v62 = vadd.f32 %v6538_v21, %v6157_v33  ;;  %v4282_v3 = vsel %vm301_vm5, %v4264_v56, 0.0 }
 0xcc3   :  { %v4146_v24 = vpop.f32.mrf.mxu0  ;;  %4216 = vadd.xlane.f32.xlu0 %v4215_v2 }
 0xcc4   :  { %v9838_v38 = vadd.f32 %v6154_v58, %v4146_v24  ;;  %v4279_v41 = vsel %vm301_vm5, %v4263_v61, 0.0  ;;  %v6176_v42 = vpop.f32.mrf.mxu1  ;;  %11257 = vst [vmem:[#allocation31_spill] sm:$0xff] %v9845_v62  ;;  %v4266_v40 = vmul.f32 %v9845_v62, %v9845_v62  ;;  %v4224_v17 = vsel %vm301_vm5, %v9845_v62, 0.0 }
 0xcc5   :  { %4280 = vadd.xlane.f32.xlu1 %v4279_v41  ;;  %v6541_v30 = vpop.f32.mrf.mxu0  ;;  %v6172_v24 = vadd.f32 %v6171_v14, %v6170_v44 }
 0xcc6   :  { %11256 = vst [vmem:[#allocation15_spill] sm:$0xff] %v9838_v38  ;;  %v6177_v35 = vpop.f32.mrf.mxu1  ;;  %v4265_v28 = vmul.f32 %v9838_v38, %v9838_v38  ;;  %v4221_v31 = vsel %vm301_vm5, %v9838_v38, 0.0  ;;  %v9859_v4 = vadd.f32 %v6541_v30, %v6163_v57  ;;  %v4288_v18 = vsel %vm301_vm5, %v4266_v40, 0.0 }
 0xcc7   :  { %4219 = vadd.xlane.f32.xlu0 %v4218_v53  ;;  %v4156_v36 = vpop.f32.mrf.mxu0  ;;  %v6175_v53 = vadd.f32 %v6174_v11, %v9832_v7 }
 0xcc8   :  { %v6179_v10 = vpop.f32.mrf.mxu1  ;;  %v9852_v54 = vadd.f32 %v6160_v39, %v4156_v36  ;;  %v4285_v60 = vsel %vm301_vm5, %v4265_v28, 0.0  ;;  %11259 = vst [vmem:[#allocation45_spill] sm:$0xff] %v9859_v4  ;;  %v4268_v47 = vmul.f32 %v9859_v4, %v9859_v4  ;;  %v4230_v58 = vsel %vm301_vm5, %v9859_v4, 0.0 }
 0xcc9   :  { %4283 = vadd.xlane.f32.xlu1 %v4282_v3  ;;  %v6544_v55 = vpop.f32.mrf.mxu0 }
 0xcca   :  { %11258 = vst [vmem:[#allocation14_spill] sm:$0xff] %v9852_v54  ;;  %v6180_v25 = vpop.f32.mrf.mxu1  ;;  %v4267_v20 = vmul.f32 %v9852_v54, %v9852_v54  ;;  %v4227_v46 = vsel %vm301_vm5, %v9852_v54, 0.0  ;;  %v9873_v61 = vadd.f32 %v6544_v55, %v6169_v51  ;;  %v4294_v33 = vsel %vm301_vm5, %v4268_v47, 0.0 }
 0xccb   :  { %4222 = vadd.xlane.f32.xlu0 %v4221_v31  ;;  %v4166_v22 = vpop.f32.mrf.mxu0  ;;  %v6178_v31 = vadd.f32 %v6177_v35, %v6176_v42 }
 0xccc   :  { %v6182_v45 = vpop.f32.mrf.mxu1  ;;  %v9866_v23 = vadd.f32 %v6166_v59, %v4166_v22  ;;  %v4291_v21 = vsel %vm301_vm5, %v4267_v20, 0.0  ;;  %11261 = vst [vmem:[#allocation33_spill] sm:$0xff] %v9873_v61  ;;  %v4270_v44 = vmul.f32 %v9873_v61, %v9873_v61  ;;  %v4236_v3 = vsel %vm301_vm5, %v9873_v61, 0.0 }
 0xccd   :  { %4286 = vadd.xlane.f32.xlu1 %v4285_v60  ;;  %v6547_v27 = vpop.f32.mrf.mxu0 }
 0xcce   :  { %11260 = vst [vmem:[#allocation32_spill] sm:$0xff] %v9866_v23  ;;  %v6183_v2 = vpop.f32.mrf.mxu1  ;;  %v4269_v8 = vmul.f32 %v9866_v23, %v9866_v23  ;;  %v4233_v41 = vsel %vm301_vm5, %v9866_v23, 0.0  ;;  %v9888_v36 = vadd.f32 %v6547_v27, %v6175_v53  ;;  %v4300_v57 = vsel %vm301_vm5, %v4270_v44, 0.0 }
 0xccf   :  { %4225 = vadd.xlane.f32.xlu0 %v4224_v17  ;;  %v4176_v0 = vpop.f32.mrf.mxu0  ;;  %v6181_v17 = vadd.f32 %v6180_v25, %v6179_v10 }
 0xcd0   :  { %v6185_v56 = vpop.f32.mrf.mxu1  ;;  %v9880_v30 = vadd.f32 %v6172_v24, %v4176_v0  ;;  %v4297_v39 = vsel %vm301_vm5, %v4269_v8, 0.0  ;;  %v4272_v42 = vmul.f32 %v9888_v36, %v9888_v36 }
 0xcd1   :  { %4289 = vadd.xlane.f32.xlu1 %v4288_v18  ;;  %v6550_v14 = vpop.f32.mrf.mxu0  ;;  %v4242_v18 = vsel %vm301_vm5, %v9888_v36, 0.0 }
 0xcd2   :  { %v6186_v28 = vpop.f32.mrf.mxu1  ;;  %v4271_v7 = vmul.f32 %v9880_v30, %v9880_v30  ;;  %v4239_v60 = vsel %vm301_vm5, %v9880_v30, 0.0  ;;  %v9902_v22 = vadd.f32 %v6550_v14, %v6181_v17  ;;  %v4306_v51 = vsel %vm301_vm5, %v4272_v42, 0.0 }
 0xcd3   :  { %4228 = vadd.xlane.f32.xlu0 %v4227_v46  ;;  %v4186_v11 = vpop.f32.mrf.mxu0  ;;  %v6184_v46 = vadd.f32 %v6183_v2, %v6182_v45 }
 0xcd4   :  { %v6188_v40 = vpop.f32.mrf.mxu1  ;;  %v9895_v55 = vadd.f32 %v6178_v31, %v4186_v11  ;;  %v4303_v59 = vsel %vm301_vm5, %v4271_v7, 0.0  ;;  %v4274_v45 = vmul.f32 %v9902_v22, %v9902_v22  ;;  %v4248_v2 = vsel %vm301_vm5, %v9902_v22, 0.0 }
 0xcd5   :  { %4292 = vadd.xlane.f32.xlu1 %v4291_v21  ;;  %v6553_v35 = vpop.f32.mrf.mxu0 }
 0xcd6   :  { %v6189_v20 = vpop.f32.mrf.mxu1  ;;  %v4273_v10 = vmul.f32 %v9895_v55, %v9895_v55  ;;  %v4245_v21 = vsel %vm301_vm5, %v9895_v55, 0.0  ;;  %v4312_v0 = vsel %vm301_vm5, %v4274_v45, 0.0  ;;  %v9972_v45 = vpop.permute.xlu1 %4527 }
 0xcd7   :  { %4231 = vadd.xlane.f32.xlu0 %v4230_v58  ;;  %v4196_v25 = vpop.f32.mrf.mxu0  ;;  %v6187_v58 = vadd.f32 %v6186_v28, %v6185_v56  ;;  %v6190_v44 = vadd.f32 %v6189_v20, %v6188_v40  ;;  %v3661_v20 = vld [vmem:[%s10989_s20 + $0x40] sm:$0xff] }
 0xcd8   :  { %v6191_v47 = vpop.f32.mrf.mxu1  ;;  %v9909_v27 = vadd.f32 %v6184_v46, %v4196_v25  ;;  %v4309_v24 = vsel %vm301_vm5, %v4273_v10, 0.0  ;;  %v3642_v46 = vld [vmem:[%s10988_s19 + $0x28] sm:$0xff]  ;;  %v3641_v10 = vld [vmem:[%s10988_s19 + $0x20] sm:$0xff]  ;;  %v3659_v25 = vld [vmem:[%s10989_s20 + $0x30] sm:$0xff] }
 0xcd9   :  { %4295 = vadd.xlane.f32.xlu1 %v4294_v33  ;;  %v9916_v8 = vadd.f32 %v6553_v35, %v6187_v58  ;;  %v6556_v53 = vpop.f32.mrf.mxu0  ;;  %v3658_v58 = vld [vmem:[%s10989_s20 + $0x28] sm:$0xff] }
 0xcda   :  { %v6192_v33 = vpop.f32.mrf.mxu1 }
 0xcdb   :  { %4234 = vadd.xlane.f32.xlu0 %v4233_v41  ;;  %v4275_v41 = vmul.f32 %v9909_v27, %v9909_v27  ;;  %v6193_v56 = vadd.f32 %v6192_v33, %v6191_v47  ;;  %v4206_v28 = vpop.f32.mrf.mxu0  ;;  %v9964_v47 = vpop.permute.xlu0 %4532  ;;  %v3638_v33 = vld [vmem:[%s10988_s19 + $0x8] sm:$0xff] }
 0xcdc   :  { %v9930_v7 = vadd.f32 %v6190_v44, %v4206_v28  ;;  %v3655_v44 = vld [vmem:[%s10989_s20 + $0x10] sm:$0xff]  ;;  %v3654_v28 = vld [vmem:[%s10989_s20 + $0x8] sm:$0xff] }
 0xcdd   :  { %4298 = vadd.xlane.f32.xlu1 %v4297_v39  ;;  %v4251_v39 = vsel %vm301_vm5, %v9909_v27, 0.0  ;;  %v4315_v14 = vsel %vm301_vm5, %v4275_v41, 0.0  ;;  %v9926_v31 = vadd.f32 %v6556_v53, %v6193_v56  ;;  %v9982_v41 = vpop.permute.xlu1 %4522  ;;  %v3656_v53 = vld [vmem:[%s10989_s20 + $0x18] sm:$0xff]  ;;  %v3637_v56 = vld [vmem:[%s10988_s19] sm:$0xff] }
 0xcde   :  { %v4257_v17 = vsel %vm301_vm5, %v9930_v7, 0.0 }
 0xcdf   :  { %4237 = vadd.xlane.f32.xlu0 %v4236_v3  ;;  %v4276_v3 = vmul.f32 %v9916_v8, %v9916_v8  ;;  %v4278_v40 = vmul.f32 %v9926_v31, %v9926_v31 }
 0xce1   :  { %4301 = vadd.xlane.f32.xlu1 %v4300_v57  ;;  %v4254_v57 = vsel %vm301_vm5, %v9916_v8, 0.0  ;;  %v4318_v11 = vsel %vm301_vm5, %v4276_v3, 0.0  ;;  %v4324_v42 = vsel %vm301_vm5, %v4278_v40, 0.0  ;;  %v9998_v3 = vpop.permute.xlu1 %4517 }
 0xce3   :  { %4240 = vadd.xlane.f32.xlu0 %v4239_v60  ;;  %v4260_v60 = vsel %vm301_vm5, %v9926_v31, 0.0 }
 0xce5   :  { %4304 = vadd.xlane.f32.xlu1 %v4303_v59  ;;  %v4277_v59 = vmul.f32 %v9930_v7, %v9930_v7 }
 0xce7   :  { %4243 = vadd.xlane.f32.xlu0 %v4242_v18  ;;  %v4321_v35 = vsel %vm301_vm5, %v4277_v59, 0.0  ;;  %v3643_v18 = vld [vmem:[%s10988_s19 + $0x30] sm:$0xff] }
 0xce9   :  { %4307 = vadd.xlane.f32.xlu1 %v4306_v51  ;;  %v3660_v51 = vld [vmem:[%s10989_s20 + $0x38] sm:$0xff] }
 0xceb   :  { %4246 = vadd.xlane.f32.xlu0 %v4245_v21  ;;  %v3640_v21 = vld [vmem:[%s10988_s19 + $0x18] sm:$0xff] }
 0xced   :  { %4310 = vadd.xlane.f32.xlu1 %v4309_v24  ;;  %v3639_v24 = vld [vmem:[%s10988_s19 + $0x10] sm:$0xff] }
 0xcef   :  { %4249 = vadd.xlane.f32.xlu0 %v4248_v2  ;;  %v3657_v2 = vld [vmem:[%s10989_s20 + $0x20] sm:$0xff] }
 0xcf1   :  { %4313 = vadd.xlane.f32.xlu1 %v4312_v0  ;;  %v9980_v0 = vpop.permute.xlu0 %4628 }
 0xcf3   :  { %4252 = vadd.xlane.f32.xlu0 %v4251_v39 }
 0xcf5   :  { %4316 = vadd.xlane.f32.xlu1 %v4315_v14  ;;  %v9990_v39 = vpop.permute.xlu0 %4623  ;;  %v3653_v14 = vld [vmem:[%s10989_s20] sm:$0xff] }
 0xcf7   :  { %4255 = vadd.xlane.f32.xlu0 %v4254_v57 }
 0xcf9   :  { %4319 = vadd.xlane.f32.xlu1 %v4318_v11  ;;  %v10003_v57 = vpop.permute.xlu0 %4618  ;;  %v10005_v11 = vpop.permute.xlu1 %4512 }
 0xcfb   :  { %4261 = vadd.xlane.f32.xlu0 %v4260_v60 }
 0xcfd   :  { %4258 = vadd.xlane.f32.xlu1 %v4257_v17  ;;  %v10007_v60 = vpop.permute.xlu0 %4613  ;;  %v10009_v40 = vpop.permute.xlu1 %4507 }
 0xcfe   :  { %11262 = vst [vmem:[#allocation42_spill] sm:$0xff] %v10009_v40 }
 0xcff   :  { %4325 = vadd.xlane.f32.xlu0 %v4324_v42 }
 0xd01   :  { %4322 = vadd.xlane.f32.xlu1 %v4321_v35  ;;  %v10011_v17 = vpop.permute.xlu0 %4608  ;;  %v10013_v59 = vpop.permute.xlu1 %4502 }
 0xd02   :  { %11263 = vst [vmem:[#allocation43_spill] sm:$0xff] %v10011_v17  ;;  %11264 = vst [vmem:[#allocation34_spill] sm:$0xff] %v10013_v59 }
 0xd05   :  { %v10015_v42 = vpop.permute.xlu0 %4603  ;;  %v10017_v35 = vpop.permute.xlu1 %4497 }
 0xd06   :  { %11265 = vst [vmem:[#allocation23_spill] sm:$0xff] %v10015_v42  ;;  %11266 = vst [vmem:[#allocation28_spill] sm:$0xff] %v10017_v35 }
 0xd12   :  { %4487 = vperm.xlu1 %6686, %v3643_v18   ;;  %v10019_v18 = vpop.permute.xlu0 %4598 }
 0xd13   :  { %11267 = vst [vmem:[#allocation35_spill] sm:$0xff] %v10019_v18 }
 0xd15   :  { %4593 = vperm.xlu0 %6687, %v3661_v20   ;;  %v10021_v20 = vpop.permute.xlu1 %4492 }
 0xd16   :  { %4482 = vperm.xlu1 %6686, %v3642_v46   ;;  %11268 = vst [vmem:[#allocation24_spill] sm:$0xff] %v10021_v20 }
 0xd19   :  { %4588 = vperm.xlu0 %6687, %v3660_v51  }
 0xd1a   :  { %4477 = vperm.xlu1 %6686, %v3641_v10  }
 0xd1d   :  { %4583 = vperm.xlu0 %6687, %v3659_v25  }
 0xd1e   :  { %4472 = vperm.xlu1 %6686, %v3640_v21  }
 0xd21   :  { %4578 = vperm.xlu0 %6687, %v3658_v58  }
 0xd22   :  { %4467 = vperm.xlu1 %6686, %v3639_v24  }
 0xd25   :  { %4573 = vperm.xlu0 %6687, %v3657_v2  }
 0xd26   :  { %4462 = vperm.xlu1 %6686, %v3638_v33  }
 0xd29   :  { %4568 = vperm.xlu0 %6687, %v3656_v53  }
 0xd2a   :  { %4457 = vperm.xlu1 %6686, %v3637_v56  }
 0xd2d   :  { %4563 = vperm.xlu0 %6687, %v3655_v44  }
 0xd2e   :  { %4553 = vperm.xlu1 %6686, %v3653_v14  }
 0xd31   :  { %4558 = vperm.xlu0 %6687, %v3654_v28  }
 0xd4c   :  { %v10023_v46 = vpop.xlane.xlu0 %4216 }
 0xd4e   :  { %v10025_v51 = vpop.xlane.xlu1 %4280 }
 0xd50   :  { %v10027_v10 = vpop.xlane.xlu0 %4219 }
 0xd52   :  { %v10029_v25 = vpop.xlane.xlu1 %4283 }
 0xd54   :  { %v10031_v21 = vpop.xlane.xlu0 %4222 }
 0xd56   :  { %v10033_v58 = vpop.xlane.xlu1 %4286 }
 0xd58   :  { %v10035_v24 = vpop.xlane.xlu0 %4225 }
 0xd5a   :  { %v10037_v2 = vpop.xlane.xlu1 %4289 }
 0xd5c   :  { %v10039_v33 = vpop.xlane.xlu0 %4228 }
 0xd5e   :  { %v10041_v53 = vpop.xlane.xlu1 %4292 }
 0xd60   :  { %v10043_v56 = vpop.xlane.xlu0 %4231 }
 0xd62   :  { %v10045_v44 = vpop.xlane.xlu1 %4295 }
 0xd64   :  { %v4235_v14 = vpop.xlane.xlu0 %4234 }
 0xd66   :  { %v10047_v28 = vpop.xlane.xlu1 %4298 }
 0xd68   :  { %v4238_v52 = vpop.xlane.xlu0 %4237 }
 0xd6a   :  { %v4302_v13 = vpop.xlane.xlu1 %4301 }
 0xd6c   :  { %v4241_v5 = vpop.xlane.xlu0 %4240 }
 0xd6e   :  { %v4305_v1 = vpop.xlane.xlu1 %4304 }
 0xd70   :  { %v4244_v49 = vpop.xlane.xlu0 %4243 }
 0xd71   :  { %v10059_v63 = vmul.f32 0.03125, %v4244_v49  ;;  %v10069_v49 = vmul.f32 0.03125, %v4241_v5 }
 0xd72   :  { %v4308_v12 = vpop.xlane.xlu1 %4307 }
 0xd73   :  { %v4368_v35 = vmul.f32 %v10059_v63, %v10059_v63  ;;  %v4367_v5 = vmul.f32 %v10069_v49, %v10069_v49 }
 0xd74   :  { %v4247_v29 = vpop.xlane.xlu0 %4246 }
 0xd75   :  { %v10053_v6 = vmul.f32 0.03125, %v4247_v29 }
 0xd76   :  { %v4311_v34 = vpop.xlane.xlu1 %4310 }
 0xd77   :  { %v4369_v29 = vmul.f32 %v10053_v6, %v10053_v6  ;;  %v4353_v20 = vmul.f32 0.03125, %v4311_v34 }
 0xd78   :  { %v4250_v37 = vpop.xlane.xlu0 %4249 }
 0xd79   :  { %v10051_v16 = vmul.f32 0.03125, %v4250_v37  ;;  %v4385_v61 = vsub.f32 %v4353_v20, %v4369_v29  ;;  %v10083_v20 = vmul.f32 0.03125, %v4235_v14  ;;  %v4350_v29 = vmul.f32 0.03125, %v4302_v13 }
 0xd7a   :  { %v4314_v15 = vpop.xlane.xlu1 %4313 }
 0xd7b   :  { %v4370_v38 = vmul.f32 %v10051_v16, %v10051_v16  ;;  %v4354_v62 = vmul.f32 0.03125, %v4314_v15  ;;  %v4352_v15 = vmul.f32 0.03125, %v4308_v12  ;;  %v4365_v14 = vmul.f32 %v10083_v20, %v10083_v20 }
 0xd7c   :  { %v4253_v48 = vpop.xlane.xlu0 %4252 }
 0xd7d   :  { %v10049_v19 = vmul.f32 0.03125, %v4253_v48  ;;  %v4386_v23 = vsub.f32 %v4354_v62, %v4370_v38 }
 0xd7e   :  { %v4317_v43 = vpop.xlane.xlu1 %4316 }
 0xd7f   :  { %v4371_v50 = vmul.f32 %v10049_v19, %v10049_v19  ;;  %v4355_v32 = vmul.f32 0.03125, %v4317_v43  ;;  %v4418_v12 = vadd.f32 1e-05, %v4386_v23 }
 0xd80   :  { %v4256_v26 = vpop.xlane.xlu0 %4255 }
 0xd81   :  { %v10057_v9 = vmul.f32 0.03125, %v4256_v26  ;;  %v4387_v18 = vsub.f32 %v4355_v32, %v4371_v50 }
 0xd82   :  { %v4320_v48 = vpop.xlane.xlu1 %4319 }
 0xd83   :  { %v4372_v37 = vmul.f32 %v10057_v9, %v10057_v9  ;;  %v4356_v54 = vmul.f32 0.03125, %v4320_v48  ;;  %v10075_v48 = vmul.f32 0.03125, %v4238_v52  ;;  %v4419_v40 = vadd.f32 1e-05, %v4387_v18 }
 0xd84   :  { %v4262_v4 = vpop.xlane.xlu0 %4261 }
 0xd85   :  { %v4388_v43 = vsub.f32 %v4356_v54, %v4372_v37  ;;  %v10067_v26 = vmul.f32 0.03125, %v4262_v4  ;;  %v4351_v54 = vmul.f32 0.03125, %v4305_v1  ;;  %v4384_v4 = vsub.f32 %v4352_v15, %v4368_v35 }
 0xd86   :  { %v4259_v42 = vpop.xlane.xlu1 %4258  ;;  %v4366_v18 = vmul.f32 %v10075_v48, %v10075_v48  ;;  %v4417_v37 = vadd.f32 1e-05, %v4385_v61  ;;  %v10088_v1 = vmul.f32 0.03125, %v10043_v56  ;;  %v10091_v15 = vmul.f32 0.03125, %v10039_v33 }
 0xd87   :  { %v4420_v59 = vadd.f32 1e-05, %v4388_v43  ;;  %v10073_v17 = vmul.f32 0.03125, %v4259_v42  ;;  %v4374_v32 = vmul.f32 %v10067_v26, %v10067_v26  ;;  %v4416_v23 = vadd.f32 1e-05, %v4384_v4 }
 0xd88   :  { %v4326_v34 = vpop.xlane.xlu0 %4325  ;;  %v4349_v61 = vmul.f32 0.03125, %v10047_v28  ;;  %v4382_v56 = vsub.f32 %v4350_v29, %v4366_v18  ;;  %v4348_v33 = vmul.f32 0.03125, %v10045_v44  ;;  %v4363_v28 = vmul.f32 %v10091_v15, %v10091_v15 }
 0xd89   :  { %v4358_v50 = vmul.f32 0.03125, %v4326_v34  ;;  %6800 = vrsqrt.f32 %v4420_v59  ;;  %v4373_v62 = vmul.f32 %v10073_v17, %v10073_v17  ;;  %v4383_v59 = vsub.f32 %v4351_v54, %v4367_v5 }
 0xd8a   :  { %v4323_v38 = vpop.xlane.xlu1 %4322  ;;  %6802 = vrsqrt.f32 %v4419_v40  ;;  %v10107_v54 = vmul.f32 0.03125, %v10031_v21  ;;  %v4347_v4 = vmul.f32 0.03125, %v10041_v53  ;;  %v10123_v18 = vmul.f32 0.03125, %v10023_v46 }
 0xd8b   :  { %v4390_v52 = vsub.f32 %v4358_v50, %v4374_v32  ;;  %v4357_v42 = vmul.f32 0.03125, %v4323_v38  ;;  %6804 = vrsqrt.f32 %v4418_v12  ;;  %v10101_v32 = vmul.f32 0.03125, %v10035_v24 }
 0xd8c   :  { %v4364_v50 = vmul.f32 %v10088_v1, %v10088_v1  ;;  %v4415_v5 = vadd.f32 1e-05, %v4383_v59  ;;  %v4381_v12 = vsub.f32 %v4349_v61, %v4365_v14  ;;  %v4414_v24 = vadd.f32 1e-05, %v4382_v56 }
 0xd8d   :  { %v4422_v43 = vadd.f32 1e-05, %v4390_v52  ;;  %v4389_v34 = vsub.f32 %v4357_v42, %v4373_v62  ;;  %v10115_v62 = vmul.f32 0.03125, %v10027_v10  ;;  %v4362_v44 = vmul.f32 %v10101_v32, %v10101_v32 }
 0xd8e   :  { %v10096_v13 = vpop.permute.xlu1 %4487  ;;  %v4346_v52 = vmul.f32 0.03125, %v10037_v2  ;;  %v4380_v42 = vsub.f32 %v4348_v33, %v4364_v50  ;;  %v4345_v29 = vmul.f32 0.03125, %v10033_v58  ;;  %v4379_v10 = vsub.f32 %v4347_v4, %v4363_v28 }
 0xd8f   :  { %6806 = vrsqrt.f32 %v4422_v43  ;;  %v4421_v35 = vadd.f32 1e-05, %v4389_v34  ;;  %v4413_v43 = vadd.f32 1e-05, %v4381_v12  ;;  %v4404_v34 = vsub.f32 %v9916_v8, %v10057_v9 }
 0xd90   :  { %6808 = vrsqrt.f32 %v4417_v37  ;;  %v10098_v40 = vpop.permute.xlu0 %4593  ;;  %v4361_v37 = vmul.f32 %v10107_v54, %v10107_v54  ;;  %v4344_v46 = vmul.f32 0.03125, %v10029_v25  ;;  %v4378_v59 = vsub.f32 %v4346_v52, %v4362_v44 }
 0xd91   :  { %6810 = vrsqrt.f32 %v4421_v35  ;;  %v4412_v35 = vadd.f32 1e-05, %v4380_v42  ;;  %v4359_v58 = vmul.f32 %v10123_v18, %v10123_v18  ;;  %v4403_v56 = vsub.f32 %v9909_v27, %v10049_v19 }
 0xd92   :  { %6812 = vrsqrt.f32 %v4416_v23  ;;  %v10120_v21 = vpop.permute.xlu1 %4482  ;;  %v4360_v23 = vmul.f32 %v10115_v62, %v10115_v62  ;;  %v4406_v9 = vsub.f32 %v9926_v31, %v10067_v26  ;;  %v4343_v33 = vmul.f32 0.03125, %v10025_v51 }
 0xd93   :  { %6814 = vrsqrt.f32 %v4415_v5  ;;  %v4377_v5 = vsub.f32 %v4345_v29, %v4361_v37  ;;  %v4411_v25 = vadd.f32 1e-05, %v4379_v10  ;;  %v4402_v12 = vsub.f32 %v9902_v22, %v10051_v16 }
 0xd94   :  { %v10112_v38 = vpop.permute.xlu0 %4588  ;;  %6816 = vrsqrt.f32 %v4414_v24  ;;  %v4405_v24 = vsub.f32 %v9930_v7, %v10073_v17  ;;  %v4376_v31 = vsub.f32 %v4344_v46, %v4360_v23  ;;  %v4410_v26 = vadd.f32 1e-05, %v4378_v59 }
 0xd95   :  { %6818 = vrsqrt.f32 %v4413_v43  ;;  %v4401_v51 = vsub.f32 %v9895_v55, %v10053_v6  ;;  %v4375_v16 = vsub.f32 %v4343_v33, %v4359_v58  ;;  %v4409_v22 = vadd.f32 1e-05, %v4377_v5 }
 0xd96   :  { %v6801_v53 = vpop.eup %6800  ;;  %v10142_v28 = vpop.permute.xlu1 %4477  ;;  %6820 = vrsqrt.f32 %v4412_v35  ;;  %v4400_v7 = vsub.f32 %v9888_v36, %v10059_v63 }
 0xd97   :  { %v6803_v2 = vpop.eup %6802  ;;  %v4452_v8 = vmul.f32 %v6801_v53, %v4404_v34  ;;  %6822 = vrsqrt.f32 %v4411_v25 }
 0xd98   :  { %v10133_v14 = vpop.permute.xlu0 %4583  ;;  %v6805_v61 = vpop.eup %6804  ;;  %v4451_v27 = vmul.f32 %v6803_v2, %v4403_v56  ;;  %6824 = vrsqrt.f32 %v4410_v26  ;;  %v11276_v26 = vld [vmem:[#allocation35_spill] sm:$0xff] }
 0xd99   :  { %v4548_v37 = vmul.f32 %v9982_v41, %v4452_v8  ;;  %v4450_v29 = vmul.f32 %v6805_v61, %v4402_v12  ;;  %6826 = vrsqrt.f32 %v4409_v22  ;;  %v11272_v8 = vld [vmem:[#allocation34_spill] sm:$0xff]  ;;  %v11278_v22 = vld [vmem:[#allocation24_spill] sm:$0xff] }
 0xd9a   :  { %v4547_v6 = vmul.f32 %v9998_v3, %v4451_v27  ;;  %v10159_v34 = vpop.permute.xlu1 %4472  ;;  %v11275_v27 = vld [vmem:[#allocation28_spill] sm:$0xff] }
 0xd9b   :  { %v4644_v63 = vadd.f32 %v10003_v57, %v4548_v37  ;;  %v4546_v36 = vmul.f32 %v10005_v11, %v4450_v29  ;;  %v11270_v11 = vld [vmem:[#allocation33_spill] sm:$0xff] }
 0xd9c   :  { %v6807_v50 = vpop.eup %6806  ;;  %v10154_v17 = vpop.permute.xlu0 %4578  ;;  %v4643_v59 = vadd.f32 %v10007_v60, %v4547_v6  ;;  %v4398_v61 = vsub.f32 %v11270_v11, %v10075_v48  ;;  %v11273_v48 = vld [vmem:[#allocation23_spill] sm:$0xff] }
 0xd9d   :  { %v6809_v4 = vpop.eup %6808  ;;  %v4454_v19 = vmul.f32 %v6807_v50, %v4406_v9 }
 0xd9e   :  { %v6811_v44 = vpop.eup %6810  ;;  %v4449_v55 = vmul.f32 %v6809_v4, %v4401_v51  ;;  %v4468_v33 = vpop.permute.xlu1 %4467  ;;  %v10185_v25 = vmax.f32 %v4643_v59, 0.0 }
 0xd9f   :  { %v6813_v52 = vpop.eup %6812  ;;  %v4550_v42 = vmul.f32 %v9964_v47, %v4454_v19  ;;  %v4453_v53 = vmul.f32 %v6811_v44, %v4405_v24  ;;  %v4408_v47 = vadd.f32 1e-05, %v4376_v31  ;;  %v11274_v24 = vld [vmem:[#allocation32_spill] sm:$0xff] }
 0xda0   :  { %v4448_v41 = vmul.f32 %v6813_v52, %v4400_v7  ;;  %v6815_v46 = vpop.eup %6814  ;;  %v4574_v58 = vpop.permute.xlu0 %4573  ;;  %v4397_v19 = vsub.f32 %v11274_v24, %v10083_v20  ;;  %v11277_v52 = vld [vmem:[#allocation45_spill] sm:$0xff] }
 0xda1   :  { %v4646_v10 = vadd.f32 %v9980_v0, %v4550_v42  ;;  %v4549_v43 = vmul.f32 %v9972_v45, %v4453_v53  ;;  %v4407_v0 = vadd.f32 1e-05, %v4375_v16  ;;  %v4399_v45 = vsub.f32 %v9880_v30, %v10069_v49  ;;  %v6817_v57 = vpop.eup %6816  ;;  %v11271_v49 = vld [vmem:[#allocation43_spill] sm:$0xff] }
 0xda2   :  { %6828 = vrsqrt.f32 %v4408_v47  ;;  %v10179_v30 = vmax.f32 %v4644_v63, 0.0  ;;  %v4642_v9 = vadd.f32 %v11271_v49, %v4546_v36  ;;  %v4544_v50 = vmul.f32 %v11272_v8, %v4448_v41  ;;  %v6819_v60 = vpop.eup %6818  ;;  %v4463_v6 = vpop.permute.xlu1 %4462  ;;  %v11283_v8 = vld [vmem:[#allocation44_spill] sm:$0xff] }
 0xda3   :  { %v10161_v2 = vmax.f32 %v4646_v10, 0.0  ;;  %v4645_v23 = vadd.f32 %v9990_v39, %v4549_v43  ;;  %v11269_v39 = vld [vmem:[#allocation42_spill] sm:$0xff]  ;;  %v4447_v56 = vmul.f32 %v6815_v46, %v4399_v45  ;;  %6830 = vrsqrt.f32 %v4407_v0  ;;  %v6821_v12 = vpop.eup %6820 }
 0xda4   :  { %v4545_v35 = vmul.f32 %v11269_v39, %v4449_v55  ;;  %v4446_v5 = vmul.f32 %v6817_v57, %v4398_v61  ;;  %v10193_v31 = vmax.f32 %v4642_v9, 0.0  ;;  %v4640_v51 = vadd.f32 %v11276_v26, %v4544_v50  ;;  %v4569_v53 = vpop.permute.xlu0 %4568  ;;  %v6823_v37 = vpop.eup %6822  ;;  %v11279_v10 = vld [vmem:[#allocation14_spill] sm:$0xff] }
 0xda5   :  { %4709 = vrot.lane.b32.xlu0 %v10161_v2, %s6888_s26  ;;  %6226 = vmatprep.subr.mxu0 %v10161_v2  ;;  %v10171_v3 = vmax.f32 %v4645_v23, 0.0  ;;  %v4543_v44 = vmul.f32 %v11275_v27, %v4447_v56  ;;  %v4396_v42 = vsub.f32 %v11277_v52, %v10088_v1  ;;  %v4445_v29 = vmul.f32 %v6819_v60, %v4397_v19  ;;  %v6825_v55 = vpop.eup %6824  ;;  %v11280_v23 = vld [vmem:[#allocation31_spill] sm:$0xff] }
 0xda6   :  { %v4641_v4 = vadd.f32 %v11273_v48, %v4545_v35  ;;  %v4542_v7 = vmul.f32 %v11278_v22, %v4446_v5  ;;  %v4395_v43 = vsub.f32 %v11279_v10, %v10091_v15  ;;  %v4394_v63 = vsub.f32 %v11280_v23, %v10101_v32  ;;  %v6827_v36 = vpop.eup %6826  ;;  %v4458_v61 = vpop.permute.xlu1 %4457  ;;  %v3671_v52 = vld [vmem:[%s10990_s21 + $0x10] sm:$0xff]  ;;  %v3734_v22 = vld [vmem:[%s10992_s23 + $0x8] sm:$0xff]  ;;  %v3720_v10 = vld [vmem:[%s10991_s22 + $0x18] sm:$0xff] }
 0xda7   :  { %4707 = vrot.lane.b32.xlu1 %v10171_v3, %s6888_s26  ;;  %v4639_v16 = vadd.f32 %v10098_v40, %v4543_v44  ;;  %v4541_v47 = vmul.f32 %v10096_v13, %v4445_v29  ;;  %v4444_v1 = vmul.f32 %v6821_v12, %v4396_v42  ;;  %v10210_v40 = vmax.f32 %v4640_v51, 0.0  ;;  %v11281_v13 = vld [vmem:[#allocation15_spill] sm:$0xff]  ;;  %6589 = vmatprep.mubr.f32.mxu1 %v3671_v52  ;;  %v3733_v29 = vld [vmem:[%s10992_s23] sm:$0xff] }
 0xda8   :  { %v10202_v20 = vmax.f32 %v4641_v4, 0.0  ;;  %v4638_v41 = vadd.f32 %v10112_v38, %v4542_v7  ;;  %v4443_v0 = vmul.f32 %v6823_v37, %v4395_v43  ;;  %v4393_v38 = vsub.f32 %v11281_v13, %v10107_v54  ;;  %v4564_v59 = vpop.permute.xlu0 %4563  ;;  %v3718_v42 = vld [vmem:[%s10991_s22 + $0x8] sm:$0xff]  ;;  %v3719_v37 = vld [vmem:[%s10991_s22 + $0x10] sm:$0xff]  ;;  %v3721_v7 = vld [vmem:[%s10991_s22 + $0x20] sm:$0xff] }
 0xda9   :  { %4705 = vrot.lane.b32.xlu0 %v10179_v30, %s6888_s26  ;;  %v10214_v46 = vmax.f32 %v4639_v16, 0.0  ;;  %v4540_v15 = vmul.f32 %v10120_v21, %v4444_v1  ;;  %v4637_v45 = vadd.f32 %v10133_v14, %v4541_v47  ;;  %v4442_v57 = vmul.f32 %v6825_v55, %v4394_v63  ;;  %v11282_v21 = vld [vmem:[#allocation13_spill] sm:$0xff]  ;;  %v3735_v16 = vld [vmem:[%s10992_s23 + $0x10] sm:$0xff]  ;;  %v3722_v47 = vld [vmem:[%s10991_s22 + $0x28] sm:$0xff] }
 0xdaa   :  { %v10222_v35 = vmax.f32 %v4638_v41, 0.0  ;;  %v4539_v32 = vmul.f32 %v10142_v28, %v4443_v0  ;;  %v4392_v14 = vsub.f32 %v11282_v21, %v10115_v62  ;;  %v4441_v49 = vmul.f32 %v6827_v36, %v4393_v38  ;;  %v4554_v24 = vpop.permute.xlu1 %4553  ;;  %v3737_v43 = vld [vmem:[%s10992_s23 + $0x20] sm:$0xff]  ;;  %v3723_v55 = vld [vmem:[%s10991_s22 + $0x30] sm:$0xff]  ;;  %v3738_v41 = vld [vmem:[%s10992_s23 + $0x28] sm:$0xff] }
 0xdab   :  { %4703 = vrot.lane.b32.xlu1 %v10185_v25, %s6888_s26  ;;  %v4636_v11 = vadd.f32 %v10154_v17, %v4540_v15  ;;  %v10230_v56 = vmax.f32 %v4637_v45, 0.0  ;;  %v4538_v54 = vmul.f32 %v10159_v34, %v4442_v57  ;;  %v4391_v17 = vsub.f32 %v11283_v8, %v10123_v18  ;;  %v3739_v1 = vld [vmem:[%s10992_s23 + $0x30] sm:$0xff]  ;;  %v3725_v23 = vld [vmem:[%s10991_s22 + $0x40] sm:$0xff]  ;;  %v3724_v63 = vld [vmem:[%s10991_s22 + $0x38] sm:$0xff] }
 0xdac   :  { %v4635_v9 = vadd.f32 %v4574_v58, %v4539_v32  ;;  %v4537_v60 = vmul.f32 %v4468_v33, %v4441_v49  ;;  %v4559_v62 = vpop.permute.xlu0 %4558  ;;  %v3741_v36 = vld [vmem:[%s10992_s23 + $0x40] sm:$0xff]  ;;  %v3740_v15 = vld [vmem:[%s10992_s23 + $0x38] sm:$0xff]  ;;  %v3727_v0 = vld [vmem:[%s10991_s22 + $0x50] sm:$0xff] }
 0xdad   :  { %4701 = vrot.lane.b32.xlu0 %v10193_v31, %s6888_s26  ;;  %v10237_v50 = vmax.f32 %v4636_v11, 0.0  ;;  %v4634_v48 = vadd.f32 %v4569_v53, %v4538_v54  ;;  %v3717_v53 = vld [vmem:[%s10991_s22] sm:$0xff]  ;;  %v3726_v45 = vld [vmem:[%s10991_s22 + $0x48] sm:$0xff]  ;;  %v3743_v13 = vld [vmem:[%s10992_s23 + $0x50] sm:$0xff] }
 0xdae   :  { %v10241_v4 = vmax.f32 %v4635_v9, 0.0  ;;  %v4633_v12 = vadd.f32 %v4564_v59, %v4537_v60  ;;  %v3742_v38 = vld [vmem:[%s10992_s23 + $0x48] sm:$0xff]  ;;  %v3729_v59 = vld [vmem:[%s10991_s22 + $0x60] sm:$0xff]  ;;  %v3744_v57 = vld [vmem:[%s10992_s23 + $0x58] sm:$0xff] }
 0xdaf   :  { %4699 = vrot.lane.b32.xlu1 %v10202_v20, %s6888_s26  ;;  %v6829_v39 = vpop.eup %6828  ;;  %v10245_v19 = vmax.f32 %v4634_v48, 0.0  ;;  %v3745_v32 = vld [vmem:[%s10992_s23 + $0x60] sm:$0xff]  ;;  %v3731_v11 = vld [vmem:[%s10991_s22 + $0x70] sm:$0xff] }
 0xdb0   :  { %v6831_v28 = vpop.eup %6830  ;;  %v4440_v5 = vmul.f32 %v6829_v39, %v4392_v14  ;;  %v10249_v33 = vmax.f32 %v4633_v12, 0.0  ;;  %v3728_v39 = vld [vmem:[%s10991_s22 + $0x58] sm:$0xff]  ;;  %v11284_v54 = vld [vmem:[#allocation7_spill] sm:$0xff] }
 0xdb1   :  { %4697 = vrot.lane.b32.xlu0 %v10210_v40, %s6888_s26  ;;  %v4439_v58 = vmul.f32 %v6831_v28, %v4391_v17 }
 0xdb2   :  { %v4536_v34 = vmul.f32 %v4463_v6, %v4440_v5  ;;  %v3736_v6 = vld [vmem:[%s10992_s23 + $0x18] sm:$0xff]  ;;  %v3746_v5 = vld [vmem:[%s10992_s23 + $0x68] sm:$0xff] }
 0xdb3   :  { %4695 = vrot.lane.b32.xlu1 %v10214_v46, %s6888_s26  ;;  %v4535_v18 = vmul.f32 %v4458_v61, %v4439_v58  ;;  %v3730_v61 = vld [vmem:[%s10991_s22 + $0x68] sm:$0xff] }
 0xdb4   :  { %v4632_v27 = vadd.f32 %v4559_v62, %v4536_v34 }
 0xdb5   :  { %4693 = vrot.lane.b32.xlu0 %v10222_v35, %s6888_s26  ;;  %v4631_v44 = vadd.f32 %v4554_v24, %v4535_v18 }
 0xdb6   :  { %v10253_v26 = vmax.f32 %v4632_v27, 0.0 }
 0xdb7   :  { %4691 = vrot.lane.b32.xlu1 %v10230_v56, %s6888_s26  ;;  %v10257_v51 = vmax.f32 %v4631_v44, 0.0 }
 0xdb9   :  { %4689 = vrot.lane.b32.xlu0 %v10237_v50, %s6888_s26 }
 0xdbb   :  { %4687 = vrot.lane.b32.xlu1 %v10241_v4, %s6888_s26 }
 0xdbd   :  { %4685 = vrot.lane.b32.xlu0 %v10245_v19, %s6888_s26 }
 0xdbf   :  { %4683 = vrot.lane.b32.xlu1 %v10249_v33, %s6888_s26 }
 0xdc1   :  { %4681 = vrot.lane.b32.xlu0 %v10253_v26, %s6888_s26 }
 0xdc3   :  { %4679 = vrot.lane.b32.xlu1 %v10257_v51, %s6888_s26 }
 0xdc5   :  { %4789 = vrot.lane.b32.xlu0 %v10161_v2, %s6886_s0  ;;  %v3670_v2 = vld [vmem:[%s10990_s21 + $0x8] sm:$0xff] }
 0xdc6   :  { %4903 = vmatprep.mubr.f32.mxu0 %v3670_v2 }
 0xdc7   :  { %4787 = vrot.lane.b32.xlu1 %v10171_v3, %s6886_s0 }
 0xdc9   :  { %4785 = vrot.lane.b32.xlu0 %v10179_v30, %s6886_s0 }
 0xdcb   :  { %4783 = vrot.lane.b32.xlu1 %v10185_v25, %s6886_s0 }
 0xdcd   :  { %4781 = vrot.lane.b32.xlu0 %v10193_v31, %s6886_s0 }
 0xdcf   :  { %4779 = vrot.lane.b32.xlu1 %v10202_v20, %s6886_s0 }
 0xdd1   :  { %4777 = vrot.lane.b32.xlu0 %v10210_v40, %s6886_s0 }
 0xdd3   :  { %4775 = vrot.lane.b32.xlu1 %v10214_v46, %s6886_s0 }
 0xdd5   :  { %4773 = vrot.lane.b32.xlu0 %v10222_v35, %s6886_s0 }
 0xdd7   :  { %4771 = vrot.lane.b32.xlu1 %v10230_v56, %s6886_s0 }
 0xdd9   :  { %4769 = vrot.lane.b32.xlu0 %v10237_v50, %s6886_s0 }
 0xddb   :  { %4767 = vrot.lane.b32.xlu1 %v10241_v4, %s6886_s0 }
 0xddd   :  { %4765 = vrot.lane.b32.xlu0 %v10245_v19, %s6886_s0 }
 0xddf   :  { %4763 = vrot.lane.b32.xlu1 %v10249_v33, %s6886_s0 }
 0xde1   :  { %4761 = vrot.lane.b32.xlu0 %v10253_v26, %s6886_s0 }
 0xde3   :  { %4759 = vrot.lane.b32.xlu1 %v10257_v51, %s6886_s0 }
 0xde5   :  { %5376 = vperm.xlu0 %6687, %v3718_v42  }
 0xde7   :  { %5371 = vperm.xlu1 %6686, %v3717_v53  }
 0xde9   :  { %5381 = vperm.xlu0 %6687, %v3719_v37  }
 0xdeb   :  { %5467 = vperm.xlu1 %6686, %v3733_v29  }
 0xded   :  { %5477 = vperm.xlu0 %6687, %v3735_v16  }
 0xdef   :  { %5472 = vperm.xlu1 %6686, %v3734_v22  }
 0xdf1   :  { %5391 = vperm.xlu0 %6687, %v3721_v7  }
 0xdf3   :  { %5386 = vperm.xlu1 %6686, %v3720_v10  }
 0xdf5   :  { %5487 = vperm.xlu0 %6687, %v3737_v43  }
 0xdf7   :  { %5482 = vperm.xlu1 %6686, %v3736_v6  }
 0xdf9   :  { %5401 = vperm.xlu0 %6687, %v3723_v55  }
 0xdfb   :  { %5396 = vperm.xlu1 %6686, %v3722_v47  }
 0xdfd   :  { %5497 = vperm.xlu0 %6687, %v3739_v1  }
 0xdff   :  { %5492 = vperm.xlu1 %6686, %v3738_v41  }
 0xe01   :  { %5411 = vperm.xlu0 %6687, %v3725_v23  }
 0xe03   :  { %5406 = vperm.xlu1 %6686, %v3724_v63  }
 0xe05   :  { %5507 = vperm.xlu0 %6687, %v3741_v36  }
 0xe07   :  { %5502 = vperm.xlu1 %6686, %v3740_v15  }
 0xe09   :  { %5421 = vperm.xlu0 %6687, %v3727_v0  }
 0xe0b   :  { %5416 = vperm.xlu1 %6686, %v3726_v45  }
 0xe0d   :  { %5517 = vperm.xlu0 %6687, %v3743_v13  }
 0xe0f   :  { %5512 = vperm.xlu1 %6686, %v3742_v38   ;;  %v11285_v38 = vld [vmem:[#allocation6_spill] sm:$0xff] }
 0xe11   :  { %5431 = vperm.xlu0 %6687, %v3729_v59  }
 0xe13   :  { %5426 = vperm.xlu1 %6686, %v3728_v39  }
 0xe15   :  { %5527 = vperm.xlu0 %6687, %v3745_v32   ;;  %v11286_v32 = vmov 0.0  }
 0xe17   :  { %v4710_v21 = vpop.permute.xlu0 %4709  ;;  %5522 = vperm.xlu1 %6686, %v3744_v57  }
 0xe18   :  { %v4742_v14 = vsel %vm132_vm3, 0.0, %v4710_v21 }
 0xe19   :  { %v4758_v49 = vmul.f32 %v11284_v54, %v4742_v14  ;;  %5441 = vperm.xlu0 %6687, %v3731_v11   ;;  %v4708_v9 = vpop.permute.xlu1 %4707  ;;  %v3676_v14 = vld [vmem:[%s10990_s21 + $0x38] sm:$0xff] }
 0xe1a   :  { %v4741_v28 = vsel %vm132_vm3, 0.0, %v4708_v9 }
 0xe1b   :  { %v4757_v8 = vmul.f32 %v11284_v54, %v4741_v28  ;;  %6227 = vmatpush3.msra.mxu0 %v4758_v49  ;;  %v4706_v17 = vpop.permute.xlu0 %4705  ;;  %5436 = vperm.xlu1 %6686, %v3730_v61  }
 0xe1c   :  { %v4740_v60 = vsel %vm132_vm3, 0.0, %v4706_v17  ;;  %6228 = vmatprep.subr.mxu0 %v10171_v3  ;;  %v3732_v3 = vld [vmem:[%s10991_s22 + $0x78] sm:$0xff]  ;;  %s5879_s22 = sshll.u32 %s6891_s18, 4  ;;  %s5880_s22 = int_to_ptr.vmem [resolvable:$true] %s5879_s22 }
 0xe1d   :  { %v4756_v48 = vmul.f32 %v11284_v54, %v4740_v60  ;;  %6229 = vmatpush3.msra.mxu0 %v4757_v8  ;;  %v4704_v62 = vpop.permute.xlu1 %4703  ;;  %v3675_v8 = vld [vmem:[%s10990_s21 + $0x30] sm:$0xff]  ;;  %s6864_s0 = scalar_lea.vmem %s5880_s22, 16  ;;  %p6869_p1 = scmp.lt.s32.totalorder %s5880_s22, %s5880_s22 }
 0xe1e   :  { %v4739_v34 = vsel %vm132_vm3, 0.0, %v4704_v62  ;;  %6230 = vmatprep.subr.mxu0 %v10179_v30  ;;  %v3679_v60 = vld [vmem:[%s10990_s21 + $0x50] sm:$0xff]  ;;  %p6865_p0 = scmp.ne.s32.totalorder %s5880_s22, %s6864_s0 }
 0xe1f   :  { %v4755_v58 = vmul.f32 %v11284_v54, %v4739_v34  ;;  %v4702_v12 = vpop.permute.xlu0 %4701  ;;  %5532 = vperm.xlu1 %6686, %v3746_v5   ;;  %6231 = vmatpush3.msra.mxu0 %v4756_v48 }
 0xe20   :  { %v4738_v24 = vsel %vm132_vm3, 0.0, %v4702_v12  ;;  %6232 = vmatprep.subr.mxu0 %v10185_v25  ;;  %v3678_v12 = vld [vmem:[%s10990_s21 + $0x48] sm:$0xff] }
 0xe21   :  { %v4754_v18 = vmul.f32 %v11284_v54, %v4738_v24  ;;  %6233 = vmatpush3.msra.mxu0 %v4755_v58  ;;  %v4700_v27 = vpop.permute.xlu1 %4699 }
 0xe22   :  { %v4737_v44 = vsel %vm132_vm3, 0.0, %v4700_v27  ;;  %6234 = vmatprep.subr.mxu0 %v10193_v31 }
 0xe23   :  { %v4753_v30 = vmul.f32 %v11284_v54, %v4737_v44  ;;  %v4698_v2 = vpop.permute.xlu0 %4697  ;;  %5446 = vperm.xlu1 %6686, %v3732_v3   ;;  %6235 = vmatpush3.msra.mxu0 %v4754_v18  ;;  %v3682_v3 = vld [vmem:[%s10990_s21 + $0x68] sm:$0xff] }
 0xe24   :  { %v4736_v52 = vsel %vm132_vm3, 0.0, %v4698_v2  ;;  %6236 = vmatprep.subr.mxu0 %v10202_v20 }
 0xe25   :  { %v4752_v25 = vmul.f32 %v11284_v54, %v4736_v52  ;;  %6237 = vmatpush3.msra.mxu0 %v4753_v30  ;;  %v4696_v42 = vpop.permute.xlu1 %4695  ;;  %v3681_v52 = vld [vmem:[%s10990_s21 + $0x60] sm:$0xff] }
 0xe26   :  { %v4735_v53 = vsel %vm132_vm3, 0.0, %v4696_v42  ;;  %6238 = vmatprep.subr.mxu0 %v10210_v40  ;;  %v3685_v42 = vld [vmem:[%s10990_s21 + $0x80] sm:$0xff] }
 0xe27   :  { %v4751_v37 = vmul.f32 %v11284_v54, %v4735_v53  ;;  %v4694_v31 = vpop.permute.xlu0 %4693  ;;  %6239 = vmatpush3.msra.mxu0 %v4752_v25 }
 0xe28   :  { %v4734_v29 = vsel %vm132_vm3, 0.0, %v4694_v31  ;;  %6240 = vmatprep.subr.mxu0 %v10214_v46 }
 0xe29   :  { %v4750_v16 = vmul.f32 %v11284_v54, %v4734_v29  ;;  %6241 = vmatpush3.msra.mxu0 %v4751_v37  ;;  %v4692_v20 = vpop.permute.xlu1 %4691 }
 0xe2a   :  { %v4733_v22 = vsel %vm132_vm3, 0.0, %v4692_v20  ;;  %6242 = vmatprep.subr.mxu0 %v10222_v35  ;;  %v3684_v20 = vld [vmem:[%s10990_s21 + $0x78] sm:$0xff] }
 0xe2b   :  { %v4749_v7 = vmul.f32 %v11284_v54, %v4733_v22  ;;  %v4690_v10 = vpop.permute.xlu0 %4689  ;;  %6243 = vmatpush3.msra.mxu0 %v4750_v16 }
 0xe2c   :  { %v4732_v40 = vsel %vm132_vm3, 0.0, %v4690_v10  ;;  %6244 = vmatprep.subr.mxu0 %v10230_v56 }
 0xe2d   :  { %v4748_v43 = vmul.f32 %v11284_v54, %v4732_v40  ;;  %6245 = vmatpush3.msra.mxu0 %v4749_v7  ;;  %v4688_v46 = vpop.permute.xlu1 %4687  ;;  %v3688_v7 = vld [vmem:[%s10990_s21 + $0x98] sm:$0xff] }
 0xe2e   :  { %v4731_v6 = vsel %vm132_vm3, 0.0, %v4688_v46  ;;  %6246 = vmatprep.subr.mxu0 %v10237_v50 }
 0xe2f   :  { %v4747_v55 = vmul.f32 %v11284_v54, %v4731_v6  ;;  %v4686_v47 = vpop.permute.xlu0 %4685  ;;  %6247 = vmatpush3.msra.mxu0 %v4748_v43 }
 0xe30   :  { %v4730_v35 = vsel %vm132_vm3, 0.0, %v4686_v47  ;;  %6248 = vmatprep.subr.mxu0 %v10241_v4 }
 0xe31   :  { %v4746_v1 = vmul.f32 %v11284_v54, %v4730_v35  ;;  %6249 = vmatpush3.msra.mxu0 %v4747_v55  ;;  %v4684_v56 = vpop.permute.xlu1 %4683  ;;  %v3687_v55 = vld [vmem:[%s10990_s21 + $0x90] sm:$0xff] }
 0xe32   :  { %v4729_v41 = vsel %vm132_vm3, 0.0, %v4684_v56  ;;  %6250 = vmatprep.subr.mxu0 %v10245_v19  ;;  %v3669_v19 = vld [vmem:[%s10990_s21] sm:$0xff]  ;;  %v3691_v35 = vld [vmem:[%s10990_s21 + $0xb0] sm:$0xff] }
 0xe33   :  { %v4745_v23 = vmul.f32 %v11284_v54, %v4729_v41  ;;  %v4682_v63 = vpop.permute.xlu0 %4681  ;;  %6251 = vmatpush3.msra.mxu0 %v4746_v1 }
 0xe34   :  { %v4728_v50 = vsel %vm132_vm3, 0.0, %v4682_v63  ;;  %6252 = vmatprep.subr.mxu0 %v10249_v33  ;;  %v3673_v33 = vld [vmem:[%s10990_s21 + $0x20] sm:$0xff] }
 0xe35   :  { %v4744_v36 = vmul.f32 %v11284_v54, %v4728_v50  ;;  %6253 = vmatpush3.msra.mxu0 %v4745_v23  ;;  %v4680_v4 = vpop.permute.xlu1 %4679  ;;  %v3690_v50 = vld [vmem:[%s10990_s21 + $0xa8] sm:$0xff] }
 0xe36   :  { %v4727_v15 = vsel %vm132_vm3, 0.0, %v4680_v4  ;;  %6254 = vmatprep.subr.mxu0 %v10253_v26  ;;  %v3694_v4 = vld [vmem:[%s10990_s21 + $0xc8] sm:$0xff] }
 0xe37   :  { %v4743_v0 = vmul.f32 %v11284_v54, %v4727_v15  ;;  %v4790_v45 = vpop.permute.xlu0 %4789  ;;  %6255 = vmatpush3.msra.mxu0 %v4744_v36 }
 0xe38   :  { %v4822_v13 = vsel %vm148_vm2, %v4790_v45, 0.0  ;;  %6256 = vmatprep.subr.mxu0 %v10257_v51  ;;  %v3672_v51 = vld [vmem:[%s10990_s21 + $0x18] sm:$0xff] }
 0xe39   :  { %v4838_v59 = vmul.f32 %v11285_v38, %v4822_v13  ;;  %6257 = vmatpush3.msra.mxu0 %v4743_v0  ;;  %v4788_v26 = vpop.permute.xlu1 %4787  ;;  %v3693_v13 = vld [vmem:[%s10990_s21 + $0xc0] sm:$0xff] }
 0xe3a   :  { %v4821_v39 = vsel %vm148_vm2, %v4788_v26, 0.0  ;;  %4904 = vmatmul.mubr.f32.vlgmr.msra.gmra.mxu0 %v3669_v19  ;;  %6645 = vmatprep.subr.mxu0 %v11286_v32  ;;  %v3696_v26 = vld [vmem:[%s10990_s21 + $0xd8] sm:$0xff] }
 0xe3b   :  { %v4837_v57 = vmul.f32 %v11285_v38, %v4821_v39  ;;  %6557 = vmatprep.subr.mxu1 %v4838_v59  ;;  %v4786_v11 = vpop.permute.xlu0 %4785  ;;  %4908 = vmatprep.mubr.f32.mxu0 %v3673_v33  ;;  %v3674_v33 = vld [vmem:[%s10990_s21 + $0x28] sm:$0xff]  ;;  %v3680_v39 = vld [vmem:[%s10990_s21 + $0x58] sm:$0xff] }
 0xe3c   :  { %v4820_v21 = vsel %vm148_vm2, %v4786_v11, 0.0  ;;  %6558 = vmatpush3.msra.mxu1 %v4838_v59  ;;  %v3697_v59 = vld [vmem:[%s10990_s21 + $0xe0] sm:$0xff]  ;;  %v3683_v11 = vld [vmem:[%s10990_s21 + $0x70] sm:$0xff] }
 0xe3d   :  { %v4836_v61 = vmul.f32 %v11285_v38, %v4820_v21  ;;  %6559 = vmatprep.subr.mxu1 %v4837_v57  ;;  %v4784_v54 = vpop.permute.xlu1 %4783  ;;  %v3686_v21 = vld [vmem:[%s10990_s21 + $0x88] sm:$0xff] }
 0xe3e   :  { %v4819_v49 = vsel %vm148_vm2, %v4784_v54, 0.0  ;;  %6560 = vmatpush3.msra.mxu1 %v4837_v57  ;;  %4909 = vmatmul.mubr.f32.gmra.mxu0 %v3672_v51  ;;  %v3700_v57 = vld [vmem:[%s10990_s21 + $0xf8] sm:$0xff]  ;;  %v3699_v51 = vld [vmem:[%s10990_s21 + $0xf0] sm:$0xff]  ;;  %v3702_v54 = vld [vmem:[%s10990_s21 + $0x108] sm:$0xff] }
 0xe3f   :  { %v4835_v9 = vmul.f32 %v11285_v38, %v4819_v49  ;;  %v4782_v28 = vpop.permute.xlu0 %4781  ;;  %6561 = vmatprep.subr.mxu1 %v4836_v61  ;;  %4913 = vmatprep.mubr.f32.mxu0 %v3676_v14  ;;  %v3703_v14 = vld [vmem:[%s10990_s21 + $0x110] sm:$0xff]  ;;  %v3692_v49 = vld [vmem:[%s10990_s21 + $0xb8] sm:$0xff] }
 0xe40   :  { %v4818_v17 = vsel %vm148_vm2, %v4782_v28, 0.0  ;;  %6562 = vmatpush3.msra.mxu1 %v4836_v61  ;;  %v3689_v61 = vld [vmem:[%s10990_s21 + $0xa0] sm:$0xff]  ;;  %v3695_v28 = vld [vmem:[%s10990_s21 + $0xd0] sm:$0xff] }
 0xe41   :  { %v4834_v5 = vmul.f32 %v11285_v38, %v4818_v17  ;;  %6563 = vmatprep.subr.mxu1 %v4835_v9  ;;  %v4780_v48 = vpop.permute.xlu1 %4779  ;;  %v3698_v17 = vld [vmem:[%s10990_s21 + $0xe8] sm:$0xff] }
 0xe42   :  { %v4817_v62 = vsel %vm148_vm2, %v4780_v48, 0.0  ;;  %6564 = vmatpush3.msra.mxu1 %v4835_v9  ;;  %4914 = vmatmul.mubr.f32.gmra.mxu0 %v3675_v8  ;;  %v3706_v9 = vld [vmem:[%s10990_s21 + $0x128] sm:$0xff]  ;;  %v3705_v8 = vld [vmem:[%s10990_s21 + $0x120] sm:$0xff]  ;;  %v3708_v48 = vld [vmem:[%s10990_s21 + $0x138] sm:$0xff] }
 0xe43   :  { %v4833_v34 = vmul.f32 %v11285_v38, %v4817_v62  ;;  %v4778_v58 = vpop.permute.xlu0 %4777  ;;  %6565 = vmatprep.subr.mxu1 %v4834_v5  ;;  %4918 = vmatprep.mubr.f32.mxu0 %v3679_v60  ;;  %v3709_v60 = vld [vmem:[%s10990_s21 + $0x140] sm:$0xff]  ;;  %v3704_v62 = vld [vmem:[%s10990_s21 + $0x118] sm:$0xff] }
 0xe44   :  { %v4816_v24 = vsel %vm148_vm2, %v4778_v58, 0.0  ;;  %6566 = vmatpush3.msra.mxu1 %v4834_v5  ;;  %v3701_v5 = vld [vmem:[%s10990_s21 + $0x100] sm:$0xff]  ;;  %v3707_v58 = vld [vmem:[%s10990_s21 + $0x130] sm:$0xff] }
 0xe45   :  { %v4832_v18 = vmul.f32 %v11285_v38, %v4816_v24  ;;  %6567 = vmatprep.subr.mxu1 %v4833_v34  ;;  %v4776_v27 = vpop.permute.xlu1 %4775  ;;  %v3710_v24 = vld [vmem:[%s10990_s21 + $0x148] sm:$0xff] }
 0xe46   :  { %v4815_v44 = vsel %vm148_vm2, %v4776_v27, 0.0  ;;  %6568 = vmatpush3.msra.mxu1 %v4833_v34  ;;  %4919 = vmatmul.mubr.f32.gmra.mxu0 %v3678_v12  ;;  %v3712_v34 = vld [vmem:[%s10990_s21 + $0x158] sm:$0xff]  ;;  %v3711_v12 = vld [vmem:[%s10990_s21 + $0x150] sm:$0xff]  ;;  %v3714_v27 = vld [vmem:[%s10990_s21 + $0x168] sm:$0xff] }
 0xe47   :  { %v4831_v30 = vmul.f32 %v11285_v38, %v4815_v44  ;;  %v4774_v2 = vpop.permute.xlu0 %4773  ;;  %6569 = vmatprep.subr.mxu1 %v4832_v18  ;;  %4923 = vmatprep.mubr.f32.mxu0 %v3682_v3  ;;  %v3715_v3 = vld [vmem:[%s10990_s21 + $0x170] sm:$0xff]  ;;  %v3716_v44 = vld [vmem:[%s10990_s21 + $0x178] sm:$0xff] }
 0xe48   :  { %v4814_v25 = vsel %vm148_vm2, %v4774_v2, 0.0  ;;  %6570 = vmatpush3.msra.mxu1 %v4832_v18  ;;  %v3713_v18 = vld [vmem:[%s10990_s21 + $0x160] sm:$0xff] }
 0xe49   :  { %v4830_v53 = vmul.f32 %v11285_v38, %v4814_v25  ;;  %6571 = vmatprep.subr.mxu1 %v4831_v30  ;;  %v4772_v37 = vpop.permute.xlu1 %4771 }
 0xe4a   :  { %v4813_v31 = vsel %vm148_vm2, %v4772_v37, 0.0  ;;  %6572 = vmatpush3.msra.mxu1 %v4831_v30  ;;  %4924 = vmatmul.mubr.f32.gmra.mxu0 %v3681_v52 }
 0xe4b   :  { %v4829_v29 = vmul.f32 %v11285_v38, %v4813_v31  ;;  %v4770_v16 = vpop.permute.xlu0 %4769  ;;  %6573 = vmatprep.subr.mxu1 %v4830_v53  ;;  %4928 = vmatprep.mubr.f32.mxu0 %v3685_v42 }
 0xe4c   :  { %v4812_v22 = vsel %vm148_vm2, %v4770_v16, 0.0  ;;  %6574 = vmatpush3.msra.mxu1 %v4830_v53 }
 0xe4d   :  { %v4828_v10 = vmul.f32 %v11285_v38, %v4812_v22  ;;  %6575 = vmatprep.subr.mxu1 %v4829_v29  ;;  %v4768_v40 = vpop.permute.xlu1 %4767 }
 0xe4e   :  { %v4811_v43 = vsel %vm148_vm2, %v4768_v40, 0.0  ;;  %6576 = vmatpush3.msra.mxu1 %v4829_v29  ;;  %4929 = vmatmul.mubr.f32.gmra.mxu0 %v3684_v20 }
 0xe4f   :  { %v4827_v46 = vmul.f32 %v11285_v38, %v4811_v43  ;;  %v4766_v6 = vpop.permute.xlu0 %4765  ;;  %6577 = vmatprep.subr.mxu1 %v4828_v10  ;;  %4933 = vmatprep.mubr.f32.mxu0 %v3688_v7 }
 0xe50   :  { %v4810_v47 = vsel %vm148_vm2, %v4766_v6, 0.0  ;;  %6578 = vmatpush3.msra.mxu1 %v4828_v10 }
 0xe51   :  { %v4826_v1 = vmul.f32 %v11285_v38, %v4810_v47  ;;  %6579 = vmatprep.subr.mxu1 %v4827_v46  ;;  %v4764_v56 = vpop.permute.xlu1 %4763 }
 0xe52   :  { %v4809_v41 = vsel %vm148_vm2, %v4764_v56, 0.0  ;;  %6580 = vmatpush3.msra.mxu1 %v4827_v46  ;;  %4934 = vmatmul.mubr.f32.gmra.mxu0 %v3687_v55 }
 0xe53   :  { %v4825_v23 = vmul.f32 %v11285_v38, %v4809_v41  ;;  %v4762_v63 = vpop.permute.xlu0 %4761  ;;  %6581 = vmatprep.subr.mxu1 %v4826_v1  ;;  %4938 = vmatprep.mubr.f32.mxu0 %v3691_v35 }
 0xe54   :  { %v4808_v36 = vsel %vm148_vm2, %v4762_v63, 0.0  ;;  %6582 = vmatpush3.msra.mxu1 %v4826_v1 }
 0xe55   :  { %v4824_v15 = vmul.f32 %v11285_v38, %v4808_v36  ;;  %6583 = vmatprep.subr.mxu1 %v4825_v23  ;;  %v4760_v0 = vpop.permute.xlu1 %4759 }
 0xe56   :  { %v4807_v45 = vsel %vm148_vm2, %v4760_v0, 0.0  ;;  %6584 = vmatpush3.msra.mxu1 %v4825_v23  ;;  %4939 = vmatmul.mubr.f32.gmra.mxu0 %v3690_v50 }
 0xe57   :  { %v4823_v19 = vmul.f32 %v11285_v38, %v4807_v45  ;;  %6585 = vmatprep.subr.mxu1 %v4824_v15  ;;  %4943 = vmatprep.mubr.f32.mxu0 %v3694_v4  ;;  %v3677_v38 = vld [vmem:[%s10990_s21 + $0x40] sm:$0xff] }
 0xe58   :  { %6586 = vmatpush3.msra.mxu1 %v4824_v15 }
 0xe59   :  { %6587 = vmatprep.subr.mxu1 %v4823_v19 }
 0xe5a   :  { %6588 = vmatpush3.msra.mxu1 %v4823_v19  ;;  %4944 = vmatmul.mubr.f32.gmra.mxu0 %v3693_v13 }
 0xe5b   :  { %6590 = vmatmul.mubr.f32.vlgmr.msra.gmra.mxu1 %v3674_v33  ;;  %4948 = vmatprep.mubr.f32.mxu0 %v3697_v59 }
 0xe5c   :  { %6592 = vmatprep.mubr.f32.mxu1 %v3677_v38 }
 0xe5e   :  { %4949 = vmatmul.mubr.f32.gmra.mxu0 %v3696_v26 }
 0xe5f   :  { %6593 = vmatmul.mubr.f32.gmra.mxu1 %v3680_v39  ;;  %4953 = vmatprep.mubr.f32.mxu0 %v3700_v57 }
 0xe60   :  { %6595 = vmatprep.mubr.f32.mxu1 %v3683_v11 }
 0xe62   :  { %4954 = vmatmul.mubr.f32.gmra.mxu0 %v3699_v51 }
 0xe63   :  { %6596 = vmatmul.mubr.f32.gmra.mxu1 %v3686_v21  ;;  %4958 = vmatprep.mubr.f32.mxu0 %v3703_v14 }
 0xe64   :  { %6598 = vmatprep.mubr.f32.mxu1 %v3689_v61 }
 0xe66   :  { %4959 = vmatmul.mubr.f32.gmra.mxu0 %v3702_v54 }
 0xe67   :  { %6599 = vmatmul.mubr.f32.gmra.mxu1 %v3692_v49  ;;  %4963 = vmatprep.mubr.f32.mxu0 %v3706_v9 }
 0xe68   :  { %6601 = vmatprep.mubr.f32.mxu1 %v3695_v28 }
 0xe6a   :  { %4964 = vmatmul.mubr.f32.gmra.mxu0 %v3705_v8 }
 0xe6b   :  { %6602 = vmatmul.mubr.f32.gmra.mxu1 %v3698_v17  ;;  %4968 = vmatprep.mubr.f32.mxu0 %v3709_v60 }
 0xe6c   :  { %6604 = vmatprep.mubr.f32.mxu1 %v3701_v5 }
 0xe6e   :  { %4969 = vmatmul.mubr.f32.gmra.mxu0 %v3708_v48 }
 0xe6f   :  { %6605 = vmatmul.mubr.f32.gmra.mxu1 %v3704_v62  ;;  %4973 = vmatprep.mubr.f32.mxu0 %v3712_v34 }
 0xe70   :  { %6607 = vmatprep.mubr.f32.mxu1 %v3707_v58 }
 0xe72   :  { %4974 = vmatmul.mubr.f32.gmra.mxu0 %v3711_v12 }
 0xe73   :  { %6608 = vmatmul.mubr.f32.gmra.mxu1 %v3710_v24  ;;  %4978 = vmatprep.mubr.f32.mxu0 %v3715_v3 }
 0xe74   :  { %6610 = vmatprep.mubr.f32.mxu1 %v3713_v18 }
 0xe76   :  { %4979 = vmatmul.mubr.f32.gmra.mxu0 %v3714_v27 }
 0xe77   :  { %6611 = vmatmul.mubr.f32.gmra.mxu1 %v3716_v44 }
 0xefa   :  { %v6258_v30 = vpop.f32.mrf.mxu0 }
 0xefc   :  { %v6259_v2 = vpop.f32.mrf.mxu0 }
 0xefd   :  { %v6260_v47 = vadd.f32 %v6259_v2, %v6258_v30 }
 0xefe   :  { %v6261_v52 = vpop.f32.mrf.mxu0 }
 0xf00   :  { %v6262_v25 = vpop.f32.mrf.mxu0 }
 0xf01   :  { %v6263_v43 = vadd.f32 %v6262_v25, %v6261_v52 }
 0xf02   :  { %v6264_v42 = vpop.f32.mrf.mxu0 }
 0xf04   :  { %v6265_v53 = vpop.f32.mrf.mxu0 }
 0xf05   :  { %v6266_v23 = vadd.f32 %v6265_v53, %v6264_v42 }
 0xf06   :  { %v6267_v37 = vpop.f32.mrf.mxu0 }
 0xf08   :  { %v6268_v31 = vpop.f32.mrf.mxu0 }
 0xf09   :  { %v6269_v33 = vadd.f32 %v6268_v31, %v6267_v37 }
 0xf0a   :  { %v6270_v29 = vpop.f32.mrf.mxu0 }
 0xf0c   :  { %v6271_v16 = vpop.f32.mrf.mxu0 }
 0xf0d   :  { %v6272_v13 = vadd.f32 %v6271_v16, %v6270_v29 }
 0xf0e   :  { %v6273_v20 = vpop.f32.mrf.mxu0 }
 0xf10   :  { %v6274_v22 = vpop.f32.mrf.mxu0 }
 0xf11   :  { %v6275_v48 = vadd.f32 %v6274_v22, %v6273_v20 }
 0xf12   :  { %v6276_v7 = vpop.f32.mrf.mxu0 }
 0xf14   :  { %v6277_v10 = vpop.f32.mrf.mxu0 }
 0xf15   :  { %v6278_v8 = vadd.f32 %v6277_v10, %v6276_v7 }
 0xf16   :  { %v10609_v40 = vpop.f32.mrf.mxu0 }
 0xf18   :  { %v6280_v46 = vpop.f32.mrf.mxu0 }
 0xf19   :  { %v6281_v42 = vadd.f32 %v6280_v46, %v10609_v40 }
 0xf1a   :  { %v6282_v6 = vpop.f32.mrf.mxu0 }
 0xf1b   :  { %v6591_v55 = vpop.f32.mrf.mxu1 }
 0xf1c   :  { %v10611_v35 = vadd.f32 %v6591_v55, %v6263_v43  ;;  %v6283_v1 = vpop.f32.mrf.mxu0 }
 0xf1d   :  { %v5050_v56 = vpop.f32.mrf.mxu1  ;;  %v6284_v30 = vadd.f32 %v6283_v1, %v6282_v6 }
 0xf1e   :  { %v10613_v41 = vadd.f32 %v6260_v47, %v5050_v56  ;;  %v5132_v63 = vsel %vm301_vm5, %v10611_v35, 0.0  ;;  %v10617_v50 = vpop.f32.mrf.mxu0  ;;  %v5178_v11 = vmul.f32 %v10611_v35, %v10611_v35 }
 0xf1f   :  { %5133 = vadd.xlane.f32.xlu1 %v5132_v63  ;;  %v6594_v36 = vpop.f32.mrf.mxu1 }
 0xf20   :  { %v5129_v4 = vsel %vm301_vm5, %v10613_v41, 0.0  ;;  %v5177_v15 = vmul.f32 %v10613_v41, %v10613_v41  ;;  %v10623_v0 = vpop.f32.mrf.mxu0  ;;  %v10637_v49 = vadd.f32 %v6594_v36, %v6269_v33  ;;  %v5196_v9 = vsel %vm301_vm5, %v5178_v11, 0.0 }
 0xf21   :  { %v5060_v45 = vpop.f32.mrf.mxu1  ;;  %5130 = vadd.xlane.f32.xlu0 %v5129_v4  ;;  %v6287_v55 = vadd.f32 %v10623_v0, %v10617_v50 }
 0xf22   :  { %v10625_v19 = vadd.f32 %v6266_v23, %v5060_v45  ;;  %v6288_v38 = vpop.f32.mrf.mxu0  ;;  %v5193_v39 = vsel %vm301_vm5, %v5177_v15, 0.0  ;;  %v5138_v62 = vsel %vm301_vm5, %v10637_v49, 0.0  ;;  %v5180_v34 = vmul.f32 %v10637_v49, %v10637_v49 }
 0xf23   :  { %v6597_v59 = vpop.f32.mrf.mxu1 }
 0xf24   :  { %v5135_v26 = vsel %vm301_vm5, %v10625_v19, 0.0  ;;  %v5179_v57 = vmul.f32 %v10625_v19, %v10625_v19  ;;  %v6289_v54 = vpop.f32.mrf.mxu0  ;;  %v10651_v18 = vadd.f32 %v6597_v59, %v6275_v48  ;;  %v5202_v27 = vsel %vm301_vm5, %v5180_v34, 0.0 }
 0xf25   :  { %5136 = vadd.xlane.f32.xlu1 %v5135_v26  ;;  %5194 = vadd.xlane.f32.xlu0 %v5193_v39  ;;  %v5070_v51 = vpop.f32.mrf.mxu1  ;;  %v6290_v40 = vadd.f32 %v6289_v54, %v6288_v38  ;;  %v5596_v54 = vld [vmem:[%s10993_s24 + $0x18] sm:$0xff] }
 0xf26   :  { %v10634_v21 = vadd.f32 %v6272_v13, %v5070_v51  ;;  %v5199_v14 = vsel %vm301_vm5, %v5179_v57, 0.0  ;;  %v6291_v5 = vpop.f32.mrf.mxu0  ;;  %v5144_v53 = vsel %vm301_vm5, %v10651_v18, 0.0  ;;  %v5182_v37 = vmul.f32 %v10651_v18, %v10651_v18  ;;  %6613 = vmatprep.subr.mxu1 %v5596_v54 }
 0xf27   :  { %v6600_v61 = vpop.f32.mrf.mxu1  ;;  %6614 = vmatpush3.msra.mxu1 %v5596_v54 }
 0xf28   :  { %v5141_v28 = vsel %vm301_vm5, %v10634_v21, 0.0  ;;  %v5181_v17 = vmul.f32 %v10634_v21, %v10634_v21  ;;  %v6292_v3 = vpop.f32.mrf.mxu0  ;;  %v10666_v22 = vadd.f32 %v6600_v61, %v6281_v42  ;;  %v5208_v7 = vsel %vm301_vm5, %v5182_v37, 0.0 }
 0xf29   :  { %5200 = vadd.xlane.f32.xlu1 %v5199_v14  ;;  %5197 = vadd.xlane.f32.xlu0 %v5196_v9  ;;  %v5080_v60 = vpop.f32.mrf.mxu1  ;;  %v6293_v59 = vadd.f32 %v6292_v3, %v6291_v5  ;;  %v10709_v5 = vpop.permute.xlu1 %5371 }
 0xf2a   :  { %v10648_v58 = vadd.f32 %v6278_v8, %v5080_v60  ;;  %v5205_v12 = vsel %vm301_vm5, %v5181_v17, 0.0  ;;  %v6294_v25 = vpop.f32.mrf.mxu0  ;;  %v5150_v47 = vsel %vm301_vm5, %v10666_v22, 0.0  ;;  %v5184_v1 = vmul.f32 %v10666_v22, %v10666_v22  ;;  %v5595_v60 = vld [vmem:[%s10993_s24 + $0x10] sm:$0xff] }
 0xf2b   :  { %v6603_v24 = vpop.f32.mrf.mxu1  ;;  %6615 = vmatprep.subr.mxu1 %v5595_v60 }
 0xf2c   :  { %v5147_v44 = vsel %vm301_vm5, %v10648_v58, 0.0  ;;  %v5183_v2 = vmul.f32 %v10648_v58, %v10648_v58  ;;  %v6295_v20 = vpop.f32.mrf.mxu0  ;;  %v10682_v4 = vadd.f32 %v6603_v24, %v6287_v55  ;;  %v5214_v15 = vsel %vm301_vm5, %v5184_v1, 0.0  ;;  %v5594_v24 = vld [vmem:[%s10993_s24 + $0x8] sm:$0xff]  ;;  %6616 = vmatpush3.msra.mxu1 %v5595_v60 }
 0xf2d   :  { %5142 = vadd.xlane.f32.xlu1 %v5141_v28  ;;  %5139 = vadd.xlane.f32.xlu0 %v5138_v62  ;;  %v5090_v52 = vpop.f32.mrf.mxu1  ;;  %v6296_v0 = vadd.f32 %v6295_v20, %v6294_v25  ;;  %v10727_v25 = vpop.permute.xlu1 %5467 }
 0xf2e   :  { %v10663_v31 = vadd.f32 %v6284_v30, %v5090_v52  ;;  %v5211_v29 = vsel %vm301_vm5, %v5183_v2, 0.0  ;;  %v6297_v6 = vpop.f32.mrf.mxu0  ;;  %v5156_v38 = vsel %vm301_vm5, %v10682_v4, 0.0  ;;  %v5186_v26 = vmul.f32 %v10682_v4, %v10682_v4  ;;  %6617 = vmatprep.subr.mxu1 %v5594_v24 }
 0xf2f   :  { %v6606_v16 = vpop.f32.mrf.mxu1  ;;  %6618 = vmatpush3.msra.mxu1 %v5594_v24 }
 0xf30   :  { %v5153_v10 = vsel %vm301_vm5, %v10663_v31, 0.0  ;;  %v5185_v43 = vmul.f32 %v10663_v31, %v10663_v31  ;;  %v6298_v36 = vpop.f32.mrf.mxu0  ;;  %v10696_v14 = vadd.f32 %v6606_v16, %v6293_v59  ;;  %v5220_v61 = vsel %vm301_vm5, %v5186_v26, 0.0 }
 0xf31   :  { %5206 = vadd.xlane.f32.xlu1 %v5205_v12  ;;  %5203 = vadd.xlane.f32.xlu0 %v5202_v27  ;;  %v5100_v46 = vpop.f32.mrf.mxu1  ;;  %v6299_v48 = vadd.f32 %v6298_v36, %v6297_v6  ;;  %v3748_v36 = vld [vmem:[%s10992_s23 + $0x78] sm:$0xff] }
 0xf32   :  { %v10679_v56 = vadd.f32 %v6290_v40, %v5100_v46  ;;  %v5217_v23 = vsel %vm301_vm5, %v5185_v43, 0.0  ;;  %v6300_v33 = vpop.f32.mrf.mxu0  ;;  %v5162_v62 = vsel %vm301_vm5, %v10696_v14, 0.0  ;;  %v5188_v34 = vmul.f32 %v10696_v14, %v10696_v14 }
 0xf33   :  { %v6609_v63 = vpop.f32.mrf.mxu1 }
 0xf34   :  { %v5159_v50 = vsel %vm301_vm5, %v10679_v56, 0.0  ;;  %v5187_v45 = vmul.f32 %v10679_v56, %v10679_v56  ;;  %v6301_v11 = vpop.f32.mrf.mxu0  ;;  %v10724_v30 = vadd.f32 %v6609_v63, %v6299_v48  ;;  %v5226_v2 = vsel %vm301_vm5, %v5188_v34, 0.0 }
 0xf35   :  { %5148 = vadd.xlane.f32.xlu1 %v5147_v44  ;;  %5145 = vadd.xlane.f32.xlu0 %v5144_v53  ;;  %v5110_v13 = vpop.f32.mrf.mxu1  ;;  %v6302_v28 = vadd.f32 %v6301_v11, %v6300_v33  ;;  %v5593_v44 = vld [vmem:[%s10993_s24] sm:$0xff] }
 0xf36   :  { %v10693_v39 = vadd.f32 %v6296_v0, %v5110_v13  ;;  %v5223_v57 = vsel %vm301_vm5, %v5187_v45, 0.0  ;;  %v6303_v12 = vpop.f32.mrf.mxu0  ;;  %11288 = vst [vmem:[#allocation40_spill] sm:$0xff] %v10724_v30  ;;  %6619 = vmatprep.subr.mxu1 %v5593_v44  ;;  %v5190_v16 = vmul.f32 %v10724_v30, %v10724_v30  ;;  %v3747_v13 = vld [vmem:[%s10992_s23 + $0x70] sm:$0xff] }
 0xf37   :  { %v6612_v51 = vpop.f32.mrf.mxu1  ;;  %6620 = vmatpush3.msra.mxu1 %v5593_v44 }
 0xf38   :  { %v5165_v9 = vsel %vm301_vm5, %v10693_v39, 0.0  ;;  %v5189_v8 = vmul.f32 %v10693_v39, %v10693_v39  ;;  %v6304_v52 = vpop.f32.mrf.mxu0  ;;  %v5232_v43 = vsel %vm301_vm5, %v5190_v16, 0.0 }
 0xf39   :  { %5212 = vadd.xlane.f32.xlu1 %v5211_v29  ;;  %5209 = vadd.xlane.f32.xlu0 %v5208_v7  ;;  %v5120_v17 = vpop.f32.mrf.mxu1  ;;  %v6305_v37 = vadd.f32 %v6304_v52, %v6303_v12  ;;  %v5168_v29 = vsel %vm301_vm5, %v10724_v30, 0.0  ;;  %v10738_v7 = vpop.permute.xlu0 %5376 }
 0xf3a   :  { %v10718_v3 = vadd.f32 %v6302_v28, %v5120_v17  ;;  %v5229_v27 = vsel %vm301_vm5, %v5189_v8, 0.0 }
 0xf3b   :  { %v10742_v40 = vadd.f32 %v6612_v51, %v6305_v37 }
 0xf3c   :  { %11287 = vst [vmem:[#allocation22_spill] sm:$0xff] %v10718_v3  ;;  %v5171_v42 = vsel %vm301_vm5, %v10718_v3, 0.0  ;;  %v5191_v53 = vmul.f32 %v10718_v3, %v10718_v3 }
 0xf3d   :  { %5154 = vadd.xlane.f32.xlu1 %v5153_v10  ;;  %5151 = vadd.xlane.f32.xlu0 %v5150_v47  ;;  %v10740_v10 = vpop.permute.xlu1 %5472  ;;  %11289 = vst [vmem:[#allocation41_spill] sm:$0xff] %v10742_v40  ;;  %v5174_v46 = vsel %vm301_vm5, %v10742_v40, 0.0  ;;  %v5192_v6 = vmul.f32 %v10742_v40, %v10742_v40  ;;  %v10749_v55 = vpop.permute.xlu0 %5381 }
 0xf3e   :  { %v5235_v20 = vsel %vm301_vm5, %v5191_v53, 0.0 }
 0xf3f   :  { %v5238_v1 = vsel %vm301_vm5, %v5192_v6, 0.0 }
 0xf41   :  { %5218 = vadd.xlane.f32.xlu1 %v5217_v23  ;;  %5215 = vadd.xlane.f32.xlu0 %v5214_v15  ;;  %v10751_v47 = vpop.permute.xlu1 %5386  ;;  %v10754_v23 = vpop.permute.xlu0 %5477 }
 0xf45   :  { %5160 = vadd.xlane.f32.xlu1 %v5159_v50  ;;  %5157 = vadd.xlane.f32.xlu0 %v5156_v38  ;;  %v10756_v63 = vpop.permute.xlu1 %5482  ;;  %v10761_v15 = vpop.permute.xlu0 %5391  ;;  %v5791_v38 = vld [vmem:[#allocation2] sm:$0x1] }
 0xf49   :  { %5224 = vadd.xlane.f32.xlu1 %v5223_v57  ;;  %5221 = vadd.xlane.f32.xlu0 %v5220_v61  ;;  %v10763_v50 = vpop.permute.xlu1 %5396  ;;  %v10765_v0 = vpop.permute.xlu0 %5487 }
 0xf4d   :  { %5166 = vadd.xlane.f32.xlu1 %v5165_v9  ;;  %5163 = vadd.xlane.f32.xlu0 %v5162_v62  ;;  %v10767_v45 = vpop.permute.xlu1 %5492  ;;  %v10772_v33 = vpop.permute.xlu0 %5401 }
 0xf51   :  { %5230 = vadd.xlane.f32.xlu1 %v5229_v27  ;;  %5227 = vadd.xlane.f32.xlu0 %v5226_v2  ;;  %v10774_v59 = vpop.permute.xlu1 %5406  ;;  %v10776_v26 = vpop.permute.xlu0 %5497 }
 0xf55   :  { %5172 = vadd.xlane.f32.xlu1 %v5171_v42  ;;  %5169 = vadd.xlane.f32.xlu0 %v5168_v29  ;;  %v10778_v57 = vpop.permute.xlu1 %5502  ;;  %v10780_v11 = vpop.permute.xlu0 %5411 }
 0xf59   :  { %5236 = vadd.xlane.f32.xlu1 %v5235_v20  ;;  %5233 = vadd.xlane.f32.xlu0 %v5232_v43  ;;  %v10782_v51 = vpop.permute.xlu1 %5416  ;;  %v10784_v61 = vpop.permute.xlu0 %5507 }
 0xf5d   :  { %5175 = vadd.xlane.f32.xlu0 %v5174_v46  ;;  %v10786_v54 = vpop.permute.xlu1 %5512  ;;  %v10788_v9 = vpop.permute.xlu0 %5421 }
 0xf61   :  { %5239 = vadd.xlane.f32.xlu0 %v5238_v1  ;;  %v10790_v28 = vpop.permute.xlu1 %5426  ;;  %v10792_v8 = vpop.permute.xlu0 %5517 }
 0xf65   :  { %v10794_v17 = vpop.permute.xlu1 %5522  ;;  %v10796_v60 = vpop.permute.xlu0 %5431 }
 0xf66   :  { %11290 = vst [vmem:[#allocation47_spill] sm:$0xff] %v10794_v17 }
 0xf69   :  { %v10798_v48 = vpop.permute.xlu1 %5436  ;;  %v10800_v62 = vpop.permute.xlu0 %5527 }
 0xf6a   :  { %5542 = vperm.xlu1 %6686, %v3748_v36   ;;  %11291 = vst [vmem:[#allocation27_spill] sm:$0xff] %v10798_v48  ;;  %11292 = vst [vmem:[#allocation48_spill] sm:$0xff] %v10800_v62 }
 0xf6d   :  { %v10802_v34 = vpop.permute.xlu1 %5532  ;;  %v10804_v12 = vpop.permute.xlu0 %5441 }
 0xf6e   :  { %11293 = vst [vmem:[#allocation38_spill] sm:$0xff] %v10802_v34  ;;  %11294 = vst [vmem:[#allocation39_spill] sm:$0xff] %v10804_v12 }
 0xf71   :  { %v10806_v24 = vpop.permute.xlu1 %5446 }
 0xf72   :  { %11295 = vst [vmem:[#allocation36_spill] sm:$0xff] %v10806_v24 }
 0xf77   :  { %5537 = vperm.xlu0 %6687, %v3747_v13  }
 0xf7b   :  { %5794 = vperm.xlu0 %6687, %v5791_v38  }
 0xfa8   :  { %v5134_v27 = vpop.xlane.xlu1 %5133 }
 0xfa9   :  { %v5242_v53 = vmul.f32 0.03125, %v5134_v27 }
 0xfaa   :  { %v5131_v44 = vpop.xlane.xlu0 %5130 }
 0xfab   :  { %v5241_v2 = vmul.f32 0.03125, %v5131_v44  ;;  %v5274_v1 = vmul.f32 %v5242_v53, %v5242_v53 }
 0xfad   :  { %v5273_v37 = vmul.f32 %v5241_v2, %v5241_v2 }
 0xfae   :  { %v5195_v52 = vpop.xlane.xlu0 %5194  ;;  %v5137_v42 = vpop.xlane.xlu1 %5136 }
 0xfaf   :  { %v5257_v29 = vmul.f32 0.03125, %v5195_v52  ;;  %v5243_v16 = vmul.f32 0.03125, %v5137_v42 }
 0xfb1   :  { %v5289_v20 = vsub.f32 %v5257_v29, %v5273_v37  ;;  %v5275_v43 = vmul.f32 %v5243_v16, %v5243_v16 }
 0xfb2   :  { %v5198_v46 = vpop.xlane.xlu0 %5197  ;;  %v5201_v6 = vpop.xlane.xlu1 %5200 }
 0xfb3   :  { %v5321_v36 = vadd.f32 1e-05, %v5289_v20  ;;  %v5258_v13 = vmul.f32 0.03125, %v5198_v46  ;;  %v5259_v38 = vmul.f32 0.03125, %v5201_v6 }
 0xfb5   :  { %6832 = vrsqrt.f32 %v5321_v36  ;;  %v5290_v32 = vsub.f32 %v5258_v13, %v5274_v1  ;;  %v5291_v24 = vsub.f32 %v5259_v38, %v5275_v43  ;;  %v5305_v13 = vsub.f32 %v10613_v41, %v5241_v2 }
 0xfb6   :  { %v5140_v40 = vpop.xlane.xlu0 %5139  ;;  %v5143_v34 = vpop.xlane.xlu1 %5142 }
 0xfb7   :  { %v5322_v44 = vadd.f32 1e-05, %v5290_v32  ;;  %v5323_v12 = vadd.f32 1e-05, %v5291_v24  ;;  %v10808_v48 = vmul.f32 0.03125, %v5140_v40  ;;  %v10810_v27 = vmul.f32 0.03125, %v5143_v34 }
 0xfb9   :  { %6834 = vrsqrt.f32 %v5322_v44  ;;  %v5277_v52 = vmul.f32 %v10810_v27, %v10810_v27  ;;  %v5276_v29 = vmul.f32 %v10808_v48, %v10808_v48 }
 0xfba   :  { %6836 = vrsqrt.f32 %v5323_v12  ;;  %v5204_v42 = vpop.xlane.xlu0 %5203  ;;  %v5207_v37 = vpop.xlane.xlu1 %5206 }
 0xfbb   :  { %v5260_v20 = vmul.f32 0.03125, %v5204_v42  ;;  %v5261_v43 = vmul.f32 0.03125, %v5207_v37 }
 0xfbd   :  { %v5292_v46 = vsub.f32 %v5260_v20, %v5276_v29  ;;  %v5293_v6 = vsub.f32 %v5261_v43, %v5277_v52  ;;  %v5306_v43 = vsub.f32 %v10611_v35, %v5242_v53 }
 0xfbe   :  { %v5146_v32 = vpop.xlane.xlu0 %5145  ;;  %v5149_v24 = vpop.xlane.xlu1 %5148 }
 0xfbf   :  { %v5324_v40 = vadd.f32 1e-05, %v5292_v46  ;;  %v5325_v1 = vadd.f32 1e-05, %v5293_v6  ;;  %v10816_v34 = vmul.f32 0.03125, %v5146_v32  ;;  %v10818_v36 = vmul.f32 0.03125, %v5149_v24 }
 0xfc0   :  { %v5307_v32 = vsub.f32 %v10625_v19, %v5243_v16 }
 0xfc1   :  { %6838 = vrsqrt.f32 %v5324_v40  ;;  %v5279_v12 = vmul.f32 %v10818_v36, %v10818_v36  ;;  %v5278_v52 = vmul.f32 %v10816_v34, %v10816_v34 }
 0xfc2   :  { %v6833_v38 = vpop.eup %6832  ;;  %6840 = vrsqrt.f32 %v5325_v1  ;;  %v5210_v44 = vpop.xlane.xlu0 %5209 }
 0xfc3   :  { %v5213_v42 = vpop.xlane.xlu1 %5212  ;;  %v5262_v37 = vmul.f32 0.03125, %v5210_v44  ;;  %v5353_v20 = vmul.f32 %v6833_v38, %v5305_v13  ;;  %v11296_v38 = vld [vmem:[#allocation12_spill] sm:$0xff] }
 0xfc4   :  { %v5263_v29 = vmul.f32 0.03125, %v5213_v42 }
 0xfc5   :  { %v5294_v46 = vsub.f32 %v5262_v37, %v5278_v52  ;;  %v5449_v41 = vmul.f32 %v10709_v5, %v5353_v20 }
 0xfc6   :  { %v5295_v6 = vsub.f32 %v5263_v29, %v5279_v12  ;;  %v6835_v2 = vpop.eup %6834  ;;  %v5152_v24 = vpop.xlane.xlu0 %5151 }
 0xfc7   :  { %v5155_v40 = vpop.xlane.xlu1 %5154  ;;  %v6837_v1 = vpop.eup %6836  ;;  %v5354_v3 = vmul.f32 %v6835_v2, %v5306_v43  ;;  %v5326_v30 = vadd.f32 1e-05, %v5294_v46  ;;  %v10828_v17 = vmul.f32 0.03125, %v5152_v24  ;;  %v5545_v13 = vadd.f32 %v10727_v25, %v5449_v41 }
 0xfc8   :  { %v5327_v62 = vadd.f32 1e-05, %v5295_v6  ;;  %v10830_v44 = vmul.f32 0.03125, %v5155_v40  ;;  %v5355_v35 = vmul.f32 %v6837_v1, %v5307_v32  ;;  %v5309_v41 = vsub.f32 %v10634_v21, %v10810_v27 }
 0xfc9   :  { %v5450_v53 = vmul.f32 %v10738_v7, %v5354_v3  ;;  %6842 = vrsqrt.f32 %v5326_v30  ;;  %v5280_v19 = vmul.f32 %v10828_v17, %v10828_v17  ;;  %v5561_v42 = vadd.f32 %v5545_v13, %v11296_v38  ;;  %v11297_v7 = vld [vmem:[#allocation10_spill] sm:$0xff]  ;;  %v11298_v13 = vld [vmem:[#allocation25_spill] sm:$0xff] }
 0xfca   :  { %6844 = vrsqrt.f32 %v5327_v62  ;;  %v5281_v5 = vmul.f32 %v10830_v44, %v10830_v44  ;;  %v5216_v16 = vpop.xlane.xlu0 %5215  ;;  %v5451_v25 = vmul.f32 %v10749_v55, %v5355_v35  ;;  %v5308_v3 = vsub.f32 %v10637_v49, %v10808_v48 }
 0xfcb   :  { %v5219_v12 = vpop.xlane.xlu1 %5218  ;;  %v5546_v52 = vadd.f32 %v10740_v10, %v5450_v53  ;;  %v5264_v37 = vmul.f32 0.03125, %v5216_v16  ;;  %v5577_v30 = vmax.f32 %v5561_v42, 0.0 }
 0xfcc   :  { %v5265_v29 = vmul.f32 0.03125, %v5219_v12  ;;  %v5547_v46 = vadd.f32 %v10754_v23, %v5451_v25  ;;  %v11299_v25 = vld [vmem:[#allocation8_spill] sm:$0xff] }
 0xfcd   :  { %v5562_v62 = vadd.f32 %v5546_v52, %v11297_v7  ;;  %v5296_v20 = vsub.f32 %v5264_v37, %v5280_v19  ;;  %6621 = vmatprep.mubr.msk.f32.mxu1 %vm301_vm5, %v5577_v30 }
 0xfce   :  { %v5297_v43 = vsub.f32 %v5265_v29, %v5281_v5  ;;  %v6839_v6 = vpop.eup %6838  ;;  %v5158_v10 = vpop.xlane.xlu0 %5157  ;;  %v5563_v35 = vadd.f32 %v5547_v46, %v11298_v13 }
 0xfcf   :  { %v5161_v2 = vpop.xlane.xlu1 %5160  ;;  %v6841_v32 = vpop.eup %6840  ;;  %v5356_v55 = vmul.f32 %v6839_v6, %v5308_v3  ;;  %v5328_v24 = vadd.f32 1e-05, %v5296_v20  ;;  %v10848_v49 = vmul.f32 0.03125, %v5158_v10  ;;  %v5578_v1 = vmax.f32 %v5562_v62, 0.0  ;;  %v11300_v10 = vld [vmem:[#allocation11_spill] sm:$0xff] }
 0xfd0   :  { %v5329_v40 = vadd.f32 1e-05, %v5297_v43  ;;  %v10850_v48 = vmul.f32 0.03125, %v5161_v2  ;;  %v5357_v23 = vmul.f32 %v6841_v32, %v5309_v41  ;;  %v5579_v5 = vmax.f32 %v5563_v35, 0.0 }
 0xfd1   :  { %6846 = vrsqrt.f32 %v5328_v24  ;;  %v5452_v53 = vmul.f32 %v10751_v47, %v5356_v55  ;;  %v5282_v21 = vmul.f32 %v10848_v49, %v10848_v49  ;;  %6622 = vmatmul.mubr.msk.f32.vlgmr.msra.gmra.mxu1 %vm301_vm5, %v5578_v1  ;;  %v5310_v47 = vsub.f32 %v10651_v18, %v10816_v34 }
 0xfd2   :  { %6848 = vrsqrt.f32 %v5329_v40  ;;  %v5283_v27 = vmul.f32 %v10850_v48, %v10850_v48  ;;  %v5222_v19 = vpop.xlane.xlu0 %5221  ;;  %v5453_v52 = vmul.f32 %v10761_v15, %v5357_v23  ;;  %6624 = vmatprep.mubr.msk.f32.mxu1 %vm301_vm5, %v5579_v5  ;;  %v5311_v62 = vsub.f32 %v10648_v58, %v10818_v36 }
 0xfd3   :  { %v5225_v16 = vpop.xlane.xlu1 %5224  ;;  %v5266_v12 = vmul.f32 0.03125, %v5222_v19  ;;  %v5548_v42 = vadd.f32 %v10756_v63, %v5452_v53 }
 0xfd4   :  { %v5267_v38 = vmul.f32 0.03125, %v5225_v16  ;;  %v5549_v30 = vadd.f32 %v10765_v0, %v5453_v52 }
 0xfd5   :  { %v5298_v37 = vsub.f32 %v5266_v12, %v5282_v21  ;;  %v5564_v3 = vadd.f32 %v5548_v42, %v11299_v25  ;;  %v5313_v12 = vsub.f32 %v10663_v31, %v10830_v44 }
 0xfd6   :  { %v5299_v29 = vsub.f32 %v5267_v38, %v5283_v27  ;;  %v6843_v7 = vpop.eup %6842  ;;  %v5164_v20 = vpop.xlane.xlu0 %5163  ;;  %v5565_v2 = vadd.f32 %v5549_v30, %v11300_v10  ;;  %v11301_v27 = vld [vmem:[#allocation9_spill] sm:$0xff] }
 0xfd7   :  { %v5167_v43 = vpop.xlane.xlu1 %5166  ;;  %v6845_v63 = vpop.eup %6844  ;;  %v5358_v46 = vmul.f32 %v6843_v7, %v5310_v47  ;;  %v5330_v15 = vadd.f32 1e-05, %v5298_v37  ;;  %v10868_v41 = vmul.f32 0.03125, %v5164_v20  ;;  %v5580_v34 = vmax.f32 %v5564_v3, 0.0 }
 0xfd8   :  { %v5331_v6 = vadd.f32 1e-05, %v5299_v29  ;;  %v10870_v18 = vmul.f32 0.03125, %v5167_v43  ;;  %v5359_v32 = vmul.f32 %v6845_v63, %v5311_v62  ;;  %v5581_v24 = vmax.f32 %v5565_v2, 0.0  ;;  %v11302_v29 = vld [vmem:[#allocation26_spill] sm:$0xff] }
 0xfd9   :  { %6850 = vrsqrt.f32 %v5330_v15  ;;  %v5454_v0 = vmul.f32 %v10763_v50, %v5358_v46  ;;  %v5284_v58 = vmul.f32 %v10868_v41, %v10868_v41  ;;  %6625 = vmatmul.mubr.msk.f32.gmra.mxu1 %vm301_vm5, %v5580_v34  ;;  %v5312_v50 = vsub.f32 %v10666_v22, %v10828_v17  ;;  %v11303_v34 = vld [vmem:[#allocation46_spill] sm:$0xff] }
 0xfda   :  { %6852 = vrsqrt.f32 %v5331_v6  ;;  %v5285_v36 = vmul.f32 %v10870_v18, %v10870_v18  ;;  %v5228_v55 = vpop.xlane.xlu0 %5227  ;;  %v5455_v23 = vmul.f32 %v10772_v33, %v5359_v32  ;;  %6627 = vmatprep.mubr.msk.f32.mxu1 %vm301_vm5, %v5581_v24 }
 0xfdb   :  { %v5231_v40 = vpop.xlane.xlu1 %5230  ;;  %v5268_v1 = vmul.f32 0.03125, %v5228_v55  ;;  %v5550_v35 = vadd.f32 %v10767_v45, %v5454_v0  ;;  %v5315_v0 = vsub.f32 %v10679_v56, %v10850_v48 }
 0xfdc   :  { %v5269_v13 = vmul.f32 0.03125, %v5231_v40  ;;  %v5551_v5 = vadd.f32 %v10776_v26, %v5455_v23 }
 0xfdd   :  { %v5300_v53 = vsub.f32 %v5268_v1, %v5284_v58  ;;  %v5566_v19 = vadd.f32 %v5550_v35, %v11301_v27 }
 0xfde   :  { %v5301_v21 = vsub.f32 %v5269_v13, %v5285_v36  ;;  %v6847_v16 = vpop.eup %6846  ;;  %v5170_v38 = vpop.xlane.xlu0 %5169  ;;  %v5567_v25 = vadd.f32 %v5551_v5, %v11302_v29 }
 0xfdf   :  { %v5173_v42 = vpop.xlane.xlu1 %5172  ;;  %v6849_v45 = vpop.eup %6848  ;;  %v5360_v52 = vmul.f32 %v6847_v16, %v5312_v50  ;;  %v5332_v33 = vadd.f32 1e-05, %v5300_v53  ;;  %v10888_v37 = vmul.f32 0.03125, %v5170_v38  ;;  %v5582_v17 = vmax.f32 %v5566_v19, 0.0 }
 0xfe0   :  { %v5333_v47 = vadd.f32 1e-05, %v5301_v21  ;;  %v10890_v22 = vmul.f32 0.03125, %v5173_v42  ;;  %v5361_v3 = vmul.f32 %v6849_v45, %v5313_v12  ;;  %v5583_v7 = vmax.f32 %v5567_v25, 0.0  ;;  %v11306_v12 = vld [vmem:[#allocation17_spill] sm:$0xff]  ;;  %v11310_v25 = vld [vmem:[#allocation30_spill] sm:$0xff] }
 0xfe1   :  { %6854 = vrsqrt.f32 %v5332_v33  ;;  %v5456_v26 = vmul.f32 %v10774_v59, %v5360_v52  ;;  %v5286_v31 = vmul.f32 %v10888_v37, %v10888_v37  ;;  %6628 = vmatmul.mubr.msk.f32.gmra.mxu1 %vm301_vm5, %v5582_v17  ;;  %v5314_v59 = vsub.f32 %v10682_v4, %v10848_v49  ;;  %v11304_v4 = vld [vmem:[#allocation16_spill] sm:$0xff] }
 0xfe2   :  { %6856 = vrsqrt.f32 %v5333_v47  ;;  %v5287_v44 = vmul.f32 %v10890_v22, %v10890_v22  ;;  %v5234_v30 = vpop.xlane.xlu0 %5233  ;;  %v5457_v46 = vmul.f32 %v10780_v11, %v5361_v3  ;;  %6630 = vmatprep.mubr.msk.f32.mxu1 %vm301_vm5, %v5583_v7  ;;  %v5316_v21 = vsub.f32 %v10696_v14, %v10868_v41  ;;  %v11307_v41 = vld [vmem:[#allocation47_spill] sm:$0xff]  ;;  %v11309_v17 = vld [vmem:[#allocation40_spill] sm:$0xff] }
 0xfe3   :  { %v5237_v62 = vpop.xlane.xlu1 %5236  ;;  %v5270_v20 = vmul.f32 0.03125, %v5234_v30  ;;  %v5552_v63 = vadd.f32 %v10778_v57, %v5456_v26  ;;  %v5317_v16 = vsub.f32 %v10693_v39, %v10870_v18  ;;  %v11308_v39 = vld [vmem:[#allocation48_spill] sm:$0xff]  ;;  %v5318_v29 = vsub.f32 %v11309_v17, %v10888_v37  ;;  %v11312_v30 = vld [vmem:[#allocation18_spill] sm:$0xff] }
 0xfe4   :  { %v5271_v43 = vmul.f32 0.03125, %v5237_v62  ;;  %v5553_v2 = vadd.f32 %v10784_v61, %v5457_v46 }
 0xfe5   :  { %v5302_v15 = vsub.f32 %v5270_v20, %v5286_v31  ;;  %v5568_v10 = vadd.f32 %v5552_v63, %v11303_v34  ;;  %v11311_v31 = vld [vmem:[#allocation22_spill] sm:$0xff]  ;;  %v11313_v63 = vld [vmem:[#allocation27_spill] sm:$0xff] }
 0xfe6   :  { %v5303_v6 = vsub.f32 %v5271_v43, %v5287_v44  ;;  %v6851_v32 = vpop.eup %6850  ;;  %v5176_v58 = vpop.xlane.xlu0 %5175  ;;  %v5569_v49 = vadd.f32 %v5553_v2, %v11304_v4  ;;  %v5319_v44 = vsub.f32 %v11311_v31, %v10890_v22  ;;  %v11316_v22 = vld [vmem:[#allocation41_spill] sm:$0xff]  ;;  %v11319_v4 = vld [vmem:[#allocation36_spill] sm:$0xff] }
 0xfe7   :  { %v6853_v36 = vpop.eup %6852  ;;  %v5362_v57 = vmul.f32 %v6851_v32, %v5314_v59  ;;  %v5334_v55 = vadd.f32 1e-05, %v5302_v15  ;;  %v5256_v24 = vmul.f32 0.03125, %v5176_v58  ;;  %v5584_v40 = vmax.f32 %v5568_v10, 0.0  ;;  %v11314_v59 = vld [vmem:[#allocation39_spill] sm:$0xff]  ;;  %v11317_v32 = vld [vmem:[#allocation21_spill] sm:$0xff] }
 0xfe8   :  { %v5335_v11 = vadd.f32 1e-05, %v5303_v6  ;;  %v5363_v1 = vmul.f32 %v6853_v36, %v5315_v0  ;;  %v5585_v35 = vmax.f32 %v5569_v49, 0.0  ;;  %v11315_v6 = vld [vmem:[#allocation38_spill] sm:$0xff]  ;;  %v11318_v36 = vld [vmem:[#allocation29_spill] sm:$0xff] }
 0xfe9   :  { %6858 = vrsqrt.f32 %v5334_v55  ;;  %v5458_v13 = vmul.f32 %v10782_v51, %v5362_v57  ;;  %6631 = vmatmul.mubr.msk.f32.gmra.mxu1 %vm301_vm5, %v5584_v40  ;;  %v5288_v48 = vmul.f32 %v5256_v24, %v5256_v24  ;;  %v11305_v51 = vld [vmem:[#allocation19_spill] sm:$0xff]  ;;  %v5320_v2 = vsub.f32 %v11316_v22, %v5256_v24 }
 0xfea   :  { %6860 = vrsqrt.f32 %v5335_v11  ;;  %v5240_v61 = vpop.xlane.xlu0 %5239  ;;  %v5459_v56 = vmul.f32 %v10788_v9, %v5363_v1  ;;  %6633 = vmatprep.mubr.msk.f32.mxu1 %vm301_vm5, %v5585_v35  ;;  %v5543_v1 = vpop.permute.xlu1 %5542  ;;  %v11321_v24 = vmov 0.0  }
 0xfeb   :  { %v5272_v23 = vmul.f32 0.03125, %v5240_v61  ;;  %v5554_v50 = vadd.f32 %v10786_v54, %v5458_v13  ;;  %v11320_v61 = vld [vmem:[#allocation20_spill] sm:$0xff]  ;;  %6677 = vmatprep.mubr.msk.f32.mxu0 %vm6890_vm7, %v11321_v24 }
 0xfec   :  { %v5555_v53 = vadd.f32 %v10792_v8, %v5459_v56 }
 0xfed   :  { %v5304_v27 = vsub.f32 %v5272_v23, %v5288_v48  ;;  %v5570_v19 = vadd.f32 %v5554_v50, %v11305_v51 }
 0xfee   :  { %v6855_v5 = vpop.eup %6854  ;;  %v5571_v9 = vadd.f32 %v5555_v53, %v11306_v12 }
 0xfef   :  { %v6857_v38 = vpop.eup %6856  ;;  %v5364_v42 = vmul.f32 %v6855_v5, %v5316_v21  ;;  %v5336_v45 = vadd.f32 1e-05, %v5304_v27  ;;  %v5586_v54 = vmax.f32 %v5570_v19, 0.0 }
 0xff0   :  { %v5587_v52 = vmax.f32 %v5571_v9, 0.0  ;;  %v5365_v33 = vmul.f32 %v6857_v38, %v5317_v16 }
 0xff1   :  { %6862 = vrsqrt.f32 %v5336_v45  ;;  %6634 = vmatmul.mubr.msk.f32.gmra.mxu1 %vm301_vm5, %v5586_v54  ;;  %v5460_v14 = vmul.f32 %v10790_v28, %v5364_v42 }
 0xff2   :  { %6636 = vmatprep.mubr.msk.f32.mxu1 %vm301_vm5, %v5587_v52  ;;  %v5461_v8 = vmul.f32 %v10796_v60, %v5365_v33  ;;  %v5538_v37 = vpop.permute.xlu0 %5537  ;;  %v5790_v52 = vld [vmem:[%s10994_s25] sm:$0x1]  ;;  %v11322_v33 = vlaneseq  ;;  %s6868_s25 = scalar_lea.vmem %s5880_s22, 32 }
 0xff3   :  { %v5556_v47 = vadd.f32 %v11307_v41, %v5460_v14  ;;  %p6870_p2 = scmp.lt.s32.totalorder %s6868_s25, %s6864_s0 }
 0xff4   :  { %v5557_v18 = vadd.f32 %v11308_v39, %v5461_v8  ;;  %v5798_v14 = vshrl.u32 %v11322_v33, 7 }
 0xff5   :  { %v5572_v3 = vadd.f32 %v5556_v47, %v11310_v25  ;;  %p6871_p3 = por %p6870_p2, %p6869_p1 }
 0xff6   :  { %v6859_v26 = vpop.eup %6858  ;;  %v5573_v7 = vadd.f32 %v5557_v18, %v11312_v30  ;;  %v5799_v8 = vsub.s32 0, %v5798_v14  ;;  %v5795_v41 = vpop.permute.xlu0 %5794 }
 0xff7   :  { %v6861_v28 = vpop.eup %6860  ;;  %v5366_v62 = vmul.f32 %v6859_v26, %v5318_v29  ;;  %v5588_v20 = vmax.f32 %v5572_v3, 0.0  ;;  %p6872_p4 = pnand %p6871_p3, %p6865_p0 }
 0xff8   :  { %v5367_v43 = vmul.f32 %v6861_v28, %v5319_v44  ;;  %v5589_v60 = vmax.f32 %v5573_v7, 0.0  ;;  %v5800_v47 = vrot.slane %v5795_v41, %v5799_v8 }
 0xff9   :  { %6637 = vmatmul.mubr.msk.f32.gmra.mxu1 %vm301_vm5, %v5588_v20  ;;  %v5462_v46 = vmul.f32 %v11313_v63, %v5366_v62 }
 0xffa   :  { %v5463_v15 = vmul.f32 %v11314_v59, %v5367_v43  ;;  %6639 = vmatprep.mubr.msk.f32.mxu1 %vm301_vm5, %v5589_v60 }
 0xffb   :  { %v5558_v34 = vadd.f32 %v11315_v6, %v5462_v46 }
 0xffc   :  { %v5559_v10 = vadd.f32 %v5538_v37, %v5463_v15 }
 0xffd   :  { %v5574_v0 = vadd.f32 %v5558_v34, %v11317_v32 }
 0xffe   :  { %v6863_v58 = vpop.eup %6862  ;;  %v5575_v57 = vadd.f32 %v5559_v10, %v11318_v36 }
 0xfff   :  { %v5368_v55 = vmul.f32 %v6863_v58, %v5320_v2  ;;  %v5590_v11 = vmax.f32 %v5574_v0, 0.0 }
0x1000   :  { %v5591_v40 = vmax.f32 %v5575_v57, 0.0 }
0x1001   :  { %6640 = vmatmul.mubr.msk.f32.gmra.mxu1 %vm301_vm5, %v5590_v11  ;;  %v5464_v49 = vmul.f32 %v11319_v4, %v5368_v55 }
0x1002   :  { %6642 = vmatprep.mubr.msk.f32.mxu1 %vm301_vm5, %v5591_v40 }
0x1003   :  { %v5560_v13 = vadd.f32 %v5543_v1, %v5464_v49 }
0x1005   :  { %v5576_v35 = vadd.f32 %v5560_v13, %v11320_v61 }
0x1007   :  { %v5592_v56 = vmax.f32 %v5576_v35, 0.0 }
0x1009   :  { %6643 = vmatmul.mubr.msk.f32.gmra.mxu1 %vm301_vm5, %v5592_v56 }
0x1091   :  { %v6623_v48 = vpop.f32.mrf.mxu1 }
0x1093   :  { %v5711_v23 = vpop.f32.mrf.mxu1 }
0x1099   :  { %v6626_v50 = vpop.f32.mrf.mxu1 }
0x109b   :  { %v5721_v53 = vpop.f32.mrf.mxu1 }
0x10a1   :  { %v6629_v21 = vpop.f32.mrf.mxu1 }
0x10a3   :  { %v5731_v27 = vpop.f32.mrf.mxu1 }
0x10a9   :  { %v6632_v51 = vpop.f32.mrf.mxu1 }
0x10ab   :  { %v5741_v19 = vpop.f32.mrf.mxu1 }
0x10b1   :  { %v6635_v5 = vpop.f32.mrf.mxu1 }
0x10b3   :  { %v5751_v16 = vpop.f32.mrf.mxu1 }
0x10b9   :  { %v6638_v12 = vpop.f32.mrf.mxu1 }
0x10bb   :  { %v5761_v9 = vpop.f32.mrf.mxu1 }
0x10c1   :  { %v6641_v38 = vpop.f32.mrf.mxu1 }
0x10c3   :  { %v5771_v42 = vpop.f32.mrf.mxu1 }
0x10c9   :  { %v6644_v45 = vpop.f32.mrf.mxu1 }
0x10ca   :  { %6646 = vmatpush3.msra.mxu0 %v6644_v45 }
0x10cb   :  { %v5781_v54 = vpop.f32.mrf.mxu1  ;;  %6647 = vmatprep.subr.mxu0 %v11321_v24 }
0x10cc   :  { %6648 = vmatpush3.msra.mxu0 %v5781_v54 }
0x10cd   :  { %6649 = vmatprep.subr.mxu0 %v11321_v24 }
0x10ce   :  { %6650 = vmatpush3.msra.mxu0 %v6641_v38 }
0x10cf   :  { %6651 = vmatprep.subr.mxu0 %v11321_v24 }
0x10d0   :  { %6652 = vmatpush3.msra.mxu0 %v5771_v42 }
0x10d1   :  { %6653 = vmatprep.subr.mxu0 %v11321_v24 }
0x10d2   :  { %6654 = vmatpush3.msra.mxu0 %v6638_v12 }
0x10d3   :  { %6655 = vmatprep.subr.mxu0 %v11321_v24 }
0x10d4   :  { %6656 = vmatpush3.msra.mxu0 %v5761_v9 }
0x10d5   :  { %6657 = vmatprep.subr.mxu0 %v11321_v24 }
0x10d6   :  { %6658 = vmatpush3.msra.mxu0 %v6635_v5 }
0x10d7   :  { %6659 = vmatprep.subr.mxu0 %v11321_v24 }
0x10d8   :  { %6660 = vmatpush3.msra.mxu0 %v5751_v16 }
0x10d9   :  { %6661 = vmatprep.subr.mxu0 %v11321_v24 }
0x10da   :  { %6662 = vmatpush3.msra.mxu0 %v6632_v51 }
0x10db   :  { %6663 = vmatprep.subr.mxu0 %v11321_v24 }
0x10dc   :  { %6664 = vmatpush3.msra.mxu0 %v5741_v19 }
0x10dd   :  { %6665 = vmatprep.subr.mxu0 %v11321_v24 }
0x10de   :  { %6666 = vmatpush3.msra.mxu0 %v6629_v21 }
0x10df   :  { %6667 = vmatprep.subr.mxu0 %v11321_v24 }
0x10e0   :  { %6668 = vmatpush3.msra.mxu0 %v5731_v27 }
0x10e1   :  { %6669 = vmatprep.subr.mxu0 %v11321_v24 }
0x10e2   :  { %6670 = vmatpush3.msra.mxu0 %v6626_v50 }
0x10e3   :  { %6671 = vmatprep.subr.mxu0 %v11321_v24 }
0x10e4   :  { %6672 = vmatpush3.msra.mxu0 %v5721_v53 }
0x10e5   :  { %6673 = vmatprep.subr.mxu0 %v11321_v24 }
0x10e6   :  { %6674 = vmatpush3.msra.mxu0 %v6623_v48 }
0x10e7   :  { %6675 = vmatprep.subr.mxu0 %v11321_v24 }
0x10e8   :  { %6676 = vmatpush3.msra.mxu0 %v5711_v23 }
0x10e9   :  { %6678 = vmatmul.mubr.f32.vlgmr.msra.gmra.mxu0 %v5790_v52 }
0x11a9   :  { %v5867_v39 = vpop.f32.mrf.mxu0 }
0x11aa   :  { %v5868_v18 = vadd.f32 %v5867_v39, %v5800_v47 }
0x11ab   :  { %v6679_v17 = vpop.f32.mrf.mxu0 }
0x11ac   :  { %5872 = vst.msk [vmem:[#allocation3] sm:$0x1] %vm5871_vm8, %v5868_v18 }
0x11ad   :  { %6875 = shalt.err (!%p6872_p4)
}
0x11ae   :  { %5882 = dma.vmem_to_hbm [thread:$0]  %s5880_s22, 16, %s10996_s27, [#allocation4]  }
0x11af   :  { %6884 = dma.done.wait [#allocation4], 16  }
0x11b0   :  { %6885 = vsyncadd [#allocation4], 4294967280 }
0x11b1   :  { %5886 = vsyncpa [#allocation4], 1 }

</bundles_post_ra>
